<compile_context>
chip_gen: v7x
topology: tpu7x:2x2x1
jax: 0.10.0
libtpu: 0.0.40
codegen_flags: <defaults>
</compile_context>

<pallas_src>
import numpy as np

import jax
import jax.numpy as jnp
from jax.experimental import pallas as pl
from jax.experimental.pallas import tpu as pltpu

# ----------------------------- configuration --------------------------------
IN_CH = 16          # in_channels (skip connection channels for the last layer)
OUT_CH = 32         # out_channels
PREV_OUT_CH = 32    # prev_output_channel (channels of incoming hidden_states)
TEMB_CH = 64        # temb_channels
GROUPS = 8          # resnet_groups (and transformer norm_num_groups)
HEADS = 4           # attn_num_head_channels
CROSS_DIM = 64      # cross_attention_dim
RESNET_EPS = 1e-6
OUTPUT_SCALE = 1.0


# --------------------------- in-kernel math helpers ---------------------------
def _mm(a, b):
    """bf16 MXU matmul with f32 accumulation."""
    return jnp.dot(a.astype(jnp.bfloat16), b.astype(jnp.bfloat16),
                   preferred_element_type=jnp.float32)


def _group_norm(x, gamma, beta, gmat, eps, silu):
    """GroupNorm on channels-last (S, C) without any reshape/relayout.

    Group statistics are gathered with tiny f32 matmuls against a (C, G)
    one-hot membership matrix (two-pass mean/var, matching torch.nn.GroupNorm).
    """
    s_rows, c = x.shape
    g = gmat.shape[1]
    inv_n = 1.0 / float(s_rows * (c // g))
    ch_sum = jnp.sum(x, axis=0, keepdims=True)                              # (1, C)
    g_mean = jnp.dot(ch_sum, gmat, preferred_element_type=jnp.float32) * inv_n   # (1, G)
    mean_c = jax.lax.dot_general(g_mean, gmat, (((1,), (1,)), ((), ())),
                                 preferred_element_type=jnp.float32)        # (1, C)
    d = x - mean_c
    ch_sq = jnp.sum(d * d, axis=0, keepdims=True)                           # (1, C)
    g_var = jnp.dot(ch_sq, gmat, preferred_element_type=jnp.float32) * inv_n      # (1, G)
    inv_g = jax.lax.rsqrt(g_var + eps)
    inv_c = jax.lax.dot_general(inv_g, gmat, (((1,), (1,)), ((), ())),
                                preferred_element_type=jnp.float32)          # (1, C)
    y = d * inv_c * gamma + beta
    if silu:
        y = y * jax.nn.sigmoid(y)
    return y


def _layer_norm(x, gamma, beta, eps=1e-5):
    mean = jnp.mean(x, axis=-1, keepdims=True)
    d = x - mean
    var = jnp.mean(d * d, axis=-1, keepdims=True)
    return d * jax.lax.rsqrt(var + eps) * gamma + beta


def _conv3x3_sc(h, shift_ref, w_ref, bias):
    """3x3 conv (padding=1) on channels-last rows, as 9 shift-matrix matmuls.

    h        : (rows_in, Cin) f32 activation (flattened spatial).
    shift_ref: (9, rows_out, rows_in) bf16 0/1 shift (or upsample-gather) matrices.
    w_ref    : (9, Cin, Cout) bf16 weights (tap-major, same ordering as shift_ref).
    bias     : (1, Cout) f32.
    """
    rows_out = shift_ref.shape[1]
    cout = w_ref.shape[2]
    hb = h.astype(jnp.bfloat16)
    acc = jnp.zeros((rows_out, cout), jnp.float32) + bias
    for t in range(9):
        g = jnp.dot(shift_ref[t], hb, preferred_element_type=jnp.float32)    # (rows_out, Cin)
        acc = acc + jnp.dot(g.astype(jnp.bfloat16), w_ref[t],
                            preferred_element_type=jnp.float32)
    return acc


def _mha(q, k, v, wo, bo, heads):
    """Multi-head attention with heads kept fused in (S, C); output projection is
    folded into the per-head loop so no concatenation/relayout is needed."""
    _, c = q.shape
    d = c // heads
    scale = d ** -0.5
    acc = None
    for h in range(heads):
        lo, hi = h * d, (h + 1) * d
        qh = (q[:, lo:hi] * scale).astype(jnp.bfloat16)
        kh = k[:, lo:hi].astype(jnp.bfloat16)
        vh = v[:, lo:hi].astype(jnp.bfloat16)
        s = jax.lax.dot_general(qh, kh, (((1,), (1,)), ((), ())),
                                preferred_element_type=jnp.float32)          # (Sq, Sk)
        m = jnp.max(s, axis=-1, keepdims=True)
        p = jnp.exp(s - m)
        l = jnp.sum(p, axis=-1, keepdims=True)
        p = p * pl.reciprocal(l, approx=True)
        oh = _mm(p, vh)                                                       # (Sq, d)
        contrib = _mm(oh, wo[lo:hi, :])                                       # (Sq, C)
        acc = contrib if acc is None else acc + contrib
    return acc + bo


# ------------------------------- Pallas kernels -------------------------------
def _resnet_kernel(x_ref, temb_ref, shift_ref,
                   gm_in_ref, gn1_g_ref, gn1_b_ref,
                   w1_ref, b1_ref,
                   temb_w_ref, temb_b_ref,
                   gm_out_ref, gn2_g_ref, gn2_b_ref,
                   w2_ref, b2_ref,
                   ws_ref, bs_ref,
                   o_ref):
    x = x_ref[0].astype(jnp.float32)                                          # (S, Ccat)
    h = _group_norm(x, gn1_g_ref[...], gn1_b_ref[...], gm_in_ref[...],
                    RESNET_EPS, silu=True)
    h = _conv3x3_sc(h, shift_ref, w1_ref, b1_ref[...])                        # (S, Cout)
    t = temb_ref[0].astype(jnp.float32)                                       # (1, TEMB)
    t = t * jax.nn.sigmoid(t)
    h = h + (_mm(t, temb_w_ref[...]) + temb_b_ref[...])
    h = _group_norm(h, gn2_g_ref[...], gn2_b_ref[...], gm_out_ref[...],
                    RESNET_EPS, silu=True)
    h = _conv3x3_sc(h, shift_ref, w2_ref, b2_ref[...])
    short = _mm(x, ws_ref[...]) + bs_ref[...]                                 # 1x1 shortcut
    o_ref[0] = ((short + h) * (1.0 / OUTPUT_SCALE)).astype(o_ref.dtype)


def _transformer_kernel(x_ref, ctx_ref,
                        gm_ref, gn_g_ref, gn_b_ref,
                        pin_w_ref, pin_b_ref,
                        ln1_g_ref, ln1_b_ref,
                        a1_wqkv_ref, a1_wo_ref, a1_bo_ref,
                        ln2_g_ref, ln2_b_ref,
                        a2_wq_ref, a2_wkv_ref, a2_wo_ref, a2_bo_ref,
                        ln3_g_ref, ln3_b_ref,
                        ff1_w_ref, ff1_b_ref, ff2_w_ref, ff2_b_ref,
                        pout_w_ref, pout_b_ref,
                        o_ref):
    x = x_ref[0].astype(jnp.float32)                                          # (S, C) residual
    ctx = ctx_ref[0].astype(jnp.float32)                                      # (Sk, Ck)
    c = x.shape[1]

    # GroupNorm (no act) + proj_in (1x1 conv == matmul)
    h = _group_norm(x, gn_g_ref[...], gn_b_ref[...], gm_ref[...], 1e-6, silu=False)
    h = _mm(h, pin_w_ref[...]) + pin_b_ref[...]

    # --- BasicTransformerBlock ---
    # self attention (fused QKV projection)
    n = _layer_norm(h, ln1_g_ref[...], ln1_b_ref[...])
    qkv = _mm(n, a1_wqkv_ref[...])                                            # (S, 3C)
    q, k, v = qkv[:, :c], qkv[:, c:2 * c], qkv[:, 2 * c:]
    h = h + _mha(q, k, v, a1_wo_ref[...], a1_bo_ref[...], HEADS)

    # cross attention (fused KV projection)
    n = _layer_norm(h, ln2_g_ref[...], ln2_b_ref[...])
    q = _mm(n, a2_wq_ref[...])
    kv = _mm(ctx, a2_wkv_ref[...])                                            # (Sk, 2C)
    k, v = kv[:, :c], kv[:, c:]
    h = h + _mha(q, k, v, a2_wo_ref[...], a2_bo_ref[...], HEADS)

    # feed forward (GEGLU)
    n = _layer_norm(h, ln3_g_ref[...], ln3_b_ref[...])
    y = _mm(n, ff1_w_ref[...]) + ff1_b_ref[...]                               # (S, 8C)
    val, gate = jnp.split(y, 2, axis=-1)
    # TODO(synk): torch F.gelu is exact (erf); tanh approximation used here.
    y = val * jax.nn.gelu(gate, approximate=True)
    h = h + (_mm(y, ff2_w_ref[...]) + ff2_b_ref[...])

    # proj_out + residual
    out = _mm(h, pout_w_ref[...]) + pout_b_ref[...]
    o_ref[0] = (out + x).astype(o_ref.dtype)


def _upsample_kernel(x_ref, gather_ref, w_ref, b_ref, o_ref):
    # gather matrices already encode "read input pixel (i//2, j//2)", so the
    # nearest-2x intermediate is never materialized.
    x = x_ref[0].astype(jnp.float32)                                          # (S, C)
    out = _conv3x3_sc(x, gather_ref, w_ref, b_ref[...])                       # (4S, C)
    o_ref[0] = out.astype(o_ref.dtype)


# ----------------------------- spec / operand helpers --------------------------
def _param_spec(arr):
    zeros = (0,) * arr.ndim
    return pl.BlockSpec(tuple(arr.shape), lambda b, _z=zeros: _z)


def _batched_spec(tail):
    nd = len(tail)
    return pl.BlockSpec((1,) + tuple(tail), lambda b, _n=nd: (b,) + (0,) * _n)


def _group_matrix(c, groups):
    """(C, G) one-hot membership matrix (contiguous channel groups, like torch)."""
    return jnp.repeat(jnp.eye(groups, dtype=jnp.float32), c // groups, axis=0)


def _conv_w(w):
    """(Cout, Cin, 3, 3) torch layout -> (9, Cin, Cout) bf16, tap-major (ky, kx)."""
    cout, cin = w.shape[0], w.shape[1]
    return w.transpose(2, 3, 1, 0).reshape(9, cin, cout).astype(jnp.bfloat16)


def _conv_shift_matrices(h, w):
    """(9, H*W, H*W) 0/1 matrices: out_row -> zero-padded shifted input row per tap."""
    s = h * w
    mats = np.zeros((9, s, s), np.float32)
    yy, xx = np.meshgrid(np.arange(h), np.arange(w), indexing="ij")
    out_idx = (yy * w + xx).reshape(-1)
    taps = [(dy, dx) for dy in (-1, 0, 1) for dx in (-1, 0, 1)]
    for t, (dy, dx) in enumerate(taps):
        sy, sx = yy + dy, xx + dx
        valid = ((sy >= 0) & (sy < h) & (sx >= 0) & (sx < w)).reshape(-1)
        src_idx = (np.clip(sy, 0, h - 1) * w + np.clip(sx, 0, w - 1)).reshape(-1)
        mats[t, out_idx[valid], src_idx[valid]] = 1.0
    return mats


def _upsample_gather_matrices(h, w):
    """(9, 4*H*W, H*W) matrices fusing nearest-2x upsample into the 3x3 conv taps."""
    h2, w2 = 2 * h, 2 * w
    mats = np.zeros((9, h2 * w2, h * w), np.float32)
    yy, xx = np.meshgrid(np.arange(h2), np.arange(w2), indexing="ij")
    out_idx = (yy * w2 + xx).reshape(-1)
    taps = [(dy, dx) for dy in (-1, 0, 1) for dx in (-1, 0, 1)]
    for t, (dy, dx) in enumerate(taps):
        sy, sx = yy + dy, xx + dx
        valid = ((sy >= 0) & (sy < h2) & (sx >= 0) & (sx < w2)).reshape(-1)
        src_idx = ((np.clip(sy, 0, h2 - 1) // 2) * w
                   + (np.clip(sx, 0, w2 - 1) // 2)).reshape(-1)
        mats[t, out_idx[valid], src_idx[valid]] = 1.0
    return mats


_PARALLEL_B = pltpu.CompilerParams(dimension_semantics=("parallel",))


# ---------------------------- module building blocks -------------------------
def resnet_block(x, temb, p, shift_mats):
    """x: (B, S, Ccat) channels-last; temb: (B, TEMB)."""
    bsz, s, c_in = x.shape
    c_out = p["conv1_w"].shape[0]
    bf = lambda a: a.astype(jnp.bfloat16)
    operands = [
        x,
        temb.reshape(bsz, 1, temb.shape[-1]),
        bf(shift_mats),
        _group_matrix(c_in, GROUPS),
        p["norm1_g"].reshape(1, c_in), p["norm1_b"].reshape(1, c_in),
        _conv_w(p["conv1_w"]), p["conv1_b"].reshape(1, c_out),
        bf(p["temb_w"].T), p["temb_b"].reshape(1, c_out),
        _group_matrix(c_out, GROUPS),
        p["norm2_g"].reshape(1, c_out), p["norm2_b"].reshape(1, c_out),
        _conv_w(p["conv2_w"]), p["conv2_b"].reshape(1, c_out),
        bf(p["short_w"].reshape(c_out, c_in).T), p["short_b"].reshape(1, c_out),
    ]
    in_specs = ([_batched_spec((s, c_in)), _batched_spec((1, temb.shape[-1]))]
                + [_param_spec(a) for a in operands[2:]])
    return pl.pallas_call(
        _resnet_kernel,
        grid=(bsz,),
        in_specs=in_specs,
        out_specs=_batched_spec((s, c_out)),
        out_shape=jax.ShapeDtypeStruct((bsz, s, c_out), jnp.float32),
        compiler_params=_PARALLEL_B,
    )(*operands)


def transformer_2d(x, ctx, p):
    """x: (B, S, C) channels-last; ctx: (B, Sk, Ck)."""
    bsz, s, c = x.shape
    sk, ck = ctx.shape[1], ctx.shape[2]
    bf = lambda a: a.astype(jnp.bfloat16)
    blk = p["block"]
    a1, a2 = blk["attn1"], blk["attn2"]
    wqkv1 = jnp.concatenate([a1["to_q"].T, a1["to_k"].T, a1["to_v"].T], axis=1)  # (C, 3C)
    wkv2 = jnp.concatenate([a2["to_k"].T, a2["to_v"].T], axis=1)                 # (Ck, 2C)
    operands = [
        x, ctx,
        _group_matrix(c, GROUPS),
        p["norm_g"].reshape(1, c), p["norm_b"].reshape(1, c),
        bf(p["proj_in_w"].reshape(c, c).T), p["proj_in_b"].reshape(1, c),
        blk["norm1_g"].reshape(1, c), blk["norm1_b"].reshape(1, c),
        bf(wqkv1), bf(a1["to_out_w"].T), a1["to_out_b"].reshape(1, c),
        blk["norm2_g"].reshape(1, c), blk["norm2_b"].reshape(1, c),
        bf(a2["to_q"].T), bf(wkv2), bf(a2["to_out_w"].T), a2["to_out_b"].reshape(1, c),
        blk["norm3_g"].reshape(1, c), blk["norm3_b"].reshape(1, c),
        bf(blk["ff1_w"].T), blk["ff1_b"].reshape(1, -1),
        bf(blk["ff2_w"].T), blk["ff2_b"].reshape(1, c),
        bf(p["proj_out_w"].reshape(c, c).T), p["proj_out_b"].reshape(1, c),
    ]
    in_specs = ([_batched_spec((s, c)), _batched_spec((sk, ck))]
                + [_param_spec(a) for a in operands[2:]])
    out = pl.pallas_call(
        _transformer_kernel,
        grid=(bsz,),
        in_specs=in_specs,
        out_specs=_batched_spec((s, c)),
        out_shape=jax.ShapeDtypeStruct((bsz, s, c), jnp.float32),
        compiler_params=_PARALLEL_B,
    )(*operands)
    # TODO(synk): custom refer_hs branch of Transformer2DModel not implemented (refer_hs=None path).
    return out, None


def upsample2d(x, p, gather_mats):
    """Nearest-2x upsample fused into the 3x3 conv. x: (B, S, C) -> (B, 4S, C)."""
    bsz, s, c = x.shape
    s2 = gather_mats.shape[1]
    operands = [
        x,
        gather_mats.astype(jnp.bfloat16),
        _conv_w(p["conv_w"]),
        p["conv_b"].reshape(1, c),
    ]
    in_specs = [_batched_spec((s, c))] + [_param_spec(a) for a in operands[1:]]
    return pl.pallas_call(
        _upsample_kernel,
        grid=(bsz,),
        in_specs=in_specs,
        out_specs=_batched_spec((s2, c)),
        out_shape=jax.ShapeDtypeStruct((bsz, s2, c), jnp.float32),
        compiler_params=_PARALLEL_B,
    )(*operands)


def cross_attn_up_block_2d(params, hidden_states, res_hidden_states_tuple,
                           temb, encoder_hidden_states):
    """Inputs/outputs follow the PyTorch module: NCHW images, (B, S, C) context."""
    bsz, _, height, width = hidden_states.shape
    shift_mats = jnp.asarray(_conv_shift_matrices(height, width))
    gather_mats = jnp.asarray(_upsample_gather_matrices(height, width))

    def to_seq(t):  # NCHW -> (B, H*W, C), done once at the boundary
        return t.transpose(0, 2, 3, 1).reshape(t.shape[0], -1, t.shape[1])

    hs = to_seq(hidden_states)
    output_refer_states = ()
    for rp, ap in zip(params["resnets"], params["attentions"]):
        res_hidden_states = res_hidden_states_tuple[-1]
        res_hidden_states_tuple = res_hidden_states_tuple[:-1]
        hs = jnp.concatenate([hs, to_seq(res_hidden_states)], axis=-1)
        hs = resnet_block(hs, temb, rp, shift_mats)
        hs, o_refer = transformer_2d(hs, encoder_hidden_states, ap)
        if o_refer is not None:
            output_refer_states += (o_refer,)

    if params.get("upsampler") is not None:
        hs = upsample2d(hs, params["upsampler"], gather_mats)
        height, width = 2 * height, 2 * width

    out = hs.reshape(bsz, height, width, -1).transpose(0, 3, 1, 2)   # back to NCHW
    if output_refer_states == ():
        output_refer_states = None
    return out, output_refer_states


# ------------------------------- parameters ----------------------------------
def init_params(key):
    keys = iter(jax.random.split(key, 64))

    def w(*shape):
        return jax.random.normal(next(keys), shape, jnp.float32) * 0.05

    zeros = lambda *s: jnp.zeros(s, jnp.float32)
    ones = lambda *s: jnp.ones(s, jnp.float32)

    c_cat = PREV_OUT_CH + IN_CH   # num_layers=1 -> resnet input = prev_output + in_channels
    resnet = dict(
        norm1_g=ones(c_cat), norm1_b=zeros(c_cat),
        conv1_w=w(OUT_CH, c_cat, 3, 3), conv1_b=zeros(OUT_CH),
        temb_w=w(OUT_CH, TEMB_CH), temb_b=zeros(OUT_CH),
        norm2_g=ones(OUT_CH), norm2_b=zeros(OUT_CH),
        conv2_w=w(OUT_CH, OUT_CH, 3, 3), conv2_b=zeros(OUT_CH),
        short_w=w(OUT_CH, c_cat, 1, 1), short_b=zeros(OUT_CH),
    )

    def attn_p(kv_dim):
        return dict(
            to_q=w(OUT_CH, OUT_CH), to_k=w(OUT_CH, kv_dim), to_v=w(OUT_CH, kv_dim),
            to_out_w=w(OUT_CH, OUT_CH), to_out_b=zeros(OUT_CH),
        )

    block = dict(
        norm1_g=ones(OUT_CH), norm1_b=zeros(OUT_CH), attn1=attn_p(OUT_CH),
        norm2_g=ones(OUT_CH), norm2_b=zeros(OUT_CH), attn2=attn_p(CROSS_DIM),
        norm3_g=ones(OUT_CH), norm3_b=zeros(OUT_CH),
        ff1_w=w(8 * OUT_CH, OUT_CH), ff1_b=zeros(8 * OUT_CH),     # GEGLU proj (dim -> 2*4*dim)
        ff2_w=w(OUT_CH, 4 * OUT_CH), ff2_b=zeros(OUT_CH),
    )
    attention = dict(
        norm_g=ones(OUT_CH), norm_b=zeros(OUT_CH),
        proj_in_w=w(OUT_CH, OUT_CH, 1, 1), proj_in_b=zeros(OUT_CH),
        block=block,
        proj_out_w=w(OUT_CH, OUT_CH, 1, 1), proj_out_b=zeros(OUT_CH),
    )
    upsampler = dict(conv_w=w(OUT_CH, OUT_CH, 3, 3), conv_b=zeros(OUT_CH))
    return dict(resnets=[resnet], attentions=[attention], upsampler=upsampler)


# --------------------------------- main ---------------------------------------
if __name__ == "__main__":
    key = jax.random.PRNGKey(0)
    k1, k2, k3, k4, kp = jax.random.split(key, 5)
    B, H, W, SEQ = 2, 8, 8, 8

    hidden_states = jax.random.normal(k1, (B, PREV_OUT_CH, H, W), jnp.float32)
    res_hidden = jax.random.normal(k2, (B, IN_CH, H, W), jnp.float32)
    temb = jax.random.normal(k3, (B, TEMB_CH), jnp.float32)
    encoder_hidden_states = jax.random.normal(k4, (B, SEQ, CROSS_DIM), jnp.float32)
    params = init_params(kp)

    fwd = jax.jit(cross_attn_up_block_2d)
    out, refer_states = fwd(params, hidden_states, (res_hidden,), temb,
                            encoder_hidden_states)
    out = jax.block_until_ready(out)

    assert out.shape == (B, OUT_CH, 2 * H, 2 * W), out.shape
    assert refer_states is None
    assert bool(jnp.all(jnp.isfinite(out)))
    print("KERNEL_OK")
</pallas_src>

<mosaic_0001>
module attributes {stable_mosaic.version = 11 : i64} {
  func.func @_resnet_kernel(%arg0: i32, %arg1: memref<1x64x48xf32, #tpu.memory_space<vmem>>, %arg2: memref<1x1x64xf32, #tpu.memory_space<vmem>>, %arg3: memref<9x64x64xbf16, #tpu.memory_space<vmem>>, %arg4: memref<48x8xf32, #tpu.memory_space<vmem>>, %arg5: memref<1x48xf32, #tpu.memory_space<vmem>>, %arg6: memref<1x48xf32, #tpu.memory_space<vmem>>, %arg7: memref<9x48x32xbf16, #tpu.memory_space<vmem>>, %arg8: memref<1x32xf32, #tpu.memory_space<vmem>>, %arg9: memref<64x32xbf16, #tpu.memory_space<vmem>>, %arg10: memref<1x32xf32, #tpu.memory_space<vmem>>, %arg11: memref<32x8xf32, #tpu.memory_space<vmem>>, %arg12: memref<1x32xf32, #tpu.memory_space<vmem>>, %arg13: memref<1x32xf32, #tpu.memory_space<vmem>>, %arg14: memref<9x32x32xbf16, #tpu.memory_space<vmem>>, %arg15: memref<1x32xf32, #tpu.memory_space<vmem>>, %arg16: memref<48x32xbf16, #tpu.memory_space<vmem>>, %arg17: memref<1x32xf32, #tpu.memory_space<vmem>>, %arg18: memref<1x64x32xf32, #tpu.memory_space<vmem>>) attributes {dimension_semantics = [#tpu.dimension_semantics<parallel>], iteration_bounds = array<i64: 2>, scalar_prefetch = 0 : i64, scratch_operands = 0 : i64, tpu.core_type = #tpu.core_type<tc>, window_params = [{transform_indices = @transform_0, window_bounds = array<i64: 1, 64, 48>}, {transform_indices = @transform_1, window_bounds = array<i64: 1, 1, 64>}, {pipeline_mode = #tpu.pipeline_mode<synchronous>, transform_indices = @transform_2, window_bounds = array<i64: 9, 64, 64>}, {pipeline_mode = #tpu.pipeline_mode<synchronous>, transform_indices = @transform_3, window_bounds = array<i64: 48, 8>}, {pipeline_mode = #tpu.pipeline_mode<synchronous>, transform_indices = @transform_4, window_bounds = array<i64: 1, 48>}, {pipeline_mode = #tpu.pipeline_mode<synchronous>, transform_indices = @transform_5, window_bounds = array<i64: 1, 48>}, {pipeline_mode = #tpu.pipeline_mode<synchronous>, transform_indices = @transform_6, window_bounds = array<i64: 9, 48, 32>}, {pipeline_mode = #tpu.pipeline_mode<synchronous>, transform_indices = @transform_7, window_bounds = array<i64: 1, 32>}, {pipeline_mode = #tpu.pipeline_mode<synchronous>, transform_indices = @transform_8, window_bounds = array<i64: 64, 32>}, {pipeline_mode = #tpu.pipeline_mode<synchronous>, transform_indices = @transform_9, window_bounds = array<i64: 1, 32>}, {pipeline_mode = #tpu.pipeline_mode<synchronous>, transform_indices = @transform_10, window_bounds = array<i64: 32, 8>}, {pipeline_mode = #tpu.pipeline_mode<synchronous>, transform_indices = @transform_11, window_bounds = array<i64: 1, 32>}, {pipeline_mode = #tpu.pipeline_mode<synchronous>, transform_indices = @transform_12, window_bounds = array<i64: 1, 32>}, {pipeline_mode = #tpu.pipeline_mode<synchronous>, transform_indices = @transform_13, window_bounds = array<i64: 9, 32, 32>}, {pipeline_mode = #tpu.pipeline_mode<synchronous>, transform_indices = @transform_14, window_bounds = array<i64: 1, 32>}, {pipeline_mode = #tpu.pipeline_mode<synchronous>, transform_indices = @transform_15, window_bounds = array<i64: 48, 32>}, {pipeline_mode = #tpu.pipeline_mode<synchronous>, transform_indices = @transform_16, window_bounds = array<i64: 1, 32>}, {transform_indices = @transform_17, window_bounds = array<i64: 1, 64, 32>}]} {
    %c0 = arith.constant 0 : index
    %c0_0 = arith.constant 0 : index
    %c0_1 = arith.constant 0 : index
    %0 = vector.load %arg1[%c0, %c0_0, %c0_1] : memref<1x64x48xf32, #tpu.memory_space<vmem>>, vector<1x64x48xf32>
    %1 = vector.shape_cast %0 : vector<1x64x48xf32> to vector<64x48xf32>
    %c0_2 = arith.constant 0 : index
    %c0_3 = arith.constant 0 : index
    %2 = vector.load %arg5[%c0_2, %c0_3] : memref<1x48xf32, #tpu.memory_space<vmem>>, vector<1x48xf32>
    %c0_4 = arith.constant 0 : index
    %c0_5 = arith.constant 0 : index
    %3 = vector.load %arg6[%c0_4, %c0_5] : memref<1x48xf32, #tpu.memory_space<vmem>>, vector<1x48xf32>
    %c0_6 = arith.constant 0 : index
    %c0_7 = arith.constant 0 : index
    %4 = vector.load %arg4[%c0_6, %c0_7] : memref<48x8xf32, #tpu.memory_space<vmem>>, vector<48x8xf32>
    %cst = arith.constant dense<0.000000e+00> : vector<48xf32>
    %5 = vector.multi_reduction <add>, %1, %cst [0] : vector<64x48xf32> to vector<48xf32>
    %6 = vector.shape_cast %5 : vector<48xf32> to vector<1x48xf32>
    %cst_8 = arith.constant dense<0.000000e+00> : vector<1x8xf32>
    %7 = tpu.matmul %6, %4, %cst_8 {dimension_numbers = #tpu.dot_dimension_numbers<[1], [0], [0], [1], [0, 0, 1, 1], [], []>} : vector<1x48xf32>, vector<48x8xf32>, vector<1x8xf32> -> vector<1x8xf32>
    %cst_9 = arith.constant 0.00260416674 : f32
    %8 = vector.broadcast %cst_9 : f32 to vector<1x8xf32>
    %9 = arith.mulf %7, %8 : vector<1x8xf32>
    %cst_10 = arith.constant dense<0.000000e+00> : vector<1x48xf32>
    %10 = tpu.matmul %9, %4, %cst_10 {dimension_numbers = #tpu.dot_dimension_numbers<[1], [1], [0], [0], [0, 0, 1, 0], [], []>} : vector<1x8xf32>, vector<48x8xf32>, vector<1x48xf32> -> vector<1x48xf32>
    %11 = vector.broadcast %10 : vector<1x48xf32> to vector<64x48xf32>
    %12 = arith.subf %1, %11 : vector<64x48xf32>
    %13 = arith.mulf %12, %12 : vector<64x48xf32>
    %cst_11 = arith.constant dense<0.000000e+00> : vector<48xf32>
    %14 = vector.multi_reduction <add>, %13, %cst_11 [0] : vector<64x48xf32> to vector<48xf32>
    %15 = vector.shape_cast %14 : vector<48xf32> to vector<1x48xf32>
    %cst_12 = arith.constant dense<0.000000e+00> : vector<1x8xf32>
    %16 = tpu.matmul %15, %4, %cst_12 {dimension_numbers = #tpu.dot_dimension_numbers<[1], [0], [0], [1], [0, 0, 1, 1], [], []>} : vector<1x48xf32>, vector<48x8xf32>, vector<1x8xf32> -> vector<1x8xf32>
    %cst_13 = arith.constant 0.00260416674 : f32
    %17 = vector.broadcast %cst_13 : f32 to vector<1x8xf32>
    %18 = arith.mulf %16, %17 : vector<1x8xf32>
    %cst_14 = arith.constant 9.99999997E-7 : f32
    %19 = vector.broadcast %cst_14 : f32 to vector<1x8xf32>
    %20 = arith.addf %18, %19 : vector<1x8xf32>
    %21 = math.rsqrt %20 : vector<1x8xf32>
    %cst_15 = arith.constant dense<0.000000e+00> : vector<1x48xf32>
    %22 = tpu.matmul %21, %4, %cst_15 {dimension_numbers = #tpu.dot_dimension_numbers<[1], [1], [0], [0], [0, 0, 1, 0], [], []>} : vector<1x8xf32>, vector<48x8xf32>, vector<1x48xf32> -> vector<1x48xf32>
    %23 = vector.broadcast %22 : vector<1x48xf32> to vector<64x48xf32>
    %24 = arith.mulf %12, %23 : vector<64x48xf32>
    %25 = vector.broadcast %2 : vector<1x48xf32> to vector<64x48xf32>
    %26 = arith.mulf %24, %25 : vector<64x48xf32>
    %27 = vector.broadcast %3 : vector<1x48xf32> to vector<64x48xf32>
    %28 = arith.addf %26, %27 : vector<64x48xf32>
    %29 = arith.negf %28 : vector<64x48xf32>
    %30 = math.exp %29 : vector<64x48xf32>
    %cst_16 = arith.constant 1.000000e+00 : f32
    %31 = vector.broadcast %cst_16 : f32 to vector<64x48xf32>
    %32 = arith.addf %31, %30 : vector<64x48xf32>
    %33 = arith.divf %31, %32 : vector<64x48xf32>
    %34 = arith.mulf %28, %33 : vector<64x48xf32>
    %c0_17 = arith.constant 0 : index
    %c0_18 = arith.constant 0 : index
    %35 = vector.load %arg8[%c0_17, %c0_18] : memref<1x32xf32, #tpu.memory_space<vmem>>, vector<1x32xf32>
    %36 = arith.truncf %34 : vector<64x48xf32> to vector<64x48xbf16>
    %cst_19 = arith.constant 0.000000e+00 : f32
    %37 = vector.broadcast %cst_19 : f32 to vector<64x32xf32>
    %38 = vector.broadcast %35 : vector<1x32xf32> to vector<64x32xf32>
    %39 = arith.addf %37, %38 : vector<64x32xf32>
    %c0_20 = arith.constant 0 : index
    %c0_21 = arith.constant 0 : index
    %c0_22 = arith.constant 0 : index
    %40 = vector.load %arg3[%c0_20, %c0_21, %c0_22] : memref<9x64x64xbf16, #tpu.memory_space<vmem>>, vector<1x64x64xbf16>
    %41 = vector.shape_cast %40 : vector<1x64x64xbf16> to vector<64x64xbf16>
    %cst_23 = arith.constant dense<0.000000e+00> : vector<64x48xf32>
    %42 = tpu.matmul %41, %36, %cst_23 {dimension_numbers = #tpu.dot_dimension_numbers<[1], [0], [0], [1], [0, 0, 1, 1], [], []>} : vector<64x64xbf16>, vector<64x48xbf16>, vector<64x48xf32> -> vector<64x48xf32>
    %43 = arith.truncf %42 : vector<64x48xf32> to vector<64x48xbf16>
    %c0_24 = arith.constant 0 : index
    %c0_25 = arith.constant 0 : index
    %c0_26 = arith.constant 0 : index
    %44 = vector.load %arg7[%c0_24, %c0_25, %c0_26] : memref<9x48x32xbf16, #tpu.memory_space<vmem>>, vector<1x48x32xbf16>
    %45 = vector.shape_cast %44 : vector<1x48x32xbf16> to vector<48x32xbf16>
    %cst_27 = arith.constant dense<0.000000e+00> : vector<64x32xf32>
    %46 = tpu.matmul %43, %45, %cst_27 {dimension_numbers = #tpu.dot_dimension_numbers<[1], [0], [0], [1], [0, 0, 1, 1], [], []>} : vector<64x48xbf16>, vector<48x32xbf16>, vector<64x32xf32> -> vector<64x32xf32>
    %47 = arith.addf %39, %46 : vector<64x32xf32>
    %c1 = arith.constant 1 : index
    %c0_28 = arith.constant 0 : index
    %c0_29 = arith.constant 0 : index
    %48 = vector.load %arg3[%c1, %c0_28, %c0_29] : memref<9x64x64xbf16, #tpu.memory_space<vmem>>, vector<1x64x64xbf16>
    %49 = vector.shape_cast %48 : vector<1x64x64xbf16> to vector<64x64xbf16>
    %cst_30 = arith.constant dense<0.000000e+00> : vector<64x48xf32>
    %50 = tpu.matmul %49, %36, %cst_30 {dimension_numbers = #tpu.dot_dimension_numbers<[1], [0], [0], [1], [0, 0, 1, 1], [], []>} : vector<64x64xbf16>, vector<64x48xbf16>, vector<64x48xf32> -> vector<64x48xf32>
    %51 = arith.truncf %50 : vector<64x48xf32> to vector<64x48xbf16>
    %c1_31 = arith.constant 1 : index
    %c0_32 = arith.constant 0 : index
    %c0_33 = arith.constant 0 : index
    %52 = vector.load %arg7[%c1_31, %c0_32, %c0_33] : memref<9x48x32xbf16, #tpu.memory_space<vmem>>, vector<1x48x32xbf16>
    %53 = vector.shape_cast %52 : vector<1x48x32xbf16> to vector<48x32xbf16>
    %cst_34 = arith.constant dense<0.000000e+00> : vector<64x32xf32>
    %54 = tpu.matmul %51, %53, %cst_34 {dimension_numbers = #tpu.dot_dimension_numbers<[1], [0], [0], [1], [0, 0, 1, 1], [], []>} : vector<64x48xbf16>, vector<48x32xbf16>, vector<64x32xf32> -> vector<64x32xf32>
    %55 = arith.addf %47, %54 : vector<64x32xf32>
    %c2 = arith.constant 2 : index
    %c0_35 = arith.constant 0 : index
    %c0_36 = arith.constant 0 : index
    %56 = vector.load %arg3[%c2, %c0_35, %c0_36] : memref<9x64x64xbf16, #tpu.memory_space<vmem>>, vector<1x64x64xbf16>
    %57 = vector.shape_cast %56 : vector<1x64x64xbf16> to vector<64x64xbf16>
    %cst_37 = arith.constant dense<0.000000e+00> : vector<64x48xf32>
    %58 = tpu.matmul %57, %36, %cst_37 {dimension_numbers = #tpu.dot_dimension_numbers<[1], [0], [0], [1], [0, 0, 1, 1], [], []>} : vector<64x64xbf16>, vector<64x48xbf16>, vector<64x48xf32> -> vector<64x48xf32>
    %59 = arith.truncf %58 : vector<64x48xf32> to vector<64x48xbf16>
    %c2_38 = arith.constant 2 : index
    %c0_39 = arith.constant 0 : index
    %c0_40 = arith.constant 0 : index
    %60 = vector.load %arg7[%c2_38, %c0_39, %c0_40] : memref<9x48x32xbf16, #tpu.memory_space<vmem>>, vector<1x48x32xbf16>
    %61 = vector.shape_cast %60 : vector<1x48x32xbf16> to vector<48x32xbf16>
    %cst_41 = arith.constant dense<0.000000e+00> : vector<64x32xf32>
    %62 = tpu.matmul %59, %61, %cst_41 {dimension_numbers = #tpu.dot_dimension_numbers<[1], [0], [0], [1], [0, 0, 1, 1], [], []>} : vector<64x48xbf16>, vector<48x32xbf16>, vector<64x32xf32> -> vector<64x32xf32>
    %63 = arith.addf %55, %62 : vector<64x32xf32>
    %c3 = arith.constant 3 : index
    %c0_42 = arith.constant 0 : index
    %c0_43 = arith.constant 0 : index
    %64 = vector.load %arg3[%c3, %c0_42, %c0_43] : memref<9x64x64xbf16, #tpu.memory_space<vmem>>, vector<1x64x64xbf16>
    %65 = vector.shape_cast %64 : vector<1x64x64xbf16> to vector<64x64xbf16>
    %cst_44 = arith.constant dense<0.000000e+00> : vector<64x48xf32>
    %66 = tpu.matmul %65, %36, %cst_44 {dimension_numbers = #tpu.dot_dimension_numbers<[1], [0], [0], [1], [0, 0, 1, 1], [], []>} : vector<64x64xbf16>, vector<64x48xbf16>, vector<64x48xf32> -> vector<64x48xf32>
    %67 = arith.truncf %66 : vector<64x48xf32> to vector<64x48xbf16>
    %c3_45 = arith.constant 3 : index
    %c0_46 = arith.constant 0 : index
    %c0_47 = arith.constant 0 : index
    %68 = vector.load %arg7[%c3_45, %c0_46, %c0_47] : memref<9x48x32xbf16, #tpu.memory_space<vmem>>, vector<1x48x32xbf16>
    %69 = vector.shape_cast %68 : vector<1x48x32xbf16> to vector<48x32xbf16>
    %cst_48 = arith.constant dense<0.000000e+00> : vector<64x32xf32>
    %70 = tpu.matmul %67, %69, %cst_48 {dimension_numbers = #tpu.dot_dimension_numbers<[1], [0], [0], [1], [0, 0, 1, 1], [], []>} : vector<64x48xbf16>, vector<48x32xbf16>, vector<64x32xf32> -> vector<64x32xf32>
    %71 = arith.addf %63, %70 : vector<64x32xf32>
    %c4 = arith.constant 4 : index
    %c0_49 = arith.constant 0 : index
    %c0_50 = arith.constant 0 : index
    %72 = vector.load %arg3[%c4, %c0_49, %c0_50] : memref<9x64x64xbf16, #tpu.memory_space<vmem>>, vector<1x64x64xbf16>
    %73 = vector.shape_cast %72 : vector<1x64x64xbf16> to vector<64x64xbf16>
    %cst_51 = arith.constant dense<0.000000e+00> : vector<64x48xf32>
    %74 = tpu.matmul %73, %36, %cst_51 {dimension_numbers = #tpu.dot_dimension_numbers<[1], [0], [0], [1], [0, 0, 1, 1], [], []>} : vector<64x64xbf16>, vector<64x48xbf16>, vector<64x48xf32> -> vector<64x48xf32>
    %75 = arith.truncf %74 : vector<64x48xf32> to vector<64x48xbf16>
    %c4_52 = arith.constant 4 : index
    %c0_53 = arith.constant 0 : index
    %c0_54 = arith.constant 0 : index
    %76 = vector.load %arg7[%c4_52, %c0_53, %c0_54] : memref<9x48x32xbf16, #tpu.memory_space<vmem>>, vector<1x48x32xbf16>
    %77 = vector.shape_cast %76 : vector<1x48x32xbf16> to vector<48x32xbf16>
    %cst_55 = arith.constant dense<0.000000e+00> : vector<64x32xf32>
    %78 = tpu.matmul %75, %77, %cst_55 {dimension_numbers = #tpu.dot_dimension_numbers<[1], [0], [0], [1], [0, 0, 1, 1], [], []>} : vector<64x48xbf16>, vector<48x32xbf16>, vector<64x32xf32> -> vector<64x32xf32>
    %79 = arith.addf %71, %78 : vector<64x32xf32>
    %c5 = arith.constant 5 : index
    %c0_56 = arith.constant 0 : index
    %c0_57 = arith.constant 0 : index
    %80 = vector.load %arg3[%c5, %c0_56, %c0_57] : memref<9x64x64xbf16, #tpu.memory_space<vmem>>, vector<1x64x64xbf16>
    %81 = vector.shape_cast %80 : vector<1x64x64xbf16> to vector<64x64xbf16>
    %cst_58 = arith.constant dense<0.000000e+00> : vector<64x48xf32>
    %82 = tpu.matmul %81, %36, %cst_58 {dimension_numbers = #tpu.dot_dimension_numbers<[1], [0], [0], [1], [0, 0, 1, 1], [], []>} : vector<64x64xbf16>, vector<64x48xbf16>, vector<64x48xf32> -> vector<64x48xf32>
    %83 = arith.truncf %82 : vector<64x48xf32> to vector<64x48xbf16>
    %c5_59 = arith.constant 5 : index
    %c0_60 = arith.constant 0 : index
    %c0_61 = arith.constant 0 : index
    %84 = vector.load %arg7[%c5_59, %c0_60, %c0_61] : memref<9x48x32xbf16, #tpu.memory_space<vmem>>, vector<1x48x32xbf16>
    %85 = vector.shape_cast %84 : vector<1x48x32xbf16> to vector<48x32xbf16>
    %cst_62 = arith.constant dense<0.000000e+00> : vector<64x32xf32>
    %86 = tpu.matmul %83, %85, %cst_62 {dimension_numbers = #tpu.dot_dimension_numbers<[1], [0], [0], [1], [0, 0, 1, 1], [], []>} : vector<64x48xbf16>, vector<48x32xbf16>, vector<64x32xf32> -> vector<64x32xf32>
    %87 = arith.addf %79, %86 : vector<64x32xf32>
    %c6 = arith.constant 6 : index
    %c0_63 = arith.constant 0 : index
    %c0_64 = arith.constant 0 : index
    %88 = vector.load %arg3[%c6, %c0_63, %c0_64] : memref<9x64x64xbf16, #tpu.memory_space<vmem>>, vector<1x64x64xbf16>
    %89 = vector.shape_cast %88 : vector<1x64x64xbf16> to vector<64x64xbf16>
    %cst_65 = arith.constant dense<0.000000e+00> : vector<64x48xf32>
    %90 = tpu.matmul %89, %36, %cst_65 {dimension_numbers = #tpu.dot_dimension_numbers<[1], [0], [0], [1], [0, 0, 1, 1], [], []>} : vector<64x64xbf16>, vector<64x48xbf16>, vector<64x48xf32> -> vector<64x48xf32>
    %91 = arith.truncf %90 : vector<64x48xf32> to vector<64x48xbf16>
    %c6_66 = arith.constant 6 : index
    %c0_67 = arith.constant 0 : index
    %c0_68 = arith.constant 0 : index
    %92 = vector.load %arg7[%c6_66, %c0_67, %c0_68] : memref<9x48x32xbf16, #tpu.memory_space<vmem>>, vector<1x48x32xbf16>
    %93 = vector.shape_cast %92 : vector<1x48x32xbf16> to vector<48x32xbf16>
    %cst_69 = arith.constant dense<0.000000e+00> : vector<64x32xf32>
    %94 = tpu.matmul %91, %93, %cst_69 {dimension_numbers = #tpu.dot_dimension_numbers<[1], [0], [0], [1], [0, 0, 1, 1], [], []>} : vector<64x48xbf16>, vector<48x32xbf16>, vector<64x32xf32> -> vector<64x32xf32>
    %95 = arith.addf %87, %94 : vector<64x32xf32>
    %c7 = arith.constant 7 : index
    %c0_70 = arith.constant 0 : index
    %c0_71 = arith.constant 0 : index
    %96 = vector.load %arg3[%c7, %c0_70, %c0_71] : memref<9x64x64xbf16, #tpu.memory_space<vmem>>, vector<1x64x64xbf16>
    %97 = vector.shape_cast %96 : vector<1x64x64xbf16> to vector<64x64xbf16>
    %cst_72 = arith.constant dense<0.000000e+00> : vector<64x48xf32>
    %98 = tpu.matmul %97, %36, %cst_72 {dimension_numbers = #tpu.dot_dimension_numbers<[1], [0], [0], [1], [0, 0, 1, 1], [], []>} : vector<64x64xbf16>, vector<64x48xbf16>, vector<64x48xf32> -> vector<64x48xf32>
    %99 = arith.truncf %98 : vector<64x48xf32> to vector<64x48xbf16>
    %c7_73 = arith.constant 7 : index
    %c0_74 = arith.constant 0 : index
    %c0_75 = arith.constant 0 : index
    %100 = vector.load %arg7[%c7_73, %c0_74, %c0_75] : memref<9x48x32xbf16, #tpu.memory_space<vmem>>, vector<1x48x32xbf16>
    %101 = vector.shape_cast %100 : vector<1x48x32xbf16> to vector<48x32xbf16>
    %cst_76 = arith.constant dense<0.000000e+00> : vector<64x32xf32>
    %102 = tpu.matmul %99, %101, %cst_76 {dimension_numbers = #tpu.dot_dimension_numbers<[1], [0], [0], [1], [0, 0, 1, 1], [], []>} : vector<64x48xbf16>, vector<48x32xbf16>, vector<64x32xf32> -> vector<64x32xf32>
    %103 = arith.addf %95, %102 : vector<64x32xf32>
    %c8 = arith.constant 8 : index
    %c0_77 = arith.constant 0 : index
    %c0_78 = arith.constant 0 : index
    %104 = vector.load %arg3[%c8, %c0_77, %c0_78] : memref<9x64x64xbf16, #tpu.memory_space<vmem>>, vector<1x64x64xbf16>
    %105 = vector.shape_cast %104 : vector<1x64x64xbf16> to vector<64x64xbf16>
    %cst_79 = arith.constant dense<0.000000e+00> : vector<64x48xf32>
    %106 = tpu.matmul %105, %36, %cst_79 {dimension_numbers = #tpu.dot_dimension_numbers<[1], [0], [0], [1], [0, 0, 1, 1], [], []>} : vector<64x64xbf16>, vector<64x48xbf16>, vector<64x48xf32> -> vector<64x48xf32>
    %107 = arith.truncf %106 : vector<64x48xf32> to vector<64x48xbf16>
    %c8_80 = arith.constant 8 : index
    %c0_81 = arith.constant 0 : index
    %c0_82 = arith.constant 0 : index
    %108 = vector.load %arg7[%c8_80, %c0_81, %c0_82] : memref<9x48x32xbf16, #tpu.memory_space<vmem>>, vector<1x48x32xbf16>
    %109 = vector.shape_cast %108 : vector<1x48x32xbf16> to vector<48x32xbf16>
    %cst_83 = arith.constant dense<0.000000e+00> : vector<64x32xf32>
    %110 = tpu.matmul %107, %109, %cst_83 {dimension_numbers = #tpu.dot_dimension_numbers<[1], [0], [0], [1], [0, 0, 1, 1], [], []>} : vector<64x48xbf16>, vector<48x32xbf16>, vector<64x32xf32> -> vector<64x32xf32>
    %111 = arith.addf %103, %110 : vector<64x32xf32>
    %c0_84 = arith.constant 0 : index
    %c0_85 = arith.constant 0 : index
    %c0_86 = arith.constant 0 : index
    %112 = vector.load %arg2[%c0_84, %c0_85, %c0_86] : memref<1x1x64xf32, #tpu.memory_space<vmem>>, vector<1x1x64xf32>
    %113 = vector.shape_cast %112 : vector<1x1x64xf32> to vector<1x64xf32>
    %114 = arith.negf %113 : vector<1x64xf32>
    %115 = math.exp %114 : vector<1x64xf32>
    %cst_87 = arith.constant 1.000000e+00 : f32
    %116 = vector.broadcast %cst_87 : f32 to vector<1x64xf32>
    %117 = arith.addf %116, %115 : vector<1x64xf32>
    %118 = arith.divf %116, %117 : vector<1x64xf32>
    %119 = arith.mulf %113, %118 : vector<1x64xf32>
    %c0_88 = arith.constant 0 : index
    %c0_89 = arith.constant 0 : index
    %120 = vector.load %arg9[%c0_88, %c0_89] : memref<64x32xbf16, #tpu.memory_space<vmem>>, vector<64x32xbf16>
    %121 = arith.truncf %119 : vector<1x64xf32> to vector<1x64xbf16>
    %cst_90 = arith.constant dense<0.000000e+00> : vector<1x32xf32>
    %122 = tpu.matmul %121, %120, %cst_90 {dimension_numbers = #tpu.dot_dimension_numbers<[1], [0], [0], [1], [0, 0, 1, 1], [], []>} : vector<1x64xbf16>, vector<64x32xbf16>, vector<1x32xf32> -> vector<1x32xf32>
    %c0_91 = arith.constant 0 : index
    %c0_92 = arith.constant 0 : index
    %123 = vector.load %arg10[%c0_91, %c0_92] : memref<1x32xf32, #tpu.memory_space<vmem>>, vector<1x32xf32>
    %124 = arith.addf %122, %123 : vector<1x32xf32>
    %125 = vector.broadcast %124 : vector<1x32xf32> to vector<64x32xf32>
    %126 = arith.addf %111, %125 : vector<64x32xf32>
    %c0_93 = arith.constant 0 : index
    %c0_94 = arith.constant 0 : index
    %127 = vector.load %arg12[%c0_93, %c0_94] : memref<1x32xf32, #tpu.memory_space<vmem>>, vector<1x32xf32>
    %c0_95 = arith.constant 0 : index
    %c0_96 = arith.constant 0 : index
    %128 = vector.load %arg13[%c0_95, %c0_96] : memref<1x32xf32, #tpu.memory_space<vmem>>, vector<1x32xf32>
    %c0_97 = arith.constant 0 : index
    %c0_98 = arith.constant 0 : index
    %129 = vector.load %arg11[%c0_97, %c0_98] : memref<32x8xf32, #tpu.memory_space<vmem>>, vector<32x8xf32>
    %cst_99 = arith.constant dense<0.000000e+00> : vector<32xf32>
    %130 = vector.multi_reduction <add>, %126, %cst_99 [0] : vector<64x32xf32> to vector<32xf32>
    %131 = vector.shape_cast %130 : vector<32xf32> to vector<1x32xf32>
    %cst_100 = arith.constant dense<0.000000e+00> : vector<1x8xf32>
    %132 = tpu.matmul %131, %129, %cst_100 {dimension_numbers = #tpu.dot_dimension_numbers<[1], [0], [0], [1], [0, 0, 1, 1], [], []>} : vector<1x32xf32>, vector<32x8xf32>, vector<1x8xf32> -> vector<1x8xf32>
    %cst_101 = arith.constant 3.906250e-03 : f32
    %133 = vector.broadcast %cst_101 : f32 to vector<1x8xf32>
    %134 = arith.mulf %132, %133 : vector<1x8xf32>
    %cst_102 = arith.constant dense<0.000000e+00> : vector<1x32xf32>
    %135 = tpu.matmul %134, %129, %cst_102 {dimension_numbers = #tpu.dot_dimension_numbers<[1], [1], [0], [0], [0, 0, 1, 0], [], []>} : vector<1x8xf32>, vector<32x8xf32>, vector<1x32xf32> -> vector<1x32xf32>
    %136 = vector.broadcast %135 : vector<1x32xf32> to vector<64x32xf32>
    %137 = arith.subf %126, %136 : vector<64x32xf32>
    %138 = arith.mulf %137, %137 : vector<64x32xf32>
    %cst_103 = arith.constant dense<0.000000e+00> : vector<32xf32>
    %139 = vector.multi_reduction <add>, %138, %cst_103 [0] : vector<64x32xf32> to vector<32xf32>
    %140 = vector.shape_cast %139 : vector<32xf32> to vector<1x32xf32>
    %cst_104 = arith.constant dense<0.000000e+00> : vector<1x8xf32>
    %141 = tpu.matmul %140, %129, %cst_104 {dimension_numbers = #tpu.dot_dimension_numbers<[1], [0], [0], [1], [0, 0, 1, 1], [], []>} : vector<1x32xf32>, vector<32x8xf32>, vector<1x8xf32> -> vector<1x8xf32>
    %cst_105 = arith.constant 3.906250e-03 : f32
    %142 = vector.broadcast %cst_105 : f32 to vector<1x8xf32>
    %143 = arith.mulf %141, %142 : vector<1x8xf32>
    %cst_106 = arith.constant 9.99999997E-7 : f32
    %144 = vector.broadcast %cst_106 : f32 to vector<1x8xf32>
    %145 = arith.addf %143, %144 : vector<1x8xf32>
    %146 = math.rsqrt %145 : vector<1x8xf32>
    %cst_107 = arith.constant dense<0.000000e+00> : vector<1x32xf32>
    %147 = tpu.matmul %146, %129, %cst_107 {dimension_numbers = #tpu.dot_dimension_numbers<[1], [1], [0], [0], [0, 0, 1, 0], [], []>} : vector<1x8xf32>, vector<32x8xf32>, vector<1x32xf32> -> vector<1x32xf32>
    %148 = vector.broadcast %147 : vector<1x32xf32> to vector<64x32xf32>
    %149 = arith.mulf %137, %148 : vector<64x32xf32>
    %150 = vector.broadcast %127 : vector<1x32xf32> to vector<64x32xf32>
    %151 = arith.mulf %149, %150 : vector<64x32xf32>
    %152 = vector.broadcast %128 : vector<1x32xf32> to vector<64x32xf32>
    %153 = arith.addf %151, %152 : vector<64x32xf32>
    %154 = arith.negf %153 : vector<64x32xf32>
    %155 = math.exp %154 : vector<64x32xf32>
    %cst_108 = arith.constant 1.000000e+00 : f32
    %156 = vector.broadcast %cst_108 : f32 to vector<64x32xf32>
    %157 = arith.addf %156, %155 : vector<64x32xf32>
    %158 = arith.divf %156, %157 : vector<64x32xf32>
    %159 = arith.mulf %153, %158 : vector<64x32xf32>
    %c0_109 = arith.constant 0 : index
    %c0_110 = arith.constant 0 : index
    %160 = vector.load %arg15[%c0_109, %c0_110] : memref<1x32xf32, #tpu.memory_space<vmem>>, vector<1x32xf32>
    %161 = arith.truncf %159 : vector<64x32xf32> to vector<64x32xbf16>
    %cst_111 = arith.constant 0.000000e+00 : f32
    %162 = vector.broadcast %cst_111 : f32 to vector<64x32xf32>
    %163 = vector.broadcast %160 : vector<1x32xf32> to vector<64x32xf32>
    %164 = arith.addf %162, %163 : vector<64x32xf32>
    %c0_112 = arith.constant 0 : index
    %c0_113 = arith.constant 0 : index
    %c0_114 = arith.constant 0 : index
    %165 = vector.load %arg3[%c0_112, %c0_113, %c0_114] : memref<9x64x64xbf16, #tpu.memory_space<vmem>>, vector<1x64x64xbf16>
    %166 = vector.shape_cast %165 : vector<1x64x64xbf16> to vector<64x64xbf16>
    %cst_115 = arith.constant dense<0.000000e+00> : vector<64x32xf32>
    %167 = tpu.matmul %166, %161, %cst_115 {dimension_numbers = #tpu.dot_dimension_numbers<[1], [0], [0], [1], [0, 0, 1, 1], [], []>} : vector<64x64xbf16>, vector<64x32xbf16>, vector<64x32xf32> -> vector<64x32xf32>
    %168 = arith.truncf %167 : vector<64x32xf32> to vector<64x32xbf16>
    %c0_116 = arith.constant 0 : index
    %c0_117 = arith.constant 0 : index
    %c0_118 = arith.constant 0 : index
    %169 = vector.load %arg14[%c0_116, %c0_117, %c0_118] : memref<9x32x32xbf16, #tpu.memory_space<vmem>>, vector<1x32x32xbf16>
    %170 = vector.shape_cast %169 : vector<1x32x32xbf16> to vector<32x32xbf16>
    %cst_119 = arith.constant dense<0.000000e+00> : vector<64x32xf32>
    %171 = tpu.matmul %168, %170, %cst_119 {dimension_numbers = #tpu.dot_dimension_numbers<[1], [0], [0], [1], [0, 0, 1, 1], [], []>} : vector<64x32xbf16>, vector<32x32xbf16>, vector<64x32xf32> -> vector<64x32xf32>
    %172 = arith.addf %164, %171 : vector<64x32xf32>
    %c1_120 = arith.constant 1 : index
    %c0_121 = arith.constant 0 : index
    %c0_122 = arith.constant 0 : index
    %173 = vector.load %arg3[%c1_120, %c0_121, %c0_122] : memref<9x64x64xbf16, #tpu.memory_space<vmem>>, vector<1x64x64xbf16>
    %174 = vector.shape_cast %173 : vector<1x64x64xbf16> to vector<64x64xbf16>
    %cst_123 = arith.constant dense<0.000000e+00> : vector<64x32xf32>
    %175 = tpu.matmul %174, %161, %cst_123 {dimension_numbers = #tpu.dot_dimension_numbers<[1], [0], [0], [1], [0, 0, 1, 1], [], []>} : vector<64x64xbf16>, vector<64x32xbf16>, vector<64x32xf32> -> vector<64x32xf32>
    %176 = arith.truncf %175 : vector<64x32xf32> to vector<64x32xbf16>
    %c1_124 = arith.constant 1 : index
    %c0_125 = arith.constant 0 : index
    %c0_126 = arith.constant 0 : index
    %177 = vector.load %arg14[%c1_124, %c0_125, %c0_126] : memref<9x32x32xbf16, #tpu.memory_space<vmem>>, vector<1x32x32xbf16>
    %178 = vector.shape_cast %177 : vector<1x32x32xbf16> to vector<32x32xbf16>
    %cst_127 = arith.constant dense<0.000000e+00> : vector<64x32xf32>
    %179 = tpu.matmul %176, %178, %cst_127 {dimension_numbers = #tpu.dot_dimension_numbers<[1], [0], [0], [1], [0, 0, 1, 1], [], []>} : vector<64x32xbf16>, vector<32x32xbf16>, vector<64x32xf32> -> vector<64x32xf32>
    %180 = arith.addf %172, %179 : vector<64x32xf32>
    %c2_128 = arith.constant 2 : index
    %c0_129 = arith.constant 0 : index
    %c0_130 = arith.constant 0 : index
    %181 = vector.load %arg3[%c2_128, %c0_129, %c0_130] : memref<9x64x64xbf16, #tpu.memory_space<vmem>>, vector<1x64x64xbf16>
    %182 = vector.shape_cast %181 : vector<1x64x64xbf16> to vector<64x64xbf16>
    %cst_131 = arith.constant dense<0.000000e+00> : vector<64x32xf32>
    %183 = tpu.matmul %182, %161, %cst_131 {dimension_numbers = #tpu.dot_dimension_numbers<[1], [0], [0], [1], [0, 0, 1, 1], [], []>} : vector<64x64xbf16>, vector<64x32xbf16>, vector<64x32xf32> -> vector<64x32xf32>
    %184 = arith.truncf %183 : vector<64x32xf32> to vector<64x32xbf16>
    %c2_132 = arith.constant 2 : index
    %c0_133 = arith.constant 0 : index
    %c0_134 = arith.constant 0 : index
    %185 = vector.load %arg14[%c2_132, %c0_133, %c0_134] : memref<9x32x32xbf16, #tpu.memory_space<vmem>>, vector<1x32x32xbf16>
    %186 = vector.shape_cast %185 : vector<1x32x32xbf16> to vector<32x32xbf16>
    %cst_135 = arith.constant dense<0.000000e+00> : vector<64x32xf32>
    %187 = tpu.matmul %184, %186, %cst_135 {dimension_numbers = #tpu.dot_dimension_numbers<[1], [0], [0], [1], [0, 0, 1, 1], [], []>} : vector<64x32xbf16>, vector<32x32xbf16>, vector<64x32xf32> -> vector<64x32xf32>
    %188 = arith.addf %180, %187 : vector<64x32xf32>
    %c3_136 = arith.constant 3 : index
    %c0_137 = arith.constant 0 : index
    %c0_138 = arith.constant 0 : index
    %189 = vector.load %arg3[%c3_136, %c0_137, %c0_138] : memref<9x64x64xbf16, #tpu.memory_space<vmem>>, vector<1x64x64xbf16>
    %190 = vector.shape_cast %189 : vector<1x64x64xbf16> to vector<64x64xbf16>
    %cst_139 = arith.constant dense<0.000000e+00> : vector<64x32xf32>
    %191 = tpu.matmul %190, %161, %cst_139 {dimension_numbers = #tpu.dot_dimension_numbers<[1], [0], [0], [1], [0, 0, 1, 1], [], []>} : vector<64x64xbf16>, vector<64x32xbf16>, vector<64x32xf32> -> vector<64x32xf32>
    %192 = arith.truncf %191 : vector<64x32xf32> to vector<64x32xbf16>
    %c3_140 = arith.constant 3 : index
    %c0_141 = arith.constant 0 : index
    %c0_142 = arith.constant 0 : index
    %193 = vector.load %arg14[%c3_140, %c0_141, %c0_142] : memref<9x32x32xbf16, #tpu.memory_space<vmem>>, vector<1x32x32xbf16>
    %194 = vector.shape_cast %193 : vector<1x32x32xbf16> to vector<32x32xbf16>
    %cst_143 = arith.constant dense<0.000000e+00> : vector<64x32xf32>
    %195 = tpu.matmul %192, %194, %cst_143 {dimension_numbers = #tpu.dot_dimension_numbers<[1], [0], [0], [1], [0, 0, 1, 1], [], []>} : vector<64x32xbf16>, vector<32x32xbf16>, vector<64x32xf32> -> vector<64x32xf32>
    %196 = arith.addf %188, %195 : vector<64x32xf32>
    %c4_144 = arith.constant 4 : index
    %c0_145 = arith.constant 0 : index
    %c0_146 = arith.constant 0 : index
    %197 = vector.load %arg3[%c4_144, %c0_145, %c0_146] : memref<9x64x64xbf16, #tpu.memory_space<vmem>>, vector<1x64x64xbf16>
    %198 = vector.shape_cast %197 : vector<1x64x64xbf16> to vector<64x64xbf16>
    %cst_147 = arith.constant dense<0.000000e+00> : vector<64x32xf32>
    %199 = tpu.matmul %198, %161, %cst_147 {dimension_numbers = #tpu.dot_dimension_numbers<[1], [0], [0], [1], [0, 0, 1, 1], [], []>} : vector<64x64xbf16>, vector<64x32xbf16>, vector<64x32xf32> -> vector<64x32xf32>
    %200 = arith.truncf %199 : vector<64x32xf32> to vector<64x32xbf16>
    %c4_148 = arith.constant 4 : index
    %c0_149 = arith.constant 0 : index
    %c0_150 = arith.constant 0 : index
    %201 = vector.load %arg14[%c4_148, %c0_149, %c0_150] : memref<9x32x32xbf16, #tpu.memory_space<vmem>>, vector<1x32x32xbf16>
    %202 = vector.shape_cast %201 : vector<1x32x32xbf16> to vector<32x32xbf16>
    %cst_151 = arith.constant dense<0.000000e+00> : vector<64x32xf32>
    %203 = tpu.matmul %200, %202, %cst_151 {dimension_numbers = #tpu.dot_dimension_numbers<[1], [0], [0], [1], [0, 0, 1, 1], [], []>} : vector<64x32xbf16>, vector<32x32xbf16>, vector<64x32xf32> -> vector<64x32xf32>
    %204 = arith.addf %196, %203 : vector<64x32xf32>
    %c5_152 = arith.constant 5 : index
    %c0_153 = arith.constant 0 : index
    %c0_154 = arith.constant 0 : index
    %205 = vector.load %arg3[%c5_152, %c0_153, %c0_154] : memref<9x64x64xbf16, #tpu.memory_space<vmem>>, vector<1x64x64xbf16>
    %206 = vector.shape_cast %205 : vector<1x64x64xbf16> to vector<64x64xbf16>
    %cst_155 = arith.constant dense<0.000000e+00> : vector<64x32xf32>
    %207 = tpu.matmul %206, %161, %cst_155 {dimension_numbers = #tpu.dot_dimension_numbers<[1], [0], [0], [1], [0, 0, 1, 1], [], []>} : vector<64x64xbf16>, vector<64x32xbf16>, vector<64x32xf32> -> vector<64x32xf32>
    %208 = arith.truncf %207 : vector<64x32xf32> to vector<64x32xbf16>
    %c5_156 = arith.constant 5 : index
    %c0_157 = arith.constant 0 : index
    %c0_158 = arith.constant 0 : index
    %209 = vector.load %arg14[%c5_156, %c0_157, %c0_158] : memref<9x32x32xbf16, #tpu.memory_space<vmem>>, vector<1x32x32xbf16>
    %210 = vector.shape_cast %209 : vector<1x32x32xbf16> to vector<32x32xbf16>
    %cst_159 = arith.constant dense<0.000000e+00> : vector<64x32xf32>
    %211 = tpu.matmul %208, %210, %cst_159 {dimension_numbers = #tpu.dot_dimension_numbers<[1], [0], [0], [1], [0, 0, 1, 1], [], []>} : vector<64x32xbf16>, vector<32x32xbf16>, vector<64x32xf32> -> vector<64x32xf32>
    %212 = arith.addf %204, %211 : vector<64x32xf32>
    %c6_160 = arith.constant 6 : index
    %c0_161 = arith.constant 0 : index
    %c0_162 = arith.constant 0 : index
    %213 = vector.load %arg3[%c6_160, %c0_161, %c0_162] : memref<9x64x64xbf16, #tpu.memory_space<vmem>>, vector<1x64x64xbf16>
    %214 = vector.shape_cast %213 : vector<1x64x64xbf16> to vector<64x64xbf16>
    %cst_163 = arith.constant dense<0.000000e+00> : vector<64x32xf32>
    %215 = tpu.matmul %214, %161, %cst_163 {dimension_numbers = #tpu.dot_dimension_numbers<[1], [0], [0], [1], [0, 0, 1, 1], [], []>} : vector<64x64xbf16>, vector<64x32xbf16>, vector<64x32xf32> -> vector<64x32xf32>
    %216 = arith.truncf %215 : vector<64x32xf32> to vector<64x32xbf16>
    %c6_164 = arith.constant 6 : index
    %c0_165 = arith.constant 0 : index
    %c0_166 = arith.constant 0 : index
    %217 = vector.load %arg14[%c6_164, %c0_165, %c0_166] : memref<9x32x32xbf16, #tpu.memory_space<vmem>>, vector<1x32x32xbf16>
    %218 = vector.shape_cast %217 : vector<1x32x32xbf16> to vector<32x32xbf16>
    %cst_167 = arith.constant dense<0.000000e+00> : vector<64x32xf32>
    %219 = tpu.matmul %216, %218, %cst_167 {dimension_numbers = #tpu.dot_dimension_numbers<[1], [0], [0], [1], [0, 0, 1, 1], [], []>} : vector<64x32xbf16>, vector<32x32xbf16>, vector<64x32xf32> -> vector<64x32xf32>
    %220 = arith.addf %212, %219 : vector<64x32xf32>
    %c7_168 = arith.constant 7 : index
    %c0_169 = arith.constant 0 : index
    %c0_170 = arith.constant 0 : index
    %221 = vector.load %arg3[%c7_168, %c0_169, %c0_170] : memref<9x64x64xbf16, #tpu.memory_space<vmem>>, vector<1x64x64xbf16>
    %222 = vector.shape_cast %221 : vector<1x64x64xbf16> to vector<64x64xbf16>
    %cst_171 = arith.constant dense<0.000000e+00> : vector<64x32xf32>
    %223 = tpu.matmul %222, %161, %cst_171 {dimension_numbers = #tpu.dot_dimension_numbers<[1], [0], [0], [1], [0, 0, 1, 1], [], []>} : vector<64x64xbf16>, vector<64x32xbf16>, vector<64x32xf32> -> vector<64x32xf32>
    %224 = arith.truncf %223 : vector<64x32xf32> to vector<64x32xbf16>
    %c7_172 = arith.constant 7 : index
    %c0_173 = arith.constant 0 : index
    %c0_174 = arith.constant 0 : index
    %225 = vector.load %arg14[%c7_172, %c0_173, %c0_174] : memref<9x32x32xbf16, #tpu.memory_space<vmem>>, vector<1x32x32xbf16>
    %226 = vector.shape_cast %225 : vector<1x32x32xbf16> to vector<32x32xbf16>
    %cst_175 = arith.constant dense<0.000000e+00> : vector<64x32xf32>
    %227 = tpu.matmul %224, %226, %cst_175 {dimension_numbers = #tpu.dot_dimension_numbers<[1], [0], [0], [1], [0, 0, 1, 1], [], []>} : vector<64x32xbf16>, vector<32x32xbf16>, vector<64x32xf32> -> vector<64x32xf32>
    %228 = arith.addf %220, %227 : vector<64x32xf32>
    %c8_176 = arith.constant 8 : index
    %c0_177 = arith.constant 0 : index
    %c0_178 = arith.constant 0 : index
    %229 = vector.load %arg3[%c8_176, %c0_177, %c0_178] : memref<9x64x64xbf16, #tpu.memory_space<vmem>>, vector<1x64x64xbf16>
    %230 = vector.shape_cast %229 : vector<1x64x64xbf16> to vector<64x64xbf16>
    %cst_179 = arith.constant dense<0.000000e+00> : vector<64x32xf32>
    %231 = tpu.matmul %230, %161, %cst_179 {dimension_numbers = #tpu.dot_dimension_numbers<[1], [0], [0], [1], [0, 0, 1, 1], [], []>} : vector<64x64xbf16>, vector<64x32xbf16>, vector<64x32xf32> -> vector<64x32xf32>
    %232 = arith.truncf %231 : vector<64x32xf32> to vector<64x32xbf16>
    %c8_180 = arith.constant 8 : index
    %c0_181 = arith.constant 0 : index
    %c0_182 = arith.constant 0 : index
    %233 = vector.load %arg14[%c8_180, %c0_181, %c0_182] : memref<9x32x32xbf16, #tpu.memory_space<vmem>>, vector<1x32x32xbf16>
    %234 = vector.shape_cast %233 : vector<1x32x32xbf16> to vector<32x32xbf16>
    %cst_183 = arith.constant dense<0.000000e+00> : vector<64x32xf32>
    %235 = tpu.matmul %232, %234, %cst_183 {dimension_numbers = #tpu.dot_dimension_numbers<[1], [0], [0], [1], [0, 0, 1, 1], [], []>} : vector<64x32xbf16>, vector<32x32xbf16>, vector<64x32xf32> -> vector<64x32xf32>
    %236 = arith.addf %228, %235 : vector<64x32xf32>
    %c0_184 = arith.constant 0 : index
    %c0_185 = arith.constant 0 : index
    %237 = vector.load %arg16[%c0_184, %c0_185] : memref<48x32xbf16, #tpu.memory_space<vmem>>, vector<48x32xbf16>
    %238 = arith.truncf %1 : vector<64x48xf32> to vector<64x48xbf16>
    %cst_186 = arith.constant dense<0.000000e+00> : vector<64x32xf32>
    %239 = tpu.matmul %238, %237, %cst_186 {dimension_numbers = #tpu.dot_dimension_numbers<[1], [0], [0], [1], [0, 0, 1, 1], [], []>} : vector<64x48xbf16>, vector<48x32xbf16>, vector<64x32xf32> -> vector<64x32xf32>
    %c0_187 = arith.constant 0 : index
    %c0_188 = arith.constant 0 : index
    %240 = vector.load %arg17[%c0_187, %c0_188] : memref<1x32xf32, #tpu.memory_space<vmem>>, vector<1x32xf32>
    %241 = vector.broadcast %240 : vector<1x32xf32> to vector<64x32xf32>
    %242 = arith.addf %239, %241 : vector<64x32xf32>
    %243 = arith.addf %242, %236 : vector<64x32xf32>
    %cst_189 = arith.constant 1.000000e+00 : f32
    %244 = vector.broadcast %cst_189 : f32 to vector<64x32xf32>
    %245 = arith.mulf %243, %244 : vector<64x32xf32>
    %c0_190 = arith.constant 0 : index
    %c0_191 = arith.constant 0 : index
    %c0_192 = arith.constant 0 : index
    %246 = vector.load %arg18[%c0_190, %c0_191, %c0_192] : memref<1x64x32xf32, #tpu.memory_space<vmem>>, vector<1x64x32xf32>
    %247 = vector.shape_cast %246 : vector<1x64x32xf32> to vector<64x32xf32>
    %248 = vector.shape_cast %245 : vector<64x32xf32> to vector<1x64x32xf32>
    tpu.vector_store %arg18[%c0_190, %c0_191, %c0_192], %248 {strides = array<i32>} : memref<1x64x32xf32, #tpu.memory_space<vmem>>, vector<1x64x32xf32>,
    return
  }
  func.func @transform_0(%arg0: i32) -> (i32, i32, i32) {
    %c0_i32 = arith.constant 0 : i32
    %c0_i32_0 = arith.constant 0 : i32
    %c0_i32_1 = arith.constant 0 : i32
    return %arg0, %c0_i32, %c0_i32_0 : i32, i32, i32
  }
  func.func @transform_1(%arg0: i32) -> (i32, i32, i32) {
    %c0_i32 = arith.constant 0 : i32
    %c0_i32_0 = arith.constant 0 : i32
    %c0_i32_1 = arith.constant 0 : i32
    return %arg0, %c0_i32, %c0_i32_0 : i32, i32, i32
  }
  func.func @transform_2(%arg0: i32) -> (i32, i32, i32) {
    %c0_i32 = arith.constant 0 : i32
    %c0_i32_0 = arith.constant 0 : i32
    %c0_i32_1 = arith.constant 0 : i32
    %c0_i32_2 = arith.constant 0 : i32
    return %c0_i32, %c0_i32_0, %c0_i32_1 : i32, i32, i32
  }
  func.func @transform_3(%arg0: i32) -> (i32, i32) {
    %c0_i32 = arith.constant 0 : i32
    %c0_i32_0 = arith.constant 0 : i32
    %c0_i32_1 = arith.constant 0 : i32
    return %c0_i32, %c0_i32_0 : i32, i32
  }
  func.func @transform_4(%arg0: i32) -> (i32, i32) {
    %c0_i32 = arith.constant 0 : i32
    %c0_i32_0 = arith.constant 0 : i32
    %c0_i32_1 = arith.constant 0 : i32
    return %c0_i32, %c0_i32_0 : i32, i32
  }
  func.func @transform_5(%arg0: i32) -> (i32, i32) {
    %c0_i32 = arith.constant 0 : i32
    %c0_i32_0 = arith.constant 0 : i32
    %c0_i32_1 = arith.constant 0 : i32
    return %c0_i32, %c0_i32_0 : i32, i32
  }
  func.func @transform_6(%arg0: i32) -> (i32, i32, i32) {
    %c0_i32 = arith.constant 0 : i32
    %c0_i32_0 = arith.constant 0 : i32
    %c0_i32_1 = arith.constant 0 : i32
    %c0_i32_2 = arith.constant 0 : i32
    return %c0_i32, %c0_i32_0, %c0_i32_1 : i32, i32, i32
  }
  func.func @transform_7(%arg0: i32) -> (i32, i32) {
    %c0_i32 = arith.constant 0 : i32
    %c0_i32_0 = arith.constant 0 : i32
    %c0_i32_1 = arith.constant 0 : i32
    return %c0_i32, %c0_i32_0 : i32, i32
  }
  func.func @transform_8(%arg0: i32) -> (i32, i32) {
    %c0_i32 = arith.constant 0 : i32
    %c0_i32_0 = arith.constant 0 : i32
    %c0_i32_1 = arith.constant 0 : i32
    return %c0_i32, %c0_i32_0 : i32, i32
  }
  func.func @transform_9(%arg0: i32) -> (i32, i32) {
    %c0_i32 = arith.constant 0 : i32
    %c0_i32_0 = arith.constant 0 : i32
    %c0_i32_1 = arith.constant 0 : i32
    return %c0_i32, %c0_i32_0 : i32, i32
  }
  func.func @transform_10(%arg0: i32) -> (i32, i32) {
    %c0_i32 = arith.constant 0 : i32
    %c0_i32_0 = arith.constant 0 : i32
    %c0_i32_1 = arith.constant 0 : i32
    return %c0_i32, %c0_i32_0 : i32, i32
  }
  func.func @transform_11(%arg0: i32) -> (i32, i32) {
    %c0_i32 = arith.constant 0 : i32
    %c0_i32_0 = arith.constant 0 : i32
    %c0_i32_1 = arith.constant 0 : i32
    return %c0_i32, %c0_i32_0 : i32, i32
  }
  func.func @transform_12(%arg0: i32) -> (i32, i32) {
    %c0_i32 = arith.constant 0 : i32
    %c0_i32_0 = arith.constant 0 : i32
    %c0_i32_1 = arith.constant 0 : i32
    return %c0_i32, %c0_i32_0 : i32, i32
  }
  func.func @transform_13(%arg0: i32) -> (i32, i32, i32) {
    %c0_i32 = arith.constant 0 : i32
    %c0_i32_0 = arith.constant 0 : i32
    %c0_i32_1 = arith.constant 0 : i32
    %c0_i32_2 = arith.constant 0 : i32
    return %c0_i32, %c0_i32_0, %c0_i32_1 : i32, i32, i32
  }
  func.func @transform_14(%arg0: i32) -> (i32, i32) {
    %c0_i32 = arith.constant 0 : i32
    %c0_i32_0 = arith.constant 0 : i32
    %c0_i32_1 = arith.constant 0 : i32
    return %c0_i32, %c0_i32_0 : i32, i32
  }
  func.func @transform_15(%arg0: i32) -> (i32, i32) {
    %c0_i32 = arith.constant 0 : i32
    %c0_i32_0 = arith.constant 0 : i32
    %c0_i32_1 = arith.constant 0 : i32
    return %c0_i32, %c0_i32_0 : i32, i32
  }
  func.func @transform_16(%arg0: i32) -> (i32, i32) {
    %c0_i32 = arith.constant 0 : i32
    %c0_i32_0 = arith.constant 0 : i32
    %c0_i32_1 = arith.constant 0 : i32
    return %c0_i32, %c0_i32_0 : i32, i32
  }
  func.func @transform_17(%arg0: i32) -> (i32, i32, i32) {
    %c0_i32 = arith.constant 0 : i32
    %c0_i32_0 = arith.constant 0 : i32
    %c0_i32_1 = arith.constant 0 : i32
    return %arg0, %c0_i32, %c0_i32_0 : i32, i32, i32
  }
}

module attributes {stable_mosaic.version = 11 : i64} {
  func.func @_upsample_kernel(%arg0: i32, %arg1: memref<1x64x32xf32, #tpu.memory_space<vmem>>, %arg2: memref<9x256x64xbf16, #tpu.memory_space<vmem>>, %arg3: memref<9x32x32xbf16, #tpu.memory_space<vmem>>, %arg4: memref<1x32xf32, #tpu.memory_space<vmem>>, %arg5: memref<1x256x32xf32, #tpu.memory_space<vmem>>) attributes {dimension_semantics = [#tpu.dimension_semantics<parallel>], iteration_bounds = array<i64: 2>, scalar_prefetch = 0 : i64, scratch_operands = 0 : i64, tpu.core_type = #tpu.core_type<tc>, window_params = [{transform_indices = @transform_0, window_bounds = array<i64: 1, 64, 32>}, {pipeline_mode = #tpu.pipeline_mode<synchronous>, transform_indices = @transform_1, window_bounds = array<i64: 9, 256, 64>}, {pipeline_mode = #tpu.pipeline_mode<synchronous>, transform_indices = @transform_2, window_bounds = array<i64: 9, 32, 32>}, {pipeline_mode = #tpu.pipeline_mode<synchronous>, transform_indices = @transform_3, window_bounds = array<i64: 1, 32>}, {transform_indices = @transform_4, window_bounds = array<i64: 1, 256, 32>}]} {
    %c0 = arith.constant 0 : index
    %c0_0 = arith.constant 0 : index
    %c0_1 = arith.constant 0 : index
    %0 = vector.load %arg1[%c0, %c0_0, %c0_1] : memref<1x64x32xf32, #tpu.memory_space<vmem>>, vector<1x64x32xf32>
    %1 = vector.shape_cast %0 : vector<1x64x32xf32> to vector<64x32xf32>
    %c0_2 = arith.constant 0 : index
    %c0_3 = arith.constant 0 : index
    %2 = vector.load %arg4[%c0_2, %c0_3] : memref<1x32xf32, #tpu.memory_space<vmem>>, vector<1x32xf32>
    %3 = arith.truncf %1 : vector<64x32xf32> to vector<64x32xbf16>
    %cst = arith.constant 0.000000e+00 : f32
    %4 = vector.broadcast %cst : f32 to vector<256x32xf32>
    %5 = vector.broadcast %2 : vector<1x32xf32> to vector<256x32xf32>
    %6 = arith.addf %4, %5 : vector<256x32xf32>
    %c0_4 = arith.constant 0 : index
    %c0_5 = arith.constant 0 : index
    %c0_6 = arith.constant 0 : index
    %7 = vector.load %arg2[%c0_4, %c0_5, %c0_6] : memref<9x256x64xbf16, #tpu.memory_space<vmem>>, vector<1x256x64xbf16>
    %8 = vector.shape_cast %7 : vector<1x256x64xbf16> to vector<256x64xbf16>
    %cst_7 = arith.constant dense<0.000000e+00> : vector<256x32xf32>
    %9 = tpu.matmul %8, %3, %cst_7 {dimension_numbers = #tpu.dot_dimension_numbers<[1], [0], [0], [1], [0, 0, 1, 1], [], []>} : vector<256x64xbf16>, vector<64x32xbf16>, vector<256x32xf32> -> vector<256x32xf32>
    %10 = arith.truncf %9 : vector<256x32xf32> to vector<256x32xbf16>
    %c0_8 = arith.constant 0 : index
    %c0_9 = arith.constant 0 : index
    %c0_10 = arith.constant 0 : index
    %11 = vector.load %arg3[%c0_8, %c0_9, %c0_10] : memref<9x32x32xbf16, #tpu.memory_space<vmem>>, vector<1x32x32xbf16>
    %12 = vector.shape_cast %11 : vector<1x32x32xbf16> to vector<32x32xbf16>
    %cst_11 = arith.constant dense<0.000000e+00> : vector<256x32xf32>
    %13 = tpu.matmul %10, %12, %cst_11 {dimension_numbers = #tpu.dot_dimension_numbers<[1], [0], [0], [1], [0, 0, 1, 1], [], []>} : vector<256x32xbf16>, vector<32x32xbf16>, vector<256x32xf32> -> vector<256x32xf32>
    %14 = arith.addf %6, %13 : vector<256x32xf32>
    %c1 = arith.constant 1 : index
    %c0_12 = arith.constant 0 : index
    %c0_13 = arith.constant 0 : index
    %15 = vector.load %arg2[%c1, %c0_12, %c0_13] : memref<9x256x64xbf16, #tpu.memory_space<vmem>>, vector<1x256x64xbf16>
    %16 = vector.shape_cast %15 : vector<1x256x64xbf16> to vector<256x64xbf16>
    %cst_14 = arith.constant dense<0.000000e+00> : vector<256x32xf32>
    %17 = tpu.matmul %16, %3, %cst_14 {dimension_numbers = #tpu.dot_dimension_numbers<[1], [0], [0], [1], [0, 0, 1, 1], [], []>} : vector<256x64xbf16>, vector<64x32xbf16>, vector<256x32xf32> -> vector<256x32xf32>
    %18 = arith.truncf %17 : vector<256x32xf32> to vector<256x32xbf16>
    %c1_15 = arith.constant 1 : index
    %c0_16 = arith.constant 0 : index
    %c0_17 = arith.constant 0 : index
    %19 = vector.load %arg3[%c1_15, %c0_16, %c0_17] : memref<9x32x32xbf16, #tpu.memory_space<vmem>>, vector<1x32x32xbf16>
    %20 = vector.shape_cast %19 : vector<1x32x32xbf16> to vector<32x32xbf16>
    %cst_18 = arith.constant dense<0.000000e+00> : vector<256x32xf32>
    %21 = tpu.matmul %18, %20, %cst_18 {dimension_numbers = #tpu.dot_dimension_numbers<[1], [0], [0], [1], [0, 0, 1, 1], [], []>} : vector<256x32xbf16>, vector<32x32xbf16>, vector<256x32xf32> -> vector<256x32xf32>
    %22 = arith.addf %14, %21 : vector<256x32xf32>
    %c2 = arith.constant 2 : index
    %c0_19 = arith.constant 0 : index
    %c0_20 = arith.constant 0 : index
    %23 = vector.load %arg2[%c2, %c0_19, %c0_20] : memref<9x256x64xbf16, #tpu.memory_space<vmem>>, vector<1x256x64xbf16>
    %24 = vector.shape_cast %23 : vector<1x256x64xbf16> to vector<256x64xbf16>
    %cst_21 = arith.constant dense<0.000000e+00> : vector<256x32xf32>
    %25 = tpu.matmul %24, %3, %cst_21 {dimension_numbers = #tpu.dot_dimension_numbers<[1], [0], [0], [1], [0, 0, 1, 1], [], []>} : vector<256x64xbf16>, vector<64x32xbf16>, vector<256x32xf32> -> vector<256x32xf32>
    %26 = arith.truncf %25 : vector<256x32xf32> to vector<256x32xbf16>
    %c2_22 = arith.constant 2 : index
    %c0_23 = arith.constant 0 : index
    %c0_24 = arith.constant 0 : index
    %27 = vector.load %arg3[%c2_22, %c0_23, %c0_24] : memref<9x32x32xbf16, #tpu.memory_space<vmem>>, vector<1x32x32xbf16>
    %28 = vector.shape_cast %27 : vector<1x32x32xbf16> to vector<32x32xbf16>
    %cst_25 = arith.constant dense<0.000000e+00> : vector<256x32xf32>
    %29 = tpu.matmul %26, %28, %cst_25 {dimension_numbers = #tpu.dot_dimension_numbers<[1], [0], [0], [1], [0, 0, 1, 1], [], []>} : vector<256x32xbf16>, vector<32x32xbf16>, vector<256x32xf32> -> vector<256x32xf32>
    %30 = arith.addf %22, %29 : vector<256x32xf32>
    %c3 = arith.constant 3 : index
    %c0_26 = arith.constant 0 : index
    %c0_27 = arith.constant 0 : index
    %31 = vector.load %arg2[%c3, %c0_26, %c0_27] : memref<9x256x64xbf16, #tpu.memory_space<vmem>>, vector<1x256x64xbf16>
    %32 = vector.shape_cast %31 : vector<1x256x64xbf16> to vector<256x64xbf16>
    %cst_28 = arith.constant dense<0.000000e+00> : vector<256x32xf32>
    %33 = tpu.matmul %32, %3, %cst_28 {dimension_numbers = #tpu.dot_dimension_numbers<[1], [0], [0], [1], [0, 0, 1, 1], [], []>} : vector<256x64xbf16>, vector<64x32xbf16>, vector<256x32xf32> -> vector<256x32xf32>
    %34 = arith.truncf %33 : vector<256x32xf32> to vector<256x32xbf16>
    %c3_29 = arith.constant 3 : index
    %c0_30 = arith.constant 0 : index
    %c0_31 = arith.constant 0 : index
    %35 = vector.load %arg3[%c3_29, %c0_30, %c0_31] : memref<9x32x32xbf16, #tpu.memory_space<vmem>>, vector<1x32x32xbf16>
    %36 = vector.shape_cast %35 : vector<1x32x32xbf16> to vector<32x32xbf16>
    %cst_32 = arith.constant dense<0.000000e+00> : vector<256x32xf32>
    %37 = tpu.matmul %34, %36, %cst_32 {dimension_numbers = #tpu.dot_dimension_numbers<[1], [0], [0], [1], [0, 0, 1, 1], [], []>} : vector<256x32xbf16>, vector<32x32xbf16>, vector<256x32xf32> -> vector<256x32xf32>
    %38 = arith.addf %30, %37 : vector<256x32xf32>
    %c4 = arith.constant 4 : index
    %c0_33 = arith.constant 0 : index
    %c0_34 = arith.constant 0 : index
    %39 = vector.load %arg2[%c4, %c0_33, %c0_34] : memref<9x256x64xbf16, #tpu.memory_space<vmem>>, vector<1x256x64xbf16>
    %40 = vector.shape_cast %39 : vector<1x256x64xbf16> to vector<256x64xbf16>
    %cst_35 = arith.constant dense<0.000000e+00> : vector<256x32xf32>
    %41 = tpu.matmul %40, %3, %cst_35 {dimension_numbers = #tpu.dot_dimension_numbers<[1], [0], [0], [1], [0, 0, 1, 1], [], []>} : vector<256x64xbf16>, vector<64x32xbf16>, vector<256x32xf32> -> vector<256x32xf32>
    %42 = arith.truncf %41 : vector<256x32xf32> to vector<256x32xbf16>
    %c4_36 = arith.constant 4 : index
    %c0_37 = arith.constant 0 : index
    %c0_38 = arith.constant 0 : index
    %43 = vector.load %arg3[%c4_36, %c0_37, %c0_38] : memref<9x32x32xbf16, #tpu.memory_space<vmem>>, vector<1x32x32xbf16>
    %44 = vector.shape_cast %43 : vector<1x32x32xbf16> to vector<32x32xbf16>
    %cst_39 = arith.constant dense<0.000000e+00> : vector<256x32xf32>
    %45 = tpu.matmul %42, %44, %cst_39 {dimension_numbers = #tpu.dot_dimension_numbers<[1], [0], [0], [1], [0, 0, 1, 1], [], []>} : vector<256x32xbf16>, vector<32x32xbf16>, vector<256x32xf32> -> vector<256x32xf32>
    %46 = arith.addf %38, %45 : vector<256x32xf32>
    %c5 = arith.constant 5 : index
    %c0_40 = arith.constant 0 : index
    %c0_41 = arith.constant 0 : index
    %47 = vector.load %arg2[%c5, %c0_40, %c0_41] : memref<9x256x64xbf16, #tpu.memory_space<vmem>>, vector<1x256x64xbf16>
    %48 = vector.shape_cast %47 : vector<1x256x64xbf16> to vector<256x64xbf16>
    %cst_42 = arith.constant dense<0.000000e+00> : vector<256x32xf32>
    %49 = tpu.matmul %48, %3, %cst_42 {dimension_numbers = #tpu.dot_dimension_numbers<[1], [0], [0], [1], [0, 0, 1, 1], [], []>} : vector<256x64xbf16>, vector<64x32xbf16>, vector<256x32xf32> -> vector<256x32xf32>
    %50 = arith.truncf %49 : vector<256x32xf32> to vector<256x32xbf16>
    %c5_43 = arith.constant 5 : index
    %c0_44 = arith.constant 0 : index
    %c0_45 = arith.constant 0 : index
    %51 = vector.load %arg3[%c5_43, %c0_44, %c0_45] : memref<9x32x32xbf16, #tpu.memory_space<vmem>>, vector<1x32x32xbf16>
    %52 = vector.shape_cast %51 : vector<1x32x32xbf16> to vector<32x32xbf16>
    %cst_46 = arith.constant dense<0.000000e+00> : vector<256x32xf32>
    %53 = tpu.matmul %50, %52, %cst_46 {dimension_numbers = #tpu.dot_dimension_numbers<[1], [0], [0], [1], [0, 0, 1, 1], [], []>} : vector<256x32xbf16>, vector<32x32xbf16>, vector<256x32xf32> -> vector<256x32xf32>
    %54 = arith.addf %46, %53 : vector<256x32xf32>
    %c6 = arith.constant 6 : index
    %c0_47 = arith.constant 0 : index
    %c0_48 = arith.constant 0 : index
    %55 = vector.load %arg2[%c6, %c0_47, %c0_48] : memref<9x256x64xbf16, #tpu.memory_space<vmem>>, vector<1x256x64xbf16>
    %56 = vector.shape_cast %55 : vector<1x256x64xbf16> to vector<256x64xbf16>
    %cst_49 = arith.constant dense<0.000000e+00> : vector<256x32xf32>
    %57 = tpu.matmul %56, %3, %cst_49 {dimension_numbers = #tpu.dot_dimension_numbers<[1], [0], [0], [1], [0, 0, 1, 1], [], []>} : vector<256x64xbf16>, vector<64x32xbf16>, vector<256x32xf32> -> vector<256x32xf32>
    %58 = arith.truncf %57 : vector<256x32xf32> to vector<256x32xbf16>
    %c6_50 = arith.constant 6 : index
    %c0_51 = arith.constant 0 : index
    %c0_52 = arith.constant 0 : index
    %59 = vector.load %arg3[%c6_50, %c0_51, %c0_52] : memref<9x32x32xbf16, #tpu.memory_space<vmem>>, vector<1x32x32xbf16>
    %60 = vector.shape_cast %59 : vector<1x32x32xbf16> to vector<32x32xbf16>
    %cst_53 = arith.constant dense<0.000000e+00> : vector<256x32xf32>
    %61 = tpu.matmul %58, %60, %cst_53 {dimension_numbers = #tpu.dot_dimension_numbers<[1], [0], [0], [1], [0, 0, 1, 1], [], []>} : vector<256x32xbf16>, vector<32x32xbf16>, vector<256x32xf32> -> vector<256x32xf32>
    %62 = arith.addf %54, %61 : vector<256x32xf32>
    %c7 = arith.constant 7 : index
    %c0_54 = arith.constant 0 : index
    %c0_55 = arith.constant 0 : index
    %63 = vector.load %arg2[%c7, %c0_54, %c0_55] : memref<9x256x64xbf16, #tpu.memory_space<vmem>>, vector<1x256x64xbf16>
    %64 = vector.shape_cast %63 : vector<1x256x64xbf16> to vector<256x64xbf16>
    %cst_56 = arith.constant dense<0.000000e+00> : vector<256x32xf32>
    %65 = tpu.matmul %64, %3, %cst_56 {dimension_numbers = #tpu.dot_dimension_numbers<[1], [0], [0], [1], [0, 0, 1, 1], [], []>} : vector<256x64xbf16>, vector<64x32xbf16>, vector<256x32xf32> -> vector<256x32xf32>
    %66 = arith.truncf %65 : vector<256x32xf32> to vector<256x32xbf16>
    %c7_57 = arith.constant 7 : index
    %c0_58 = arith.constant 0 : index
    %c0_59 = arith.constant 0 : index
    %67 = vector.load %arg3[%c7_57, %c0_58, %c0_59] : memref<9x32x32xbf16, #tpu.memory_space<vmem>>, vector<1x32x32xbf16>
    %68 = vector.shape_cast %67 : vector<1x32x32xbf16> to vector<32x32xbf16>
    %cst_60 = arith.constant dense<0.000000e+00> : vector<256x32xf32>
    %69 = tpu.matmul %66, %68, %cst_60 {dimension_numbers = #tpu.dot_dimension_numbers<[1], [0], [0], [1], [0, 0, 1, 1], [], []>} : vector<256x32xbf16>, vector<32x32xbf16>, vector<256x32xf32> -> vector<256x32xf32>
    %70 = arith.addf %62, %69 : vector<256x32xf32>
    %c8 = arith.constant 8 : index
    %c0_61 = arith.constant 0 : index
    %c0_62 = arith.constant 0 : index
    %71 = vector.load %arg2[%c8, %c0_61, %c0_62] : memref<9x256x64xbf16, #tpu.memory_space<vmem>>, vector<1x256x64xbf16>
    %72 = vector.shape_cast %71 : vector<1x256x64xbf16> to vector<256x64xbf16>
    %cst_63 = arith.constant dense<0.000000e+00> : vector<256x32xf32>
    %73 = tpu.matmul %72, %3, %cst_63 {dimension_numbers = #tpu.dot_dimension_numbers<[1], [0], [0], [1], [0, 0, 1, 1], [], []>} : vector<256x64xbf16>, vector<64x32xbf16>, vector<256x32xf32> -> vector<256x32xf32>
    %74 = arith.truncf %73 : vector<256x32xf32> to vector<256x32xbf16>
    %c8_64 = arith.constant 8 : index
    %c0_65 = arith.constant 0 : index
    %c0_66 = arith.constant 0 : index
    %75 = vector.load %arg3[%c8_64, %c0_65, %c0_66] : memref<9x32x32xbf16, #tpu.memory_space<vmem>>, vector<1x32x32xbf16>
    %76 = vector.shape_cast %75 : vector<1x32x32xbf16> to vector<32x32xbf16>
    %cst_67 = arith.constant dense<0.000000e+00> : vector<256x32xf32>
    %77 = tpu.matmul %74, %76, %cst_67 {dimension_numbers = #tpu.dot_dimension_numbers<[1], [0], [0], [1], [0, 0, 1, 1], [], []>} : vector<256x32xbf16>, vector<32x32xbf16>, vector<256x32xf32> -> vector<256x32xf32>
    %78 = arith.addf %70, %77 : vector<256x32xf32>
    %c0_68 = arith.constant 0 : index
    %c0_69 = arith.constant 0 : index
    %c0_70 = arith.constant 0 : index
    %79 = vector.load %arg5[%c0_68, %c0_69, %c0_70] : memref<1x256x32xf32, #tpu.memory_space<vmem>>, vector<1x256x32xf32>
    %80 = vector.shape_cast %79 : vector<1x256x32xf32> to vector<256x32xf32>
    %81 = vector.shape_cast %78 : vector<256x32xf32> to vector<1x256x32xf32>
    tpu.vector_store %arg5[%c0_68, %c0_69, %c0_70], %81 {strides = array<i32>} : memref<1x256x32xf32, #tpu.memory_space<vmem>>, vector<1x256x32xf32>,
    return
  }
  func.func @transform_0(%arg0: i32) -> (i32, i32, i32) {
    %c0_i32 = arith.constant 0 : i32
    %c0_i32_0 = arith.constant 0 : i32
    %c0_i32_1 = arith.constant 0 : i32
    return %arg0, %c0_i32, %c0_i32_0 : i32, i32, i32
  }
  func.func @transform_1(%arg0: i32) -> (i32, i32, i32) {
    %c0_i32 = arith.constant 0 : i32
    %c0_i32_0 = arith.constant 0 : i32
    %c0_i32_1 = arith.constant 0 : i32
    %c0_i32_2 = arith.constant 0 : i32
    return %c0_i32, %c0_i32_0, %c0_i32_1 : i32, i32, i32
  }
  func.func @transform_2(%arg0: i32) -> (i32, i32, i32) {
    %c0_i32 = arith.constant 0 : i32
    %c0_i32_0 = arith.constant 0 : i32
    %c0_i32_1 = arith.constant 0 : i32
    %c0_i32_2 = arith.constant 0 : i32
    return %c0_i32, %c0_i32_0, %c0_i32_1 : i32, i32, i32
  }
  func.func @transform_3(%arg0: i32) -> (i32, i32) {
    %c0_i32 = arith.constant 0 : i32
    %c0_i32_0 = arith.constant 0 : i32
    %c0_i32_1 = arith.constant 0 : i32
    return %c0_i32, %c0_i32_0 : i32, i32
  }
  func.func @transform_4(%arg0: i32) -> (i32, i32, i32) {
    %c0_i32 = arith.constant 0 : i32
    %c0_i32_0 = arith.constant 0 : i32
    %c0_i32_1 = arith.constant 0 : i32
    return %arg0, %c0_i32, %c0_i32_0 : i32, i32, i32
  }
}

module attributes {stable_mosaic.version = 11 : i64} {
  func.func @_transformer_kernel(%arg0: i32, %arg1: memref<1x64x32xf32, #tpu.memory_space<vmem>>, %arg2: memref<1x8x64xf32, #tpu.memory_space<vmem>>, %arg3: memref<32x8xf32, #tpu.memory_space<vmem>>, %arg4: memref<1x32xf32, #tpu.memory_space<vmem>>, %arg5: memref<1x32xf32, #tpu.memory_space<vmem>>, %arg6: memref<32x32xbf16, #tpu.memory_space<vmem>>, %arg7: memref<1x32xf32, #tpu.memory_space<vmem>>, %arg8: memref<1x32xf32, #tpu.memory_space<vmem>>, %arg9: memref<1x32xf32, #tpu.memory_space<vmem>>, %arg10: memref<32x96xbf16, #tpu.memory_space<vmem>>, %arg11: memref<32x32xbf16, #tpu.memory_space<vmem>>, %arg12: memref<1x32xf32, #tpu.memory_space<vmem>>, %arg13: memref<1x32xf32, #tpu.memory_space<vmem>>, %arg14: memref<1x32xf32, #tpu.memory_space<vmem>>, %arg15: memref<32x32xbf16, #tpu.memory_space<vmem>>, %arg16: memref<64x64xbf16, #tpu.memory_space<vmem>>, %arg17: memref<32x32xbf16, #tpu.memory_space<vmem>>, %arg18: memref<1x32xf32, #tpu.memory_space<vmem>>, %arg19: memref<1x32xf32, #tpu.memory_space<vmem>>, %arg20: memref<1x32xf32, #tpu.memory_space<vmem>>, %arg21: memref<32x256xbf16, #tpu.memory_space<vmem>>, %arg22: memref<1x256xf32, #tpu.memory_space<vmem>>, %arg23: memref<128x32xbf16, #tpu.memory_space<vmem>>, %arg24: memref<1x32xf32, #tpu.memory_space<vmem>>, %arg25: memref<32x32xbf16, #tpu.memory_space<vmem>>, %arg26: memref<1x32xf32, #tpu.memory_space<vmem>>, %arg27: memref<1x64x32xf32, #tpu.memory_space<vmem>>) attributes {dimension_semantics = [#tpu.dimension_semantics<parallel>], iteration_bounds = array<i64: 2>, scalar_prefetch = 0 : i64, scratch_operands = 0 : i64, tpu.core_type = #tpu.core_type<tc>, window_params = [{transform_indices = @transform_0, window_bounds = array<i64: 1, 64, 32>}, {transform_indices = @transform_1, window_bounds = array<i64: 1, 8, 64>}, {pipeline_mode = #tpu.pipeline_mode<synchronous>, transform_indices = @transform_2, window_bounds = array<i64: 32, 8>}, {pipeline_mode = #tpu.pipeline_mode<synchronous>, transform_indices = @transform_3, window_bounds = array<i64: 1, 32>}, {pipeline_mode = #tpu.pipeline_mode<synchronous>, transform_indices = @transform_4, window_bounds = array<i64: 1, 32>}, {pipeline_mode = #tpu.pipeline_mode<synchronous>, transform_indices = @transform_5, window_bounds = array<i64: 32, 32>}, {pipeline_mode = #tpu.pipeline_mode<synchronous>, transform_indices = @transform_6, window_bounds = array<i64: 1, 32>}, {pipeline_mode = #tpu.pipeline_mode<synchronous>, transform_indices = @transform_7, window_bounds = array<i64: 1, 32>}, {pipeline_mode = #tpu.pipeline_mode<synchronous>, transform_indices = @transform_8, window_bounds = array<i64: 1, 32>}, {pipeline_mode = #tpu.pipeline_mode<synchronous>, transform_indices = @transform_9, window_bounds = array<i64: 32, 96>}, {pipeline_mode = #tpu.pipeline_mode<synchronous>, transform_indices = @transform_10, window_bounds = array<i64: 32, 32>}, {pipeline_mode = #tpu.pipeline_mode<synchronous>, transform_indices = @transform_11, window_bounds = array<i64: 1, 32>}, {pipeline_mode = #tpu.pipeline_mode<synchronous>, transform_indices = @transform_12, window_bounds = array<i64: 1, 32>}, {pipeline_mode = #tpu.pipeline_mode<synchronous>, transform_indices = @transform_13, window_bounds = array<i64: 1, 32>}, {pipeline_mode = #tpu.pipeline_mode<synchronous>, transform_indices = @transform_14, window_bounds = array<i64: 32, 32>}, {pipeline_mode = #tpu.pipeline_mode<synchronous>, transform_indices = @transform_15, window_bounds = array<i64: 64, 64>}, {pipeline_mode = #tpu.pipeline_mode<synchronous>, transform_indices = @transform_16, window_bounds = array<i64: 32, 32>}, {pipeline_mode = #tpu.pipeline_mode<synchronous>, transform_indices = @transform_17, window_bounds = array<i64: 1, 32>}, {pipeline_mode = #tpu.pipeline_mode<synchronous>, transform_indices = @transform_18, window_bounds = array<i64: 1, 32>}, {pipeline_mode = #tpu.pipeline_mode<synchronous>, transform_indices = @transform_19, window_bounds = array<i64: 1, 32>}, {pipeline_mode = #tpu.pipeline_mode<synchronous>, transform_indices = @transform_20, window_bounds = array<i64: 32, 256>}, {pipeline_mode = #tpu.pipeline_mode<synchronous>, transform_indices = @transform_21, window_bounds = array<i64: 1, 256>}, {pipeline_mode = #tpu.pipeline_mode<synchronous>, transform_indices = @transform_22, window_bounds = array<i64: 128, 32>}, {pipeline_mode = #tpu.pipeline_mode<synchronous>, transform_indices = @transform_23, window_bounds = array<i64: 1, 32>}, {pipeline_mode = #tpu.pipeline_mode<synchronous>, transform_indices = @transform_24, window_bounds = array<i64: 32, 32>}, {pipeline_mode = #tpu.pipeline_mode<synchronous>, transform_indices = @transform_25, window_bounds = array<i64: 1, 32>}, {transform_indices = @transform_26, window_bounds = array<i64: 1, 64, 32>}]} {
    %c0 = arith.constant 0 : index
    %c0_0 = arith.constant 0 : index
    %c0_1 = arith.constant 0 : index
    %0 = vector.load %arg1[%c0, %c0_0, %c0_1] : memref<1x64x32xf32, #tpu.memory_space<vmem>>, vector<1x64x32xf32>
    %1 = vector.shape_cast %0 : vector<1x64x32xf32> to vector<64x32xf32>
    %c0_2 = arith.constant 0 : index
    %c0_3 = arith.constant 0 : index
    %c0_4 = arith.constant 0 : index
    %2 = vector.load %arg2[%c0_2, %c0_3, %c0_4] : memref<1x8x64xf32, #tpu.memory_space<vmem>>, vector<1x8x64xf32>
    %3 = vector.shape_cast %2 : vector<1x8x64xf32> to vector<8x64xf32>
    %c0_5 = arith.constant 0 : index
    %c0_6 = arith.constant 0 : index
    %4 = vector.load %arg4[%c0_5, %c0_6] : memref<1x32xf32, #tpu.memory_space<vmem>>, vector<1x32xf32>
    %c0_7 = arith.constant 0 : index
    %c0_8 = arith.constant 0 : index
    %5 = vector.load %arg5[%c0_7, %c0_8] : memref<1x32xf32, #tpu.memory_space<vmem>>, vector<1x32xf32>
    %c0_9 = arith.constant 0 : index
    %c0_10 = arith.constant 0 : index
    %6 = vector.load %arg3[%c0_9, %c0_10] : memref<32x8xf32, #tpu.memory_space<vmem>>, vector<32x8xf32>
    %cst = arith.constant dense<0.000000e+00> : vector<32xf32>
    %7 = vector.multi_reduction <add>, %1, %cst [0] : vector<64x32xf32> to vector<32xf32>
    %8 = vector.shape_cast %7 : vector<32xf32> to vector<1x32xf32>
    %cst_11 = arith.constant dense<0.000000e+00> : vector<1x8xf32>
    %9 = tpu.matmul %8, %6, %cst_11 {dimension_numbers = #tpu.dot_dimension_numbers<[1], [0], [0], [1], [0, 0, 1, 1], [], []>} : vector<1x32xf32>, vector<32x8xf32>, vector<1x8xf32> -> vector<1x8xf32>
    %cst_12 = arith.constant 3.906250e-03 : f32
    %10 = vector.broadcast %cst_12 : f32 to vector<1x8xf32>
    %11 = arith.mulf %9, %10 : vector<1x8xf32>
    %cst_13 = arith.constant dense<0.000000e+00> : vector<1x32xf32>
    %12 = tpu.matmul %11, %6, %cst_13 {dimension_numbers = #tpu.dot_dimension_numbers<[1], [1], [0], [0], [0, 0, 1, 0], [], []>} : vector<1x8xf32>, vector<32x8xf32>, vector<1x32xf32> -> vector<1x32xf32>
    %13 = vector.broadcast %12 : vector<1x32xf32> to vector<64x32xf32>
    %14 = arith.subf %1, %13 : vector<64x32xf32>
    %15 = arith.mulf %14, %14 : vector<64x32xf32>
    %cst_14 = arith.constant dense<0.000000e+00> : vector<32xf32>
    %16 = vector.multi_reduction <add>, %15, %cst_14 [0] : vector<64x32xf32> to vector<32xf32>
    %17 = vector.shape_cast %16 : vector<32xf32> to vector<1x32xf32>
    %cst_15 = arith.constant dense<0.000000e+00> : vector<1x8xf32>
    %18 = tpu.matmul %17, %6, %cst_15 {dimension_numbers = #tpu.dot_dimension_numbers<[1], [0], [0], [1], [0, 0, 1, 1], [], []>} : vector<1x32xf32>, vector<32x8xf32>, vector<1x8xf32> -> vector<1x8xf32>
    %cst_16 = arith.constant 3.906250e-03 : f32
    %19 = vector.broadcast %cst_16 : f32 to vector<1x8xf32>
    %20 = arith.mulf %18, %19 : vector<1x8xf32>
    %cst_17 = arith.constant 9.99999997E-7 : f32
    %21 = vector.broadcast %cst_17 : f32 to vector<1x8xf32>
    %22 = arith.addf %20, %21 : vector<1x8xf32>
    %23 = math.rsqrt %22 : vector<1x8xf32>
    %cst_18 = arith.constant dense<0.000000e+00> : vector<1x32xf32>
    %24 = tpu.matmul %23, %6, %cst_18 {dimension_numbers = #tpu.dot_dimension_numbers<[1], [1], [0], [0], [0, 0, 1, 0], [], []>} : vector<1x8xf32>, vector<32x8xf32>, vector<1x32xf32> -> vector<1x32xf32>
    %25 = vector.broadcast %24 : vector<1x32xf32> to vector<64x32xf32>
    %26 = arith.mulf %14, %25 : vector<64x32xf32>
    %27 = vector.broadcast %4 : vector<1x32xf32> to vector<64x32xf32>
    %28 = arith.mulf %26, %27 : vector<64x32xf32>
    %29 = vector.broadcast %5 : vector<1x32xf32> to vector<64x32xf32>
    %30 = arith.addf %28, %29 : vector<64x32xf32>
    %c0_19 = arith.constant 0 : index
    %c0_20 = arith.constant 0 : index
    %31 = vector.load %arg6[%c0_19, %c0_20] : memref<32x32xbf16, #tpu.memory_space<vmem>>, vector<32x32xbf16>
    %32 = arith.truncf %30 : vector<64x32xf32> to vector<64x32xbf16>
    %cst_21 = arith.constant dense<0.000000e+00> : vector<64x32xf32>
    %33 = tpu.matmul %32, %31, %cst_21 {dimension_numbers = #tpu.dot_dimension_numbers<[1], [0], [0], [1], [0, 0, 1, 1], [], []>} : vector<64x32xbf16>, vector<32x32xbf16>, vector<64x32xf32> -> vector<64x32xf32>
    %c0_22 = arith.constant 0 : index
    %c0_23 = arith.constant 0 : index
    %34 = vector.load %arg7[%c0_22, %c0_23] : memref<1x32xf32, #tpu.memory_space<vmem>>, vector<1x32xf32>
    %35 = vector.broadcast %34 : vector<1x32xf32> to vector<64x32xf32>
    %36 = arith.addf %33, %35 : vector<64x32xf32>
    %c0_24 = arith.constant 0 : index
    %c0_25 = arith.constant 0 : index
    %37 = vector.load %arg8[%c0_24, %c0_25] : memref<1x32xf32, #tpu.memory_space<vmem>>, vector<1x32xf32>
    %c0_26 = arith.constant 0 : index
    %c0_27 = arith.constant 0 : index
    %38 = vector.load %arg9[%c0_26, %c0_27] : memref<1x32xf32, #tpu.memory_space<vmem>>, vector<1x32xf32>
    %cst_28 = arith.constant dense<0.000000e+00> : vector<64xf32>
    %39 = vector.multi_reduction <add>, %36, %cst_28 [1] : vector<64x32xf32> to vector<64xf32>
    %40 = vector.shape_cast %39 : vector<64xf32> to vector<64x1xf32>
    %cst_29 = arith.constant 3.200000e+01 : f32
    %41 = vector.broadcast %cst_29 : f32 to vector<64x1xf32>
    %42 = arith.divf %40, %41 : vector<64x1xf32>
    %43 = vector.broadcast %42 : vector<64x1xf32> to vector<64x32xf32>
    %44 = arith.subf %36, %43 : vector<64x32xf32>
    %45 = arith.mulf %44, %44 : vector<64x32xf32>
    %cst_30 = arith.constant dense<0.000000e+00> : vector<64xf32>
    %46 = vector.multi_reduction <add>, %45, %cst_30 [1] : vector<64x32xf32> to vector<64xf32>
    %47 = vector.shape_cast %46 : vector<64xf32> to vector<64x1xf32>
    %cst_31 = arith.constant 3.200000e+01 : f32
    %48 = vector.broadcast %cst_31 : f32 to vector<64x1xf32>
    %49 = arith.divf %47, %48 : vector<64x1xf32>
    %cst_32 = arith.constant 9.99999974E-6 : f32
    %50 = vector.broadcast %cst_32 : f32 to vector<64x1xf32>
    %51 = arith.addf %49, %50 : vector<64x1xf32>
    %52 = math.rsqrt %51 : vector<64x1xf32>
    %53 = vector.broadcast %52 : vector<64x1xf32> to vector<64x32xf32>
    %54 = arith.mulf %44, %53 : vector<64x32xf32>
    %55 = vector.broadcast %37 : vector<1x32xf32> to vector<64x32xf32>
    %56 = arith.mulf %54, %55 : vector<64x32xf32>
    %57 = vector.broadcast %38 : vector<1x32xf32> to vector<64x32xf32>
    %58 = arith.addf %56, %57 : vector<64x32xf32>
    %c0_33 = arith.constant 0 : index
    %c0_34 = arith.constant 0 : index
    %59 = vector.load %arg10[%c0_33, %c0_34] : memref<32x96xbf16, #tpu.memory_space<vmem>>, vector<32x96xbf16>
    %60 = arith.truncf %58 : vector<64x32xf32> to vector<64x32xbf16>
    %cst_35 = arith.constant dense<0.000000e+00> : vector<64x96xf32>
    %61 = tpu.matmul %60, %59, %cst_35 {dimension_numbers = #tpu.dot_dimension_numbers<[1], [0], [0], [1], [0, 0, 1, 1], [], []>} : vector<64x32xbf16>, vector<32x96xbf16>, vector<64x96xf32> -> vector<64x96xf32>
    %62 = vector.extract_strided_slice %61 {offsets = [0, 0], sizes = [64, 32], strides = [1, 1]} : vector<64x96xf32> to vector<64x32xf32>
    %63 = vector.extract_strided_slice %61 {offsets = [0, 32], sizes = [64, 32], strides = [1, 1]} : vector<64x96xf32> to vector<64x32xf32>
    %64 = vector.extract_strided_slice %61 {offsets = [0, 64], sizes = [64, 32], strides = [1, 1]} : vector<64x96xf32> to vector<64x32xf32>
    %c0_36 = arith.constant 0 : index
    %c0_37 = arith.constant 0 : index
    %65 = vector.load %arg11[%c0_36, %c0_37] : memref<32x32xbf16, #tpu.memory_space<vmem>>, vector<32x32xbf16>
    %c0_38 = arith.constant 0 : index
    %c0_39 = arith.constant 0 : index
    %66 = vector.load %arg12[%c0_38, %c0_39] : memref<1x32xf32, #tpu.memory_space<vmem>>, vector<1x32xf32>
    %67 = vector.extract_strided_slice %62 {offsets = [0, 0], sizes = [64, 8], strides = [1, 1]} : vector<64x32xf32> to vector<64x8xf32>
    %cst_40 = arith.constant 0.353553385 : f32
    %68 = vector.broadcast %cst_40 : f32 to vector<64x8xf32>
    %69 = arith.mulf %67, %68 : vector<64x8xf32>
    %70 = arith.truncf %69 : vector<64x8xf32> to vector<64x8xbf16>
    %71 = vector.extract_strided_slice %63 {offsets = [0, 0], sizes = [64, 8], strides = [1, 1]} : vector<64x32xf32> to vector<64x8xf32>
    %72 = arith.truncf %71 : vector<64x8xf32> to vector<64x8xbf16>
    %73 = vector.extract_strided_slice %64 {offsets = [0, 0], sizes = [64, 8], strides = [1, 1]} : vector<64x32xf32> to vector<64x8xf32>
    %74 = arith.truncf %73 : vector<64x8xf32> to vector<64x8xbf16>
    %cst_41 = arith.constant dense<0.000000e+00> : vector<64x64xf32>
    %75 = tpu.matmul %70, %72, %cst_41 {dimension_numbers = #tpu.dot_dimension_numbers<[1], [1], [0], [0], [0, 0, 1, 0], [], []>} : vector<64x8xbf16>, vector<64x8xbf16>, vector<64x64xf32> -> vector<64x64xf32>
    %cst_42 = arith.constant dense<0xFF800000> : vector<64xf32>
    %76 = vector.multi_reduction <maximumf>, %75, %cst_42 [1] : vector<64x64xf32> to vector<64xf32>
    %77 = vector.shape_cast %76 : vector<64xf32> to vector<64x1xf32>
    %78 = vector.broadcast %77 : vector<64x1xf32> to vector<64x64xf32>
    %79 = arith.subf %75, %78 : vector<64x64xf32>
    %80 = math.exp %79 : vector<64x64xf32>
    %cst_43 = arith.constant dense<0.000000e+00> : vector<64xf32>
    %81 = vector.multi_reduction <add>, %80, %cst_43 [1] : vector<64x64xf32> to vector<64xf32>
    %82 = vector.shape_cast %81 : vector<64xf32> to vector<64x1xf32>
    %83 = tpu.reciprocal %82 {approx = true} : vector<64x1xf32> -> vector<64x1xf32>
    %84 = vector.broadcast %83 : vector<64x1xf32> to vector<64x64xf32>
    %85 = arith.mulf %80, %84 : vector<64x64xf32>
    %86 = arith.truncf %85 : vector<64x64xf32> to vector<64x64xbf16>
    %cst_44 = arith.constant dense<0.000000e+00> : vector<64x8xf32>
    %87 = tpu.matmul %86, %74, %cst_44 {dimension_numbers = #tpu.dot_dimension_numbers<[1], [0], [0], [1], [0, 0, 1, 1], [], []>} : vector<64x64xbf16>, vector<64x8xbf16>, vector<64x8xf32> -> vector<64x8xf32>
    %88 = vector.extract_strided_slice %65 {offsets = [0, 0], sizes = [8, 32], strides = [1, 1]} : vector<32x32xbf16> to vector<8x32xbf16>
    %89 = arith.truncf %87 : vector<64x8xf32> to vector<64x8xbf16>
    %cst_45 = arith.constant dense<0.000000e+00> : vector<64x32xf32>
    %90 = tpu.matmul %89, %88, %cst_45 {dimension_numbers = #tpu.dot_dimension_numbers<[1], [0], [0], [1], [0, 0, 1, 1], [], []>} : vector<64x8xbf16>, vector<8x32xbf16>, vector<64x32xf32> -> vector<64x32xf32>
    %91 = vector.extract_strided_slice %62 {offsets = [0, 8], sizes = [64, 8], strides = [1, 1]} : vector<64x32xf32> to vector<64x8xf32>
    %cst_46 = arith.constant 0.353553385 : f32
    %92 = vector.broadcast %cst_46 : f32 to vector<64x8xf32>
    %93 = arith.mulf %91, %92 : vector<64x8xf32>
    %94 = arith.truncf %93 : vector<64x8xf32> to vector<64x8xbf16>
    %95 = vector.extract_strided_slice %63 {offsets = [0, 8], sizes = [64, 8], strides = [1, 1]} : vector<64x32xf32> to vector<64x8xf32>
    %96 = arith.truncf %95 : vector<64x8xf32> to vector<64x8xbf16>
    %97 = vector.extract_strided_slice %64 {offsets = [0, 8], sizes = [64, 8], strides = [1, 1]} : vector<64x32xf32> to vector<64x8xf32>
    %98 = arith.truncf %97 : vector<64x8xf32> to vector<64x8xbf16>
    %cst_47 = arith.constant dense<0.000000e+00> : vector<64x64xf32>
    %99 = tpu.matmul %94, %96, %cst_47 {dimension_numbers = #tpu.dot_dimension_numbers<[1], [1], [0], [0], [0, 0, 1, 0], [], []>} : vector<64x8xbf16>, vector<64x8xbf16>, vector<64x64xf32> -> vector<64x64xf32>
    %cst_48 = arith.constant dense<0xFF800000> : vector<64xf32>
    %100 = vector.multi_reduction <maximumf>, %99, %cst_48 [1] : vector<64x64xf32> to vector<64xf32>
    %101 = vector.shape_cast %100 : vector<64xf32> to vector<64x1xf32>
    %102 = vector.broadcast %101 : vector<64x1xf32> to vector<64x64xf32>
    %103 = arith.subf %99, %102 : vector<64x64xf32>
    %104 = math.exp %103 : vector<64x64xf32>
    %cst_49 = arith.constant dense<0.000000e+00> : vector<64xf32>
    %105 = vector.multi_reduction <add>, %104, %cst_49 [1] : vector<64x64xf32> to vector<64xf32>
    %106 = vector.shape_cast %105 : vector<64xf32> to vector<64x1xf32>
    %107 = tpu.reciprocal %106 {approx = true} : vector<64x1xf32> -> vector<64x1xf32>
    %108 = vector.broadcast %107 : vector<64x1xf32> to vector<64x64xf32>
    %109 = arith.mulf %104, %108 : vector<64x64xf32>
    %110 = arith.truncf %109 : vector<64x64xf32> to vector<64x64xbf16>
    %cst_50 = arith.constant dense<0.000000e+00> : vector<64x8xf32>
    %111 = tpu.matmul %110, %98, %cst_50 {dimension_numbers = #tpu.dot_dimension_numbers<[1], [0], [0], [1], [0, 0, 1, 1], [], []>} : vector<64x64xbf16>, vector<64x8xbf16>, vector<64x8xf32> -> vector<64x8xf32>
    %112 = vector.extract_strided_slice %65 {offsets = [8, 0], sizes = [8, 32], strides = [1, 1]} : vector<32x32xbf16> to vector<8x32xbf16>
    %113 = arith.truncf %111 : vector<64x8xf32> to vector<64x8xbf16>
    %cst_51 = arith.constant dense<0.000000e+00> : vector<64x32xf32>
    %114 = tpu.matmul %113, %112, %cst_51 {dimension_numbers = #tpu.dot_dimension_numbers<[1], [0], [0], [1], [0, 0, 1, 1], [], []>} : vector<64x8xbf16>, vector<8x32xbf16>, vector<64x32xf32> -> vector<64x32xf32>
    %115 = arith.addf %90, %114 : vector<64x32xf32>
    %116 = vector.extract_strided_slice %62 {offsets = [0, 16], sizes = [64, 8], strides = [1, 1]} : vector<64x32xf32> to vector<64x8xf32>
    %cst_52 = arith.constant 0.353553385 : f32
    %117 = vector.broadcast %cst_52 : f32 to vector<64x8xf32>
    %118 = arith.mulf %116, %117 : vector<64x8xf32>
    %119 = arith.truncf %118 : vector<64x8xf32> to vector<64x8xbf16>
    %120 = vector.extract_strided_slice %63 {offsets = [0, 16], sizes = [64, 8], strides = [1, 1]} : vector<64x32xf32> to vector<64x8xf32>
    %121 = arith.truncf %120 : vector<64x8xf32> to vector<64x8xbf16>
    %122 = vector.extract_strided_slice %64 {offsets = [0, 16], sizes = [64, 8], strides = [1, 1]} : vector<64x32xf32> to vector<64x8xf32>
    %123 = arith.truncf %122 : vector<64x8xf32> to vector<64x8xbf16>
    %cst_53 = arith.constant dense<0.000000e+00> : vector<64x64xf32>
    %124 = tpu.matmul %119, %121, %cst_53 {dimension_numbers = #tpu.dot_dimension_numbers<[1], [1], [0], [0], [0, 0, 1, 0], [], []>} : vector<64x8xbf16>, vector<64x8xbf16>, vector<64x64xf32> -> vector<64x64xf32>
    %cst_54 = arith.constant dense<0xFF800000> : vector<64xf32>
    %125 = vector.multi_reduction <maximumf>, %124, %cst_54 [1] : vector<64x64xf32> to vector<64xf32>
    %126 = vector.shape_cast %125 : vector<64xf32> to vector<64x1xf32>
    %127 = vector.broadcast %126 : vector<64x1xf32> to vector<64x64xf32>
    %128 = arith.subf %124, %127 : vector<64x64xf32>
    %129 = math.exp %128 : vector<64x64xf32>
    %cst_55 = arith.constant dense<0.000000e+00> : vector<64xf32>
    %130 = vector.multi_reduction <add>, %129, %cst_55 [1] : vector<64x64xf32> to vector<64xf32>
    %131 = vector.shape_cast %130 : vector<64xf32> to vector<64x1xf32>
    %132 = tpu.reciprocal %131 {approx = true} : vector<64x1xf32> -> vector<64x1xf32>
    %133 = vector.broadcast %132 : vector<64x1xf32> to vector<64x64xf32>
    %134 = arith.mulf %129, %133 : vector<64x64xf32>
    %135 = arith.truncf %134 : vector<64x64xf32> to vector<64x64xbf16>
    %cst_56 = arith.constant dense<0.000000e+00> : vector<64x8xf32>
    %136 = tpu.matmul %135, %123, %cst_56 {dimension_numbers = #tpu.dot_dimension_numbers<[1], [0], [0], [1], [0, 0, 1, 1], [], []>} : vector<64x64xbf16>, vector<64x8xbf16>, vector<64x8xf32> -> vector<64x8xf32>
    %137 = vector.extract_strided_slice %65 {offsets = [16, 0], sizes = [8, 32], strides = [1, 1]} : vector<32x32xbf16> to vector<8x32xbf16>
    %138 = arith.truncf %136 : vector<64x8xf32> to vector<64x8xbf16>
    %cst_57 = arith.constant dense<0.000000e+00> : vector<64x32xf32>
    %139 = tpu.matmul %138, %137, %cst_57 {dimension_numbers = #tpu.dot_dimension_numbers<[1], [0], [0], [1], [0, 0, 1, 1], [], []>} : vector<64x8xbf16>, vector<8x32xbf16>, vector<64x32xf32> -> vector<64x32xf32>
    %140 = arith.addf %115, %139 : vector<64x32xf32>
    %141 = vector.extract_strided_slice %62 {offsets = [0, 24], sizes = [64, 8], strides = [1, 1]} : vector<64x32xf32> to vector<64x8xf32>
    %cst_58 = arith.constant 0.353553385 : f32
    %142 = vector.broadcast %cst_58 : f32 to vector<64x8xf32>
    %143 = arith.mulf %141, %142 : vector<64x8xf32>
    %144 = arith.truncf %143 : vector<64x8xf32> to vector<64x8xbf16>
    %145 = vector.extract_strided_slice %63 {offsets = [0, 24], sizes = [64, 8], strides = [1, 1]} : vector<64x32xf32> to vector<64x8xf32>
    %146 = arith.truncf %145 : vector<64x8xf32> to vector<64x8xbf16>
    %147 = vector.extract_strided_slice %64 {offsets = [0, 24], sizes = [64, 8], strides = [1, 1]} : vector<64x32xf32> to vector<64x8xf32>
    %148 = arith.truncf %147 : vector<64x8xf32> to vector<64x8xbf16>
    %cst_59 = arith.constant dense<0.000000e+00> : vector<64x64xf32>
    %149 = tpu.matmul %144, %146, %cst_59 {dimension_numbers = #tpu.dot_dimension_numbers<[1], [1], [0], [0], [0, 0, 1, 0], [], []>} : vector<64x8xbf16>, vector<64x8xbf16>, vector<64x64xf32> -> vector<64x64xf32>
    %cst_60 = arith.constant dense<0xFF800000> : vector<64xf32>
    %150 = vector.multi_reduction <maximumf>, %149, %cst_60 [1] : vector<64x64xf32> to vector<64xf32>
    %151 = vector.shape_cast %150 : vector<64xf32> to vector<64x1xf32>
    %152 = vector.broadcast %151 : vector<64x1xf32> to vector<64x64xf32>
    %153 = arith.subf %149, %152 : vector<64x64xf32>
    %154 = math.exp %153 : vector<64x64xf32>
    %cst_61 = arith.constant dense<0.000000e+00> : vector<64xf32>
    %155 = vector.multi_reduction <add>, %154, %cst_61 [1] : vector<64x64xf32> to vector<64xf32>
    %156 = vector.shape_cast %155 : vector<64xf32> to vector<64x1xf32>
    %157 = tpu.reciprocal %156 {approx = true} : vector<64x1xf32> -> vector<64x1xf32>
    %158 = vector.broadcast %157 : vector<64x1xf32> to vector<64x64xf32>
    %159 = arith.mulf %154, %158 : vector<64x64xf32>
    %160 = arith.truncf %159 : vector<64x64xf32> to vector<64x64xbf16>
    %cst_62 = arith.constant dense<0.000000e+00> : vector<64x8xf32>
    %161 = tpu.matmul %160, %148, %cst_62 {dimension_numbers = #tpu.dot_dimension_numbers<[1], [0], [0], [1], [0, 0, 1, 1], [], []>} : vector<64x64xbf16>, vector<64x8xbf16>, vector<64x8xf32> -> vector<64x8xf32>
    %162 = vector.extract_strided_slice %65 {offsets = [24, 0], sizes = [8, 32], strides = [1, 1]} : vector<32x32xbf16> to vector<8x32xbf16>
    %163 = arith.truncf %161 : vector<64x8xf32> to vector<64x8xbf16>
    %cst_63 = arith.constant dense<0.000000e+00> : vector<64x32xf32>
    %164 = tpu.matmul %163, %162, %cst_63 {dimension_numbers = #tpu.dot_dimension_numbers<[1], [0], [0], [1], [0, 0, 1, 1], [], []>} : vector<64x8xbf16>, vector<8x32xbf16>, vector<64x32xf32> -> vector<64x32xf32>
    %165 = arith.addf %140, %164 : vector<64x32xf32>
    %166 = vector.broadcast %66 : vector<1x32xf32> to vector<64x32xf32>
    %167 = arith.addf %165, %166 : vector<64x32xf32>
    %168 = arith.addf %36, %167 : vector<64x32xf32>
    %c0_64 = arith.constant 0 : index
    %c0_65 = arith.constant 0 : index
    %169 = vector.load %arg13[%c0_64, %c0_65] : memref<1x32xf32, #tpu.memory_space<vmem>>, vector<1x32xf32>
    %c0_66 = arith.constant 0 : index
    %c0_67 = arith.constant 0 : index
    %170 = vector.load %arg14[%c0_66, %c0_67] : memref<1x32xf32, #tpu.memory_space<vmem>>, vector<1x32xf32>
    %cst_68 = arith.constant dense<0.000000e+00> : vector<64xf32>
    %171 = vector.multi_reduction <add>, %168, %cst_68 [1] : vector<64x32xf32> to vector<64xf32>
    %172 = vector.shape_cast %171 : vector<64xf32> to vector<64x1xf32>
    %cst_69 = arith.constant 3.200000e+01 : f32
    %173 = vector.broadcast %cst_69 : f32 to vector<64x1xf32>
    %174 = arith.divf %172, %173 : vector<64x1xf32>
    %175 = vector.broadcast %174 : vector<64x1xf32> to vector<64x32xf32>
    %176 = arith.subf %168, %175 : vector<64x32xf32>
    %177 = arith.mulf %176, %176 : vector<64x32xf32>
    %cst_70 = arith.constant dense<0.000000e+00> : vector<64xf32>
    %178 = vector.multi_reduction <add>, %177, %cst_70 [1] : vector<64x32xf32> to vector<64xf32>
    %179 = vector.shape_cast %178 : vector<64xf32> to vector<64x1xf32>
    %cst_71 = arith.constant 3.200000e+01 : f32
    %180 = vector.broadcast %cst_71 : f32 to vector<64x1xf32>
    %181 = arith.divf %179, %180 : vector<64x1xf32>
    %cst_72 = arith.constant 9.99999974E-6 : f32
    %182 = vector.broadcast %cst_72 : f32 to vector<64x1xf32>
    %183 = arith.addf %181, %182 : vector<64x1xf32>
    %184 = math.rsqrt %183 : vector<64x1xf32>
    %185 = vector.broadcast %184 : vector<64x1xf32> to vector<64x32xf32>
    %186 = arith.mulf %176, %185 : vector<64x32xf32>
    %187 = vector.broadcast %169 : vector<1x32xf32> to vector<64x32xf32>
    %188 = arith.mulf %186, %187 : vector<64x32xf32>
    %189 = vector.broadcast %170 : vector<1x32xf32> to vector<64x32xf32>
    %190 = arith.addf %188, %189 : vector<64x32xf32>
    %c0_73 = arith.constant 0 : index
    %c0_74 = arith.constant 0 : index
    %191 = vector.load %arg15[%c0_73, %c0_74] : memref<32x32xbf16, #tpu.memory_space<vmem>>, vector<32x32xbf16>
    %192 = arith.truncf %190 : vector<64x32xf32> to vector<64x32xbf16>
    %cst_75 = arith.constant dense<0.000000e+00> : vector<64x32xf32>
    %193 = tpu.matmul %192, %191, %cst_75 {dimension_numbers = #tpu.dot_dimension_numbers<[1], [0], [0], [1], [0, 0, 1, 1], [], []>} : vector<64x32xbf16>, vector<32x32xbf16>, vector<64x32xf32> -> vector<64x32xf32>
    %c0_76 = arith.constant 0 : index
    %c0_77 = arith.constant 0 : index
    %194 = vector.load %arg16[%c0_76, %c0_77] : memref<64x64xbf16, #tpu.memory_space<vmem>>, vector<64x64xbf16>
    %195 = arith.truncf %3 : vector<8x64xf32> to vector<8x64xbf16>
    %cst_78 = arith.constant dense<0.000000e+00> : vector<8x64xf32>
    %196 = tpu.matmul %195, %194, %cst_78 {dimension_numbers = #tpu.dot_dimension_numbers<[1], [0], [0], [1], [0, 0, 1, 1], [], []>} : vector<8x64xbf16>, vector<64x64xbf16>, vector<8x64xf32> -> vector<8x64xf32>
    %197 = vector.extract_strided_slice %196 {offsets = [0, 0], sizes = [8, 32], strides = [1, 1]} : vector<8x64xf32> to vector<8x32xf32>
    %198 = vector.extract_strided_slice %196 {offsets = [0, 32], sizes = [8, 32], strides = [1, 1]} : vector<8x64xf32> to vector<8x32xf32>
    %c0_79 = arith.constant 0 : index
    %c0_80 = arith.constant 0 : index
    %199 = vector.load %arg17[%c0_79, %c0_80] : memref<32x32xbf16, #tpu.memory_space<vmem>>, vector<32x32xbf16>
    %c0_81 = arith.constant 0 : index
    %c0_82 = arith.constant 0 : index
    %200 = vector.load %arg18[%c0_81, %c0_82] : memref<1x32xf32, #tpu.memory_space<vmem>>, vector<1x32xf32>
    %201 = vector.extract_strided_slice %193 {offsets = [0, 0], sizes = [64, 8], strides = [1, 1]} : vector<64x32xf32> to vector<64x8xf32>
    %cst_83 = arith.constant 0.353553385 : f32
    %202 = vector.broadcast %cst_83 : f32 to vector<64x8xf32>
    %203 = arith.mulf %201, %202 : vector<64x8xf32>
    %204 = arith.truncf %203 : vector<64x8xf32> to vector<64x8xbf16>
    %205 = vector.extract_strided_slice %197 {offsets = [0, 0], sizes = [8, 8], strides = [1, 1]} : vector<8x32xf32> to vector<8x8xf32>
    %206 = arith.truncf %205 : vector<8x8xf32> to vector<8x8xbf16>
    %207 = vector.extract_strided_slice %198 {offsets = [0, 0], sizes = [8, 8], strides = [1, 1]} : vector<8x32xf32> to vector<8x8xf32>
    %208 = arith.truncf %207 : vector<8x8xf32> to vector<8x8xbf16>
    %cst_84 = arith.constant dense<0.000000e+00> : vector<64x8xf32>
    %209 = tpu.matmul %204, %206, %cst_84 {dimension_numbers = #tpu.dot_dimension_numbers<[1], [1], [0], [0], [0, 0, 1, 0], [], []>} : vector<64x8xbf16>, vector<8x8xbf16>, vector<64x8xf32> -> vector<64x8xf32>
    %cst_85 = arith.constant dense<0xFF800000> : vector<64xf32>
    %210 = vector.multi_reduction <maximumf>, %209, %cst_85 [1] : vector<64x8xf32> to vector<64xf32>
    %211 = vector.shape_cast %210 : vector<64xf32> to vector<64x1xf32>
    %212 = vector.broadcast %211 : vector<64x1xf32> to vector<64x8xf32>
    %213 = arith.subf %209, %212 : vector<64x8xf32>
    %214 = math.exp %213 : vector<64x8xf32>
    %cst_86 = arith.constant dense<0.000000e+00> : vector<64xf32>
    %215 = vector.multi_reduction <add>, %214, %cst_86 [1] : vector<64x8xf32> to vector<64xf32>
    %216 = vector.shape_cast %215 : vector<64xf32> to vector<64x1xf32>
    %217 = tpu.reciprocal %216 {approx = true} : vector<64x1xf32> -> vector<64x1xf32>
    %218 = vector.broadcast %217 : vector<64x1xf32> to vector<64x8xf32>
    %219 = arith.mulf %214, %218 : vector<64x8xf32>
    %220 = arith.truncf %219 : vector<64x8xf32> to vector<64x8xbf16>
    %cst_87 = arith.constant dense<0.000000e+00> : vector<64x8xf32>
    %221 = tpu.matmul %220, %208, %cst_87 {dimension_numbers = #tpu.dot_dimension_numbers<[1], [0], [0], [1], [0, 0, 1, 1], [], []>} : vector<64x8xbf16>, vector<8x8xbf16>, vector<64x8xf32> -> vector<64x8xf32>
    %222 = vector.extract_strided_slice %199 {offsets = [0, 0], sizes = [8, 32], strides = [1, 1]} : vector<32x32xbf16> to vector<8x32xbf16>
    %223 = arith.truncf %221 : vector<64x8xf32> to vector<64x8xbf16>
    %cst_88 = arith.constant dense<0.000000e+00> : vector<64x32xf32>
    %224 = tpu.matmul %223, %222, %cst_88 {dimension_numbers = #tpu.dot_dimension_numbers<[1], [0], [0], [1], [0, 0, 1, 1], [], []>} : vector<64x8xbf16>, vector<8x32xbf16>, vector<64x32xf32> -> vector<64x32xf32>
    %225 = vector.extract_strided_slice %193 {offsets = [0, 8], sizes = [64, 8], strides = [1, 1]} : vector<64x32xf32> to vector<64x8xf32>
    %cst_89 = arith.constant 0.353553385 : f32
    %226 = vector.broadcast %cst_89 : f32 to vector<64x8xf32>
    %227 = arith.mulf %225, %226 : vector<64x8xf32>
    %228 = arith.truncf %227 : vector<64x8xf32> to vector<64x8xbf16>
    %229 = vector.extract_strided_slice %197 {offsets = [0, 8], sizes = [8, 8], strides = [1, 1]} : vector<8x32xf32> to vector<8x8xf32>
    %230 = arith.truncf %229 : vector<8x8xf32> to vector<8x8xbf16>
    %231 = vector.extract_strided_slice %198 {offsets = [0, 8], sizes = [8, 8], strides = [1, 1]} : vector<8x32xf32> to vector<8x8xf32>
    %232 = arith.truncf %231 : vector<8x8xf32> to vector<8x8xbf16>
    %cst_90 = arith.constant dense<0.000000e+00> : vector<64x8xf32>
    %233 = tpu.matmul %228, %230, %cst_90 {dimension_numbers = #tpu.dot_dimension_numbers<[1], [1], [0], [0], [0, 0, 1, 0], [], []>} : vector<64x8xbf16>, vector<8x8xbf16>, vector<64x8xf32> -> vector<64x8xf32>
    %cst_91 = arith.constant dense<0xFF800000> : vector<64xf32>
    %234 = vector.multi_reduction <maximumf>, %233, %cst_91 [1] : vector<64x8xf32> to vector<64xf32>
    %235 = vector.shape_cast %234 : vector<64xf32> to vector<64x1xf32>
    %236 = vector.broadcast %235 : vector<64x1xf32> to vector<64x8xf32>
    %237 = arith.subf %233, %236 : vector<64x8xf32>
    %238 = math.exp %237 : vector<64x8xf32>
    %cst_92 = arith.constant dense<0.000000e+00> : vector<64xf32>
    %239 = vector.multi_reduction <add>, %238, %cst_92 [1] : vector<64x8xf32> to vector<64xf32>
    %240 = vector.shape_cast %239 : vector<64xf32> to vector<64x1xf32>
    %241 = tpu.reciprocal %240 {approx = true} : vector<64x1xf32> -> vector<64x1xf32>
    %242 = vector.broadcast %241 : vector<64x1xf32> to vector<64x8xf32>
    %243 = arith.mulf %238, %242 : vector<64x8xf32>
    %244 = arith.truncf %243 : vector<64x8xf32> to vector<64x8xbf16>
    %cst_93 = arith.constant dense<0.000000e+00> : vector<64x8xf32>
    %245 = tpu.matmul %244, %232, %cst_93 {dimension_numbers = #tpu.dot_dimension_numbers<[1], [0], [0], [1], [0, 0, 1, 1], [], []>} : vector<64x8xbf16>, vector<8x8xbf16>, vector<64x8xf32> -> vector<64x8xf32>
    %246 = vector.extract_strided_slice %199 {offsets = [8, 0], sizes = [8, 32], strides = [1, 1]} : vector<32x32xbf16> to vector<8x32xbf16>
    %247 = arith.truncf %245 : vector<64x8xf32> to vector<64x8xbf16>
    %cst_94 = arith.constant dense<0.000000e+00> : vector<64x32xf32>
    %248 = tpu.matmul %247, %246, %cst_94 {dimension_numbers = #tpu.dot_dimension_numbers<[1], [0], [0], [1], [0, 0, 1, 1], [], []>} : vector<64x8xbf16>, vector<8x32xbf16>, vector<64x32xf32> -> vector<64x32xf32>
    %249 = arith.addf %224, %248 : vector<64x32xf32>
    %250 = vector.extract_strided_slice %193 {offsets = [0, 16], sizes = [64, 8], strides = [1, 1]} : vector<64x32xf32> to vector<64x8xf32>
    %cst_95 = arith.constant 0.353553385 : f32
    %251 = vector.broadcast %cst_95 : f32 to vector<64x8xf32>
    %252 = arith.mulf %250, %251 : vector<64x8xf32>
    %253 = arith.truncf %252 : vector<64x8xf32> to vector<64x8xbf16>
    %254 = vector.extract_strided_slice %197 {offsets = [0, 16], sizes = [8, 8], strides = [1, 1]} : vector<8x32xf32> to vector<8x8xf32>
    %255 = arith.truncf %254 : vector<8x8xf32> to vector<8x8xbf16>
    %256 = vector.extract_strided_slice %198 {offsets = [0, 16], sizes = [8, 8], strides = [1, 1]} : vector<8x32xf32> to vector<8x8xf32>
    %257 = arith.truncf %256 : vector<8x8xf32> to vector<8x8xbf16>
    %cst_96 = arith.constant dense<0.000000e+00> : vector<64x8xf32>
    %258 = tpu.matmul %253, %255, %cst_96 {dimension_numbers = #tpu.dot_dimension_numbers<[1], [1], [0], [0], [0, 0, 1, 0], [], []>} : vector<64x8xbf16>, vector<8x8xbf16>, vector<64x8xf32> -> vector<64x8xf32>
    %cst_97 = arith.constant dense<0xFF800000> : vector<64xf32>
    %259 = vector.multi_reduction <maximumf>, %258, %cst_97 [1] : vector<64x8xf32> to vector<64xf32>
    %260 = vector.shape_cast %259 : vector<64xf32> to vector<64x1xf32>
    %261 = vector.broadcast %260 : vector<64x1xf32> to vector<64x8xf32>
    %262 = arith.subf %258, %261 : vector<64x8xf32>
    %263 = math.exp %262 : vector<64x8xf32>
    %cst_98 = arith.constant dense<0.000000e+00> : vector<64xf32>
    %264 = vector.multi_reduction <add>, %263, %cst_98 [1] : vector<64x8xf32> to vector<64xf32>
    %265 = vector.shape_cast %264 : vector<64xf32> to vector<64x1xf32>
    %266 = tpu.reciprocal %265 {approx = true} : vector<64x1xf32> -> vector<64x1xf32>
    %267 = vector.broadcast %266 : vector<64x1xf32> to vector<64x8xf32>
    %268 = arith.mulf %263, %267 : vector<64x8xf32>
    %269 = arith.truncf %268 : vector<64x8xf32> to vector<64x8xbf16>
    %cst_99 = arith.constant dense<0.000000e+00> : vector<64x8xf32>
    %270 = tpu.matmul %269, %257, %cst_99 {dimension_numbers = #tpu.dot_dimension_numbers<[1], [0], [0], [1], [0, 0, 1, 1], [], []>} : vector<64x8xbf16>, vector<8x8xbf16>, vector<64x8xf32> -> vector<64x8xf32>
    %271 = vector.extract_strided_slice %199 {offsets = [16, 0], sizes = [8, 32], strides = [1, 1]} : vector<32x32xbf16> to vector<8x32xbf16>
    %272 = arith.truncf %270 : vector<64x8xf32> to vector<64x8xbf16>
    %cst_100 = arith.constant dense<0.000000e+00> : vector<64x32xf32>
    %273 = tpu.matmul %272, %271, %cst_100 {dimension_numbers = #tpu.dot_dimension_numbers<[1], [0], [0], [1], [0, 0, 1, 1], [], []>} : vector<64x8xbf16>, vector<8x32xbf16>, vector<64x32xf32> -> vector<64x32xf32>
    %274 = arith.addf %249, %273 : vector<64x32xf32>
    %275 = vector.extract_strided_slice %193 {offsets = [0, 24], sizes = [64, 8], strides = [1, 1]} : vector<64x32xf32> to vector<64x8xf32>
    %cst_101 = arith.constant 0.353553385 : f32
    %276 = vector.broadcast %cst_101 : f32 to vector<64x8xf32>
    %277 = arith.mulf %275, %276 : vector<64x8xf32>
    %278 = arith.truncf %277 : vector<64x8xf32> to vector<64x8xbf16>
    %279 = vector.extract_strided_slice %197 {offsets = [0, 24], sizes = [8, 8], strides = [1, 1]} : vector<8x32xf32> to vector<8x8xf32>
    %280 = arith.truncf %279 : vector<8x8xf32> to vector<8x8xbf16>
    %281 = vector.extract_strided_slice %198 {offsets = [0, 24], sizes = [8, 8], strides = [1, 1]} : vector<8x32xf32> to vector<8x8xf32>
    %282 = arith.truncf %281 : vector<8x8xf32> to vector<8x8xbf16>
    %cst_102 = arith.constant dense<0.000000e+00> : vector<64x8xf32>
    %283 = tpu.matmul %278, %280, %cst_102 {dimension_numbers = #tpu.dot_dimension_numbers<[1], [1], [0], [0], [0, 0, 1, 0], [], []>} : vector<64x8xbf16>, vector<8x8xbf16>, vector<64x8xf32> -> vector<64x8xf32>
    %cst_103 = arith.constant dense<0xFF800000> : vector<64xf32>
    %284 = vector.multi_reduction <maximumf>, %283, %cst_103 [1] : vector<64x8xf32> to vector<64xf32>
    %285 = vector.shape_cast %284 : vector<64xf32> to vector<64x1xf32>
    %286 = vector.broadcast %285 : vector<64x1xf32> to vector<64x8xf32>
    %287 = arith.subf %283, %286 : vector<64x8xf32>
    %288 = math.exp %287 : vector<64x8xf32>
    %cst_104 = arith.constant dense<0.000000e+00> : vector<64xf32>
    %289 = vector.multi_reduction <add>, %288, %cst_104 [1] : vector<64x8xf32> to vector<64xf32>
    %290 = vector.shape_cast %289 : vector<64xf32> to vector<64x1xf32>
    %291 = tpu.reciprocal %290 {approx = true} : vector<64x1xf32> -> vector<64x1xf32>
    %292 = vector.broadcast %291 : vector<64x1xf32> to vector<64x8xf32>
    %293 = arith.mulf %288, %292 : vector<64x8xf32>
    %294 = arith.truncf %293 : vector<64x8xf32> to vector<64x8xbf16>
    %cst_105 = arith.constant dense<0.000000e+00> : vector<64x8xf32>
    %295 = tpu.matmul %294, %282, %cst_105 {dimension_numbers = #tpu.dot_dimension_numbers<[1], [0], [0], [1], [0, 0, 1, 1], [], []>} : vector<64x8xbf16>, vector<8x8xbf16>, vector<64x8xf32> -> vector<64x8xf32>
    %296 = vector.extract_strided_slice %199 {offsets = [24, 0], sizes = [8, 32], strides = [1, 1]} : vector<32x32xbf16> to vector<8x32xbf16>
    %297 = arith.truncf %295 : vector<64x8xf32> to vector<64x8xbf16>
    %cst_106 = arith.constant dense<0.000000e+00> : vector<64x32xf32>
    %298 = tpu.matmul %297, %296, %cst_106 {dimension_numbers = #tpu.dot_dimension_numbers<[1], [0], [0], [1], [0, 0, 1, 1], [], []>} : vector<64x8xbf16>, vector<8x32xbf16>, vector<64x32xf32> -> vector<64x32xf32>
    %299 = arith.addf %274, %298 : vector<64x32xf32>
    %300 = vector.broadcast %200 : vector<1x32xf32> to vector<64x32xf32>
    %301 = arith.addf %299, %300 : vector<64x32xf32>
    %302 = arith.addf %168, %301 : vector<64x32xf32>
    %c0_107 = arith.constant 0 : index
    %c0_108 = arith.constant 0 : index
    %303 = vector.load %arg19[%c0_107, %c0_108] : memref<1x32xf32, #tpu.memory_space<vmem>>, vector<1x32xf32>
    %c0_109 = arith.constant 0 : index
    %c0_110 = arith.constant 0 : index
    %304 = vector.load %arg20[%c0_109, %c0_110] : memref<1x32xf32, #tpu.memory_space<vmem>>, vector<1x32xf32>
    %cst_111 = arith.constant dense<0.000000e+00> : vector<64xf32>
    %305 = vector.multi_reduction <add>, %302, %cst_111 [1] : vector<64x32xf32> to vector<64xf32>
    %306 = vector.shape_cast %305 : vector<64xf32> to vector<64x1xf32>
    %cst_112 = arith.constant 3.200000e+01 : f32
    %307 = vector.broadcast %cst_112 : f32 to vector<64x1xf32>
    %308 = arith.divf %306, %307 : vector<64x1xf32>
    %309 = vector.broadcast %308 : vector<64x1xf32> to vector<64x32xf32>
    %310 = arith.subf %302, %309 : vector<64x32xf32>
    %311 = arith.mulf %310, %310 : vector<64x32xf32>
    %cst_113 = arith.constant dense<0.000000e+00> : vector<64xf32>
    %312 = vector.multi_reduction <add>, %311, %cst_113 [1] : vector<64x32xf32> to vector<64xf32>
    %313 = vector.shape_cast %312 : vector<64xf32> to vector<64x1xf32>
    %cst_114 = arith.constant 3.200000e+01 : f32
    %314 = vector.broadcast %cst_114 : f32 to vector<64x1xf32>
    %315 = arith.divf %313, %314 : vector<64x1xf32>
    %cst_115 = arith.constant 9.99999974E-6 : f32
    %316 = vector.broadcast %cst_115 : f32 to vector<64x1xf32>
    %317 = arith.addf %315, %316 : vector<64x1xf32>
    %318 = math.rsqrt %317 : vector<64x1xf32>
    %319 = vector.broadcast %318 : vector<64x1xf32> to vector<64x32xf32>
    %320 = arith.mulf %310, %319 : vector<64x32xf32>
    %321 = vector.broadcast %303 : vector<1x32xf32> to vector<64x32xf32>
    %322 = arith.mulf %320, %321 : vector<64x32xf32>
    %323 = vector.broadcast %304 : vector<1x32xf32> to vector<64x32xf32>
    %324 = arith.addf %322, %323 : vector<64x32xf32>
    %c0_116 = arith.constant 0 : index
    %c0_117 = arith.constant 0 : index
    %325 = vector.load %arg21[%c0_116, %c0_117] : memref<32x256xbf16, #tpu.memory_space<vmem>>, vector<32x256xbf16>
    %326 = arith.truncf %324 : vector<64x32xf32> to vector<64x32xbf16>
    %cst_118 = arith.constant dense<0.000000e+00> : vector<64x256xf32>
    %327 = tpu.matmul %326, %325, %cst_118 {dimension_numbers = #tpu.dot_dimension_numbers<[1], [0], [0], [1], [0, 0, 1, 1], [], []>} : vector<64x32xbf16>, vector<32x256xbf16>, vector<64x256xf32> -> vector<64x256xf32>
    %c0_119 = arith.constant 0 : index
    %c0_120 = arith.constant 0 : index
    %328 = vector.load %arg22[%c0_119, %c0_120] : memref<1x256xf32, #tpu.memory_space<vmem>>, vector<1x256xf32>
    %329 = vector.broadcast %328 : vector<1x256xf32> to vector<64x256xf32>
    %330 = arith.addf %327, %329 : vector<64x256xf32>
    %331 = vector.extract_strided_slice %330 {offsets = [0, 0], sizes = [64, 128], strides = [1, 1]} : vector<64x256xf32> to vector<64x128xf32>
    %332 = vector.extract_strided_slice %330 {offsets = [0, 128], sizes = [64, 128], strides = [1, 1]} : vector<64x256xf32> to vector<64x128xf32>
    %333 = arith.mulf %332, %332 : vector<64x128xf32>
    %334 = arith.mulf %332, %333 : vector<64x128xf32>
    %cst_121 = arith.constant 4.471500e-02 : f32
    %335 = vector.broadcast %cst_121 : f32 to vector<64x128xf32>
    %336 = arith.mulf %335, %334 : vector<64x128xf32>
    %337 = arith.addf %332, %336 : vector<64x128xf32>
    %cst_122 = arith.constant 0.797884583 : f32
    %338 = vector.broadcast %cst_122 : f32 to vector<64x128xf32>
    %339 = arith.mulf %338, %337 : vector<64x128xf32>
    %340 = math.tanh %339 : vector<64x128xf32>
    %cst_123 = arith.constant 1.000000e+00 : f32
    %341 = vector.broadcast %cst_123 : f32 to vector<64x128xf32>
    %342 = arith.addf %341, %340 : vector<64x128xf32>
    %cst_124 = arith.constant 5.000000e-01 : f32
    %343 = vector.broadcast %cst_124 : f32 to vector<64x128xf32>
    %344 = arith.mulf %343, %342 : vector<64x128xf32>
    %345 = arith.mulf %332, %344 : vector<64x128xf32>
    %346 = arith.mulf %331, %345 : vector<64x128xf32>
    %c0_125 = arith.constant 0 : index
    %c0_126 = arith.constant 0 : index
    %347 = vector.load %arg23[%c0_125, %c0_126] : memref<128x32xbf16, #tpu.memory_space<vmem>>, vector<128x32xbf16>
    %348 = arith.truncf %346 : vector<64x128xf32> to vector<64x128xbf16>
    %cst_127 = arith.constant dense<0.000000e+00> : vector<64x32xf32>
    %349 = tpu.matmul %348, %347, %cst_127 {dimension_numbers = #tpu.dot_dimension_numbers<[1], [0], [0], [1], [0, 0, 1, 1], [], []>} : vector<64x128xbf16>, vector<128x32xbf16>, vector<64x32xf32> -> vector<64x32xf32>
    %c0_128 = arith.constant 0 : index
    %c0_129 = arith.constant 0 : index
    %350 = vector.load %arg24[%c0_128, %c0_129] : memref<1x32xf32, #tpu.memory_space<vmem>>, vector<1x32xf32>
    %351 = vector.broadcast %350 : vector<1x32xf32> to vector<64x32xf32>
    %352 = arith.addf %349, %351 : vector<64x32xf32>
    %353 = arith.addf %302, %352 : vector<64x32xf32>
    %c0_130 = arith.constant 0 : index
    %c0_131 = arith.constant 0 : index
    %354 = vector.load %arg25[%c0_130, %c0_131] : memref<32x32xbf16, #tpu.memory_space<vmem>>, vector<32x32xbf16>
    %355 = arith.truncf %353 : vector<64x32xf32> to vector<64x32xbf16>
    %cst_132 = arith.constant dense<0.000000e+00> : vector<64x32xf32>
    %356 = tpu.matmul %355, %354, %cst_132 {dimension_numbers = #tpu.dot_dimension_numbers<[1], [0], [0], [1], [0, 0, 1, 1], [], []>} : vector<64x32xbf16>, vector<32x32xbf16>, vector<64x32xf32> -> vector<64x32xf32>
    %c0_133 = arith.constant 0 : index
    %c0_134 = arith.constant 0 : index
    %357 = vector.load %arg26[%c0_133, %c0_134] : memref<1x32xf32, #tpu.memory_space<vmem>>, vector<1x32xf32>
    %358 = vector.broadcast %357 : vector<1x32xf32> to vector<64x32xf32>
    %359 = arith.addf %356, %358 : vector<64x32xf32>
    %360 = arith.addf %359, %1 : vector<64x32xf32>
    %c0_135 = arith.constant 0 : index
    %c0_136 = arith.constant 0 : index
    %c0_137 = arith.constant 0 : index
    %361 = vector.load %arg27[%c0_135, %c0_136, %c0_137] : memref<1x64x32xf32, #tpu.memory_space<vmem>>, vector<1x64x32xf32>
    %362 = vector.shape_cast %361 : vector<1x64x32xf32> to vector<64x32xf32>
    %363 = vector.shape_cast %360 : vector<64x32xf32> to vector<1x64x32xf32>
    tpu.vector_store %arg27[%c0_135, %c0_136, %c0_137], %363 {strides = array<i32>} : memref<1x64x32xf32, #tpu.memory_space<vmem>>, vector<1x64x32xf32>,
    return
  }
  func.func @transform_0(%arg0: i32) -> (i32, i32, i32) {
    %c0_i32 = arith.constant 0 : i32
    %c0_i32_0 = arith.constant 0 : i32
    %c0_i32_1 = arith.constant 0 : i32
    return %arg0, %c0_i32, %c0_i32_0 : i32, i32, i32
  }
  func.func @transform_1(%arg0: i32) -> (i32, i32, i32) {
    %c0_i32 = arith.constant 0 : i32
    %c0_i32_0 = arith.constant 0 : i32
    %c0_i32_1 = arith.constant 0 : i32
    return %arg0, %c0_i32, %c0_i32_0 : i32, i32, i32
  }
  func.func @transform_2(%arg0: i32) -> (i32, i32) {
    %c0_i32 = arith.constant 0 : i32
    %c0_i32_0 = arith.constant 0 : i32
    %c0_i32_1 = arith.constant 0 : i32
    return %c0_i32, %c0_i32_0 : i32, i32
  }
  func.func @transform_3(%arg0: i32) -> (i32, i32) {
    %c0_i32 = arith.constant 0 : i32
    %c0_i32_0 = arith.constant 0 : i32
    %c0_i32_1 = arith.constant 0 : i32
    return %c0_i32, %c0_i32_0 : i32, i32
  }
  func.func @transform_4(%arg0: i32) -> (i32, i32) {
    %c0_i32 = arith.constant 0 : i32
    %c0_i32_0 = arith.constant 0 : i32
    %c0_i32_1 = arith.constant 0 : i32
    return %c0_i32, %c0_i32_0 : i32, i32
  }
  func.func @transform_5(%arg0: i32) -> (i32, i32) {
    %c0_i32 = arith.constant 0 : i32
    %c0_i32_0 = arith.constant 0 : i32
    %c0_i32_1 = arith.constant 0 : i32
    return %c0_i32, %c0_i32_0 : i32, i32
  }
  func.func @transform_6(%arg0: i32) -> (i32, i32) {
    %c0_i32 = arith.constant 0 : i32
    %c0_i32_0 = arith.constant 0 : i32
    %c0_i32_1 = arith.constant 0 : i32
    return %c0_i32, %c0_i32_0 : i32, i32
  }
  func.func @transform_7(%arg0: i32) -> (i32, i32) {
    %c0_i32 = arith.constant 0 : i32
    %c0_i32_0 = arith.constant 0 : i32
    %c0_i32_1 = arith.constant 0 : i32
    return %c0_i32, %c0_i32_0 : i32, i32
  }
  func.func @transform_8(%arg0: i32) -> (i32, i32) {
    %c0_i32 = arith.constant 0 : i32
    %c0_i32_0 = arith.constant 0 : i32
    %c0_i32_1 = arith.constant 0 : i32
    return %c0_i32, %c0_i32_0 : i32, i32
  }
  func.func @transform_9(%arg0: i32) -> (i32, i32) {
    %c0_i32 = arith.constant 0 : i32
    %c0_i32_0 = arith.constant 0 : i32
    %c0_i32_1 = arith.constant 0 : i32
    return %c0_i32, %c0_i32_0 : i32, i32
  }
  func.func @transform_10(%arg0: i32) -> (i32, i32) {
    %c0_i32 = arith.constant 0 : i32
    %c0_i32_0 = arith.constant 0 : i32
    %c0_i32_1 = arith.constant 0 : i32
    return %c0_i32, %c0_i32_0 : i32, i32
  }
  func.func @transform_11(%arg0: i32) -> (i32, i32) {
    %c0_i32 = arith.constant 0 : i32
    %c0_i32_0 = arith.constant 0 : i32
    %c0_i32_1 = arith.constant 0 : i32
    return %c0_i32, %c0_i32_0 : i32, i32
  }
  func.func @transform_12(%arg0: i32) -> (i32, i32) {
    %c0_i32 = arith.constant 0 : i32
    %c0_i32_0 = arith.constant 0 : i32
    %c0_i32_1 = arith.constant 0 : i32
    return %c0_i32, %c0_i32_0 : i32, i32
  }
  func.func @transform_13(%arg0: i32) -> (i32, i32) {
    %c0_i32 = arith.constant 0 : i32
    %c0_i32_0 = arith.constant 0 : i32
    %c0_i32_1 = arith.constant 0 : i32
    return %c0_i32, %c0_i32_0 : i32, i32
  }
  func.func @transform_14(%arg0: i32) -> (i32, i32) {
    %c0_i32 = arith.constant 0 : i32
    %c0_i32_0 = arith.constant 0 : i32
    %c0_i32_1 = arith.constant 0 : i32
    return %c0_i32, %c0_i32_0 : i32, i32
  }
  func.func @transform_15(%arg0: i32) -> (i32, i32) {
    %c0_i32 = arith.constant 0 : i32
    %c0_i32_0 = arith.constant 0 : i32
    %c0_i32_1 = arith.constant 0 : i32
    return %c0_i32, %c0_i32_0 : i32, i32
  }
  func.func @transform_16(%arg0: i32) -> (i32, i32) {
    %c0_i32 = arith.constant 0 : i32
    %c0_i32_0 = arith.constant 0 : i32
    %c0_i32_1 = arith.constant 0 : i32
    return %c0_i32, %c0_i32_0 : i32, i32
  }
  func.func @transform_17(%arg0: i32) -> (i32, i32) {
    %c0_i32 = arith.constant 0 : i32
    %c0_i32_0 = arith.constant 0 : i32
    %c0_i32_1 = arith.constant 0 : i32
    return %c0_i32, %c0_i32_0 : i32, i32
  }
  func.func @transform_18(%arg0: i32) -> (i32, i32) {
    %c0_i32 = arith.constant 0 : i32
    %c0_i32_0 = arith.constant 0 : i32
    %c0_i32_1 = arith.constant 0 : i32
    return %c0_i32, %c0_i32_0 : i32, i32
  }
  func.func @transform_19(%arg0: i32) -> (i32, i32) {
    %c0_i32 = arith.constant 0 : i32
    %c0_i32_0 = arith.constant 0 : i32
    %c0_i32_1 = arith.constant 0 : i32
    return %c0_i32, %c0_i32_0 : i32, i32
  }
  func.func @transform_20(%arg0: i32) -> (i32, i32) {
    %c0_i32 = arith.constant 0 : i32
    %c0_i32_0 = arith.constant 0 : i32
    %c0_i32_1 = arith.constant 0 : i32
    return %c0_i32, %c0_i32_0 : i32, i32
  }
  func.func @transform_21(%arg0: i32) -> (i32, i32) {
    %c0_i32 = arith.constant 0 : i32
    %c0_i32_0 = arith.constant 0 : i32
    %c0_i32_1 = arith.constant 0 : i32
    return %c0_i32, %c0_i32_0 : i32, i32
  }
  func.func @transform_22(%arg0: i32) -> (i32, i32) {
    %c0_i32 = arith.constant 0 : i32
    %c0_i32_0 = arith.constant 0 : i32
    %c0_i32_1 = arith.constant 0 : i32
    return %c0_i32, %c0_i32_0 : i32, i32
  }
  func.func @transform_23(%arg0: i32) -> (i32, i32) {
    %c0_i32 = arith.constant 0 : i32
    %c0_i32_0 = arith.constant 0 : i32
    %c0_i32_1 = arith.constant 0 : i32
    return %c0_i32, %c0_i32_0 : i32, i32
  }
  func.func @transform_24(%arg0: i32) -> (i32, i32) {
    %c0_i32 = arith.constant 0 : i32
    %c0_i32_0 = arith.constant 0 : i32
    %c0_i32_1 = arith.constant 0 : i32
    return %c0_i32, %c0_i32_0 : i32, i32
  }
  func.func @transform_25(%arg0: i32) -> (i32, i32) {
    %c0_i32 = arith.constant 0 : i32
    %c0_i32_0 = arith.constant 0 : i32
    %c0_i32_1 = arith.constant 0 : i32
    return %c0_i32, %c0_i32_0 : i32, i32
  }
  func.func @transform_26(%arg0: i32) -> (i32, i32, i32) {
    %c0_i32 = arith.constant 0 : i32
    %c0_i32_0 = arith.constant 0 : i32
    %c0_i32_1 = arith.constant 0 : i32
    return %arg0, %c0_i32, %c0_i32_0 : i32, i32, i32
  }
}

</mosaic_0001>

<bundles_post_ra>
// kernel: cross_attn_up_block_2d.4
= control target key start
LH: loop header
LB: loop body
LE: loop exit
PB: predicated region body
PF: predicated region fallthrough
CT: control target
= control target key end

     0   :  { %s6984_s27 = smov 0   ;;  %s8484_s0 = inlined_call_operand.vmem [shape: f32[2,64,32], index: 0, kind: input, shape index: {}]   ;;  %s8485_s1 = inlined_call_operand.vmem [shape: f32[2,8,64], index: 1, kind: input, shape index: {}]   ;;  %s8486_s2 = inlined_call_operand.vmem [shape: f32[32,8], index: 2, kind: input, shape index: {}]   ;;  %s8487_s3 = inlined_call_operand.vmem [shape: f32[1,32], index: 3, kind: input, shape index: {}]   ;;  %s8488_s4 = inlined_call_operand.vmem [shape: f32[1,32], index: 4, kind: input, shape index: {}]   ;;  %s8489_s5 = inlined_call_operand.vmem [shape: bf16[32,32], index: 5, kind: input, shape index: {}]   ;;  %s8490_s6 = inlined_call_operand.vmem [shape: f32[1,32], index: 6, kind: input, shape index: {}]   ;;  %s8491_s7 = inlined_call_operand.vmem [shape: f32[1,32], index: 7, kind: input, shape index: {}]   ;;  %s8492_s8 = inlined_call_operand.vmem [shape: f32[1,32], index: 8, kind: input, shape index: {}]   ;;  %s8493_s9 = inlined_call_operand.vmem [shape: bf16[32,96], index: 9, kind: input, shape index: {}]   ;;  %s8494_s10 = inlined_call_operand.vmem [shape: bf16[32,32], index: 10, kind: input, shape index: {}]   ;;  %s8495_s11 = inlined_call_operand.vmem [shape: f32[1,32], index: 11, kind: input, shape index: {}]   ;;  %s8496_s12 = inlined_call_operand.vmem [shape: f32[1,32], index: 12, kind: input, shape index: {}]   ;;  %s8497_s13 = inlined_call_operand.vmem [shape: f32[1,32], index: 13, kind: input, shape index: {}]   ;;  %s8498_s14 = inlined_call_operand.vmem [shape: bf16[32,32], index: 14, kind: input, shape index: {}]   ;;  %s8499_s15 = inlined_call_operand.vmem [shape: bf16[64,64], index: 15, kind: input, shape index: {}]   ;;  %s8500_s16 = inlined_call_operand.vmem [shape: bf16[32,32], index: 16, kind: input, shape index: {}]   ;;  %s8501_s17 = inlined_call_operand.vmem [shape: f32[1,32], index: 17, kind: input, shape index: {}]   ;;  %s8502_s18 = inlined_call_operand.vmem [shape: f32[1,32], index: 18, kind: input, shape index: {}]   ;;  %s8503_s19 = inlined_call_operand.vmem [shape: f32[1,32], index: 19, kind: input, shape index: {}]   ;;  %s8504_s20 = inlined_call_operand.vmem [shape: bf16[32,256], index: 20, kind: input, shape index: {}]   ;;  %s8505_s21 = inlined_call_operand.vmem [shape: f32[1,256], index: 21, kind: input, shape index: {}]   ;;  %s8506_s22 = inlined_call_operand.vmem [shape: bf16[128,32], index: 22, kind: input, shape index: {}]   ;;  %s8507_s23 = inlined_call_operand.vmem [shape: f32[1,32], index: 23, kind: input, shape index: {}]   ;;  %s8508_s24 = inlined_call_operand.vmem [shape: bf16[32,32], index: 24, kind: input, shape index: {}]   ;;  %s8509_s25 = inlined_call_operand.vmem [shape: f32[1,32], index: 25, kind: input, shape index: {}]   ;;  %s8510_s26 = inlined_call_operand.vmem [shape: f32[2,64,32], index: 26, kind: output, shape index: {}]  }
   0x1   :  { %8527 = sst [smem:[#allocation2_spill]] %s8484_s0 }
   0x2   :  { %8528 = sst [smem:[#allocation3_spill]] %s8485_s1 }
   0x3   :  { %8529 = sst [smem:[#allocation4_spill]] %s8486_s2 }
   0x4   :  { %8530 = sst [smem:[#allocation5_spill]] %s8487_s3 }
   0x5   :  { %8531 = sst [smem:[#allocation6_spill]] %s8488_s4 }
   0x6   :  { %8532 = sst [smem:[#allocation7_spill]] %s8489_s5 }
   0x7   :  { %8533 = sst [smem:[#allocation8_spill]] %s8490_s6 }
   0x8   :  { %8534 = sst [smem:[#allocation9_spill]] %s8491_s7 }
   0x9   :  { %8535 = sst [smem:[#allocation10_spill]] %s8492_s8 }
   0xa   :  { %8536 = sst [smem:[#allocation11_spill]] %s8493_s9 }
   0xb   :  { %8537 = sst [smem:[#allocation12_spill]] %s8494_s10 }
   0xc LB: > { %s5538_s3 = sadd.s32 4294967295, %s6832_s27   ;;  %p5542_p0 = scmp.ge.s32.totalorder %s6832_s27, 1  ;;  %s6832_s27 = sphi %s6984_s27, %s36_s27  }
   0xd   : > { %p721_p1 = scmp.lt.s32.totalorder %s6832_s27, 3 }
   0xf   : > { %p722_p2 = pnand %p5542_p0, %p721_p1 }
  0x10   : > { %s8538_s8 = sld [smem:[#allocation4_spill]] (!%p722_p2)  ;;  %v6834_v3 = vmov (!%p722_p2), 0.0|0.0   ;;  %vm6835_vm0 = vmmov (!%p722_p2), 0   ;;  %v6836_v6 = vmov (!%p722_p2), 0.0   ;;  %p795_p3 = scmp.lt.s32.totalorder (!%p722_p2), %s5538_s3, 1  ;;  %vm921_vm1 = vcmask (!%p722_p2), 64512  }
  0x11   : > { %725 = sbr.rel (%p722_p2) target bundleno = 7974 (0x1f26), region = 124  ;;  %6339 = vmatprep.subr.bf16.mxu0 (!%p722_p2), %v6834_v3  ;;  %5931 = vmatprep.mubr.msk.f32.mxu0 (!%p722_p2), %vm6835_vm0, %v6836_v6  ;;  %vm825_vm2 = vcmask (!%p722_p2), 261120   ;;  %vm7012_vm3 = vmpackc.low (!%p722_p2), %vm921_vm1, %vm921_vm1  ;;  %s8541_s1 = sld [smem:[#allocation2_spill]] (!%p722_p2)  ;;  %v1007_v41 = vlaneseq (!%p722_p2)  ;;  %vm1695_vm4 = vcmask (!%p722_p2), 523264   ;;  %vm2187_vm5 = vcmask (!%p722_p2), 1043456  }
  0x12   : > { %6345 = vmatprep.subr.bf16.mxu1 (!%p722_p2), %v6834_v3  ;;  %5942 = vmatprep.mubr.msk.f32.mxu1 (!%p722_p2), %vm6835_vm0, %v6836_v6  ;;  %s8542_s29 = sld [smem:[#allocation7_spill]] (!%p722_p2)  ;;  %s8543_s10 = sld [smem:[#allocation5_spill]] (!%p722_p2) }
  0x13   : > { %v7065_v42 = vshrl.u32 (!%p722_p2), %v1007_v41, 7  ;;  %s8544_s28 = sld [smem:[#allocation6_spill]] (!%p722_p2)  ;;  %s8545_s9 = sld [smem:[#allocation8_spill]] (!%p722_p2) }
  0x14   : > { %s8547_s0 = sld [smem:[#allocation9_spill]] (!%p722_p2)  ;;  %s8548_s2 = sld [smem:[#allocation10_spill]] (!%p722_p2) }
  0x15   : > { %v7068_v43 = vsub.s32 (!%p722_p2), 0, %v7065_v42  ;;  %s8523_s6 = smov (!%p722_p2), 96   ;;  %s8524_s4 = smov (!%p722_p2), 120  }
  0x16   : > { %v821_v0 = vld [vmem:[%s8538_s8] sm:$0xff] (!%p722_p2)  ;;  %v822_v1 = vld [vmem:[%s8538_s8 + $0x8] sm:$0xff] (!%p722_p2)  ;;  %v823_v2 = vld [vmem:[%s8538_s8 + $0x10] sm:$0xff] (!%p722_p2)  ;;  %s6843_s30 = smov (!%p722_p2), 56  }
  0x17   : > { %v7002_v4 = vpack.c.bf16 (!%p722_p2), %v822_v1, %v821_v0  ;;  %v824_v5 = vld [vmem:[%s8538_s8 + $0x18] sm:$0xff] (!%p722_p2) }
  0x18   : > { %v7019_v8 = vpack.c.bf16 %v824_v5, %v823_v2  ;;  %s8560_s3 = smov (!%p795_p3, %s5538_s3), 1 }
  0x19   : > { %6341 = vmatpush3.bf16.msra.mxu0 %v7002_v4  ;;  %6348 = vmatpush3.bf16.xpose.msk.msra.mxu1 %vm7012_vm3, %v7002_v4  ;;  %s8515_s5 = sshll.u32 %s8560_s3, 6 }
  0x1a   : > { %6342 = vmatprep.subr.bf16.mxu0 %v6834_v3  ;;  %6349 = vmatprep.subr.bf16.mxu1 %v6834_v3  ;;  %s7034_s7 = scalar_lea.vmem %s8541_s1, %s8515_s5  ;;  %s6838_s1 = smov 64  }
  0x1b   : > { %v810_v9 = vld [vmem:[%s7034_s7] sm:$0xff]  ;;  %v811_v10 = vld [vmem:[%s7034_s7 + $0x8] sm:$0xff]  ;;  %v812_v11 = vld [vmem:[%s7034_s7 + $0x10] sm:$0xff] }
  0x1c   : > { %v813_v12 = vld [vmem:[%s7034_s7 + $0x18] sm:$0xff]  ;;  %v814_v13 = vld [vmem:[%s7034_s7 + $0x20] sm:$0xff]  ;;  %v815_v14 = vld [vmem:[%s7034_s7 + $0x28] sm:$0xff]  ;;  %v826_v15 = vsel %vm825_vm2, %v810_v9, 0.0  ;;  %v827_v16 = vsel %vm825_vm2, %v811_v10, 0.0  ;;  %v829_v17 = vsel %vm825_vm2, %v812_v11, 0.0 }
  0x1d   : > { %6344 = vmatpush3.bf16.msra.mxu0 %v7019_v8  ;;  %v816_v18 = vld [vmem:[%s7034_s7 + $0x30] sm:$0xff]  ;;  %v817_v19 = vld [vmem:[%s7034_s7 + $0x38] sm:$0xff]  ;;  %v828_v20 = vadd.f32 %v827_v16, %v826_v15  ;;  %v831_v21 = vsel %vm825_vm2, %v813_v12, 0.0  ;;  %v833_v22 = vsel %vm825_vm2, %v814_v13, 0.0  ;;  %v835_v23 = vsel %vm825_vm2, %v815_v14, 0.0 }
  0x1e   : > { %6353 = vmatprep.subr.bf16.mxu0 %v6834_v3  ;;  %v837_v24 = vsel %vm825_vm2, %v816_v18, 0.0  ;;  %v839_v26 = vsel %vm825_vm2, %v817_v19, 0.0 }
  0x1f   : > { %v830_v25 = vadd.f32 %v829_v17, %v828_v20 }
  0x21   : > { %6352 = vmatpush3.bf16.xpose.msk.msra.mxu1 %vm7012_vm3, %v7019_v8  ;;  %v832_v27 = vadd.f32 %v831_v21, %v830_v25 }
  0x23   : > { %v834_v28 = vadd.f32 %v833_v22, %v832_v27 }
  0x25   : > { %v836_v29 = vadd.f32 %v835_v23, %v834_v28 }
  0x27   : > { %v838_v30 = vadd.f32 %v837_v24, %v836_v29 }
  0x29   : > { %v840_v31 = vadd.f32 %v839_v26, %v838_v30 }
  0x2b   : > { %v841_v32 = vrot.slane %v840_v31, 4 }
  0x2d   : > { %v842_v33 = vadd.f32 %v841_v32, %v840_v31  ;;  %v5560_v31 = vld [vmem:[%s8543_s10] ss:$0 sm:$0xff]  ;;  %s8546_s10 = sld [smem:[#allocation11_spill]] }
  0x2f   : > { %v843_v34 = vrot.slane %v842_v33, 2 }
  0x31   : > { %v844_v35 = vadd.f32 %v843_v34, %v842_v33 }
  0x33   : > { %v845_v36 = vrot.slane %v844_v35, 1 }
  0x35   : > { %v846_v37 = vadd.f32 %v845_v36, %v844_v35  ;;  %v5561_v36 = vld [vmem:[%s8544_s28] ss:$0 sm:$0xff]  ;;  %s8520_s28 = smov 88  }
  0x37   : > { %5932 = vmatmul.mubr.msk.f32.vlgmr.msra.gmra.mrb[0].mxu0 %vm825_vm2, %v846_v37 }
  0x38   : > { %6355 = vmatpush3.bf16.msra.mxu0 %v7002_v4  ;;  %5953 = vmatprep.mubr.msk.f32.mxu0 %vm6835_vm0, %v6836_v6 }
  0x39   : > { %6356 = vmatprep.subr.bf16.mxu0 %v6834_v3 }
  0x3c   : > { %6358 = vmatpush3.bf16.msra.mxu0 %v7019_v8 }
  0x3d   : > { %6359 = vmatprep.subr.bf16.mxu0 %v6834_v3 }
 0x10a   : > { %v916_v38 = vpop.f32.mrb[0].mxu0 }
 0x10b   : > { %v920_v39 = vmul.f32 0.00390625, %v916_v38  ;;  %v5933_v40 = vpop.f32.mrb[1].mxu0 }
 0x10d   : > { %5943 = vmatmul.mubr.msk.f32.vlgmr.msra.gmra.mrb[0].mxu1 %vm921_vm1, %v920_v39 }
 0x1e0   : > { %v1003_v44 = vpop.f32.mrb[0].mxu1 }
 0x1e1   : > { %v1010_v45 = vrot.slane %v1003_v44, %v7068_v43  ;;  %v5944_v46 = vpop.f32.mrb[1].mxu1 }
 0x1e3   : > { %v1011_v47 = vsub.f32 %v810_v9, %v1010_v45  ;;  %v1012_v48 = vsub.f32 %v811_v10, %v1010_v45  ;;  %v1013_v49 = vsub.f32 %v812_v11, %v1010_v45  ;;  %v1014_v50 = vsub.f32 %v813_v12, %v1010_v45 }
 0x1e4   : > { %v1015_v51 = vsub.f32 %v814_v13, %v1010_v45  ;;  %v1016_v55 = vsub.f32 %v815_v14, %v1010_v45  ;;  %v1017_v60 = vsub.f32 %v816_v18, %v1010_v45  ;;  %v1018_v0 = vsub.f32 %v817_v19, %v1010_v45 }
 0x1e5   : > { %v1019_v52 = vmul.f32 %v1011_v47, %v1011_v47  ;;  %v1020_v53 = vmul.f32 %v1012_v48, %v1012_v48  ;;  %v1021_v54 = vmul.f32 %v1013_v49, %v1013_v49  ;;  %v1022_v56 = vmul.f32 %v1014_v50, %v1014_v50 }
 0x1e6   : > { %v1023_v61 = vmul.f32 %v1015_v51, %v1015_v51  ;;  %v1024_v1 = vmul.f32 %v1016_v55, %v1016_v55  ;;  %v1025_v9 = vmul.f32 %v1017_v60, %v1017_v60  ;;  %v1026_v12 = vmul.f32 %v1018_v0, %v1018_v0 }
 0x1e7   : > { %v1027_v57 = vsel %vm825_vm2, %v1019_v52, 0.0  ;;  %v1028_v58 = vsel %vm825_vm2, %v1020_v53, 0.0  ;;  %v1030_v62 = vsel %vm825_vm2, %v1021_v54, 0.0  ;;  %v1032_v2 = vsel %vm825_vm2, %v1022_v56, 0.0 }
 0x1e8   : > { %v1029_v59 = vadd.f32 %v1028_v58, %v1027_v57  ;;  %v1034_v10 = vsel %vm825_vm2, %v1023_v61, 0.0  ;;  %v1036_v13 = vsel %vm825_vm2, %v1024_v1, 0.0  ;;  %v1038_v15 = vsel %vm825_vm2, %v1025_v9, 0.0 }
 0x1e9   : > { %v1040_v17 = vsel %vm825_vm2, %v1026_v12, 0.0 }
 0x1ea   : > { %v1031_v63 = vadd.f32 %v1030_v62, %v1029_v59 }
 0x1ec   : > { %v1033_v5 = vadd.f32 %v1032_v2, %v1031_v63  ;;  %v5562_v63 = vld [vmem:[%s8545_s9] ss:$0 sm:$0xff]  ;;  %s8521_s9 = smov 112  }
 0x1ee   : > { %v1035_v11 = vadd.f32 %v1034_v10, %v1033_v5 }
 0x1f0   : > { %v1037_v14 = vadd.f32 %v1036_v13, %v1035_v11 }
 0x1f2   : > { %v1039_v16 = vadd.f32 %v1038_v15, %v1037_v14 }
 0x1f4   : > { %v1041_v18 = vadd.f32 %v1040_v17, %v1039_v16 }
 0x1f6   : > { %v1042_v20 = vrot.slane %v1041_v18, 4 }
 0x1f8   : > { %v1043_v19 = vadd.f32 %v1042_v20, %v1041_v18 }
 0x1fa   : > { %v1044_v21 = vrot.slane %v1043_v19, 2 }
 0x1fc   : > { %v1045_v22 = vadd.f32 %v1044_v21, %v1043_v19 }
 0x1fe   : > { %v1046_v23 = vrot.slane %v1045_v22, 1 }
 0x200   : > { %v1047_v24 = vadd.f32 %v1046_v23, %v1045_v22 }
 0x202   : > { %5954 = vmatmul.mubr.msk.f32.vlgmr.msra.gmra.mrb[2].mxu0 %vm825_vm2, %v1047_v24 }
 0x203   : > { %6362 = vmatpush3.bf16.xpose.msk.msra.mxu0 %vm7012_vm3, %v7002_v4  ;;  %5964 = vmatprep.mubr.msk.f32.mxu0 %vm6835_vm0, %v6836_v6  ;;  %v6470_v4 = vld [vmem:[%s8542_s29] sm:$0xff]  }
 0x204   : > { %6363 = vmatprep.subr.bf16.mxu0 %v6834_v3  ;;  %v6471_v3 = vld [vmem:[%s8542_s29 + $0x8] sm:$0xff]   ;;  %5967 = vmatprep.subr.bf16.mxu1 %v6470_v4 }
 0x205   : > { %5968 = vmatpush3.bf16.msra.mxu1 %v6470_v4 }
 0x206   : > { %5969 = vmatprep.subr.bf16.mxu1 %v6471_v3 }
 0x209   : > { %5970 = vmatpush3.bf16.msra.mxu1 %v6471_v3 }
 0x20b   : > { %6366 = vmatpush3.bf16.xpose.msk.msra.mxu0 %vm7012_vm3, %v7019_v8 }
 0x2d5   : > { %v1117_v25 = vpop.f32.mrb[2].mxu0 }
 0x2d6   : > { %v1121_v26 = vmul.f32 0.00390625, %v1117_v25  ;;  %v5955_v27 = vpop.f32.mrb[3].mxu0 }
 0x2d8   : > { %v1122_v28 = vadd.f32 1e-06, %v1121_v26 }
 0x2da   : > { %6496 = vrsqrt.f32 %v1122_v28 }
 0x2e4   : > { %v6497_v29 = vpop.eup %6496 }
 0x2e5   : > { %5965 = vmatmul.mubr.msk.f32.vlgmr.msra.gmra.mrb[4].mxu0 %vm921_vm1, %v6497_v29 }
 0x3b8   : > { %v1193_v7 = vpop.f32.mrb[4].mxu0 }
 0x3b9   : > { %v1200_v8 = vrot.slane %v1193_v7, %v7068_v43  ;;  %v5966_v30 = vpop.f32.mrb[5].mxu0 }
 0x3bb   : > { %v1201_v32 = vmul.f32 %v1200_v8, %v1011_v47  ;;  %v1202_v33 = vmul.f32 %v1200_v8, %v1012_v48  ;;  %v1203_v34 = vmul.f32 %v1200_v8, %v1013_v49  ;;  %v1204_v35 = vmul.f32 %v1200_v8, %v1014_v50 }
 0x3bc   : > { %v1205_v37 = vmul.f32 %v1200_v8, %v1015_v51  ;;  %v1206_v38 = vmul.f32 %v1200_v8, %v1016_v55  ;;  %v1207_v52 = vmul.f32 %v1200_v8, %v1017_v60  ;;  %v1208_v53 = vmul.f32 %v1200_v8, %v1018_v0 }
 0x3bd   : > { %v1215_v39 = vmul.f32 %v5560_v31, %v1201_v32  ;;  %v1216_v40 = vmul.f32 %v5560_v31, %v1202_v33  ;;  %v1217_v41 = vmul.f32 %v5560_v31, %v1203_v34  ;;  %v1218_v44 = vmul.f32 %v5560_v31, %v1204_v35 }
 0x3be   : > { %v1219_v45 = vmul.f32 %v5560_v31, %v1205_v37  ;;  %v1220_v46 = vmul.f32 %v5560_v31, %v1206_v38  ;;  %v1221_v59 = vmul.f32 %v5560_v31, %v1207_v52  ;;  %v1222_v61 = vmul.f32 %v5560_v31, %v1208_v53 }
 0x3bf   : > { %v1229_v54 = vadd.f32 %v5561_v36, %v1215_v39  ;;  %v1230_v56 = vadd.f32 %v5561_v36, %v1216_v40  ;;  %v1231_v47 = vadd.f32 %v5561_v36, %v1217_v41  ;;  %v1232_v48 = vadd.f32 %v5561_v36, %v1218_v44 }
 0x3c0   : > { %v1233_v49 = vadd.f32 %v5561_v36, %v1219_v45  ;;  %v1234_v50 = vadd.f32 %v5561_v36, %v1220_v46  ;;  %v1235_v55 = vadd.f32 %v5561_v36, %v1221_v59  ;;  %v1236_v60 = vadd.f32 %v5561_v36, %v1222_v61 }
 0x3c1   : > { %v1241_v57 = vpack.c.bf16 %v1230_v56, %v1229_v54  ;;  %v1242_v58 = vpack.c.bf16 %v1232_v48, %v1231_v47 }
 0x3c2   : > { %v1243_v51 = vpack.c.bf16 %v1234_v50, %v1233_v49  ;;  %v1244_v62 = vpack.c.bf16 %v1236_v60, %v1235_v55 }
 0x3c3   : > { %5971 = vmatprep.mubr.msk.bf16.mxu1 %vm825_vm2, %v1241_v57 }
 0x3c4   : > { %5972 = vmatmul.mubr.msk.bf16.vlgmr.msra.gmra.mrb[4].mxu1 %vm825_vm2, %v1242_v58 }
 0x3c5   : > { %5975 = vmatprep.mubr.msk.bf16.mxu1 %vm825_vm2, %v1243_v51 }
 0x3cc   : > { %5976 = vmatmul.mubr.msk.bf16.gmra.mrb[8].mxu1 %vm825_vm2, %v1244_v62 }
 0x497   : > { %v5973_v0 = vpop.f32.mrb[4].mxu1 }
 0x498   : > { %v7110_v1 = vadd.f32 %v5973_v0, %v5562_v63  ;;  %v1310_v2 = vpop.f32.mrb[5].mxu1 }
 0x499   : > { %v7112_v5 = vadd.f32 %v5562_v63, %v1310_v2  ;;  %v5974_v9 = vpop.f32.mrb[6].mxu1 }
 0x49a   : > { %v7114_v10 = vadd.f32 %v5974_v9, %v5562_v63  ;;  %v1313_v11 = vpop.f32.mrb[7].mxu1  ;;  %v1349_v12 = vsel %vm825_vm2, %v7110_v1, 0.0 }
 0x49b   : > { %v7118_v13 = vadd.f32 %v5562_v63, %v1313_v11  ;;  %1350 = vadd.xlane.f32.xlu1 %v1349_v12  ;;  %v1343_v14 = vsel %vm825_vm2, %v7112_v5, 0.0  ;;  %v6472_v11 = vld [vmem:[%s8546_s10] sm:$0xff]   ;;  %v6473_v12 = vld [vmem:[%s8546_s10 + $0x8] sm:$0xff]  }
 0x49c   : > { %1344 = vadd.xlane.f32.xlu0 %v1343_v14  ;;  %v1352_v15 = vsel %vm825_vm2, %v7114_v10, 0.0  ;;  %5979 = vmatprep.subr.bf16.mxu0 %v6472_v11 }
 0x49d   : > { %v1346_v17 = vsel %vm825_vm2, %v7118_v13, 0.0  ;;  %5980 = vmatpush3.bf16.msra.mxu0 %v6472_v11 }
 0x49e   : > { %5981 = vmatprep.subr.bf16.mxu0 %v6473_v12 }
 0x49f   : > { %1353 = vadd.xlane.f32.xlu1 %v1352_v15  ;;  %v5977_v16 = vpop.f32.mrb[8].mxu1 }
 0x4a0   : > { %v1326_v18 = vpop.f32.mrb[9].mxu1  ;;  %1347 = vadd.xlane.f32.xlu0 %v1346_v17  ;;  %v7128_v22 = vadd.f32 %v5977_v16, %v5562_v63 }
 0x4a1   : > { %v7126_v20 = vadd.f32 %v5562_v63, %v1326_v18  ;;  %v5978_v19 = vpop.f32.mrb[10].mxu1  ;;  %5982 = vmatpush3.bf16.msra.mxu0 %v6473_v12 }
 0x4a2   : > { %v1329_v21 = vpop.f32.mrb[11].mxu1  ;;  %v7134_v25 = vadd.f32 %v5978_v19, %v5562_v63  ;;  %v1361_v27 = vsel %vm825_vm2, %v7128_v22, 0.0 }
 0x4a3   : > { %v7130_v23 = vadd.f32 %v5562_v63, %v1329_v21  ;;  %v1355_v24 = vsel %vm825_vm2, %v7126_v20, 0.0 }
 0x4a4   : > { %1356 = vadd.xlane.f32.xlu0 %v1355_v24  ;;  %v1364_v28 = vsel %vm825_vm2, %v7134_v25, 0.0 }
 0x4a5   : > { %v1358_v26 = vsel %vm825_vm2, %v7130_v23, 0.0 }
 0x4a6   : > { %1359 = vadd.xlane.f32.xlu1 %v1358_v26 }
 0x4a8   : > { %1362 = vadd.xlane.f32.xlu0 %v1361_v27 }
 0x4aa   : > { %1365 = vadd.xlane.f32.xlu1 %v1364_v28 }
 0x528   : > { %v1351_v29 = vpop.xlane.xlu1 %1350 }
 0x529   : > { %v1370_v4 = vmul.f32 0.03125, %v1351_v29  ;;  %v1345_v3 = vpop.xlane.xlu0 %1344 }
 0x52a   : > { %v1368_v7 = vmul.f32 0.03125, %v1345_v3 }
 0x52b   : > { %v7143_v8 = vsub.f32 %v7110_v1, %v1370_v4 }
 0x52c   : > { %v7146_v30 = vsub.f32 %v7112_v5, %v1368_v7  ;;  %v1354_v31 = vpop.xlane.xlu1 %1353 }
 0x52d   : > { %v1371_v32 = vmul.f32 0.03125, %v1354_v31  ;;  %v1348_v33 = vpop.xlane.xlu0 %1347  ;;  %v1386_v39 = vmul.f32 %v7143_v8, %v7143_v8 }
 0x52e   : > { %v1369_v34 = vmul.f32 0.03125, %v1348_v33  ;;  %v1384_v35 = vmul.f32 %v7146_v30, %v7146_v30 }
 0x52f   : > { %v7151_v36 = vsub.f32 %v7114_v10, %v1371_v32  ;;  %v1398_v54 = vsel %vm825_vm2, %v1386_v39, 0.0 }
 0x530   : > { %v7154_v37 = vsub.f32 %v7118_v13, %v1369_v34  ;;  %v1392_v38 = vsel %vm825_vm2, %v1384_v35, 0.0 }
 0x531   : > { %1393 = vadd.xlane.f32.xlu0 %v1392_v38  ;;  %v1357_v40 = vpop.xlane.xlu0 %1356  ;;  %v1387_v46 = vmul.f32 %v7151_v36, %v7151_v36 }
 0x532   : > { %v1372_v41 = vmul.f32 0.03125, %v1357_v40  ;;  %v1385_v44 = vmul.f32 %v7154_v37, %v7154_v37 }
 0x533   : > { %v1360_v45 = vpop.xlane.xlu1 %1359  ;;  %v1401_v58 = vsel %vm825_vm2, %v1387_v46, 0.0 }
 0x534   : > { %v7164_v52 = vsub.f32 %v7126_v20, %v1372_v41  ;;  %v1373_v53 = vmul.f32 0.03125, %v1360_v45  ;;  %v1395_v56 = vsel %vm825_vm2, %v1385_v44, 0.0  ;;  %v5569_v44 = vld [vmem:[%s8547_s0] ss:$0 sm:$0xff]  ;;  %s8517_s0 = smov 80  }
 0x535   : > { %1399 = vadd.xlane.f32.xlu0 %v1398_v54  ;;  %1396 = vadd.xlane.f32.xlu1 %v1395_v56  ;;  %v1363_v47 = vpop.xlane.xlu0 %1362 }
 0x536   : > { %v7169_v48 = vsub.f32 %v7130_v23, %v1373_v53  ;;  %v1374_v49 = vmul.f32 0.03125, %v1363_v47  ;;  %v1388_v50 = vmul.f32 %v7164_v52, %v7164_v52 }
 0x537   : > { %v1366_v57 = vpop.xlane.xlu1 %1365 }
 0x538   : > { %v7175_v59 = vsub.f32 %v7128_v22, %v1374_v49  ;;  %v1375_v61 = vmul.f32 0.03125, %v1366_v57  ;;  %v1404_v51 = vsel %vm825_vm2, %v1388_v50, 0.0  ;;  %v1389_v55 = vmul.f32 %v7169_v48, %v7169_v48 }
 0x539   : > { %1402 = vadd.xlane.f32.xlu1 %v1401_v58  ;;  %1405 = vadd.xlane.f32.xlu0 %v1404_v51 }
 0x53a   : > { %v7181_v60 = vsub.f32 %v7134_v25, %v1375_v61  ;;  %v1390_v62 = vmul.f32 %v7175_v59, %v7175_v59  ;;  %v1407_v63 = vsel %vm825_vm2, %v1389_v55, 0.0 }
 0x53c   : > { %v1410_v0 = vsel %vm825_vm2, %v1390_v62, 0.0  ;;  %v1391_v2 = vmul.f32 %v7181_v60, %v7181_v60 }
 0x53d   : > { %1408 = vadd.xlane.f32.xlu1 %v1407_v63  ;;  %1411 = vadd.xlane.f32.xlu0 %v1410_v0 }
 0x53e   : > { %v1413_v9 = vsel %vm825_vm2, %v1391_v2, 0.0 }
 0x541   : > { %1414 = vadd.xlane.f32.xlu1 %v1413_v9 }
 0x5be   : > { %v1394_v14 = vpop.xlane.xlu0 %1393 }
 0x5bf   : > { %v1416_v15 = vmul.f32 0.03125, %v1394_v14 }
 0x5c1   : > { %v1424_v16 = vadd.f32 1e-05, %v1416_v15 }
 0x5c2   : > { %v1397_v17 = vpop.xlane.xlu1 %1396  ;;  %v1400_v18 = vpop.xlane.xlu0 %1399 }
 0x5c3   : > { %6498 = vrsqrt.f32 %v1424_v16  ;;  %v1417_v19 = vmul.f32 0.03125, %v1397_v17  ;;  %v1418_v21 = vmul.f32 0.03125, %v1400_v18 }
 0x5c5   : > { %v1425_v24 = vadd.f32 1e-05, %v1417_v19  ;;  %v1426_v26 = vadd.f32 1e-05, %v1418_v21 }
 0x5c6   : > { %v1403_v27 = vpop.xlane.xlu1 %1402  ;;  %v1406_v28 = vpop.xlane.xlu0 %1405 }
 0x5c7   : > { %6500 = vrsqrt.f32 %v1425_v24  ;;  %v1419_v29 = vmul.f32 0.03125, %v1403_v27  ;;  %v1420_v4 = vmul.f32 0.03125, %v1406_v28 }
 0x5c8   : > { %6502 = vrsqrt.f32 %v1426_v26 }
 0x5c9   : > { %v1427_v3 = vadd.f32 1e-05, %v1419_v29  ;;  %v1428_v7 = vadd.f32 1e-05, %v1420_v4 }
 0x5ca   : > { %v1409_v31 = vpop.xlane.xlu1 %1408  ;;  %v1412_v32 = vpop.xlane.xlu0 %1411 }
 0x5cb   : > { %6504 = vrsqrt.f32 %v1427_v3  ;;  %v1421_v33 = vmul.f32 0.03125, %v1409_v31  ;;  %v1422_v34 = vmul.f32 0.03125, %v1412_v32 }
 0x5cc   : > { %6506 = vrsqrt.f32 %v1428_v7 }
 0x5cd   : > { %v6499_v35 = vpop.eup %6498  ;;  %v1429_v38 = vadd.f32 1e-05, %v1421_v33  ;;  %v1430_v39 = vadd.f32 1e-05, %v1422_v34 }
 0x5ce   : > { %v1415_v40 = vpop.xlane.xlu1 %1414  ;;  %v1440_v41 = vmul.f32 %v6499_v35, %v7146_v30  ;;  %v5570_v30 = vld [vmem:[%s8548_s2] ss:$0 sm:$0xff]  ;;  %s8516_s2 = smov 72  }
 0x5cf   : > { %6508 = vrsqrt.f32 %v1429_v38  ;;  %v1423_v45 = vmul.f32 0.03125, %v1415_v40 }
 0x5d0   : > { %6510 = vrsqrt.f32 %v1430_v39  ;;  %v1454_v47 = vmul.f32 %v5569_v44, %v1440_v41 }
 0x5d1   : > { %v6501_v46 = vpop.eup %6500  ;;  %v1431_v53 = vadd.f32 1e-05, %v1423_v45 }
 0x5d2   : > { %v6503_v54 = vpop.eup %6502  ;;  %v1441_v56 = vmul.f32 %v6501_v46, %v7154_v37  ;;  %v1468_v55 = vadd.f32 %v5570_v30, %v1454_v47 }
 0x5d3   : > { %v1442_v49 = vmul.f32 %v6503_v54, %v7143_v8  ;;  %6512 = vrsqrt.f32 %v1431_v53 }
 0x5d4   : > { %v1455_v50 = vmul.f32 %v5569_v44, %v1441_v56 }
 0x5d5   : > { %v6505_v57 = vpop.eup %6504  ;;  %v1456_v61 = vmul.f32 %v5569_v44, %v1442_v49 }
 0x5d6   : > { %v6507_v58 = vpop.eup %6506  ;;  %v1443_v51 = vmul.f32 %v6505_v57, %v7151_v36  ;;  %v1469_v62 = vadd.f32 %v5570_v30, %v1455_v50 }
 0x5d7   : > { %v1444_v63 = vmul.f32 %v6507_v58, %v7164_v52  ;;  %v1470_v8 = vadd.f32 %v5570_v30, %v1456_v61 }
 0x5d8   : > { %v1457_v0 = vmul.f32 %v5569_v44, %v1443_v51  ;;  %v1480_v37 = vpack.c.bf16 %v1469_v62, %v1468_v55 }
 0x5d9   : > { %v6509_v2 = vpop.eup %6508  ;;  %v1458_v14 = vmul.f32 %v5569_v44, %v1444_v63 }
 0x5da   : > { %v6511_v9 = vpop.eup %6510  ;;  %5983 = vmatprep.mubr.msk.bf16.mxu0 %vm825_vm2, %v1480_v37  ;;  %v1471_v11 = vadd.f32 %v5570_v30, %v1457_v0  ;;  %v1445_v12 = vmul.f32 %v6509_v2, %v7169_v48 }
 0x5db   : > { %v1446_v15 = vmul.f32 %v6511_v9, %v7175_v59  ;;  %v1472_v18 = vadd.f32 %v5570_v30, %v1458_v14 }
 0x5dc   : > { %v1481_v16 = vpack.c.bf16 %v1471_v11, %v1470_v8  ;;  %v1459_v17 = vmul.f32 %v5569_v44, %v1445_v12 }
 0x5dd   : > { %v6513_v36 = vpop.eup %6512  ;;  %v1460_v21 = vmul.f32 %v5569_v44, %v1446_v15 }
 0x5de   : > { %5984 = vmatmul.mubr.msk.bf16.vlgmr.msra.gmra.mrb[8].mxu0 %vm825_vm2, %v1481_v16  ;;  %v1473_v52 = vadd.f32 %v5570_v30, %v1459_v17  ;;  %v1447_v19 = vmul.f32 %v6513_v36, %v7181_v60 }
 0x5df   : > { %v1474_v27 = vadd.f32 %v5570_v30, %v1460_v21 }
 0x5e0   : > { %v1482_v24 = vpack.c.bf16 %v1473_v52, %v1472_v18  ;;  %v1461_v26 = vmul.f32 %v5569_v44, %v1447_v19 }
 0x5e2   : > { %5987 = vmatprep.mubr.msk.bf16.mxu0 %vm825_vm2, %v1482_v24  ;;  %v1475_v28 = vadd.f32 %v5570_v30, %v1461_v26 }
 0x5e4   : > { %v1483_v48 = vpack.c.bf16 %v1475_v28, %v1474_v27 }
 0x5e6   : > { %5988 = vmatmul.mubr.msk.bf16.gmra.mrb[12].mxu0 %vm825_vm2, %v1483_v48 }
 0x6b1   : > { %v5985_v59 = vpop.f32.mrb[8].mxu0 }
 0x6b2   : > { %v1542_v29 = vpop.f32.mrb[9].mxu0  ;;  %v1580_v3 = vmul.f32 0.35355338, %v5985_v59 }
 0x6b3   : > { %v5986_v4 = vpop.f32.mrb[10].mxu0  ;;  %v1578_v33 = vmul.f32 0.35355338, %v1542_v29 }
 0x6b4   : > { %v1581_v7 = vmul.f32 0.35355338, %v5986_v4  ;;  %v7214_v31 = vpack.c.bf16 %v5986_v4, %v5985_v59  ;;  %v1545_v32 = vpop.f32.mrb[11].mxu0 }
 0x6b5   : > { %v1579_v60 = vmul.f32 0.35355338, %v1545_v32  ;;  %v7216_v34 = vpack.c.bf16 %v1545_v32, %v1542_v29 }
 0x6b6   : > { %v7218_v35 = vpack.c.bf16 %v1581_v7, %v1580_v3  ;;  %1600 = vrot.lane.b32.xlu1 %v7214_v31, %s8523_s6 }
 0x6b7   : > { %v7222_v38 = vpack.c.bf16 %v1579_v60, %v1578_v33  ;;  %1598 = vrot.lane.b32.xlu0 %v7216_v34, %s8523_s6 }
 0x6b9   : > { %v5989_v39 = vpop.f32.mrb[12].mxu0  ;;  %5999 = vmatprep.mubr.msk.bf16.mxu1 %vm921_vm1, %v7222_v38 }
 0x6ba   : > { %v1558_v40 = vpop.f32.mrb[13].mxu0  ;;  %v1584_v44 = vmul.f32 0.35355338, %v5989_v39 }
 0x6bb   : > { %v5990_v41 = vpop.f32.mrb[14].mxu0  ;;  %v1582_v54 = vmul.f32 0.35355338, %v1558_v40 }
 0x6bc   : > { %v1585_v45 = vmul.f32 0.35355338, %v5990_v41  ;;  %v7228_v46 = vpack.c.bf16 %v5990_v41, %v5989_v39  ;;  %v1561_v53 = vpop.f32.mrb[15].mxu0 }
 0x6bd   : > { %v1583_v56 = vmul.f32 0.35355338, %v1561_v53  ;;  %v7230_v47 = vpack.c.bf16 %v1561_v53, %v1558_v40 }
 0x6be   : > { %v7232_v49 = vpack.c.bf16 %v1585_v45, %v1584_v44 }
 0x6bf   : > { %v7234_v30 = vpack.c.bf16 %v1583_v56, %v1582_v54  ;;  %1602 = vrot.lane.b32.xlu1 %v7230_v47, %s8523_s6 }
 0x6c3   : > { %1604 = vrot.lane.b32.xlu1 %v7228_v46, %s8523_s6 }
 0x728   : > { %v1601_v58 = vpop.permute.xlu1 %1600 }
 0x729   : > { %v1599_v50 = vpop.permute.xlu0 %1598  ;;  %v1622_v61 = vsel %vm921_vm1, %v1601_v58, 0 }
 0x72a   : > { %6415 = vmatprep.subr.msk.bf16.mxu1 %vm921_vm1, %v1599_v50  ;;  %v1619_v57 = vsel %vm921_vm1, %v1599_v50, 0 }
 0x72b   : > { %5992 = vmatpush3.bf16.xpose.msra.mxu1 %v1619_v57 }
 0x72c   : > { %6416 = vmatprep.subr.msk.bf16.mxu1 %vm921_vm1, %v1601_v58 }
 0x731   : > { %v1603_v51 = vpop.permute.xlu1 %1602 }
 0x732   : > { %v1625_v55 = vsel %vm921_vm1, %v1603_v51, 0 }
 0x733   : > { %5994 = vmatpush3.bf16.xpose.msra.mxu1 %v1622_v61 }
 0x734   : > { %6417 = vmatprep.subr.msk.bf16.mxu1 %vm921_vm1, %v1603_v51 }
 0x735   : > { %v1605_v62 = vpop.permute.xlu1 %1604 }
 0x736   : > { %v1628_v63 = vsel %vm921_vm1, %v1605_v62, 0 }
 0x73b   : > { %5996 = vmatpush3.bf16.xpose.msra.mxu1 %v1625_v55 }
 0x73c   : > { %6418 = vmatprep.subr.msk.bf16.mxu1 %vm921_vm1, %v1605_v62 }
 0x743   : > { %5998 = vmatpush3.bf16.xpose.msra.mxu1 %v1628_v63 }
 0x74a   : > { %6000 = vmatmul.mubr.msk.bf16.vlgmr.msra.gmra.mrb[12].mxu1 %vm921_vm1, %v7218_v35 }
 0x74b   : > { %6003 = vmatprep.mubr.msk.bf16.mxu1 %vm921_vm1, %v7234_v30 }
 0x752   : > { %6004 = vmatmul.mubr.msk.bf16.gmra.mrb[16].mxu1 %vm921_vm1, %v7232_v49 }
 0x81d   : > { %v6001_v0 = vpop.f32.mrb[12].mxu1 }
 0x81e   : > { %v1664_v37 = vpop.f32.mrb[13].mxu1  ;;  %v1702_v2 = vsel %vm1695_vm4, %v6001_v0, -inf }
 0x81f   : > { %1703 = vmax.xlane.f32.xlu0 %v1702_v2  ;;  %v6002_v9 = vpop.f32.mrb[14].mxu1  ;;  %v1696_v12 = vsel %vm1695_vm4, %v1664_v37, -inf }
 0x820   : > { %v1667_v8 = vpop.f32.mrb[15].mxu1  ;;  %v1705_v16 = vsel %vm1695_vm4, %v6002_v9, -inf }
 0x821   : > { %v1699_v11 = vsel %vm1695_vm4, %v1667_v8, -inf }
 0x822   : > { %1700 = vmax.xlane.f32.xlu1 %v1699_v11 }
 0x823   : > { %1697 = vmax.xlane.f32.xlu0 %v1696_v12 }
 0x825   : > { %v6005_v14 = vpop.f32.mrb[16].mxu1 }
 0x826   : > { %v1680_v15 = vpop.f32.mrb[17].mxu1  ;;  %v1714_v18 = vsel %vm1695_vm4, %v6005_v14, -inf }
 0x827   : > { %1706 = vmax.xlane.f32.xlu0 %v1705_v16  ;;  %v7258_v17 = vpop.f32.mrb[18].mxu1  ;;  %v1708_v52 = vsel %vm1695_vm4, %v1680_v15, -inf }
 0x828   : > { %v7260_v36 = vpop.f32.mrb[19].mxu1  ;;  %v1717_v19 = vsel %vm1695_vm4, %v7258_v17, -inf }
 0x829   : > { %v1711_v21 = vsel %vm1695_vm4, %v7260_v36, -inf }
 0x82b   : > { %1715 = vmax.xlane.f32.xlu0 %v1714_v18 }
 0x82f   : > { %1709 = vmax.xlane.f32.xlu0 %v1708_v52 }
 0x833   : > { %1790 = vrot.lane.b32.xlu1 %v7214_v31, %s6838_s1 }
 0x837   : > { %1792 = vrot.lane.b32.xlu1 %v7230_v47, %s6838_s1 }
 0x845   : > { %1788 = vrot.lane.b32.xlu0 %v7216_v34, %s6838_s1 }
 0x85b   : > { %1718 = vmax.xlane.f32.xlu1 %v1717_v19 }
 0x85f   : > { %1712 = vmax.xlane.f32.xlu1 %v1711_v21 }
 0x870   : > { %1794 = vrot.lane.b32.xlu1 %v7228_v46, %s6838_s1  ;;  %s8518_s1 = smov 104  }
 0x8ac   : > { %v1704_v24 = vpop.xlane.xlu0 %1703 }
 0x8ad   : > { %v1722_v26 = vsub.f32 %v6001_v0, %v1704_v24 }
 0x8af   : > { %v1732_v27 = vmul.f32 1.442695, %v1722_v26  ;;  %v1701_v28 = vpop.xlane.xlu1 %1700 }
 0x8b0   : > { %v1698_v48 = vpop.xlane.xlu0 %1697  ;;  %v1721_v29 = vsub.f32 %v1667_v8, %v1701_v28 }
 0x8b1   : > { %6514 = vpow2.f32 %v1732_v27  ;;  %v1720_v59 = vsub.f32 %v1664_v37, %v1698_v48 }
 0x8b2   : > { %v1730_v32 = vmul.f32 1.442695, %v1721_v29 }
 0x8b3   : > { %v1728_v4 = vmul.f32 1.442695, %v1720_v59  ;;  %v1791_v50 = vpop.permute.xlu1 %1790 }
 0x8b4   : > { %v1707_v3 = vpop.xlane.xlu0 %1706 }
 0x8b5   : > { %6516 = vpow2.f32 %v1728_v4  ;;  %v1723_v7 = vsub.f32 %v6002_v9, %v1707_v3 }
 0x8b7   : > { %v1734_v33 = vmul.f32 1.442695, %v1723_v7  ;;  %v1793_v62 = vpop.permute.xlu1 %1792 }
 0x8b8   : > { %v1716_v60 = vpop.xlane.xlu0 %1715 }
 0x8b9   : > { %6518 = vpow2.f32 %v1734_v33  ;;  %v1726_v39 = vsub.f32 %v6005_v14, %v1716_v60 }
 0x8ba   : > { %6520 = vpow2.f32 %v1730_v32 }
 0x8bb   : > { %v7272_v40 = vpop.eup %6514  ;;  %v1740_v41 = vmul.f32 1.442695, %v1726_v39 }
 0x8bc   : > { %v1710_v44 = vpop.xlane.xlu0 %1709  ;;  %v1750_v45 = vsel %vm1695_vm4, %v7272_v40, 0.0 }
 0x8bd   : > { %6522 = vpow2.f32 %v1740_v41  ;;  %v1724_v53 = vsub.f32 %v1680_v15, %v1710_v44  ;;  %1751 = vadd.xlane.f32.xlu0 %v1750_v45 }
 0x8bf   : > { %v7276_v54 = vpop.eup %6516  ;;  %v1736_v56 = vmul.f32 1.442695, %v1724_v53 }
 0x8c0   : > { %v1789_v57 = vpop.permute.xlu0 %1788  ;;  %v1744_v58 = vsel %vm1695_vm4, %v7276_v54, 0.0 }
 0x8c1   : > { %6524 = vpow2.f32 %v1736_v56  ;;  %1745 = vadd.xlane.f32.xlu0 %v1744_v58  ;;  %6007 = vmatprep.subr.bf16.mxu0 %v1789_v57 }
 0x8c2   : > { %6008 = vmatpush3.bf16.msra.mxu0 %v1789_v57 }
 0x8c3   : > { %v7280_v61 = vpop.eup %6518  ;;  %6009 = vmatprep.subr.bf16.mxu0 %v1791_v50 }
 0x8c4   : > { %v1753_v51 = vsel %vm1695_vm4, %v7280_v61, 0.0  ;;  %v7284_v55 = vpop.eup %6520 }
 0x8c5   : > { %1754 = vadd.xlane.f32.xlu1 %v1753_v51  ;;  %v1747_v37 = vsel %vm1695_vm4, %v7284_v55, 0.0 }
 0x8c6   : > { %6010 = vmatpush3.bf16.msra.mxu0 %v1791_v50 }
 0x8c7   : > { %v7286_v63 = vpop.eup %6522  ;;  %6011 = vmatprep.subr.bf16.mxu0 %v1793_v62 }
 0x8c8   : > { %v1762_v0 = vsel %vm1695_vm4, %v7286_v63, 0.0 }
 0x8c9   : > { %1763 = vadd.xlane.f32.xlu0 %v1762_v0  ;;  %1748 = vadd.xlane.f32.xlu1 %v1747_v37 }
 0x8ca   : > { %6012 = vmatpush3.bf16.msra.mxu0 %v1793_v62 }
 0x8cb   : > { %v7292_v2 = vpop.eup %6524 }
 0x8cc   : > { %v1756_v9 = vsel %vm1695_vm4, %v7292_v2, 0.0 }
 0x8cd   : > { %1757 = vadd.xlane.f32.xlu0 %v1756_v9 }
 0x8da   : > { %1895 = vrot.lane.b32.xlu1 %v7214_v31, %s8520_s28 }
 0x8de   : > { %1897 = vrot.lane.b32.xlu1 %v7230_v47, %s8520_s28 }
 0x8e8   : > { %v1719_v8 = vpop.xlane.xlu1 %1718 }
 0x8e9   : > { %v1727_v11 = vsub.f32 %v7258_v17, %v1719_v8 }
 0x8eb   : > { %v1742_v12 = vmul.f32 1.442695, %v1727_v11 }
 0x8ec   : > { %v1713_v14 = vpop.xlane.xlu1 %1712 }
 0x8ed   : > { %6526 = vpow2.f32 %v1742_v12  ;;  %v1725_v15 = vsub.f32 %v7260_v36, %v1713_v14 }
 0x8ef   : > { %v1738_v16 = vmul.f32 1.442695, %v1725_v15 }
 0x8f0   : > { %v1795_v18 = vpop.permute.xlu1 %1794 }
 0x8f1   : > { %6013 = vmatprep.subr.bf16.mxu0 %v1795_v18  ;;  %6528 = vpow2.f32 %v1738_v16 }
 0x8f2   : > { %6014 = vmatpush3.bf16.msra.mxu0 %v1795_v18 }
 0x8f7   : > { %v7302_v52 = vpop.eup %6526 }
 0x8f8   : > { %v1765_v19 = vsel %vm1695_vm4, %v7302_v52, 0.0 }
 0x8f9   : > { %1766 = vadd.xlane.f32.xlu0 %v1765_v19 }
 0x8fb   : > { %v7306_v21 = vpop.eup %6528 }
 0x8fc   : > { %v1759_v17 = vsel %vm1695_vm4, %v7306_v21, 0.0 }
 0x902   : > { %1760 = vadd.xlane.f32.xlu1 %v1759_v17 }
 0x90f   : > { %1893 = vrot.lane.b32.xlu0 %v7216_v34, %s8520_s28 }
 0x913   : > { %1885 = vrot.lane.b32.xlu0 %v7222_v38, %s8524_s4  ;;  %1899 = vrot.lane.b32.xlu1 %v7228_v46, %s8520_s28 }
 0x917   : > { %1889 = vrot.lane.b32.xlu0 %v7234_v30, %s8524_s4  ;;  %1887 = vrot.lane.b32.xlu1 %v7218_v35, %s8524_s4 }
 0x91b   : > { %2344 = vrot.lane.b32.xlu0 %v7216_v34, %s8517_s0  ;;  %1891 = vrot.lane.b32.xlu1 %v7232_v49, %s8524_s4  ;;  %s8551_s4 = smov 120  }
 0x91f   : > { %2348 = vrot.lane.b32.xlu0 %v7230_v47, %s8517_s0  ;;  %2346 = vrot.lane.b32.xlu1 %v7214_v31, %s8517_s0 }
 0x923   : > { %2336 = vrot.lane.b32.xlu0 %v7222_v38, %s8521_s9  ;;  %2350 = vrot.lane.b32.xlu1 %v7228_v46, %s8517_s0  ;;  %s8549_s0 = sld [smem:[#allocation12_spill]] }
 0x927   : > { %2340 = vrot.lane.b32.xlu0 %v7234_v30, %s8521_s9  ;;  %2338 = vrot.lane.b32.xlu1 %v7218_v35, %s8521_s9 }
 0x92b   : > { %2342 = vrot.lane.b32.xlu1 %v7232_v49, %s8521_s9  ;;  %s8550_s9 = sld [smem:[#allocation3_spill]] }
 0x94a   : > { %v1752_v36 = vpop.xlane.xlu0 %1751 }
 0x94e   : > { %v1746_v26 = vpop.xlane.xlu0 %1745 }
 0x952   : > { %v1755_v24 = vpop.xlane.xlu1 %1754 }
 0x953   : > { %6530 = vrcp.f32 %v1755_v24 }
 0x954   : > { %6532 = vrcp.f32 %v1746_v26 }
 0x955   : > { %6534 = vrcp.f32 %v1752_v36 }
 0x956   : > { %v1749_v27 = vpop.xlane.xlu1 %1748  ;;  %v1764_v39 = vpop.xlane.xlu0 %1763 }
 0x957   : > { %6536 = vrcp.f32 %v1749_v27 }
 0x95a   : > { %v1758_v41 = vpop.xlane.xlu0 %1757  ;;  %v1896_v44 = vpop.permute.xlu1 %1895 }
 0x95b   : > { %v1917_v50 = vsel %vm921_vm1, %v1896_v44, 0 }
 0x95d   : > { %v6531_v28 = vpop.eup %6530 }
 0x95e   : > { %v6533_v48 = vpop.eup %6532  ;;  %v1779_v4 = vmul.f32 %v6531_v28, %v7280_v61  ;;  %v1898_v56 = vpop.permute.xlu1 %1897 }
 0x95f   : > { %v6535_v59 = vpop.eup %6534  ;;  %v1776_v3 = vmul.f32 %v6533_v48, %v7276_v54  ;;  %v1920_v37 = vsel %vm921_vm1, %v1898_v56, 0 }
 0x960   : > { %v1778_v32 = vmul.f32 %v6535_v59, %v7272_v40 }
 0x961   : > { %v6537_v29 = vpop.eup %6536 }
 0x962   : > { %v1777_v7 = vmul.f32 %v6537_v29, %v7284_v55  ;;  %v1785_v60 = vpack.c.bf16 %v1779_v4, %v1778_v32 }
 0x964   : > { %v1784_v33 = vpack.c.bf16 %v1777_v7, %v1776_v3 }
 0x966   : > { %6015 = vmatprep.mubr.msk.bf16.mxu0 %vm1695_vm4, %v1784_v33 }
 0x967   : > { %6016 = vmatmul.mubr.msk.bf16.vlgmr.msra.gmra.mrb[16].mxu0 %vm1695_vm4, %v1785_v60 }
 0x986   : > { %v1767_v45 = vpop.xlane.xlu0 %1766 }
 0x987   : > { %6538 = vrcp.f32 %v1767_v45 }
 0x988   : > { %6540 = vrcp.f32 %v1758_v41 }
 0x989   : > { %6542 = vrcp.f32 %v1764_v39 }
 0x98a   : > { %v1894_v53 = vpop.permute.xlu0 %1893 }
 0x98b   : > { %6419 = vmatprep.subr.msk.bf16.mxu0 %vm921_vm1, %v1894_v53  ;;  %v1914_v54 = vsel %vm921_vm1, %v1894_v53, 0 }
 0x98c   : > { %6024 = vmatpush3.bf16.xpose.msra.mxu0 %v1914_v54 }
 0x98d   : > { %6420 = vmatprep.subr.msk.bf16.mxu0 %vm921_vm1, %v1896_v44 }
 0x98e   : > { %v1886_v61 = vpop.permute.xlu0 %1885 }
 0x98f   : > { %v1761_v40 = vpop.xlane.xlu1 %1760 }
 0x990   : > { %6544 = vrcp.f32 %v1761_v40 }
 0x991   : > { %v6539_v57 = vpop.eup %6538 }
 0x992   : > { %v6541_v58 = vpop.eup %6540  ;;  %v1783_v0 = vmul.f32 %v6539_v57, %v7302_v52  ;;  %v1890_v14 = vpop.permute.xlu0 %1889 }
 0x993   : > { %v6543_v51 = vpop.eup %6542  ;;  %v1900_v62 = vpop.permute.xlu1 %1899  ;;  %v1780_v9 = vmul.f32 %v6541_v58, %v7292_v2 }
 0x994   : > { %6026 = vmatpush3.bf16.xpose.msra.mxu0 %v1917_v50  ;;  %v1782_v11 = vmul.f32 %v6543_v51, %v7286_v63  ;;  %v1923_v18 = vsel %vm921_vm1, %v1900_v62, 0 }
 0x995   : > { %6421 = vmatprep.subr.msk.bf16.mxu0 %vm921_vm1, %v1898_v56 }
 0x996   : > { %v1787_v15 = vpack.c.bf16 %v1783_v0, %v1782_v11  ;;  %v2345_v2 = vpop.permute.xlu0 %2344 }
 0x997   : > { %v1888_v16 = vpop.permute.xlu1 %1887  ;;  %v2365_v63 = vsel %vm921_vm1, %v2345_v2, 0 }
 0x99a   : > { %v6545_v55 = vpop.eup %6544 }
 0x99b   : > { %v1781_v8 = vmul.f32 %v6545_v55, %v7306_v21  ;;  %v1892_v52 = vpop.permute.xlu1 %1891  ;;  %v2349_v21 = vpop.permute.xlu0 %2348 }
 0x99c   : > { %6028 = vmatpush3.bf16.xpose.msra.mxu0 %v1920_v37  ;;  %v2371_v24 = vsel %vm921_vm1, %v2349_v21, 0 }
 0x99d   : > { %6422 = vmatprep.subr.msk.bf16.mxu0 %vm921_vm1, %v1900_v62  ;;  %v1786_v12 = vpack.c.bf16 %v1781_v8, %v1780_v9 }
 0x99f   : > { %6019 = vmatprep.mubr.msk.bf16.mxu0 %vm1695_vm4, %v1786_v12  ;;  %v2347_v19 = vpop.permute.xlu1 %2346  ;;  %v2337_v17 = vpop.permute.xlu0 %2336 }
 0x9a0   : > { %6020 = vmatmul.mubr.msk.bf16.gmra.mrb[20].mxu0 %vm1695_vm4, %v1787_v15  ;;  %v2368_v36 = vsel %vm921_vm1, %v2347_v19, 0 }
 0x9a1   : > { %6031 = vmatprep.mubr.msk.bf16.mxu0 %vm921_vm1, %v1886_v61 }
 0x9a3   : > { %v2351_v26 = vpop.permute.xlu1 %2350  ;;  %v2341_v48 = vpop.permute.xlu0 %2340 }
 0x9a4   : > { %6030 = vmatpush3.bf16.xpose.msra.mxu0 %v1923_v18  ;;  %v2374_v27 = vsel %vm921_vm1, %v2351_v26, 0 }
 0x9a5   : > { %6425 = vmatprep.subr.msk.bf16.mxu0 %vm921_vm1, %v2345_v2 }
 0x9a7   : > { %v2339_v28 = vpop.permute.xlu1 %2338 }
 0x9ab   : > { %6032 = vmatmul.mubr.msk.bf16.vlgmr.msra.gmra.mrb[24].mxu0 %vm921_vm1, %v1888_v16  ;;  %v2343_v59 = vpop.permute.xlu1 %2342 }
 0x9ac   : > { %6035 = vmatprep.mubr.msk.bf16.mxu0 %vm921_vm1, %v1890_v14  ;;  %6076 = vmatpush3.bf16.xpose.msra.mxu0 %v2365_v63 }
 0x9ad   : > { %6426 = vmatprep.subr.msk.bf16.mxu0 %vm921_vm1, %v2347_v19 }
 0x9b3   : > { %6036 = vmatmul.mubr.msk.bf16.gmra.mrb[28].mxu0 %vm921_vm1, %v1892_v52 }
 0x9b4   : > { %6078 = vmatpush3.bf16.xpose.msra.mxu0 %v2368_v36  ;;  %6083 = vmatprep.mubr.msk.bf16.mxu0 %vm921_vm1, %v2337_v17 }
 0x9b5   : > { %6427 = vmatprep.subr.msk.bf16.mxu0 %vm921_vm1, %v2349_v21 }
 0x9bc   : > { %6080 = vmatpush3.bf16.xpose.msra.mxu0 %v2371_v24 }
 0x9bd   : > { %6428 = vmatprep.subr.msk.bf16.mxu0 %vm921_vm1, %v2351_v26 }
 0x9c4   : > { %6082 = vmatpush3.bf16.xpose.msra.mxu0 %v2374_v27 }
 0x9cb   : > { %6084 = vmatmul.mubr.msk.bf16.vlgmr.msra.gmra.mrb[32].mxu0 %vm921_vm1, %v2339_v28 }
 0x9cc   : > { %6087 = vmatprep.mubr.msk.bf16.mxu0 %vm921_vm1, %v2341_v48 }
 0x9d3   : > { %6088 = vmatmul.mubr.msk.bf16.gmra.mrb[36].mxu0 %vm921_vm1, %v2343_v59 }
 0xa3a   : > { %v7374_v29 = vpop.f32.mrb[16].mxu0 }
 0xa3b   : > { %v7376_v4 = vpop.f32.mrb[17].mxu0 }
 0xa3c   : > { %v7378_v3 = vpop.f32.mrb[18].mxu0 }
 0xa3d   : > { %v1878_v7 = vpack.c.bf16 %v7378_v3, %v7374_v29  ;;  %v7382_v32 = vpop.f32.mrb[19].mxu0 }
 0xa3e   : > { %v1877_v33 = vpack.c.bf16 %v7382_v32, %v7376_v4 }
 0xa73   : > { %v7386_v60 = vpop.f32.mrb[20].mxu0 }
 0xa74   : > { %v7388_v39 = vpop.f32.mrb[21].mxu0 }
 0xa75   : > { %v7390_v41 = vpop.f32.mrb[22].mxu0 }
 0xa76   : > { %v1880_v44 = vpack.c.bf16 %v7390_v41, %v7386_v60  ;;  %v7394_v45 = vpop.f32.mrb[23].mxu0 }
 0xa77   : > { %v1879_v53 = vpack.c.bf16 %v7394_v45, %v7388_v39 }
 0xa7e   : > { %v6033_v56 = vpop.f32.mrb[24].mxu0 }
 0xa7f   : > { %v1959_v54 = vpop.f32.mrb[25].mxu0  ;;  %v1996_v61 = vsel %vm1695_vm4, %v6033_v56, -inf }
 0xa80   : > { %v6034_v40 = vpop.f32.mrb[26].mxu0  ;;  %v1990_v50 = vsel %vm1695_vm4, %v1959_v54, -inf }
 0xa81   : > { %1991 = vmax.xlane.f32.xlu0 %v1990_v50  ;;  %v1962_v57 = vpop.f32.mrb[27].mxu0  ;;  %v1999_v0 = vsel %vm1695_vm4, %v6034_v40, -inf }
 0xa82   : > { %v1993_v58 = vsel %vm1695_vm4, %v1962_v57, -inf }
 0xa83   : > { %1994 = vmax.xlane.f32.xlu1 %v1993_v58 }
 0xa85   : > { %1997 = vmax.xlane.f32.xlu0 %v1996_v61 }
 0xa86   : > { %v6037_v51 = vpop.f32.mrb[28].mxu0 }
 0xa87   : > { %v1975_v55 = vpop.f32.mrb[29].mxu0  ;;  %v2008_v12 = vsel %vm1695_vm4, %v6037_v51, -inf }
 0xa88   : > { %v7401_v62 = vpop.f32.mrb[30].mxu0  ;;  %v2002_v8 = vsel %vm1695_vm4, %v1975_v55, -inf }
 0xa89   : > { %2000 = vmax.xlane.f32.xlu0 %v1999_v0  ;;  %v7404_v37 = vpop.f32.mrb[31].mxu0  ;;  %v2011_v11 = vsel %vm1695_vm4, %v7401_v62, -inf }
 0xa8a   : > { %v2005_v9 = vsel %vm1695_vm4, %v7404_v37, -inf }
 0xa8b   : > { %2006 = vmax.xlane.f32.xlu1 %v2005_v9 }
 0xa8d   : > { %2003 = vmax.xlane.f32.xlu0 %v2002_v8 }
 0xa8f   : > { %2012 = vmax.xlane.f32.xlu1 %v2011_v11 }
 0xa91   : > { %2009 = vmax.xlane.f32.xlu0 %v2008_v12 }
 0xa9e   : > { %v7412_v14 = vpop.f32.mrb[32].mxu0 }
 0xa9f   : > { %v7414_v15 = vpop.f32.mrb[33].mxu0 }
 0xaa0   : > { %v7416_v16 = vpop.f32.mrb[34].mxu0 }
 0xaa1   : > { %v7418_v18 = vpop.f32.mrb[35].mxu0 }
 0xaa6   : > { %v7420_v2 = vpop.f32.mrb[36].mxu0 }
 0xaa7   : > { %v7422_v52 = vpop.f32.mrb[37].mxu0 }
 0xaa8   : > { %v7424_v63 = vpop.f32.mrb[38].mxu0 }
 0xaa9   : > { %v7426_v19 = vpop.f32.mrb[39].mxu0 }
 0xb0e   : > { %v1992_v21 = vpop.xlane.xlu0 %1991 }
 0xb0f   : > { %v2014_v17 = vsub.f32 %v1959_v54, %v1992_v21 }
 0xb10   : > { %v1995_v36 = vpop.xlane.xlu1 %1994 }
 0xb11   : > { %v2022_v27 = vmul.f32 1.442695, %v2014_v17  ;;  %v2015_v28 = vsub.f32 %v1962_v57, %v1995_v36 }
 0xb12   : > { %v1998_v24 = vpop.xlane.xlu0 %1997 }
 0xb13   : > { %v2016_v26 = vsub.f32 %v6033_v56, %v1998_v24  ;;  %v2024_v58 = vmul.f32 1.442695, %v2015_v28 }
 0xb15   : > { %v2026_v48 = vmul.f32 1.442695, %v2016_v26 }
 0xb16   : > { %v2001_v59 = vpop.xlane.xlu0 %2000 }
 0xb17   : > { %6546 = vpow2.f32 %v2026_v48  ;;  %v2017_v50 = vsub.f32 %v6034_v40, %v2001_v59 }
 0xb18   : > { %6548 = vpow2.f32 %v2022_v27  ;;  %v2007_v48 = vpop.xlane.xlu1 %2006 }
 0xb19   : > { %v2028_v61 = vmul.f32 1.442695, %v2017_v50 }
 0xb1a   : > { %v2004_v0 = vpop.xlane.xlu0 %2003 }
 0xb1b   : > { %6550 = vpow2.f32 %v2028_v61  ;;  %v2018_v9 = vsub.f32 %v1975_v55, %v2004_v0 }
 0xb1c   : > { %6552 = vpow2.f32 %v2024_v58  ;;  %v2013_v59 = vpop.xlane.xlu1 %2012  ;;  %v2019_v58 = vsub.f32 %v7404_v37, %v2007_v48 }
 0xb1d   : > { %v2030_v54 = vmul.f32 1.442695, %v2018_v9  ;;  %v2021_v50 = vsub.f32 %v7401_v62, %v2013_v59 }
 0xb1e   : > { %v2010_v8 = vpop.xlane.xlu0 %2009  ;;  %v2032_v0 = vmul.f32 1.442695, %v2019_v58 }
 0xb1f   : > { %v2020_v11 = vsub.f32 %v6037_v51, %v2010_v8  ;;  %v2036_v61 = vmul.f32 1.442695, %v2021_v50 }
 0xb21   : > { %v7428_v12 = vpop.eup %6546  ;;  %v2034_v21 = vmul.f32 1.442695, %v2020_v11  ;;  %v2450_v11 = vsel %vm1695_vm4, %v7416_v16, -inf }
 0xb22   : > { %v2044_v56 = vsel %vm1695_vm4, %v7428_v12, 0.0  ;;  %v7432_v57 = vpop.eup %6548 }
 0xb23   : > { %6554 = vpow2.f32 %v2034_v21  ;;  %2045 = vadd.xlane.f32.xlu0 %v2044_v56  ;;  %v2038_v17 = vsel %vm1695_vm4, %v7432_v57, 0.0  ;;  %v2459_v21 = vsel %vm1695_vm4, %v7420_v2, -inf  ;;  %v2444_v56 = vsel %vm1695_vm4, %v7418_v18, -inf }
 0xb24   : > { %6556 = vpow2.f32 %v2030_v54  ;;  %v2453_v54 = vsel %vm1695_vm4, %v7422_v52, -inf }
 0xb25   : > { %v7434_v40 = vpop.eup %6550  ;;  %6558 = vpow2.f32 %v2036_v61 }
 0xb26   : > { %v2047_v51 = vsel %vm1695_vm4, %v7434_v40, 0.0  ;;  %v7440_v55 = vpop.eup %6552  ;;  %6560 = vpow2.f32 %v2032_v0 }
 0xb27   : > { %2039 = vadd.xlane.f32.xlu0 %v2038_v17  ;;  %2048 = vadd.xlane.f32.xlu1 %v2047_v51  ;;  %v2041_v36 = vsel %vm1695_vm4, %v7440_v55, 0.0  ;;  %v2456_v51 = vsel %vm1695_vm4, %v7426_v19, -inf }
 0xb2b   : > { %2042 = vadd.xlane.f32.xlu1 %v2041_v36 }
 0xb2d   : > { %v7444_v24 = vpop.eup %6554 }
 0xb2e   : > { %v2056_v26 = vsel %vm1695_vm4, %v7444_v24, 0.0  ;;  %v7448_v27 = vpop.eup %6556 }
 0xb2f   : > { %2057 = vadd.xlane.f32.xlu0 %v2056_v26  ;;  %v2050_v28 = vsel %vm1695_vm4, %v7448_v27, 0.0  ;;  %v7465_v9 = vpop.eup %6558 }
 0xb30   : > { %v2059_v62 = vsel %vm1695_vm4, %v7465_v9, 0.0  ;;  %v7469_v8 = vpop.eup %6560 }
 0xb31   : > { %v2053_v37 = vsel %vm1695_vm4, %v7469_v8, 0.0 }
 0xb33   : > { %2051 = vadd.xlane.f32.xlu0 %v2050_v28 }
 0xb3c   : > { %2084 = vrot.lane.b32.xlu1 %v7214_v31, %s6843_s30 }
 0xb40   : > { %2086 = vrot.lane.b32.xlu1 %v7230_v47, %s6843_s30 }
 0xb49   : > { %2082 = vrot.lane.b32.xlu0 %v7216_v34, %s6843_s30 }
 0xb4d   : > { %2722 = vrot.lane.b32.xlu0 %v7216_v34, %s8516_s2 }
 0xb51   : > { %2726 = vrot.lane.b32.xlu0 %v7230_v47, %s8516_s2 }
 0xb55   : > { %2714 = vrot.lane.b32.xlu0 %v7222_v38, %s8518_s1  ;;  %v2441_v38 = vsel %vm1695_vm4, %v7414_v15, -inf }
 0xb59   : > { %2718 = vrot.lane.b32.xlu0 %v7234_v30, %s8518_s1  ;;  %v2447_v30 = vsel %vm1695_vm4, %v7412_v14, -inf }
 0xb64   : > { %2060 = vadd.xlane.f32.xlu1 %v2059_v62 }
 0xb68   : > { %2054 = vadd.xlane.f32.xlu1 %v2053_v37 }
 0xb78   : > { %2442 = vmax.xlane.f32.xlu0 %v2441_v38 }
 0xb79   : > { %2088 = vrot.lane.b32.xlu1 %v7228_v46, %s6843_s30  ;;  %s6846_s30 = smov 48  }
 0xb7c   : > { %2448 = vmax.xlane.f32.xlu0 %v2447_v30 }
 0xb7d   : > { %2724 = vrot.lane.b32.xlu1 %v7214_v31, %s8516_s2 }
 0xb80   : > { %2451 = vmax.xlane.f32.xlu0 %v2450_v11 }
 0xb81   : > { %2728 = vrot.lane.b32.xlu1 %v7228_v46, %s8516_s2  ;;  %s6847_s2 = smov 40  }
 0xb84   : > { %2454 = vmax.xlane.f32.xlu0 %v2453_v54 }
 0xb85   : > { %2716 = vrot.lane.b32.xlu1 %v7218_v35, %s8518_s1  ;;  %v2462_v35 = vsel %vm1695_vm4, %v7424_v63, -inf }
 0xb88   : > { %2460 = vmax.xlane.f32.xlu0 %v2459_v21 }
 0xb89   : > { %2720 = vrot.lane.b32.xlu1 %v7232_v49, %s8518_s1  ;;  %s8555_s1 = smov 104  }
 0xbad   : > { %2445 = vmax.xlane.f32.xlu1 %v2444_v56 }
 0xbb0   : > { %v2046_v17 = vpop.xlane.xlu0 %2045 }
 0xbb1   : > { %2457 = vmax.xlane.f32.xlu1 %v2456_v51 }
 0xbb4   : > { %v2040_v36 = vpop.xlane.xlu0 %2039  ;;  %v2049_v26 = vpop.xlane.xlu1 %2048 }
 0xbb5   : > { %2463 = vmax.xlane.f32.xlu1 %v2462_v35  ;;  %6562 = vrcp.f32 %v2040_v36 }
 0xbb8   : > { %v2043_v28 = vpop.xlane.xlu1 %2042 }
 0xbb9   : > { %6564 = vrcp.f32 %v2043_v28 }
 0xbba   : > { %6566 = vrcp.f32 %v2049_v26 }
 0xbbb   : > { %6568 = vrcp.f32 %v2046_v17 }
 0xbbc   : > { %v2058_v48 = vpop.xlane.xlu0 %2057  ;;  %v2085_v58 = vpop.permute.xlu1 %2084 }
 0xbbf   : > { %v6563_v59 = vpop.eup %6562 }
 0xbc0   : > { %v2052_v49 = vpop.xlane.xlu0 %2051  ;;  %v2070_v0 = vmul.f32 %v6563_v59, %v7432_v57  ;;  %v2087_v11 = vpop.permute.xlu1 %2086 }
 0xbc3   : > { %v6565_v50 = vpop.eup %6564 }
 0xbc4   : > { %v2083_v61 = vpop.permute.xlu0 %2082  ;;  %v2071_v62 = vmul.f32 %v6565_v50, %v7440_v55  ;;  %v6567_v21 = vpop.eup %6566 }
 0xbc5   : > { %6039 = vmatprep.subr.bf16.mxu1 %v2083_v61  ;;  %v6569_v51 = vpop.eup %6568  ;;  %v2073_v36 = vmul.f32 %v6567_v21, %v7434_v40 }
 0xbc6   : > { %6040 = vmatpush3.bf16.msra.mxu1 %v2083_v61  ;;  %v2078_v37 = vpack.c.bf16 %v2071_v62, %v2070_v0  ;;  %v2072_v28 = vmul.f32 %v6569_v51, %v7428_v12 }
 0xbc7   : > { %6041 = vmatprep.subr.bf16.mxu1 %v2085_v58 }
 0xbc8   : > { %v2723_v38 = vpop.permute.xlu0 %2722  ;;  %6047 = vmatprep.mubr.msk.bf16.mxu1 %vm1695_vm4, %v2078_v37  ;;  %v2079_v59 = vpack.c.bf16 %v2073_v36, %v2072_v28 }
 0xbc9   : > { %6430 = vmatprep.subr.msk.bf16.mxu0 %vm921_vm1, %v2723_v38  ;;  %v2743_v30 = vsel %vm921_vm1, %v2723_v38, 0 }
 0xbca   : > { %6042 = vmatpush3.bf16.msra.mxu1 %v2085_v58  ;;  %6118 = vmatpush3.bf16.xpose.msra.mxu0 %v2743_v30 }
 0xbcb   : > { %6043 = vmatprep.subr.bf16.mxu1 %v2087_v11 }
 0xbcc   : > { %v2727_v54 = vpop.permute.xlu0 %2726 }
 0xbce   : > { %6044 = vmatpush3.bf16.msra.mxu1 %v2087_v11  ;;  %v2749_v11 = vsel %vm921_vm1, %v2727_v54, 0 }
 0xbd0   : > { %v2715_v57 = vpop.permute.xlu0 %2714 }
 0xbd1   : > { %6125 = vmatprep.mubr.msk.bf16.mxu0 %vm921_vm1, %v2715_v57 }
 0xbd4   : > { %v2719_v12 = vpop.permute.xlu0 %2718 }
 0xbf1   : > { %v2061_v55 = vpop.xlane.xlu1 %2060 }
 0xbf2   : > { %6570 = vrcp.f32 %v2061_v55 }
 0xbf3   : > { %6572 = vrcp.f32 %v2052_v49 }
 0xbf4   : > { %6574 = vrcp.f32 %v2058_v48 }
 0xbf5   : > { %v2055_v56 = vpop.xlane.xlu1 %2054 }
 0xbf6   : > { %6576 = vrcp.f32 %v2055_v56 }
 0xbf9   : > { %v2089_v35 = vpop.permute.xlu1 %2088 }
 0xbfa   : > { %6045 = vmatprep.subr.bf16.mxu1 %v2089_v35 }
 0xbfb   : > { %6046 = vmatpush3.bf16.msra.mxu1 %v2089_v35 }
 0xbfc   : > { %v6571_v50 = vpop.eup %6570 }
 0xbfd   : > { %v2725_v58 = vpop.permute.xlu1 %2724  ;;  %v6573_v26 = vpop.eup %6572  ;;  %v2077_v40 = vmul.f32 %v6571_v50, %v7465_v9 }
 0xbfe   : > { %6048 = vmatmul.mubr.msk.bf16.vlgmr.msra.gmra.mrb[20].mxu1 %vm1695_vm4, %v2079_v59  ;;  %6431 = vmatprep.subr.msk.bf16.mxu0 %vm921_vm1, %v2725_v58  ;;  %v2746_v17 = vsel %vm921_vm1, %v2725_v58, 0  ;;  %v6575_v48 = vpop.eup %6574  ;;  %v2074_v61 = vmul.f32 %v6573_v26, %v7448_v27 }
 0xbff   : > { %6120 = vmatpush3.bf16.xpose.msra.mxu0 %v2746_v17  ;;  %v2076_v62 = vmul.f32 %v6575_v48, %v7444_v24 }
 0xc00   : > { %v6577_v49 = vpop.eup %6576  ;;  %6432 = vmatprep.subr.msk.bf16.mxu0 %vm921_vm1, %v2727_v54 }
 0xc01   : > { %v2075_v0 = vmul.f32 %v6577_v49, %v7469_v8  ;;  %v2081_v38 = vpack.c.bf16 %v2077_v40, %v2076_v62  ;;  %v2729_v57 = vpop.permute.xlu1 %2728 }
 0xc02   : > { %v2752_v51 = vsel %vm921_vm1, %v2729_v57, 0 }
 0xc03   : > { %v2080_v37 = vpack.c.bf16 %v2075_v0, %v2074_v61 }
 0xc05   : > { %v2443_v30 = vpop.xlane.xlu0 %2442  ;;  %6051 = vmatprep.mubr.msk.bf16.mxu1 %vm1695_vm4, %v2080_v37  ;;  %v2717_v35 = vpop.permute.xlu1 %2716 }
 0xc06   : > { %6052 = vmatmul.mubr.msk.bf16.gmra.mrb[24].mxu1 %vm1695_vm4, %v2081_v38  ;;  %v2465_v9 = vsub.f32 %v7414_v15, %v2443_v30 }
 0xc07   : > { %6122 = vmatpush3.bf16.xpose.msra.mxu0 %v2749_v11  ;;  %v1574_v11 = vld [vmem:[%s8549_s0 + $0x4] sm:$0xf] }
 0xc08   : > { %6433 = vmatprep.subr.msk.bf16.mxu0 %vm921_vm1, %v2729_v57  ;;  %v2473_v55 = vmul.f32 1.442695, %v2465_v9  ;;  %6423 = vmatprep.subr.msk.bf16.mxu1 %vm2187_vm5, %v1574_v11  ;;  %v1573_v57 = vld [vmem:[%s8549_s0] sm:$0xf] }
 0xc09   : > { %v2449_v27 = vpop.xlane.xlu0 %2448  ;;  %v2721_v48 = vpop.permute.xlu1 %2720 }
 0xc0a   : > { %v2467_v8 = vsub.f32 %v7412_v14, %v2449_v27 }
 0xc0c   : > { %v2477_v24 = vmul.f32 1.442695, %v2467_v8 }
 0xc0d   : > { %v2452_v21 = vpop.xlane.xlu0 %2451 }
 0xc0e   : > { %6578 = vpow2.f32 %v2477_v24  ;;  %v2468_v56 = vsub.f32 %v7416_v16, %v2452_v21 }
 0xc0f   : > { %6124 = vmatpush3.bf16.xpose.msra.mxu0 %v2752_v51  ;;  %6580 = vpow2.f32 %v2473_v55 }
 0xc10   : > { %v2479_v54 = vmul.f32 1.442695, %v2468_v56 }
 0xc11   : > { %v2455_v36 = vpop.xlane.xlu0 %2454 }
 0xc12   : > { %6582 = vpow2.f32 %v2479_v54  ;;  %v2469_v15 = vsub.f32 %v7422_v52, %v2455_v36 }
 0xc14   : > { %v2481_v16 = vmul.f32 1.442695, %v2469_v15 }
 0xc15   : > { %v2461_v28 = vpop.xlane.xlu0 %2460 }
 0xc16   : > { %v2471_v59 = vsub.f32 %v7420_v2, %v2461_v28  ;;  %6126 = vmatmul.mubr.msk.bf16.vlgmr.msra.gmra.mrb[40].mxu0 %vm921_vm1, %v2717_v35 }
 0xc17   : > { %6129 = vmatprep.mubr.msk.bf16.mxu0 %vm921_vm1, %v2719_v12 }
 0xc18   : > { %v7526_v14 = vpop.eup %6578  ;;  %v2485_v50 = vmul.f32 1.442695, %v2471_v59 }
 0xc19   : > { %v2495_v58 = vsel %vm1695_vm4, %v7526_v14, 0.0  ;;  %v7530_v26 = vpop.eup %6580 }
 0xc1a   : > { %6584 = vpow2.f32 %v2485_v50  ;;  %2496 = vadd.xlane.f32.xlu0 %v2495_v58  ;;  %v2489_v2 = vsel %vm1695_vm4, %v7530_v26, 0.0 }
 0xc1b   : > { %6586 = vpow2.f32 %v2481_v16 }
 0xc1c   : > { %v7532_v52 = vpop.eup %6582 }
 0xc1d   : > { %v2498_v17 = vsel %vm1695_vm4, %v7532_v52, 0.0 }
 0xc1e   : > { %2490 = vadd.xlane.f32.xlu0 %v2489_v2  ;;  %2499 = vadd.xlane.f32.xlu1 %v2498_v17  ;;  %v2269_v17 = vsel %vm2187_vm5, %v1573_v57, 0 }
 0xc1f   : > { %6130 = vmatmul.mubr.msk.bf16.gmra.mrb[44].mxu0 %vm921_vm1, %v2721_v48 }
 0xc24   : > { %v7539_v49 = vpop.eup %6584 }
 0xc25   : > { %v2507_v40 = vsel %vm1695_vm4, %v7539_v49, 0.0  ;;  %v7543_v12 = vpop.eup %6586 }
 0xc26   : > { %2508 = vadd.xlane.f32.xlu0 %v2507_v40  ;;  %v2501_v61 = vsel %vm1695_vm4, %v7543_v12, 0.0 }
 0xc2a   : > { %2502 = vadd.xlane.f32.xlu0 %v2501_v61 }
 0xc3a   : > { %v2446_v0 = vpop.xlane.xlu1 %2445 }
 0xc3b   : > { %v2466_v62 = vsub.f32 %v7418_v18, %v2446_v0  ;;  %v2189_v18 = vsel %vm2187_vm5, %v1574_v11, 0 }
 0xc3c   : > { %6056 = vmatpush3.bf16.msra.mxu1 %v2189_v18 }
 0xc3d   : > { %v2475_v37 = vmul.f32 1.442695, %v2466_v62  ;;  %6424 = vmatprep.subr.msk.bf16.mxu1 %vm2187_vm5, %v1573_v57 }
 0xc3e   : > { %v2458_v9 = vpop.xlane.xlu1 %2457 }
 0xc3f   : > { %6588 = vpow2.f32 %v2475_v37  ;;  %v2470_v55 = vsub.f32 %v7426_v19, %v2458_v9 }
 0xc40   : > { %2533 = vrot.lane.b32.xlu0 %v7216_v34, %s6846_s30 }
 0xc41   : > { %v2483_v21 = vmul.f32 1.442695, %v2470_v55 }
 0xc42   : > { %v2464_v27 = vpop.xlane.xlu1 %2463 }
 0xc43   : > { %v2472_v8 = vsub.f32 %v7424_v63, %v2464_v27 }
 0xc45   : > { %v2487_v24 = vmul.f32 1.442695, %v2472_v8 }
 0xc47   : > { %6590 = vpow2.f32 %v2487_v24 }
 0xc48   : > { %6592 = vpow2.f32 %v2483_v21 }
 0xc49   : > { %v7549_v38 = vpop.eup %6588 }
 0xc4a   : > { %v2492_v30 = vsel %vm1695_vm4, %v7549_v38, 0.0 }
 0xc4b   : > { %2493 = vadd.xlane.f32.xlu1 %v2492_v30 }
 0xc51   : > { %v7566_v56 = vpop.eup %6590 }
 0xc52   : > { %v2510_v51 = vsel %vm1695_vm4, %v7566_v56, 0.0  ;;  %v7570_v54 = vpop.eup %6592 }
 0xc53   : > { %v2504_v36 = vsel %vm1695_vm4, %v7570_v54, 0.0 }
 0xc5c   : > { %2535 = vrot.lane.b32.xlu1 %v7214_v31, %s6846_s30 }
 0xc60   : > { %2537 = vrot.lane.b32.xlu1 %v7230_v47, %s6846_s30 }
 0xc84   : > { %2511 = vadd.xlane.f32.xlu1 %v2510_v51 }
 0xc88   : > { %2505 = vadd.xlane.f32.xlu1 %v2504_v36 }
 0xc99   : > { %2539 = vrot.lane.b32.xlu1 %v7228_v46, %s6846_s30  ;;  %s5545_s30 = sshll.u32 %s8560_s3, 3 }
 0xc9a   : > { %s803_s6 = scalar_lea.vmem %s8550_s9, %s5545_s30  ;;  %s8554_s9 = smov 88  }
 0xca7   : > { %v7575_v63 = vpop.xlane.xlu0 %2496 }
 0xcab   : > { %v2491_v19 = vpop.xlane.xlu0 %2490  ;;  %v2500_v48 = vpop.xlane.xlu1 %2499 }
 0xcb3   : > { %v7577_v15 = vpop.xlane.xlu0 %2508 }
 0xcb7   : > { %v7579_v59 = vpop.xlane.xlu0 %2502 }
 0xcbb   : > { %v2534_v40 = vpop.permute.xlu0 %2533 }
 0xcd1   : > { %v6049_v35 = vpop.f32.mrb[20].mxu1 }
 0xcd2   : > { %v2140_v28 = vpop.f32.mrb[21].mxu1 }
 0xcd3   : > { %v6050_v16 = vpop.f32.mrb[22].mxu1 }
 0xcd4   : > { %v2172_v50 = vpack.c.bf16 %v6050_v16, %v6049_v35  ;;  %v2143_v58 = vpop.f32.mrb[23].mxu1 }
 0xcd5   : > { %v2171_v2 = vpack.c.bf16 %v2143_v58, %v2140_v28 }
 0xcd7   : > { %6057 = vmatprep.mubr.msk.bf16.mxu1 %vm921_vm1, %v2171_v2 }
 0xcd8   : > { %6058 = vmatmul.mubr.msk.bf16.vlgmr.msra.gmra.mrb[28].mxu1 %vm921_vm1, %v2172_v50  ;;  %v2494_v62 = vpop.xlane.xlu1 %2493 }
 0xcd9   : > { %6066 = vmatpush3.bf16.msra.mxu1 %v2269_v17  ;;  %v6053_v61 = vpop.f32.mrb[24].mxu1  ;;  %6594 = vrcp.f32 %v2494_v62 }
 0xcda   : > { %6091 = vmatprep.subr.bf16.mxu1 %v2534_v40  ;;  %v2156_v0 = vpop.f32.mrb[25].mxu1  ;;  %6596 = vrcp.f32 %v2491_v19 }
 0xcdb   : > { %v6054_v37 = vpop.f32.mrb[26].mxu1  ;;  %6598 = vrcp.f32 %v2500_v48 }
 0xcdc   : > { %v2174_v30 = vpack.c.bf16 %v6054_v37, %v6053_v61  ;;  %v2159_v11 = vpop.f32.mrb[27].mxu1  ;;  %v2536_v57 = vpop.permute.xlu1 %2535  ;;  %6600 = vrcp.f32 %v7575_v63 }
 0xcdd   : > { %v2173_v18 = vpack.c.bf16 %v2159_v11, %v2156_v0 }
 0xcdf   : > { %6061 = vmatprep.mubr.msk.bf16.mxu1 %vm921_vm1, %v2173_v18 }
 0xce0   : > { %6062 = vmatmul.mubr.msk.bf16.gmra.mrb[32].mxu1 %vm921_vm1, %v2174_v30 }
 0xce1   : > { %6067 = vmatprep.mubr.msk.bf16.mxu1 %vm921_vm1, %v1877_v33 }
 0xce3   : > { %v6595_v9 = vpop.eup %6594 }
 0xce4   : > { %v6597_v8 = vpop.eup %6596  ;;  %v2522_v29 = vmul.f32 %v6595_v9, %v7549_v38 }
 0xce5   : > { %v2521_v45 = vmul.f32 %v6597_v8, %v7530_v26  ;;  %v6599_v35 = vpop.eup %6598 }
 0xce6   : > { %v6601_v16 = vpop.eup %6600  ;;  %v2524_v50 = vmul.f32 %v6599_v35, %v7532_v52 }
 0xce7   : > { %v2529_v55 = vpack.c.bf16 %v2522_v29, %v2521_v45  ;;  %v2523_v2 = vmul.f32 %v6601_v16, %v7526_v14  ;;  %v1575_v14 = vld [vmem:[%s8549_s0 + $0x8] sm:$0xf] }
 0xce8   : > { %6068 = vmatmul.mubr.msk.bf16.vlgmr.msra.gmra.mrb[28].mxu1 %vm921_vm1, %v1878_v7  ;;  %v2538_v7 = vpop.permute.xlu1 %2537 }
 0xce9   : > { %6092 = vmatpush3.bf16.msra.mxu1 %v2534_v40  ;;  %6071 = vmatprep.mubr.msk.bf16.mxu1 %vm921_vm1, %v1879_v53  ;;  %v7598_v27 = vpop.f32.mrb[40].mxu0  ;;  %v2530_v17 = vpack.c.bf16 %v2524_v50, %v2523_v2 }
 0xcea   : > { %6093 = vmatprep.subr.bf16.mxu1 %v2536_v57  ;;  %v7600_v4 = vpop.f32.mrb[41].mxu0  ;;  %v2825_v53 = vsel %vm1695_vm4, %v7598_v27, -inf }
 0xceb   : > { %v7602_v32 = vpop.f32.mrb[42].mxu0  ;;  %v2819_v33 = vsel %vm1695_vm4, %v7600_v4, -inf }
 0xcec   : > { %2820 = vmax.xlane.f32.xlu0 %v2819_v33  ;;  %v7607_v3 = vpop.f32.mrb[43].mxu0  ;;  %v2828_v26 = vsel %vm1695_vm4, %v7602_v32, -inf }
 0xced   : > { %6094 = vmatpush3.bf16.msra.mxu1 %v2536_v57  ;;  %v2822_v39 = vsel %vm1695_vm4, %v7607_v3, -inf }
 0xcee   : > { %6095 = vmatprep.subr.bf16.mxu1 %v2538_v7  ;;  %2823 = vmax.xlane.f32.xlu1 %v2822_v39 }
 0xcf0   : > { %6072 = vmatmul.mubr.msk.bf16.gmra.mrb[32].mxu1 %vm921_vm1, %v1880_v44  ;;  %2826 = vmax.xlane.f32.xlu0 %v2825_v53 }
 0xcf1   : > { %6096 = vmatpush3.bf16.msra.mxu1 %v2538_v7  ;;  %6099 = vmatprep.mubr.msk.bf16.mxu1 %vm1695_vm4, %v2529_v55 }
 0xcf2   : > { %v7619_v38 = vpop.f32.mrb[44].mxu0 }
 0xcf3   : > { %v7621_v24 = vpop.f32.mrb[45].mxu0  ;;  %v2837_v36 = vsel %vm1695_vm4, %v7619_v38, -inf }
 0xcf4   : > { %v7625_v21 = vpop.f32.mrb[46].mxu0  ;;  %2829 = vmax.xlane.f32.xlu0 %v2828_v26  ;;  %v2831_v41 = vsel %vm1695_vm4, %v7621_v24, -inf }
 0xcf5   : > { %v7627_v51 = vpop.f32.mrb[47].mxu0  ;;  %v2840_v44 = vsel %vm1695_vm4, %v7625_v21, -inf }
 0xcf6   : > { %v2834_v60 = vsel %vm1695_vm4, %v7627_v51, -inf }
 0xcf7   : > { %2835 = vmax.xlane.f32.xlu1 %v2834_v60 }
 0xcf8   : > { %2832 = vmax.xlane.f32.xlu0 %v2831_v41 }
 0xcfb   : > { %2841 = vmax.xlane.f32.xlu1 %v2840_v44 }
 0xcfc   : > { %2838 = vmax.xlane.f32.xlu0 %v2837_v36 }
 0xd11   : > { %v2512_v19 = vpop.xlane.xlu1 %2511 }
 0xd12   : > { %6602 = vrcp.f32 %v2512_v19 }
 0xd13   : > { %6604 = vrcp.f32 %v7579_v59 }
 0xd14   : > { %6606 = vrcp.f32 %v7577_v15 }
 0xd15   : > { %v2506_v28 = vpop.xlane.xlu1 %2505 }
 0xd16   : > { %6608 = vrcp.f32 %v2506_v28 }
 0xd19   : > { %v2540_v58 = vpop.permute.xlu1 %2539 }
 0xd1a   : > { %6097 = vmatprep.subr.bf16.mxu1 %v2540_v58 }
 0xd1b   : > { %6098 = vmatpush3.bf16.msra.mxu1 %v2540_v58 }
 0xd1c   : > { %v6603_v48 = vpop.eup %6602  ;;  %6429 = vmatprep.subr.msk.bf16.mxu1 %vm2187_vm5, %v1575_v14 }
 0xd1d   : > { %v6605_v63 = vpop.eup %6604  ;;  %v2528_v61 = vmul.f32 %v6603_v48, %v7566_v56  ;;  %v2639_v56 = vsel %vm2187_vm5, %v1575_v14, 0 }
 0xd1e   : > { %6100 = vmatmul.mubr.msk.bf16.vlgmr.msra.gmra.mrb[36].mxu1 %vm1695_vm4, %v2530_v17  ;;  %v6607_v40 = vpop.eup %6606  ;;  %v2525_v15 = vmul.f32 %v6605_v63, %v7543_v12 }
 0xd1f   : > { %v2527_v52 = vmul.f32 %v6607_v40, %v7539_v49  ;;  %6108 = vmatpush3.bf16.msra.mxu1 %v2639_v56 }
 0xd20   : > { %v6609_v59 = vpop.eup %6608 }
 0xd21   : > { %v2526_v0 = vmul.f32 %v6609_v59, %v7570_v54  ;;  %v2532_v37 = vpack.c.bf16 %v2528_v61, %v2527_v52 }
 0xd23   : > { %v2531_v62 = vpack.c.bf16 %v2526_v0, %v2525_v15 }
 0xd25   : > { %6103 = vmatprep.mubr.msk.bf16.mxu1 %vm1695_vm4, %v2531_v62 }
 0xd26   : > { %6104 = vmatmul.mubr.msk.bf16.gmra.mrb[40].mxu1 %vm1695_vm4, %v2532_v37 }
 0xd79   : > { %v2821_v12 = vpop.xlane.xlu0 %2820 }
 0xd7a   : > { %v2843_v54 = vsub.f32 %v7600_v4, %v2821_v12 }
 0xd7b   : > { %v2824_v30 = vpop.xlane.xlu1 %2823 }
 0xd7c   : > { %v2851_v18 = vmul.f32 1.442695, %v2843_v54  ;;  %v2844_v57 = vsub.f32 %v7607_v3, %v2824_v30 }
 0xd7d   : > { %v2827_v49 = vpop.xlane.xlu0 %2826 }
 0xd7e   : > { %v2845_v11 = vsub.f32 %v7598_v27, %v2827_v49  ;;  %v2853_v29 = vmul.f32 1.442695, %v2844_v57 }
 0xd80   : > { %v2855_v9 = vmul.f32 1.442695, %v2845_v11 }
 0xd81   : > { %v2830_v8 = vpop.xlane.xlu0 %2829 }
 0xd82   : > { %6610 = vpow2.f32 %v2855_v9  ;;  %v2846_v33 = vsub.f32 %v7602_v32, %v2830_v8 }
 0xd83   : > { %6612 = vpow2.f32 %v2851_v18 }
 0xd84   : > { %v2857_v7 = vmul.f32 1.442695, %v2846_v33  ;;  %v2836_v16 = vpop.xlane.xlu1 %2835 }
 0xd85   : > { %v2833_v39 = vpop.xlane.xlu0 %2832  ;;  %v2848_v2 = vsub.f32 %v7627_v51, %v2836_v16 }
 0xd86   : > { %6614 = vpow2.f32 %v2857_v7  ;;  %v2847_v4 = vsub.f32 %v7621_v24, %v2833_v39 }
 0xd87   : > { %6616 = vpow2.f32 %v2853_v29  ;;  %v2861_v48 = vmul.f32 1.442695, %v2848_v2 }
 0xd88   : > { %v2859_v55 = vmul.f32 1.442695, %v2847_v4  ;;  %v2842_v50 = vpop.xlane.xlu1 %2841 }
 0xd89   : > { %v2839_v45 = vpop.xlane.xlu0 %2838  ;;  %v2850_v58 = vsub.f32 %v7625_v21, %v2842_v50 }
 0xd8a   : > { %v2849_v53 = vsub.f32 %v7619_v38, %v2839_v45 }
 0xd8b   : > { %v2865_v17 = vmul.f32 1.442695, %v2850_v58 }
 0xd8c   : > { %v7660_v27 = vpop.eup %6610  ;;  %v2863_v3 = vmul.f32 1.442695, %v2849_v53 }
 0xd8d   : > { %v2873_v26 = vsel %vm1695_vm4, %v7660_v27, 0.0  ;;  %v7664_v60 = vpop.eup %6612 }
 0xd8e   : > { %6618 = vpow2.f32 %v2863_v3  ;;  %2874 = vadd.xlane.f32.xlu0 %v2873_v26  ;;  %v2867_v24 = vsel %vm1695_vm4, %v7664_v60, 0.0 }
 0xd8f   : > { %6620 = vpow2.f32 %v2859_v55 }
 0xd90   : > { %v7666_v32 = vpop.eup %6614  ;;  %6622 = vpow2.f32 %v2865_v17 }
 0xd91   : > { %v2876_v38 = vsel %vm1695_vm4, %v7666_v32, 0.0  ;;  %v6617_v41 = vpop.eup %6616  ;;  %6624 = vpow2.f32 %v2861_v48 }
 0xd92   : > { %2868 = vadd.xlane.f32.xlu0 %v2867_v24  ;;  %2877 = vadd.xlane.f32.xlu1 %v2876_v38  ;;  %v2870_v44 = vsel %vm1695_vm4, %v6617_v41, 0.0 }
 0xd96   : > { %2871 = vadd.xlane.f32.xlu1 %v2870_v44 }
 0xd98   : > { %v7673_v36 = vpop.eup %6618 }
 0xd99   : > { %v2885_v19 = vsel %vm1695_vm4, %v7673_v36, 0.0  ;;  %v7677_v35 = vpop.eup %6620 }
 0xd9a   : > { %2886 = vadd.xlane.f32.xlu0 %v2885_v19  ;;  %v2879_v28 = vsel %vm1695_vm4, %v7677_v35, 0.0  ;;  %v7686_v63 = vpop.eup %6622 }
 0xd9b   : > { %v2888_v40 = vsel %vm1695_vm4, %v7686_v63, 0.0 }
 0xd9e   : > { %2880 = vadd.xlane.f32.xlu0 %v2879_v28 }
 0xda7   : > { %2913 = vrot.lane.b32.xlu1 %v7214_v31, %s6847_s2  ;;  %v7690_v31 = vpop.eup %6624 }
 0xdab   : > { %2915 = vrot.lane.b32.xlu1 %v7230_v47, %s6847_s2 }
 0xdb4   : > { %2911 = vrot.lane.b32.xlu0 %v7216_v34, %s6847_s2  ;;  %v2882_v34 = vsel %vm1695_vm4, %v7690_v31, 0.0 }
 0xdcf   : > { %2889 = vadd.xlane.f32.xlu1 %v2888_v40 }
 0xdd3   : > { %2883 = vadd.xlane.f32.xlu1 %v2882_v34 }
 0xde4   : > { %2917 = vrot.lane.b32.xlu1 %v7228_v46, %s6847_s2 }
 0xdf1   : > { %v6101_v47 = vpop.f32.mrb[36].mxu1 }
 0xdf2   : > { %v2591_v21 = vpop.f32.mrb[37].mxu1 }
 0xdf3   : > { %v6102_v51 = vpop.f32.mrb[38].mxu1 }
 0xdf4   : > { %v2623_v59 = vpack.c.bf16 %v6102_v51, %v6101_v47  ;;  %v2594_v61 = vpop.f32.mrb[39].mxu1 }
 0xdf5   : > { %v2622_v15 = vpack.c.bf16 %v2594_v61, %v2591_v21 }
 0xdf7   : > { %6109 = vmatprep.mubr.msk.bf16.mxu1 %vm921_vm1, %v2622_v15  ;;  %v5625_v15 = vld [vmem:[%s8495_s11] ss:$0 sm:$0xff] }
 0xdf8   : > { %6110 = vmatmul.mubr.msk.bf16.vlgmr.msra.gmra.mrb[28].mxu1 %vm921_vm1, %v2623_v59 }
 0xdf9   : > { %v6105_v0 = vpop.f32.mrb[40].mxu1 }
 0xdfa   : > { %v2607_v52 = vpop.f32.mrb[41].mxu1 }
 0xdfb   : > { %v6106_v62 = vpop.f32.mrb[42].mxu1 }
 0xdfc   : > { %v2625_v37 = vpack.c.bf16 %v6106_v62, %v6105_v0  ;;  %v2610_v14 = vpop.f32.mrb[43].mxu1 }
 0xdfd   : > { %v2624_v56 = vpack.c.bf16 %v2610_v14, %v2607_v52 }
 0xdff   : > { %6113 = vmatprep.mubr.msk.bf16.mxu1 %vm921_vm1, %v2624_v56 }
 0xe00   : > { %6114 = vmatmul.mubr.msk.bf16.gmra.mrb[32].mxu1 %vm921_vm1, %v2625_v37 }
 0xe1b   : > { %v2875_v46 = vpop.xlane.xlu0 %2874 }
 0xe1f   : > { %v2869_v12 = vpop.xlane.xlu0 %2868  ;;  %v2878_v54 = vpop.xlane.xlu1 %2877 }
 0xe20   : > { %6626 = vrcp.f32 %v2869_v12 }
 0xe23   : > { %v2872_v30 = vpop.xlane.xlu1 %2871 }
 0xe24   : > { %6628 = vrcp.f32 %v2872_v30 }
 0xe25   : > { %6630 = vrcp.f32 %v2878_v54 }
 0xe26   : > { %6632 = vrcp.f32 %v2875_v46 }
 0xe27   : > { %v2887_v49 = vpop.xlane.xlu0 %2886  ;;  %v2914_v9 = vpop.permute.xlu1 %2913 }
 0xe2a   : > { %v6627_v18 = vpop.eup %6626 }
 0xe2b   : > { %v2881_v11 = vpop.xlane.xlu0 %2880  ;;  %v2899_v33 = vmul.f32 %v6627_v18, %v7664_v60  ;;  %v2916_v39 = vpop.permute.xlu1 %2915 }
 0xe2e   : > { %v6629_v57 = vpop.eup %6628 }
 0xe2f   : > { %v2912_v8 = vpop.permute.xlu0 %2911  ;;  %v2900_v29 = vmul.f32 %v6629_v57, %v6617_v41  ;;  %v6631_v45 = vpop.eup %6630 }
 0xe30   : > { %6133 = vmatprep.subr.bf16.mxu1 %v2912_v8  ;;  %v6633_v55 = vpop.eup %6632  ;;  %v2902_v3 = vmul.f32 %v6631_v45, %v7666_v32 }
 0xe31   : > { %6134 = vmatpush3.bf16.msra.mxu1 %v2912_v8  ;;  %v2907_v7 = vpack.c.bf16 %v2900_v29, %v2899_v33  ;;  %v2901_v60 = vmul.f32 %v6633_v55, %v7660_v27  ;;  %v1576_v27 = vld [vmem:[%s8549_s0 + $0xc] sm:$0xf]  ;;  %s8553_s0 = smov 112  }
 0xe32   : > { %6135 = vmatprep.subr.bf16.mxu1 %v2914_v9  ;;  %v3017_v17 = vsel %vm2187_vm5, %v1576_v27, 0 }
 0xe33   : > { %6141 = vmatprep.mubr.msk.bf16.mxu1 %vm1695_vm4, %v2907_v7  ;;  %v2908_v24 = vpack.c.bf16 %v2902_v3, %v2901_v60 }
 0xe35   : > { %6136 = vmatpush3.bf16.msra.mxu1 %v2914_v9 }
 0xe36   : > { %6137 = vmatprep.subr.bf16.mxu1 %v2916_v39 }
 0xe39   : > { %6138 = vmatpush3.bf16.msra.mxu1 %v2916_v39 }
 0xe5c   : > { %v2890_v4 = vpop.xlane.xlu1 %2889 }
 0xe5d   : > { %6634 = vrcp.f32 %v2890_v4 }
 0xe5e   : > { %6636 = vrcp.f32 %v2881_v11 }
 0xe5f   : > { %6638 = vrcp.f32 %v2887_v49 }
 0xe60   : > { %v2884_v53 = vpop.xlane.xlu1 %2883 }
 0xe61   : > { %6640 = vrcp.f32 %v2884_v53 }
 0xe64   : > { %v2918_v26 = vpop.permute.xlu1 %2917 }
 0xe65   : > { %6139 = vmatprep.subr.bf16.mxu1 %v2918_v26 }
 0xe66   : > { %6140 = vmatpush3.bf16.msra.mxu1 %v2918_v26 }
 0xe67   : > { %v6635_v38 = vpop.eup %6634  ;;  %6434 = vmatprep.subr.msk.bf16.mxu1 %vm2187_vm5, %v1576_v27 }
 0xe68   : > { %v6637_v41 = vpop.eup %6636  ;;  %v2906_v28 = vmul.f32 %v6635_v38, %v7686_v63 }
 0xe69   : > { %6142 = vmatmul.mubr.msk.bf16.vlgmr.msra.gmra.mrb[44].mxu1 %vm1695_vm4, %v2908_v24  ;;  %v6639_v44 = vpop.eup %6638  ;;  %v2903_v16 = vmul.f32 %v6637_v41, %v7677_v35 }
 0xe6a   : > { %v2905_v32 = vmul.f32 %v6639_v44, %v7673_v36  ;;  %6150 = vmatpush3.bf16.msra.mxu1 %v3017_v17 }
 0xe6b   : > { %v6641_v19 = vpop.eup %6640 }
 0xe6c   : > { %v2904_v50 = vmul.f32 %v6641_v19, %v7690_v31  ;;  %v2910_v2 = vpack.c.bf16 %v2906_v28, %v2905_v32 }
 0xe6e   : > { %v2909_v58 = vpack.c.bf16 %v2904_v50, %v2903_v16 }
 0xe70   : > { %6145 = vmatprep.mubr.msk.bf16.mxu1 %vm1695_vm4, %v2909_v58 }
 0xe71   : > { %6146 = vmatmul.mubr.msk.bf16.gmra.mrb[48].mxu1 %vm1695_vm4, %v2910_v2 }
 0xf3c   : > { %v6143_v35 = vpop.f32.mrb[44].mxu1 }
 0xf3d   : > { %v2969_v48 = vpop.f32.mrb[45].mxu1 }
 0xf3e   : > { %v6144_v63 = vpop.f32.mrb[46].mxu1 }
 0xf3f   : > { %v3001_v40 = vpack.c.bf16 %v6144_v63, %v6143_v35  ;;  %v2972_v36 = vpop.f32.mrb[47].mxu1 }
 0xf40   : > { %v3000_v31 = vpack.c.bf16 %v2972_v36, %v2969_v48 }
 0xf42   : > { %6151 = vmatprep.mubr.msk.bf16.mxu1 %vm921_vm1, %v3000_v31 }
 0xf43   : > { %6152 = vmatmul.mubr.msk.bf16.vlgmr.msra.gmra.mrb[28].mxu1 %vm921_vm1, %v3001_v40 }
 0xf44   : > { %v6147_v34 = vpop.f32.mrb[48].mxu1 }
 0xf45   : > { %v2985_v47 = vpop.f32.mrb[49].mxu1 }
 0xf46   : > { %v6148_v21 = vpop.f32.mrb[50].mxu1 }
 0xf47   : > { %v3003_v51 = vpack.c.bf16 %v6148_v21, %v6147_v34  ;;  %v2988_v59 = vpop.f32.mrb[51].mxu1 }
 0xf48   : > { %v3002_v61 = vpack.c.bf16 %v2988_v59, %v2985_v47 }
 0xf4a   : > { %6155 = vmatprep.mubr.msk.bf16.mxu1 %vm921_vm1, %v3002_v61 }
 0xf4b   : > { %6156 = vmatmul.mubr.msk.bf16.gmra.mrb[32].mxu1 %vm921_vm1, %v3003_v51 }
0x1016   : > { %v6153_v0 = vpop.f32.mrb[28].mxu1 }
0x1017   : > { %v3053_v52 = vpop.f32.mrb[29].mxu1  ;;  %v3100_v62 = vadd.f32 %v6153_v0, %v5625_v15 }
0x1018   : > { %v3098_v37 = vadd.f32 %v5625_v15, %v3053_v52  ;;  %v6154_v14 = vpop.f32.mrb[30].mxu1 }
0x1019   : > { %v3056_v56 = vpop.f32.mrb[31].mxu1  ;;  %v7726_v54 = vadd.f32 %v3100_v62, %v7110_v1  ;;  %v3101_v30 = vadd.f32 %v6154_v14, %v5625_v15 }
0x101a   : > { %v7723_v46 = vadd.f32 %v3098_v37, %v7112_v5  ;;  %v3099_v12 = vadd.f32 %v5625_v15, %v3056_v56 }
0x101b   : > { %v7736_v5 = vadd.f32 %v3101_v30, %v7114_v10  ;;  %v3122_v33 = vsel %vm825_vm2, %v7726_v54, 0.0 }
0x101c   : > { %v7729_v49 = vadd.f32 %v3099_v12, %v7118_v13  ;;  %v3116_v11 = vsel %vm825_vm2, %v7723_v46, 0.0 }
0x101d   : > { %3117 = vadd.xlane.f32.xlu0 %v3116_v11  ;;  %v3125_v10 = vsel %vm825_vm2, %v7736_v5, 0.0 }
0x101e   : > { %v6157_v18 = vpop.f32.mrb[32].mxu1  ;;  %v3119_v57 = vsel %vm825_vm2, %v7729_v49, 0.0 }
0x101f   : > { %3120 = vadd.xlane.f32.xlu1 %v3119_v57  ;;  %v3069_v9 = vpop.f32.mrb[33].mxu1  ;;  %v3104_v39 = vadd.f32 %v6157_v18, %v5625_v15 }
0x1020   : > { %v3102_v8 = vadd.f32 %v5625_v15, %v3069_v9  ;;  %v6158_v1 = vpop.f32.mrb[34].mxu1  ;;  %v6474_v9 = vld [vmem:[%s8498_s14] sm:$0xff]  }
0x1021   : > { %3123 = vadd.xlane.f32.xlu0 %v3122_v33  ;;  %v3072_v13 = vpop.f32.mrb[35].mxu1  ;;  %v3105_v29 = vadd.f32 %v6158_v1, %v5625_v15  ;;  %v7754_v3 = vadd.f32 %v3104_v39, %v7128_v22  ;;  %6159 = vmatprep.subr.bf16.mxu0 %v6474_v9 }
0x1022   : > { %v3103_v7 = vadd.f32 %v5625_v15, %v3072_v13  ;;  %v7741_v4 = vadd.f32 %v3102_v8, %v7126_v20  ;;  %6160 = vmatpush3.bf16.msra.mxu0 %v6474_v9  ;;  %v6475_v8 = vld [vmem:[%s8498_s14 + $0x8] sm:$0xff]  }
0x1023   : > { %v7749_v53 = vadd.f32 %v3105_v29, %v7134_v25  ;;  %v3134_v26 = vsel %vm825_vm2, %v7754_v3, 0.0  ;;  %6161 = vmatprep.subr.bf16.mxu0 %v6475_v8 }
0x1024   : > { %v7744_v45 = vadd.f32 %v3103_v7, %v7130_v23  ;;  %v3128_v20 = vsel %vm825_vm2, %v7741_v4, 0.0 }
0x1025   : > { %3126 = vadd.xlane.f32.xlu0 %v3125_v10  ;;  %v3137_v23 = vsel %vm825_vm2, %v7749_v53, 0.0 }
0x1026   : > { %v3131_v55 = vsel %vm825_vm2, %v7744_v45, 0.0  ;;  %6162 = vmatpush3.bf16.msra.mxu0 %v6475_v8 }
0x1027   : > { %3132 = vadd.xlane.f32.xlu1 %v3131_v55  ;;  %6171 = vmatprep.subr.bf16.mxu0 %v6836_v6 }
0x1029   : > { %3129 = vadd.xlane.f32.xlu0 %v3128_v20 }
0x102b   : > { %3138 = vadd.xlane.f32.xlu1 %v3137_v23 }
0x102d   : > { %3135 = vadd.xlane.f32.xlu0 %v3134_v26 }
0x10aa   : > { %v3118_v25 = vpop.xlane.xlu0 %3117 }
0x10ab   : > { %v3140_v60 = vmul.f32 0.03125, %v3118_v25 }
0x10ac   : > { %v3121_v24 = vpop.xlane.xlu1 %3120 }
0x10ad   : > { %v7763_v38 = vsub.f32 %v7723_v46, %v3140_v60  ;;  %v3141_v22 = vmul.f32 0.03125, %v3121_v24 }
0x10ae   : > { %v3124_v41 = vpop.xlane.xlu0 %3123 }
0x10af   : > { %v7766_v44 = vsub.f32 %v7729_v49, %v3141_v22  ;;  %v3142_v19 = vmul.f32 0.03125, %v3124_v41  ;;  %v3156_v28 = vmul.f32 %v7763_v38, %v7763_v38 }
0x10b1   : > { %v7771_v16 = vsub.f32 %v7726_v54, %v3142_v19  ;;  %v3164_v50 = vsel %vm825_vm2, %v3156_v28, 0.0  ;;  %v3157_v32 = vmul.f32 %v7766_v44, %v7766_v44  ;;  %v5626_v28 = vld [vmem:[%s8496_s12] ss:$0 sm:$0xff] }
0x10b2   : > { %v3127_v58 = vpop.xlane.xlu0 %3126  ;;  %3165 = vadd.xlane.f32.xlu0 %v3164_v50 }
0x10b3   : > { %v3143_v2 = vmul.f32 0.03125, %v3127_v58  ;;  %v3167_v27 = vsel %vm825_vm2, %v3157_v32, 0.0  ;;  %v3158_v17 = vmul.f32 %v7771_v16, %v7771_v16 }
0x10b4   : > { %3168 = vadd.xlane.f32.xlu1 %v3167_v27  ;;  %v3133_v35 = vpop.xlane.xlu1 %3132 }
0x10b5   : > { %v7780_v48 = vsub.f32 %v7736_v5, %v3143_v2  ;;  %v3145_v63 = vmul.f32 0.03125, %v3133_v35  ;;  %v3170_v40 = vsel %vm825_vm2, %v3158_v17, 0.0 }
0x10b6   : > { %3171 = vadd.xlane.f32.xlu0 %v3170_v40  ;;  %v3130_v36 = vpop.xlane.xlu0 %3129 }
0x10b7   : > { %v7784_v31 = vsub.f32 %v7744_v45, %v3145_v63  ;;  %v3144_v34 = vmul.f32 0.03125, %v3130_v36  ;;  %v3159_v47 = vmul.f32 %v7780_v48, %v7780_v48 }
0x10b8   : > { %v3139_v21 = vpop.xlane.xlu1 %3138 }
0x10b9   : > { %v7789_v51 = vsub.f32 %v7741_v4, %v3144_v34  ;;  %v3147_v59 = vmul.f32 0.03125, %v3139_v21  ;;  %v3173_v61 = vsel %vm825_vm2, %v3159_v47, 0.0  ;;  %v3161_v15 = vmul.f32 %v7784_v31, %v7784_v31  ;;  %v5627_v47 = vld [vmem:[%s8497_s13] ss:$0 sm:$0xff] }
0x10ba   : > { %v3136_v0 = vpop.xlane.xlu0 %3135  ;;  %3174 = vadd.xlane.f32.xlu1 %v3173_v61 }
0x10bb   : > { %v7795_v52 = vsub.f32 %v7749_v53, %v3147_v59  ;;  %v3146_v62 = vmul.f32 0.03125, %v3136_v0  ;;  %v3160_v37 = vmul.f32 %v7789_v51, %v7789_v51  ;;  %v3179_v12 = vsel %vm825_vm2, %v3161_v15, 0.0 }
0x10bd   : > { %v7800_v14 = vsub.f32 %v7754_v3, %v3146_v62  ;;  %v3176_v56 = vsel %vm825_vm2, %v3160_v37, 0.0  ;;  %v3163_v30 = vmul.f32 %v7795_v52, %v7795_v52 }
0x10be   : > { %3177 = vadd.xlane.f32.xlu0 %v3176_v56  ;;  %3180 = vadd.xlane.f32.xlu1 %v3179_v12 }
0x10bf   : > { %v3162_v11 = vmul.f32 %v7800_v14, %v7800_v14  ;;  %v3185_v57 = vsel %vm825_vm2, %v3163_v30, 0.0 }
0x10c1   : > { %v3182_v18 = vsel %vm825_vm2, %v3162_v11, 0.0 }
0x10c2   : > { %3183 = vadd.xlane.f32.xlu0 %v3182_v18  ;;  %3186 = vadd.xlane.f32.xlu1 %v3185_v57 }
0x113f   : > { %v3166_v1 = vpop.xlane.xlu0 %3165 }
0x1140   : > { %v3188_v33 = vmul.f32 0.03125, %v3166_v1 }
0x1141   : > { %v3169_v13 = vpop.xlane.xlu1 %3168 }
0x1142   : > { %v3196_v29 = vadd.f32 1e-05, %v3188_v33  ;;  %v3189_v7 = vmul.f32 0.03125, %v3169_v13 }
0x1143   : > { %v3172_v39 = vpop.xlane.xlu0 %3171 }
0x1144   : > { %6642 = vrsqrt.f32 %v3196_v29  ;;  %v3197_v10 = vadd.f32 1e-05, %v3189_v7  ;;  %v3190_v55 = vmul.f32 0.03125, %v3172_v39 }
0x1146   : > { %6644 = vrsqrt.f32 %v3197_v10  ;;  %v3198_v20 = vadd.f32 1e-05, %v3190_v55 }
0x1147   : > { %v3175_v23 = vpop.xlane.xlu1 %3174 }
0x1148   : > { %6646 = vrsqrt.f32 %v3198_v20  ;;  %v3191_v26 = vmul.f32 0.03125, %v3175_v23 }
0x114a   : > { %v3199_v25 = vadd.f32 1e-05, %v3191_v26 }
0x114b   : > { %v3178_v60 = vpop.xlane.xlu0 %3177  ;;  %v3181_v24 = vpop.xlane.xlu1 %3180 }
0x114c   : > { %6648 = vrsqrt.f32 %v3199_v25  ;;  %v3192_v22 = vmul.f32 0.03125, %v3178_v60  ;;  %v3193_v41 = vmul.f32 0.03125, %v3181_v24  ;;  %v6478_v25 = vld [vmem:[%s8499_s15 + $0x10] sm:$0xff]   ;;  %v818_v24 = vld [vmem:[%s803_s6] sm:$0xff]  ;;  %s8552_s6 = smov 96  }
0x114e   : > { %v6643_v19 = vpop.eup %6642  ;;  %v3200_v50 = vadd.f32 1e-05, %v3192_v22  ;;  %v3201_v32 = vadd.f32 1e-05, %v3193_v41  ;;  %v3353_v22 = vpack.c.bf16 %v818_v24, %v818_v24 }
0x114f   : > { %v3212_v58 = vmul.f32 %v6643_v19, %v7763_v38  ;;  %v3184_v2 = vpop.xlane.xlu0 %3183  ;;  %v3187_v27 = vpop.xlane.xlu1 %3186 }
0x1150   : > { %v6645_v17 = vpop.eup %6644  ;;  %6650 = vrsqrt.f32 %v3200_v50  ;;  %v3194_v35 = vmul.f32 0.03125, %v3184_v2  ;;  %v3195_v63 = vmul.f32 0.03125, %v3187_v27 }
0x1151   : > { %6652 = vrsqrt.f32 %v3201_v32  ;;  %v3213_v40 = vmul.f32 %v6645_v17, %v7766_v44  ;;  %v3226_v36 = vmul.f32 %v5626_v28, %v3212_v58 }
0x1152   : > { %v6647_v34 = vpop.eup %6646  ;;  %v3202_v21 = vadd.f32 1e-05, %v3194_v35  ;;  %v3203_v59 = vadd.f32 1e-05, %v3195_v63 }
0x1153   : > { %v3214_v61 = vmul.f32 %v6647_v34, %v7771_v16  ;;  %v3227_v38 = vmul.f32 %v5626_v28, %v3213_v40  ;;  %v3240_v15 = vadd.f32 %v5627_v47, %v3226_v36  ;;  %v6476_v16 = vld [vmem:[%s8499_s15] sm:$0xff]  }
0x1154   : > { %6654 = vrsqrt.f32 %v3202_v21 }
0x1155   : > { %6656 = vrsqrt.f32 %v3203_v59  ;;  %v3241_v0 = vadd.f32 %v5627_v47, %v3227_v38  ;;  %v3228_v37 = vmul.f32 %v5626_v28, %v3214_v61 }
0x1156   : > { %v6649_v62 = vpop.eup %6648 }
0x1157   : > { %v3215_v56 = vmul.f32 %v6649_v62, %v7780_v48  ;;  %v3252_v44 = vpack.c.bf16 %v3241_v0, %v3240_v15  ;;  %v3242_v18 = vadd.f32 %v5627_v47, %v3228_v37 }
0x1159   : > { %v3229_v12 = vmul.f32 %v5626_v28, %v3215_v56  ;;  %6163 = vmatprep.mubr.msk.bf16.mxu0 %vm825_vm2, %v3252_v44 }
0x115a   : > { %v6651_v30 = vpop.eup %6650 }
0x115b   : > { %v6653_v11 = vpop.eup %6652  ;;  %v3243_v57 = vadd.f32 %v5627_v47, %v3229_v12  ;;  %v3216_v9 = vmul.f32 %v6651_v30, %v7789_v51  ;;  %v6477_v51 = vld [vmem:[%s8499_s15 + $0x8] sm:$0xff]  }
0x115c   : > { %v3217_v8 = vmul.f32 %v6653_v11, %v7784_v31 }
0x115d   : > { %v3253_v1 = vpack.c.bf16 %v3243_v57, %v3242_v18  ;;  %v3230_v33 = vmul.f32 %v5626_v28, %v3216_v9 }
0x115e   : > { %v6655_v48 = vpop.eup %6654  ;;  %v3231_v13 = vmul.f32 %v5626_v28, %v3217_v8 }
0x115f   : > { %v6657_v29 = vpop.eup %6656  ;;  %v3218_v7 = vmul.f32 %v6655_v48, %v7800_v14  ;;  %6164 = vmatmul.mubr.msk.bf16.vlgmr.msra.gmra.mrb[48].mxu0 %vm825_vm2, %v3253_v1  ;;  %v3244_v39 = vadd.f32 %v5627_v47, %v3230_v33 }
0x1160   : > { %6172 = vmatpush3.bf16.msra.mxu0 %v6476_v16  ;;  %v3245_v10 = vadd.f32 %v5627_v47, %v3231_v13  ;;  %v3219_v55 = vmul.f32 %v6657_v29, %v7795_v52  ;;  %v6479_v52 = vld [vmem:[%s8499_s15 + $0x18] sm:$0xff]  }
0x1161   : > { %6173 = vmatprep.subr.bf16.mxu0 %v6836_v6  ;;  %v3232_v31 = vmul.f32 %v5626_v28, %v3218_v7 }
0x1162   : > { %v3254_v20 = vpack.c.bf16 %v3245_v10, %v3244_v39  ;;  %v3233_v23 = vmul.f32 %v5626_v28, %v3219_v55 }
0x1163   : > { %v3246_v26 = vadd.f32 %v5627_v47, %v3232_v31 }
0x1164   : > { %6167 = vmatprep.mubr.msk.bf16.mxu0 %vm825_vm2, %v3254_v20  ;;  %6174 = vmatpush3.bf16.msra.mxu0 %v6477_v51  ;;  %v3247_v14 = vadd.f32 %v5627_v47, %v3233_v23 }
0x1165   : > { %6175 = vmatprep.subr.bf16.mxu0 %v6836_v6 }
0x1166   : > { %v3255_v60 = vpack.c.bf16 %v3247_v14, %v3246_v26 }
0x1168   : > { %6168 = vmatmul.mubr.msk.bf16.gmra.mrb[52].mxu0 %vm825_vm2, %v3255_v60 }
0x1169   : > { %6176 = vmatpush3.bf16.msra.mxu0 %v6478_v25  ;;  %6179 = vmatprep.mubr.msk.bf16.mxu0 %vm6835_vm0, %v6836_v6 }
0x116a   : > { %6177 = vmatprep.subr.bf16.mxu0 %v6836_v6 }
0x116d   : > { %6178 = vmatpush3.bf16.msra.mxu0 %v6479_v52 }
0x1170   : > { %6180 = vmatmul.mubr.msk.bf16.vlgmr.msra.gmra.mrb[56].mxu0 %vm1695_vm4, %v3353_v22 }
0x1232   : > { %v6165_v41 = vpop.f32.mrb[48].mxu0 }
0x1233   : > { %v3314_v19 = vpop.f32.mrb[49].mxu0  ;;  %v3428_v50 = vmul.f32 0.35355338, %v6165_v41 }
0x1234   : > { %v6166_v28 = vpop.f32.mrb[50].mxu0  ;;  %v3426_v2 = vmul.f32 0.35355338, %v3314_v19 }
0x1235   : > { %v3429_v32 = vmul.f32 0.35355338, %v6166_v28  ;;  %v3317_v58 = vpop.f32.mrb[51].mxu0 }
0x1236   : > { %v3427_v27 = vmul.f32 0.35355338, %v3317_v58 }
0x1237   : > { %v7857_v17 = vpack.c.bf16 %v3429_v32, %v3428_v50 }
0x1238   : > { %v7859_v35 = vpack.c.bf16 %v3427_v27, %v3426_v2 }
0x123a   : > { %3702 = vrot.lane.b32.xlu1 %v7859_v35, %s8551_s4  ;;  %6185 = vmatprep.mubr.msk.bf16.mxu1 %vm921_vm1, %v7859_v35 }
0x123b   : > { %v6169_v6 = vpop.f32.mrb[52].mxu0 }
0x123c   : > { %v3330_v63 = vpop.f32.mrb[53].mxu0  ;;  %v3432_v36 = vmul.f32 0.35355338, %v6169_v6 }
0x123d   : > { %v6170_v40 = vpop.f32.mrb[54].mxu0  ;;  %v3430_v21 = vmul.f32 0.35355338, %v3330_v63 }
0x123e   : > { %v3433_v34 = vmul.f32 0.35355338, %v6170_v40  ;;  %v3333_v47 = vpop.f32.mrb[55].mxu0  ;;  %3704 = vrot.lane.b32.xlu1 %v7857_v17, %s8551_s4 }
0x123f   : > { %v3431_v59 = vmul.f32 0.35355338, %v3333_v47 }
0x1240   : > { %v7867_v61 = vpack.c.bf16 %v3433_v34, %v3432_v36 }
0x1241   : > { %v7869_v38 = vpack.c.bf16 %v3431_v59, %v3430_v21 }
0x1243   : > { %3706 = vrot.lane.b32.xlu1 %v7869_v38, %s8551_s4  ;;  %v3415_v15 = vpop.f32.mrb[56].mxu0 }
0x1244   : > { %v7873_v0 = vpack.c.bf16 %v3415_v15, %v3415_v15  ;;  %v6181_v62 = vpop.f32.mrb[57].mxu0 }
0x1245   : > { %v3418_v37 = vpop.f32.mrb[58].mxu0 }
0x1246   : > { %3710 = vrot.lane.b32.xlu0 %v7873_v0, %s8551_s4  ;;  %v6182_v56 = vpop.f32.mrb[59].mxu0  ;;  %6435 = vmatprep.subr.msk.bf16.mxu1 %vm921_vm1, %v7873_v0  ;;  %v3452_v44 = vsel %vm921_vm1, %v7873_v0, 0 }
0x1247   : > { %6184 = vmatpush3.bf16.xpose.msra.mxu1 %v3452_v44 }
0x124a   : > { %3708 = vrot.lane.b32.xlu0 %v7867_v61, %s8551_s4  ;;  %s8556_s4 = smov 80  }
0x124e   : > { %6186 = vmatmul.mubr.msk.bf16.vlgmr.msra.gmra.mrb[52].mxu1 %vm921_vm1, %v7857_v17 }
0x124f   : > { %6189 = vmatprep.mubr.msk.bf16.mxu1 %vm921_vm1, %v7869_v38 }
0x1256   : > { %6190 = vmatmul.mubr.msk.bf16.gmra.mrb[56].mxu1 %vm921_vm1, %v7867_v61 }
0x12ac   : > { %v3703_v12 = vpop.permute.xlu1 %3702 }
0x12ad   : > { %6205 = vmatprep.mubr.msk.bf16.mxu1 %vm921_vm1, %v3703_v12 }
0x12b0   : > { %v3705_v18 = vpop.permute.xlu1 %3704 }
0x12b5   : > { %v3707_v57 = vpop.permute.xlu1 %3706 }
0x12b8   : > { %v3711_v30 = vpop.permute.xlu0 %3710 }
0x12b9   : > { %v3725_v11 = vsel %vm921_vm1, %v3711_v30, 0  ;;  %6437 = vmatprep.subr.msk.bf16.mxu1 %vm921_vm1, %v3711_v30 }
0x12ba   : > { %6204 = vmatpush3.bf16.xpose.msra.mxu1 %v3725_v11 }
0x12bc   : > { %v3709_v9 = vpop.permute.xlu0 %3708 }
0x12c1   : > { %6206 = vmatmul.mubr.msk.bf16.vlgmr.msra.gmra.mrb[60].mxu1 %vm921_vm1, %v3705_v18 }
0x12c2   : > { %6209 = vmatprep.mubr.msk.bf16.mxu1 %vm921_vm1, %v3707_v57 }
0x12c9   : > { %6210 = vmatmul.mubr.msk.bf16.gmra.mrb[64].mxu1 %vm921_vm1, %v3709_v9 }
0x1321   : > { %v7895_v16 = vpop.f32.mrb[52].mxu1 }
0x1322   : > { %v7897_v8 = vpop.f32.mrb[53].mxu1  ;;  %v3525_v1 = vsel %vm921_vm1, %v7895_v16, -inf }
0x1323   : > { %3526 = vmax.xlane.f32.xlu0 %v3525_v1  ;;  %v6188_v33 = vpop.f32.mrb[54].mxu1  ;;  %v3519_v48 = vsel %vm921_vm1, %v7897_v8, -inf }
0x1324   : > { %3520 = vmax.xlane.f32.xlu1 %v3519_v48  ;;  %v3491_v13 = vpop.f32.mrb[55].mxu1  ;;  %v3528_v10 = vsel %vm921_vm1, %v6188_v33, -inf }
0x1325   : > { %v3522_v29 = vsel %vm921_vm1, %v3491_v13, -inf }
0x1327   : > { %3523 = vmax.xlane.f32.xlu0 %v3522_v29 }
0x1329   : > { %v7904_v7 = vpop.f32.mrb[56].mxu1 }
0x132a   : > { %v7906_v39 = vpop.f32.mrb[57].mxu1  ;;  %v3537_v23 = vsel %vm921_vm1, %v7904_v7, -inf }
0x132b   : > { %3529 = vmax.xlane.f32.xlu0 %v3528_v10  ;;  %v6192_v51 = vpop.f32.mrb[58].mxu1  ;;  %v3531_v55 = vsel %vm921_vm1, %v7906_v39, -inf }
0x132c   : > { %3532 = vmax.xlane.f32.xlu1 %v3531_v55  ;;  %v3507_v31 = vpop.f32.mrb[59].mxu1  ;;  %v3540_v26 = vsel %vm921_vm1, %v6192_v51, -inf }
0x132d   : > { %v3534_v20 = vsel %vm921_vm1, %v3507_v31, -inf }
0x132f   : > { %3535 = vmax.xlane.f32.xlu0 %v3534_v20 }
0x1330   : > { %3538 = vmax.xlane.f32.xlu1 %v3537_v23 }
0x1333   : > { %3541 = vmax.xlane.f32.xlu0 %v3540_v26 }
0x1394   : > { %v7915_v14 = vpop.f32.mrb[60].mxu1 }
0x1395   : > { %v7917_v25 = vpop.f32.mrb[61].mxu1  ;;  %v3798_v41 = vsel %vm921_vm1, %v7915_v14, -inf }
0x1396   : > { %v7919_v60 = vpop.f32.mrb[62].mxu1  ;;  %v3792_v52 = vsel %vm921_vm1, %v7917_v25, -inf }
0x1397   : > { %3793 = vmax.xlane.f32.xlu1 %v3792_v52  ;;  %v7923_v24 = vpop.f32.mrb[63].mxu1  ;;  %v3801_v28 = vsel %vm921_vm1, %v7919_v60, -inf }
0x1398   : > { %v3795_v22 = vsel %vm921_vm1, %v7923_v24, -inf }
0x1399   : > { %3796 = vmax.xlane.f32.xlu0 %v3795_v22 }
0x139b   : > { %3799 = vmax.xlane.f32.xlu1 %v3798_v41 }
0x139c   : > { %v7929_v19 = vpop.f32.mrb[64].mxu1 }
0x139d   : > { %3802 = vmax.xlane.f32.xlu0 %v3801_v28  ;;  %v7933_v50 = vpop.f32.mrb[65].mxu1  ;;  %v3810_v6 = vsel %vm921_vm1, %v7929_v19, -inf }
0x139e   : > { %v7935_v32 = vpop.f32.mrb[66].mxu1  ;;  %v3804_v58 = vsel %vm921_vm1, %v7933_v50, -inf }
0x139f   : > { %3805 = vmax.xlane.f32.xlu1 %v3804_v58  ;;  %v7939_v2 = vpop.f32.mrb[67].mxu1  ;;  %v3813_v63 = vsel %vm921_vm1, %v7935_v32, -inf }
0x13a0   : > { %v3807_v27 = vsel %vm921_vm1, %v7939_v2, -inf }
0x13a1   : > { %3808 = vmax.xlane.f32.xlu0 %v3807_v27 }
0x13a3   : > { %3811 = vmax.xlane.f32.xlu1 %v3810_v6 }
0x13a5   : > { %3814 = vmax.xlane.f32.xlu0 %v3813_v63 }
0x13b0   : > { %v3527_v40 = vpop.xlane.xlu0 %3526 }
0x13b1   : > { %v3521_v37 = vpop.xlane.xlu1 %3520  ;;  %v3545_v11 = vsub.f32 %v7895_v16, %v3527_v40 }
0x13b2   : > { %v3543_v1 = vsub.f32 %v7897_v8, %v3521_v37 }
0x13b3   : > { %v3555_v9 = vmul.f32 1.442695, %v3545_v11 }
0x13b4   : > { %v3524_v36 = vpop.xlane.xlu0 %3523  ;;  %3612 = vrot.lane.b32.xlu1 %v7873_v0, %s8552_s6  ;;  %v3551_v10 = vmul.f32 1.442695, %v3543_v1  ;;  %s8558_s6 = sshll.u32 %s8560_s3, 6 }
0x13b5   : > { %v3544_v34 = vsub.f32 %v3491_v13, %v3524_v36  ;;  %s8455_s30 = scalar_lea.vmem %s8510_s26, %s8558_s6 }
0x13b7   : > { %v3553_v59 = vmul.f32 1.442695, %v3544_v34 }
0x13b8   : > { %v3530_v47 = vpop.xlane.xlu0 %3529 }
0x13b9   : > { %v3546_v21 = vsub.f32 %v6188_v33, %v3530_v47  ;;  %v3533_v12 = vpop.xlane.xlu1 %3532 }
0x13ba   : > { %v3547_v8 = vsub.f32 %v7906_v39, %v3533_v12 }
0x13bb   : > { %v3557_v15 = vmul.f32 1.442695, %v3546_v21 }
0x13bc   : > { %v3536_v62 = vpop.xlane.xlu0 %3535  ;;  %v3559_v26 = vmul.f32 1.442695, %v3547_v8 }
0x13bd   : > { %6658 = vpow2.f32 %v3557_v15  ;;  %v3548_v56 = vsub.f32 %v3507_v31, %v3536_v62  ;;  %v3539_v33 = vpop.xlane.xlu1 %3538 }
0x13be   : > { %6660 = vpow2.f32 %v3553_v59  ;;  %v3549_v16 = vsub.f32 %v7904_v7, %v3539_v33 }
0x13bf   : > { %v3561_v18 = vmul.f32 1.442695, %v3548_v56 }
0x13c0   : > { %v3542_v44 = vpop.xlane.xlu0 %3541  ;;  %v3563_v55 = vmul.f32 1.442695, %v3549_v16 }
0x13c1   : > { %v3550_v30 = vsub.f32 %v6192_v51, %v3542_v44 }
0x13c3   : > { %v3565_v57 = vmul.f32 1.442695, %v3550_v30 }
0x13c5   : > { %6662 = vpow2.f32 %v3565_v57 }
0x13c6   : > { %6664 = vpow2.f32 %v3561_v18 }
0x13c7   : > { %v7951_v48 = vpop.eup %6658  ;;  %6666 = vpow2.f32 %v3555_v9 }
0x13c8   : > { %v3576_v13 = vsel %vm921_vm1, %v7951_v48, 0.0  ;;  %v7955_v29 = vpop.eup %6660  ;;  %6668 = vpow2.f32 %v3551_v10 }
0x13c9   : > { %3577 = vadd.xlane.f32.xlu0 %v3576_v13  ;;  %v3570_v51 = vsel %vm921_vm1, %v7955_v29, 0.0  ;;  %6670 = vpow2.f32 %v3563_v55 }
0x13ca   : > { %6672 = vpow2.f32 %v3559_v26 }
0x13cd   : > { %3571 = vadd.xlane.f32.xlu0 %v3570_v51 }
0x13cf   : > { %v7961_v31 = vpop.eup %6662 }
0x13d0   : > { %v3588_v20 = vsel %vm921_vm1, %v7961_v31, 0.0  ;;  %v7965_v23 = vpop.eup %6664 }
0x13d1   : > { %3589 = vadd.xlane.f32.xlu0 %v3588_v20  ;;  %v7967_v52 = vpop.eup %6666  ;;  %v3582_v7 = vsel %vm921_vm1, %v7965_v23, 0.0 }
0x13d2   : > { %v3573_v39 = vsel %vm921_vm1, %v7967_v52, 0.0  ;;  %v7973_v22 = vpop.eup %6668 }
0x13d3   : > { %v3567_v41 = vsel %vm921_vm1, %v7973_v22, 0.0  ;;  %v7977_v28 = vpop.eup %6670 }
0x13d4   : > { %v3585_v58 = vsel %vm921_vm1, %v7977_v28, 0.0  ;;  %v7981_v27 = vpop.eup %6672 }
0x13d5   : > { %3583 = vadd.xlane.f32.xlu0 %v3582_v7  ;;  %v3579_v6 = vsel %vm921_vm1, %v7981_v27, 0.0 }
0x13d8   : > { %3574 = vadd.xlane.f32.xlu1 %v3573_v39 }
0x13dc   : > { %3568 = vadd.xlane.f32.xlu1 %v3567_v41 }
0x13e0   : > { %3586 = vadd.xlane.f32.xlu1 %v3585_v58 }
0x13e4   : > { %3580 = vadd.xlane.f32.xlu1 %v3579_v6 }
0x1424   : > { %v3794_v63 = vpop.xlane.xlu1 %3793 }
0x1425   : > { %v3816_v40 = vsub.f32 %v7917_v25, %v3794_v63 }
0x1426   : > { %v3797_v36 = vpop.xlane.xlu0 %3796 }
0x1427   : > { %v3817_v47 = vsub.f32 %v7923_v24, %v3797_v36  ;;  %v3824_v59 = vmul.f32 1.442695, %v3816_v40 }
0x1428   : > { %v3800_v34 = vpop.xlane.xlu1 %3799 }
0x1429   : > { %v3818_v21 = vsub.f32 %v7915_v14, %v3800_v34  ;;  %v3826_v44 = vmul.f32 1.442695, %v3817_v47 }
0x142a   : > { %v3803_v15 = vpop.xlane.xlu0 %3802 }
0x142b   : > { %v3828_v62 = vmul.f32 1.442695, %v3818_v21  ;;  %v3819_v37 = vsub.f32 %v7919_v60, %v3803_v15 }
0x142c   : > { %v3806_v56 = vpop.xlane.xlu1 %3805 }
0x142d   : > { %6674 = vpow2.f32 %v3828_v62  ;;  %v3830_v12 = vmul.f32 1.442695, %v3819_v37  ;;  %v3820_v30 = vsub.f32 %v7933_v50, %v3806_v56 }
0x142e   : > { %6676 = vpow2.f32 %v3824_v59  ;;  %v3809_v11 = vpop.xlane.xlu0 %3808 }
0x142f   : > { %6678 = vpow2.f32 %v3830_v12  ;;  %v3821_v24 = vsub.f32 %v7939_v2, %v3809_v11  ;;  %v3832_v18 = vmul.f32 1.442695, %v3820_v30 }
0x1430   : > { %v3812_v25 = vpop.xlane.xlu1 %3811  ;;  %6680 = vpow2.f32 %v3826_v44 }
0x1431   : > { %v3822_v14 = vsub.f32 %v7929_v19, %v3812_v25  ;;  %v3834_v33 = vmul.f32 1.442695, %v3821_v24 }
0x1432   : > { %v3815_v57 = vpop.xlane.xlu0 %3814 }
0x1433   : > { %v3836_v9 = vmul.f32 1.442695, %v3822_v14  ;;  %v3823_v60 = vsub.f32 %v7935_v32, %v3815_v57 }
0x1434   : > { %v3613_v1 = vpop.permute.xlu1 %3612 }
0x1435   : > { %6682 = vpow2.f32 %v3836_v9  ;;  %v3838_v13 = vmul.f32 1.442695, %v3823_v60  ;;  %v3627_v10 = vsel %vm2187_vm5, %v3613_v1, 0  ;;  %6436 = vmatprep.subr.msk.bf16.mxu0 %vm2187_vm5, %v3613_v1 }
0x1436   : > { %6684 = vpow2.f32 %v3832_v18  ;;  %6194 = vmatpush3.bf16.msra.mxu0 %v3627_v10 }
0x1437   : > { %v7995_v50 = vpop.eup %6674  ;;  %6686 = vpow2.f32 %v3838_v13 }
0x1438   : > { %v7997_v2 = vpop.eup %6676  ;;  %v3846_v19 = vsel %vm921_vm1, %v7995_v50, 0.0  ;;  %6688 = vpow2.f32 %v3834_v33 }
0x1439   : > { %v8001_v16 = vpop.eup %6678  ;;  %3847 = vadd.xlane.f32.xlu1 %v3846_v19  ;;  %v3840_v8 = vsel %vm921_vm1, %v7997_v2, 0.0 }
0x143a   : > { %v3849_v32 = vsel %vm921_vm1, %v8001_v16, 0.0  ;;  %v8005_v51 = vpop.eup %6680 }
0x143b   : > { %3850 = vadd.xlane.f32.xlu0 %v3849_v32  ;;  %v3843_v55 = vsel %vm921_vm1, %v8005_v51, 0.0 }
0x143d   : > { %3841 = vadd.xlane.f32.xlu1 %v3840_v8 }
0x143f   : > { %v8011_v20 = vpop.eup %6682  ;;  %3844 = vadd.xlane.f32.xlu0 %v3843_v55 }
0x1440   : > { %v8013_v26 = vpop.eup %6684  ;;  %v3858_v7 = vsel %vm921_vm1, %v8011_v20, 0.0 }
0x1441   : > { %v8017_v39 = vpop.eup %6686  ;;  %3859 = vadd.xlane.f32.xlu1 %v3858_v7  ;;  %v3852_v6 = vsel %vm921_vm1, %v8013_v26, 0.0 }
0x1442   : > { %v3861_v41 = vsel %vm921_vm1, %v8017_v39, 0.0  ;;  %v8021_v58 = vpop.eup %6688 }
0x1443   : > { %3862 = vadd.xlane.f32.xlu0 %v3861_v41  ;;  %v3855_v63 = vsel %vm921_vm1, %v8021_v58, 0.0 }
0x1445   : > { %3853 = vadd.xlane.f32.xlu1 %v3852_v6 }
0x1447   : > { %3856 = vadd.xlane.f32.xlu0 %v3855_v63 }
0x1456   : > { %4138 = vrot.lane.b32.xlu1 %v7873_v0, %s8553_s0  ;;  %v3578_v40 = vpop.xlane.xlu0 %3577 }
0x145a   : > { %4130 = vrot.lane.b32.xlu1 %v7859_v35, %s8553_s0  ;;  %v3572_v36 = vpop.xlane.xlu0 %3571 }
0x145d   : > { %3884 = vrot.lane.b32.xlu0 %v7873_v0, %s8554_s9  ;;  %s8557_s9 = smov 72  }
0x145e   : > { %4132 = vrot.lane.b32.xlu1 %v7857_v17, %s8553_s0  ;;  %v3590_v47 = vpop.xlane.xlu0 %3589 }
0x1461   : > { %4134 = vrot.lane.b32.xlu0 %v7869_v38, %s8553_s0 }
0x1462   : > { %4136 = vrot.lane.b32.xlu1 %v7867_v61, %s8553_s0  ;;  %v3584_v59 = vpop.xlane.xlu0 %3583 }
0x1465   : > { %v3575_v34 = vpop.xlane.xlu1 %3574 }
0x1466   : > { %6690 = vrcp.f32 %v3575_v34 }
0x1467   : > { %6692 = vrcp.f32 %v3572_v36 }
0x1468   : > { %6694 = vrcp.f32 %v3578_v40 }
0x1469   : > { %v3569_v21 = vpop.xlane.xlu1 %3568 }
0x146a   : > { %6696 = vrcp.f32 %v3569_v21 }
0x146d   : > { %v3587_v15 = vpop.xlane.xlu1 %3586 }
0x146e   : > { %6698 = vrcp.f32 %v3587_v15 }
0x146f   : > { %6700 = vrcp.f32 %v3584_v59 }
0x1470   : > { %v6691_v62 = vpop.eup %6690  ;;  %6702 = vrcp.f32 %v3590_v47 }
0x1471   : > { %v3581_v37 = vpop.xlane.xlu1 %3580  ;;  %v6693_v56 = vpop.eup %6692  ;;  %v3601_v30 = vmul.f32 %v6691_v62, %v7967_v52 }
0x1472   : > { %6704 = vrcp.f32 %v3581_v37  ;;  %v6695_v44 = vpop.eup %6694  ;;  %v3600_v25 = vmul.f32 %v6693_v56, %v7955_v29 }
0x1473   : > { %v3602_v24 = vmul.f32 %v6695_v44, %v7951_v48 }
0x1474   : > { %v6697_v12 = vpop.eup %6696 }
0x1475   : > { %v3599_v11 = vmul.f32 %v6697_v12, %v7973_v22  ;;  %v3608_v18 = vpack.c.bf16 %v3602_v24, %v3601_v30 }
0x1477   : > { %v3607_v14 = vpack.c.bf16 %v3600_v25, %v3599_v11 }
0x1478   : > { %v6699_v57 = vpop.eup %6698 }
0x1479   : > { %6195 = vmatprep.mubr.msk.bf16.mxu0 %vm921_vm1, %v3607_v14  ;;  %v6701_v9 = vpop.eup %6700  ;;  %v3605_v33 = vmul.f32 %v6699_v57, %v7977_v28 }
0x147a   : > { %6196 = vmatmul.mubr.msk.bf16.vlgmr.msra.gmra.mrb[60].mxu0 %vm921_vm1, %v3608_v18  ;;  %v6703_v60 = vpop.eup %6702  ;;  %v3604_v22 = vmul.f32 %v6701_v9, %v7965_v23  ;;  %v3421_v18 = vld [vmem:[%s8500_s16] sm:$0xf] }
0x147b   : > { %v3606_v29 = vmul.f32 %v6703_v60, %v7961_v31 }
0x147c   : > { %v6705_v1 = vpop.eup %6704 }
0x147d   : > { %v3603_v52 = vmul.f32 %v6705_v1, %v7981_v27  ;;  %v3610_v48 = vpack.c.bf16 %v3606_v29, %v3605_v33 }
0x147f   : > { %v3609_v13 = vpack.c.bf16 %v3604_v22, %v3603_v52 }
0x1481   : > { %6199 = vmatprep.mubr.msk.bf16.mxu0 %vm921_vm1, %v3609_v13 }
0x1482   : > { %6200 = vmatmul.mubr.msk.bf16.gmra.mrb[64].mxu0 %vm921_vm1, %v3610_v48 }
0x14c6   : > { %v3848_v10 = vpop.xlane.xlu1 %3847 }
0x14c8   : > { %v3851_v19 = vpop.xlane.xlu0 %3850 }
0x14c9   : > { %6706 = vrcp.f32 %v3851_v19 }
0x14ca   : > { %v3842_v32 = vpop.xlane.xlu1 %3841 }
0x14cb   : > { %6708 = vrcp.f32 %v3842_v32 }
0x14cc   : > { %6710 = vrcp.f32 %v3848_v10  ;;  %v3845_v8 = vpop.xlane.xlu0 %3844 }
0x14cd   : > { %6712 = vrcp.f32 %v3845_v8 }
0x14ce   : > { %v3860_v28 = vpop.xlane.xlu1 %3859 }
0x14d0   : > { %v3863_v27 = vpop.xlane.xlu0 %3862 }
0x14d1   : > { %6714 = vrcp.f32 %v3863_v27 }
0x14d2   : > { %v3854_v23 = vpop.xlane.xlu1 %3853 }
0x14d3   : > { %6716 = vrcp.f32 %v3854_v23  ;;  %v6707_v31 = vpop.eup %6706 }
0x14d4   : > { %6718 = vrcp.f32 %v3860_v28  ;;  %v3857_v55 = vpop.xlane.xlu0 %3856  ;;  %v3875_v63 = vmul.f32 %v6707_v31, %v8001_v16 }
0x14d5   : > { %v6709_v7 = vpop.eup %6708  ;;  %6720 = vrcp.f32 %v3857_v55  ;;  %v4063_v55 = vsel %vm2187_vm5, %v3421_v18, 0 }
0x14d6   : > { %v6711_v41 = vpop.eup %6710  ;;  %v3872_v36 = vmul.f32 %v6709_v7, %v7997_v2  ;;  %v4139_v59 = vpop.permute.xlu1 %4138 }
0x14d7   : > { %v6713_v6 = vpop.eup %6712  ;;  %v3874_v47 = vmul.f32 %v6711_v41, %v7995_v50  ;;  %v4153_v30 = vsel %vm921_vm1, %v4139_v59, 0 }
0x14d8   : > { %v3885_v40 = vpop.permute.xlu0 %3884  ;;  %v3873_v34 = vmul.f32 %v6713_v6, %v8005_v51 }
0x14d9   : > { %v3899_v21 = vsel %vm2187_vm5, %v3885_v40, 0  ;;  %6438 = vmatprep.subr.msk.bf16.mxu0 %vm2187_vm5, %v3885_v40  ;;  %v3881_v62 = vpack.c.bf16 %v3875_v63, %v3874_v47 }
0x14da   : > { %6214 = vmatpush3.bf16.msra.mxu0 %v3899_v21  ;;  %v3880_v15 = vpack.c.bf16 %v3873_v34, %v3872_v36  ;;  %v4131_v24 = vpop.permute.xlu1 %4130 }
0x14db   : > { %6441 = vmatprep.subr.msk.bf16.mxu0 %vm921_vm1, %v4139_v59  ;;  %v6715_v37 = vpop.eup %6714 }
0x14dc   : > { %6215 = vmatprep.mubr.msk.bf16.mxu0 %vm921_vm1, %v3880_v15  ;;  %v3879_v50 = vmul.f32 %v6715_v37, %v8017_v39  ;;  %v4135_v39 = vpop.permute.xlu0 %4134 }
0x14dd   : > { %v6717_v16 = vpop.eup %6716  ;;  %6216 = vmatmul.mubr.msk.bf16.vlgmr.msra.gmra.mrb[68].mxu0 %vm921_vm1, %v3881_v62 }
0x14de   : > { %v6719_v2 = vpop.eup %6718  ;;  %v3876_v56 = vmul.f32 %v6717_v16, %v8013_v26  ;;  %v4133_v14 = vpop.permute.xlu1 %4132 }
0x14df   : > { %v6721_v51 = vpop.eup %6720  ;;  %v3878_v12 = vmul.f32 %v6719_v2, %v8011_v20  ;;  %v3422_v20 = vld [vmem:[%s8500_s16 + $0x4] sm:$0xf] }
0x14e0   : > { %v3877_v44 = vmul.f32 %v6721_v51, %v8021_v58  ;;  %6439 = vmatprep.subr.msk.bf16.mxu1 %vm2187_vm5, %v3422_v20  ;;  %v3983_v58 = vsel %vm2187_vm5, %v3422_v20, 0 }
0x14e1   : > { %v3883_v25 = vpack.c.bf16 %v3879_v50, %v3878_v12  ;;  %6224 = vmatpush3.bf16.msra.mxu1 %v3983_v58 }
0x14e2   : > { %v3882_v11 = vpack.c.bf16 %v3877_v44, %v3876_v56  ;;  %v4137_v26 = vpop.permute.xlu1 %4136  ;;  %6440 = vmatprep.subr.msk.bf16.mxu1 %vm2187_vm5, %v3421_v18 }
0x14e3   : > { %6244 = vmatpush3.bf16.xpose.msra.mxu0 %v4153_v30 }
0x14e4   : > { %6219 = vmatprep.mubr.msk.bf16.mxu0 %vm921_vm1, %v3882_v11 }
0x14e5   : > { %6220 = vmatmul.mubr.msk.bf16.gmra.mrb[72].mxu0 %vm921_vm1, %v3883_v25 }
0x14e6   : > { %6245 = vmatprep.mubr.msk.bf16.mxu0 %vm921_vm1, %v4131_v24 }
0x14ed   : > { %6246 = vmatmul.mubr.msk.bf16.vlgmr.msra.gmra.mrb[76].mxu0 %vm921_vm1, %v4133_v14 }
0x14ee   : > { %6249 = vmatprep.mubr.msk.bf16.mxu0 %vm921_vm1, %v4135_v39 }
0x14f5   : > { %6250 = vmatmul.mubr.msk.bf16.gmra.mrb[80].mxu0 %vm921_vm1, %v4137_v26 }
0x154d   : > { %v6197_v57 = vpop.f32.mrb[60].mxu0 }
0x154e   : > { %v3663_v9 = vpop.f32.mrb[61].mxu0 }
0x154f   : > { %v6198_v60 = vpop.f32.mrb[62].mxu0 }
0x1550   : > { %v3695_v1 = vpack.c.bf16 %v6198_v60, %v6197_v57  ;;  %v3666_v33 = vpop.f32.mrb[63].mxu0 }
0x1551   : > { %v3694_v52 = vpack.c.bf16 %v3666_v33, %v3663_v9 }
0x1555   : > { %v6201_v22 = vpop.f32.mrb[64].mxu0 }
0x1556   : > { %v3679_v29 = vpop.f32.mrb[65].mxu0 }
0x1557   : > { %v6202_v13 = vpop.f32.mrb[66].mxu0 }
0x1558   : > { %v3697_v48 = vpack.c.bf16 %v6202_v13, %v6201_v22  ;;  %v3682_v10 = vpop.f32.mrb[67].mxu0 }
0x1559   : > { %v3696_v19 = vpack.c.bf16 %v3682_v10, %v3679_v29 }
0x15b0   : > { %v6217_v32 = vpop.f32.mrb[68].mxu0 }
0x15b1   : > { %v3935_v8 = vpop.f32.mrb[69].mxu0 }
0x15b2   : > { %v6218_v28 = vpop.f32.mrb[70].mxu0 }
0x15b3   : > { %v3967_v27 = vpack.c.bf16 %v6218_v28, %v6217_v32  ;;  %v3938_v23 = vpop.f32.mrb[71].mxu0 }
0x15b4   : > { %v3966_v31 = vpack.c.bf16 %v3938_v23, %v3935_v8 }
0x15b6   : > { %6225 = vmatprep.mubr.msk.bf16.mxu1 %vm921_vm1, %v3966_v31 }
0x15b7   : > { %6226 = vmatmul.mubr.msk.bf16.vlgmr.msra.gmra.mrb[68].mxu1 %vm921_vm1, %v3967_v27 }
0x15b8   : > { %v6221_v7 = vpop.f32.mrb[72].mxu0  ;;  %6234 = vmatpush3.bf16.msra.mxu1 %v4063_v55 }
0x15b9   : > { %v3951_v41 = vpop.f32.mrb[73].mxu0 }
0x15ba   : > { %v6222_v6 = vpop.f32.mrb[74].mxu0 }
0x15bb   : > { %v3969_v63 = vpack.c.bf16 %v6222_v6, %v6221_v7  ;;  %v3954_v40 = vpop.f32.mrb[75].mxu0 }
0x15bc   : > { %v3968_v36 = vpack.c.bf16 %v3954_v40, %v3951_v41 }
0x15be   : > { %6229 = vmatprep.mubr.msk.bf16.mxu1 %vm921_vm1, %v3968_v36 }
0x15bf   : > { %6230 = vmatmul.mubr.msk.bf16.gmra.mrb[72].mxu1 %vm921_vm1, %v3969_v63 }
0x15c0   : > { %6235 = vmatprep.mubr.msk.bf16.mxu1 %vm921_vm1, %v3694_v52  ;;  %v6247_v34 = vpop.f32.mrb[76].mxu0 }
0x15c1   : > { %v4189_v47 = vpop.f32.mrb[77].mxu0  ;;  %v4226_v37 = vsel %vm921_vm1, %v6247_v34, -inf }
0x15c2   : > { %v6248_v21 = vpop.f32.mrb[78].mxu0  ;;  %v4220_v59 = vsel %vm921_vm1, %v4189_v47, -inf }
0x15c3   : > { %4221 = vmax.xlane.f32.xlu0 %v4220_v59  ;;  %v4192_v15 = vpop.f32.mrb[79].mxu0  ;;  %v4229_v50 = vsel %vm921_vm1, %v6248_v21, -inf }
0x15c4   : > { %v4223_v62 = vsel %vm921_vm1, %v4192_v15, -inf }
0x15c5   : > { %4224 = vmax.xlane.f32.xlu1 %v4223_v62 }
0x15c7   : > { %6236 = vmatmul.mubr.msk.bf16.vlgmr.msra.gmra.mrb[68].mxu1 %vm921_vm1, %v3695_v1  ;;  %4227 = vmax.xlane.f32.xlu0 %v4226_v37 }
0x15c8   : > { %6239 = vmatprep.mubr.msk.bf16.mxu1 %vm921_vm1, %v3696_v19  ;;  %v6251_v16 = vpop.f32.mrb[80].mxu0 }
0x15c9   : > { %v4205_v2 = vpop.f32.mrb[81].mxu0  ;;  %v4238_v11 = vsel %vm921_vm1, %v6251_v16, -inf }
0x15ca   : > { %v6252_v51 = vpop.f32.mrb[82].mxu0  ;;  %v4232_v12 = vsel %vm921_vm1, %v4205_v2, -inf }
0x15cb   : > { %4230 = vmax.xlane.f32.xlu0 %v4229_v50  ;;  %v4208_v56 = vpop.f32.mrb[83].mxu0  ;;  %v4241_v30 = vsel %vm921_vm1, %v6252_v51, -inf }
0x15cc   : > { %v4235_v44 = vsel %vm921_vm1, %v4208_v56, -inf }
0x15cd   : > { %4236 = vmax.xlane.f32.xlu1 %v4235_v44 }
0x15cf   : > { %6240 = vmatmul.mubr.msk.bf16.gmra.mrb[72].mxu1 %vm921_vm1, %v3697_v48  ;;  %4233 = vmax.xlane.f32.xlu0 %v4232_v12 }
0x15d1   : > { %4242 = vmax.xlane.f32.xlu1 %v4241_v30 }
0x15d3   : > { %4239 = vmax.xlane.f32.xlu0 %v4238_v11 }
0x1650   : > { %v4222_v25 = vpop.xlane.xlu0 %4221 }
0x1651   : > { %v4244_v24 = vsub.f32 %v4189_v47, %v4222_v25 }
0x1652   : > { %v4225_v14 = vpop.xlane.xlu1 %4224 }
0x1653   : > { %v4252_v20 = vmul.f32 1.442695, %v4244_v24  ;;  %v4245_v58 = vsub.f32 %v4192_v15, %v4225_v14 }
0x1654   : > { %v4228_v39 = vpop.xlane.xlu0 %4227 }
0x1655   : > { %v4246_v26 = vsub.f32 %v6247_v34, %v4228_v39  ;;  %v4254_v60 = vmul.f32 1.442695, %v4245_v58 }
0x1657   : > { %v4256_v18 = vmul.f32 1.442695, %v4246_v26 }
0x1658   : > { %v4231_v57 = vpop.xlane.xlu0 %4230 }
0x1659   : > { %6722 = vpow2.f32 %v4256_v18  ;;  %v4247_v9 = vsub.f32 %v6248_v21, %v4231_v57 }
0x165a   : > { %6724 = vpow2.f32 %v4252_v20  ;;  %v4237_v63 = vpop.xlane.xlu1 %4236 }
0x165b   : > { %v4258_v1 = vmul.f32 1.442695, %v4247_v9  ;;  %v4249_v34 = vsub.f32 %v4208_v56, %v4237_v63 }
0x165c   : > { %v4234_v33 = vpop.xlane.xlu0 %4233 }
0x165d   : > { %6726 = vpow2.f32 %v4258_v1  ;;  %v4248_v52 = vsub.f32 %v4205_v2, %v4234_v33  ;;  %v4262_v21 = vmul.f32 1.442695, %v4249_v34 }
0x165e   : > { %6728 = vpow2.f32 %v4254_v60  ;;  %v4243_v40 = vpop.xlane.xlu1 %4242 }
0x165f   : > { %v4260_v48 = vmul.f32 1.442695, %v4248_v52  ;;  %v4251_v36 = vsub.f32 %v6252_v51, %v4243_v40 }
0x1660   : > { %v4240_v22 = vpop.xlane.xlu0 %4239 }
0x1661   : > { %v4250_v29 = vsub.f32 %v6251_v16, %v4240_v22  ;;  %v4266_v47 = vmul.f32 1.442695, %v4251_v36 }
0x1663   : > { %v6723_v13 = vpop.eup %6722  ;;  %v4264_v10 = vmul.f32 1.442695, %v4250_v29 }
0x1664   : > { %v4274_v19 = vsel %vm921_vm1, %v6723_v13, 0.0  ;;  %v6725_v32 = vpop.eup %6724 }
0x1665   : > { %6730 = vpow2.f32 %v4264_v10  ;;  %4275 = vadd.xlane.f32.xlu0 %v4274_v19  ;;  %v4268_v28 = vsel %vm921_vm1, %v6725_v32, 0.0 }
0x1666   : > { %6732 = vpow2.f32 %v4260_v48 }
0x1667   : > { %v6727_v8 = vpop.eup %6726  ;;  %6734 = vpow2.f32 %v4266_v47 }
0x1668   : > { %v4277_v27 = vsel %vm921_vm1, %v6727_v8, 0.0  ;;  %v6729_v23 = vpop.eup %6728  ;;  %6736 = vpow2.f32 %v4262_v21 }
0x1669   : > { %4269 = vadd.xlane.f32.xlu0 %v4268_v28  ;;  %4278 = vadd.xlane.f32.xlu1 %v4277_v27  ;;  %v4271_v31 = vsel %vm921_vm1, %v6729_v23, 0.0  ;;  %v3423_v27 = vld [vmem:[%s8500_s16 + $0x8] sm:$0xf] }
0x166a   : > { %6443 = vmatprep.subr.msk.bf16.mxu1 %vm2187_vm5, %v3423_v27 }
0x166d   : > { %4272 = vadd.xlane.f32.xlu1 %v4271_v31 }
0x166f   : > { %v8101_v55 = vpop.eup %6730 }
0x1670   : > { %v4286_v7 = vsel %vm921_vm1, %v8101_v55, 0.0  ;;  %v8105_v41 = vpop.eup %6732 }
0x1671   : > { %4287 = vadd.xlane.f32.xlu0 %v4286_v7  ;;  %v4280_v6 = vsel %vm921_vm1, %v8105_v41, 0.0  ;;  %v6735_v59 = vpop.eup %6734 }
0x1672   : > { %v4289_v15 = vsel %vm921_vm1, %v6735_v59, 0.0  ;;  %v6737_v62 = vpop.eup %6736 }
0x1673   : > { %v4283_v37 = vsel %vm921_vm1, %v6737_v62, 0.0 }
0x1675   : > { %4281 = vadd.xlane.f32.xlu0 %v4280_v6 }
0x167e   : > { %4494 = vrot.lane.b32.xlu1 %v7873_v0, %s8555_s1 }
0x168b   : > { %4312 = vrot.lane.b32.xlu0 %v7873_v0, %s8556_s4 }
0x168f   : > { %4490 = vrot.lane.b32.xlu0 %v7869_v38, %s8555_s1 }
0x16a2   : > { %4290 = vadd.xlane.f32.xlu1 %v4289_v15 }
0x16a6   : > { %4284 = vadd.xlane.f32.xlu1 %v4283_v37 }
0x16b7   : > { %4486 = vrot.lane.b32.xlu1 %v7859_v35, %s8555_s1 }
0x16bb   : > { %4488 = vrot.lane.b32.xlu1 %v7857_v17, %s8555_s1 }
0x16bf   : > { %4492 = vrot.lane.b32.xlu1 %v7867_v61, %s8555_s1 }
0x16f2   : > { %v4276_v38 = vpop.xlane.xlu0 %4275 }
0x16f6   : > { %v4270_v16 = vpop.xlane.xlu0 %4269  ;;  %v4279_v2 = vpop.xlane.xlu1 %4278 }
0x16f7   : > { %6738 = vrcp.f32 %v4279_v2 }
0x16f8   : > { %6740 = vrcp.f32 %v4270_v16 }
0x16f9   : > { %6742 = vrcp.f32 %v4276_v38 }
0x16fa   : > { %v4273_v51 = vpop.xlane.xlu1 %4272 }
0x16fb   : > { %6744 = vrcp.f32 %v4273_v51 }
0x16fe   : > { %v4288_v50 = vpop.xlane.xlu0 %4287  ;;  %v4495_v39 = vpop.permute.xlu1 %4494 }
0x16ff   : > { %v4509_v58 = vsel %vm921_vm1, %v4495_v39, 0 }
0x1701   : > { %v6739_v56 = vpop.eup %6738 }
0x1702   : > { %v4282_v44 = vpop.xlane.xlu0 %4281  ;;  %v6741_v12 = vpop.eup %6740  ;;  %v4303_v11 = vmul.f32 %v6739_v56, %v6727_v8 }
0x1703   : > { %v6743_v30 = vpop.eup %6742  ;;  %v4300_v17 = vmul.f32 %v6741_v12, %v6725_v32 }
0x1704   : > { %v4302_v14 = vmul.f32 %v6743_v30, %v6723_v13 }
0x1705   : > { %v6745_v35 = vpop.eup %6744 }
0x1706   : > { %v4313_v25 = vpop.permute.xlu0 %4312  ;;  %v4301_v24 = vmul.f32 %v6745_v35, %v6729_v23  ;;  %v4309_v20 = vpack.c.bf16 %v4303_v11, %v4302_v14  ;;  %v4411_v23 = vsel %vm2187_vm5, %v3423_v27, 0 }
0x1707   : > { %v4327_v61 = vsel %vm2187_vm5, %v4313_v25, 0  ;;  %6442 = vmatprep.subr.msk.bf16.mxu0 %vm2187_vm5, %v4313_v25  ;;  %6264 = vmatpush3.bf16.msra.mxu1 %v4411_v23 }
0x1708   : > { %6254 = vmatpush3.bf16.msra.mxu0 %v4327_v61  ;;  %v4308_v26 = vpack.c.bf16 %v4301_v24, %v4300_v17 }
0x1709   : > { %6444 = vmatprep.subr.msk.bf16.mxu0 %vm921_vm1, %v4495_v39 }
0x170a   : > { %6255 = vmatprep.mubr.msk.bf16.mxu0 %vm921_vm1, %v4308_v26  ;;  %v4491_v8 = vpop.permute.xlu0 %4490 }
0x170b   : > { %6256 = vmatmul.mubr.msk.bf16.vlgmr.msra.gmra.mrb[84].mxu0 %vm921_vm1, %v4309_v20 }
0x1711   : > { %6274 = vmatpush3.bf16.xpose.msra.mxu0 %v4509_v58 }
0x172f   : > { %v4291_v18 = vpop.xlane.xlu1 %4290 }
0x1730   : > { %6746 = vrcp.f32 %v4291_v18 }
0x1731   : > { %6748 = vrcp.f32 %v4282_v44 }
0x1732   : > { %6750 = vrcp.f32 %v4288_v50 }
0x1733   : > { %v4285_v57 = vpop.xlane.xlu1 %4284 }
0x1734   : > { %6752 = vrcp.f32 %v4285_v57 }
0x1737   : > { %v4487_v19 = vpop.permute.xlu1 %4486 }
0x173a   : > { %v6747_v9 = vpop.eup %6746 }
0x173b   : > { %v6749_v60 = vpop.eup %6748  ;;  %v4307_v52 = vmul.f32 %v6747_v9, %v6735_v59  ;;  %v4489_v32 = vpop.permute.xlu1 %4488 }
0x173c   : > { %v6751_v1 = vpop.eup %6750  ;;  %v4304_v22 = vmul.f32 %v6749_v60, %v8105_v41 }
0x173d   : > { %v4306_v13 = vmul.f32 %v6751_v1, %v8101_v55 }
0x173e   : > { %v6753_v33 = vpop.eup %6752 }
0x173f   : > { %v4305_v29 = vmul.f32 %v6753_v33, %v6737_v62  ;;  %v4311_v10 = vpack.c.bf16 %v4307_v52, %v4306_v13  ;;  %v4493_v28 = vpop.permute.xlu1 %4492 }
0x1741   : > { %v4310_v48 = vpack.c.bf16 %v4305_v29, %v4304_v22 }
0x1743   : > { %6259 = vmatprep.mubr.msk.bf16.mxu0 %vm921_vm1, %v4310_v48 }
0x1744   : > { %6260 = vmatmul.mubr.msk.bf16.gmra.mrb[88].mxu0 %vm921_vm1, %v4311_v10 }
0x1745   : > { %6275 = vmatprep.mubr.msk.bf16.mxu0 %vm921_vm1, %v4487_v19 }
0x174c   : > { %6276 = vmatmul.mubr.msk.bf16.vlgmr.msra.gmra.mrb[92].mxu0 %vm921_vm1, %v4489_v32 }
0x174d   : > { %6279 = vmatprep.mubr.msk.bf16.mxu0 %vm921_vm1, %v4491_v8 }
0x1754   : > { %6280 = vmatmul.mubr.msk.bf16.gmra.mrb[96].mxu0 %vm921_vm1, %v4493_v28 }
0x17de   : > { %v6257_v31 = vpop.f32.mrb[84].mxu0 }
0x17df   : > { %v4363_v55 = vpop.f32.mrb[85].mxu0 }
0x17e0   : > { %v6258_v7 = vpop.f32.mrb[86].mxu0 }
0x17e1   : > { %v4395_v41 = vpack.c.bf16 %v6258_v7, %v6257_v31  ;;  %v4366_v6 = vpop.f32.mrb[87].mxu0 }
0x17e2   : > { %v4394_v63 = vpack.c.bf16 %v4366_v6, %v4363_v55 }
0x17e4   : > { %6265 = vmatprep.mubr.msk.bf16.mxu1 %vm921_vm1, %v4394_v63 }
0x17e5   : > { %6266 = vmatmul.mubr.msk.bf16.vlgmr.msra.gmra.mrb[68].mxu1 %vm921_vm1, %v4395_v41 }
0x1817   : > { %v6261_v40 = vpop.f32.mrb[88].mxu0 }
0x1818   : > { %v4379_v36 = vpop.f32.mrb[89].mxu0 }
0x1819   : > { %v6262_v34 = vpop.f32.mrb[90].mxu0 }
0x181a   : > { %v4397_v47 = vpack.c.bf16 %v6262_v34, %v6261_v40  ;;  %v4382_v21 = vpop.f32.mrb[91].mxu0 }
0x181b   : > { %v4396_v59 = vpack.c.bf16 %v4382_v21, %v4379_v36 }
0x181d   : > { %6269 = vmatprep.mubr.msk.bf16.mxu1 %vm921_vm1, %v4396_v59 }
0x181e   : > { %6270 = vmatmul.mubr.msk.bf16.gmra.mrb[72].mxu1 %vm921_vm1, %v4397_v47 }
0x181f   : > { %v6277_v15 = vpop.f32.mrb[92].mxu0 }
0x1820   : > { %v4545_v62 = vpop.f32.mrb[93].mxu0  ;;  %v4582_v51 = vsel %vm921_vm1, %v6277_v15, -inf }
0x1821   : > { %v6278_v37 = vpop.f32.mrb[94].mxu0  ;;  %v4576_v38 = vsel %vm921_vm1, %v4545_v62, -inf }
0x1822   : > { %4577 = vmax.xlane.f32.xlu0 %v4576_v38  ;;  %v4548_v16 = vpop.f32.mrb[95].mxu0  ;;  %v4585_v12 = vsel %vm921_vm1, %v6278_v37, -inf }
0x1823   : > { %v4579_v2 = vsel %vm921_vm1, %v4548_v16, -inf }
0x1824   : > { %4580 = vmax.xlane.f32.xlu1 %v4579_v2 }
0x1826   : > { %4583 = vmax.xlane.f32.xlu0 %v4582_v51 }
0x1827   : > { %v6281_v50 = vpop.f32.mrb[96].mxu0 }
0x1828   : > { %v4561_v56 = vpop.f32.mrb[97].mxu0  ;;  %v4594_v17 = vsel %vm921_vm1, %v6281_v50, -inf }
0x1829   : > { %v6282_v44 = vpop.f32.mrb[98].mxu0  ;;  %v4588_v11 = vsel %vm921_vm1, %v4561_v56, -inf }
0x182a   : > { %4586 = vmax.xlane.f32.xlu0 %v4585_v12  ;;  %v4564_v30 = vpop.f32.mrb[99].mxu0  ;;  %v4597_v25 = vsel %vm921_vm1, %v6282_v44, -inf }
0x182b   : > { %v4591_v35 = vsel %vm921_vm1, %v4564_v30, -inf }
0x182c   : > { %4592 = vmax.xlane.f32.xlu1 %v4591_v35 }
0x182e   : > { %4589 = vmax.xlane.f32.xlu0 %v4588_v11 }
0x1830   : > { %4598 = vmax.xlane.f32.xlu1 %v4597_v25 }
0x1832   : > { %4595 = vmax.xlane.f32.xlu0 %v4594_v17 }
0x18af   : > { %v4578_v24 = vpop.xlane.xlu0 %4577 }
0x18b0   : > { %v4600_v61 = vsub.f32 %v4545_v62, %v4578_v24 }
0x18b1   : > { %v4581_v14 = vpop.xlane.xlu1 %4580 }
0x18b2   : > { %v4601_v39 = vsub.f32 %v4548_v16, %v4581_v14  ;;  %v4608_v18 = vmul.f32 1.442695, %v4600_v61 }
0x18b3   : > { %v4584_v26 = vpop.xlane.xlu0 %4583 }
0x18b4   : > { %v4610_v20 = vmul.f32 1.442695, %v4601_v39  ;;  %v4602_v58 = vsub.f32 %v6277_v15, %v4584_v26 }
0x18b6   : > { %6754 = vpow2.f32 %v4610_v20  ;;  %v4612_v57 = vmul.f32 1.442695, %v4602_v58 }
0x18b7   : > { %v4587_v9 = vpop.xlane.xlu0 %4586 }
0x18b8   : > { %6756 = vpow2.f32 %v4612_v57  ;;  %v4603_v60 = vsub.f32 %v6278_v37, %v4587_v9 }
0x18b9   : > { %v4593_v1 = vpop.xlane.xlu1 %4592  ;;  %6758 = vpow2.f32 %v4608_v18 }
0x18ba   : > { %v4614_v33 = vmul.f32 1.442695, %v4603_v60  ;;  %v4605_v52 = vsub.f32 %v4564_v30, %v4593_v1 }
0x18bb   : > { %v4590_v22 = vpop.xlane.xlu0 %4589 }
0x18bc   : > { %6760 = vpow2.f32 %v4614_v33  ;;  %v4618_v29 = vmul.f32 1.442695, %v4605_v52  ;;  %v4604_v48 = vsub.f32 %v4561_v56, %v4590_v22 }
0x18bd   : > { %v4599_v13 = vpop.xlane.xlu1 %4598 }
0x18be   : > { %6762 = vpow2.f32 %v4618_v29  ;;  %v4607_v10 = vsub.f32 %v6282_v44, %v4599_v13  ;;  %v4616_v31 = vmul.f32 1.442695, %v4604_v48  ;;  %v3424_v13 = vld [vmem:[%s8500_s16 + $0xc] sm:$0xf] }
0x18bf   : > { %v4596_v19 = vpop.xlane.xlu0 %4595  ;;  %v4767_v48 = vsel %vm2187_vm5, %v3424_v13, 0 }
0x18c0   : > { %v6755_v32 = vpop.eup %6754  ;;  %v4622_v8 = vmul.f32 1.442695, %v4607_v10  ;;  %v4606_v28 = vsub.f32 %v6281_v50, %v4596_v19 }
0x18c1   : > { %v4627_v27 = vsel %vm921_vm1, %v6755_v32, 0.0 }
0x18c2   : > { %v6757_v23 = vpop.eup %6756  ;;  %6764 = vpow2.f32 %v4622_v8  ;;  %v4620_v55 = vmul.f32 1.442695, %v4606_v28  ;;  %4628 = vadd.xlane.f32.xlu1 %v4627_v27 }
0x18c3   : > { %v4630_v7 = vsel %vm921_vm1, %v6757_v23, 0.0  ;;  %v6759_v41 = vpop.eup %6758 }
0x18c4   : > { %6766 = vpow2.f32 %v4620_v55  ;;  %4631 = vadd.xlane.f32.xlu0 %v4630_v7  ;;  %v4624_v63 = vsel %vm921_vm1, %v6759_v41, 0.0 }
0x18c5   : > { %6768 = vpow2.f32 %v4616_v31 }
0x18c6   : > { %v6761_v6 = vpop.eup %6760 }
0x18c7   : > { %v4633_v40 = vsel %vm921_vm1, %v6761_v6, 0.0 }
0x18c8   : > { %v6763_v36 = vpop.eup %6762  ;;  %4625 = vadd.xlane.f32.xlu0 %v4624_v63  ;;  %4634 = vadd.xlane.f32.xlu1 %v4633_v40  ;;  %v5687_v63 = vld [vmem:[%s8501_s17] ss:$0 sm:$0xff] }
0x18c9   : > { %v4639_v34 = vsel %vm921_vm1, %v6763_v36, 0.0 }
0x18cc   : > { %v6765_v47 = vpop.eup %6764  ;;  %4640 = vadd.xlane.f32.xlu1 %v4639_v34 }
0x18cd   : > { %v4645_v15 = vsel %vm921_vm1, %v6765_v47, 0.0 }
0x18ce   : > { %v6767_v21 = vpop.eup %6766 }
0x18cf   : > { %v4642_v59 = vsel %vm921_vm1, %v6767_v21, 0.0  ;;  %v6769_v62 = vpop.eup %6768 }
0x18d0   : > { %4643 = vadd.xlane.f32.xlu0 %v4642_v59  ;;  %4646 = vadd.xlane.f32.xlu1 %v4645_v15  ;;  %v4636_v37 = vsel %vm921_vm1, %v6769_v62, 0.0 }
0x18d4   : > { %4637 = vadd.xlane.f32.xlu0 %v4636_v37 }
0x18ea   : > { %4668 = vrot.lane.b32.xlu0 %v7873_v0, %s8557_s9 }
0x194f   : > { %v4629_v38 = vpop.xlane.xlu1 %4628 }
0x1950   : > { %6770 = vrcp.f32 %v4629_v38 }
0x1951   : > { %v4632_v16 = vpop.xlane.xlu0 %4631 }
0x1955   : > { %v4626_v2 = vpop.xlane.xlu0 %4625  ;;  %v4635_v51 = vpop.xlane.xlu1 %4634 }
0x1956   : > { %6772 = vrcp.f32 %v4626_v2 }
0x1957   : > { %6774 = vrcp.f32 %v4635_v51 }
0x1958   : > { %6776 = vrcp.f32 %v4632_v16 }
0x1959   : > { %v4641_v50 = vpop.xlane.xlu1 %4640 }
0x195a   : > { %v6771_v12 = vpop.eup %6770 }
0x195b   : > { %v4657_v0 = vmul.f32 %v6771_v12, %v6755_v32 }
0x195d   : > { %v4644_v56 = vpop.xlane.xlu0 %4643  ;;  %v4647_v44 = vpop.xlane.xlu1 %4646 }
0x195e   : > { %6778 = vrcp.f32 %v4644_v56 }
0x195f   : > { %6780 = vrcp.f32 %v4647_v44 }
0x1960   : > { %v6773_v30 = vpop.eup %6772  ;;  %6782 = vrcp.f32 %v4641_v50 }
0x1961   : > { %v6775_v35 = vpop.eup %6774  ;;  %v4638_v11 = vpop.xlane.xlu0 %4637  ;;  %v4656_v25 = vmul.f32 %v6773_v30, %v6759_v41 }
0x1962   : > { %6784 = vrcp.f32 %v4638_v11  ;;  %v6777_v17 = vpop.eup %6776  ;;  %v4659_v14 = vmul.f32 %v6775_v35, %v6761_v6 }
0x1963   : > { %v4664_v24 = vpack.c.bf16 %v4657_v0, %v4656_v25  ;;  %v4658_v39 = vmul.f32 %v6777_v17, %v6757_v23 }
0x1965   : > { %v4669_v61 = vpop.permute.xlu0 %4668  ;;  %6285 = vmatprep.mubr.msk.bf16.mxu1 %vm921_vm1, %v4664_v24  ;;  %v4665_v58 = vpack.c.bf16 %v4659_v14, %v4658_v39 }
0x1966   : > { %v4683_v26 = vsel %vm2187_vm5, %v4669_v61, 0  ;;  %6445 = vmatprep.subr.msk.bf16.mxu1 %vm2187_vm5, %v4669_v61 }
0x1967   : > { %6284 = vmatpush3.bf16.msra.mxu1 %v4683_v26 }
0x1968   : > { %v6779_v20 = vpop.eup %6778  ;;  %6446 = vmatprep.subr.msk.bf16.mxu1 %vm2187_vm5, %v3424_v13 }
0x1969   : > { %v6781_v18 = vpop.eup %6780  ;;  %v4662_v60 = vmul.f32 %v6779_v20, %v6767_v21 }
0x196a   : > { %v6783_v57 = vpop.eup %6782  ;;  %6286 = vmatmul.mubr.msk.bf16.vlgmr.msra.gmra.mrb[76].mxu1 %vm921_vm1, %v4665_v58  ;;  %v4663_v1 = vmul.f32 %v6781_v18, %v6765_v47 }
0x196b   : > { %v4661_v52 = vmul.f32 %v6783_v57, %v6763_v36  ;;  %6294 = vmatpush3.bf16.msra.mxu1 %v4767_v48 }
0x196c   : > { %v6785_v9 = vpop.eup %6784  ;;  %v4667_v29 = vpack.c.bf16 %v4663_v1, %v4662_v60 }
0x196d   : > { %v4660_v33 = vmul.f32 %v6785_v9, %v6769_v62 }
0x196f   : > { %v4666_v22 = vpack.c.bf16 %v4661_v52, %v4660_v33 }
0x1971   : > { %6289 = vmatprep.mubr.msk.bf16.mxu1 %vm921_vm1, %v4666_v22 }
0x1972   : > { %6290 = vmatmul.mubr.msk.bf16.gmra.mrb[80].mxu1 %vm921_vm1, %v4667_v29 }
0x1a3d   : > { %v6287_v10 = vpop.f32.mrb[76].mxu1 }
0x1a3e   : > { %v4719_v19 = vpop.f32.mrb[77].mxu1 }
0x1a3f   : > { %v6288_v32 = vpop.f32.mrb[78].mxu1 }
0x1a40   : > { %v4751_v8 = vpack.c.bf16 %v6288_v32, %v6287_v10  ;;  %v4722_v28 = vpop.f32.mrb[79].mxu1 }
0x1a41   : > { %v4750_v27 = vpack.c.bf16 %v4722_v28, %v4719_v19 }
0x1a43   : > { %6295 = vmatprep.mubr.msk.bf16.mxu1 %vm921_vm1, %v4750_v27 }
0x1a44   : > { %6296 = vmatmul.mubr.msk.bf16.vlgmr.msra.gmra.mrb[68].mxu1 %vm921_vm1, %v4751_v8 }
0x1a45   : > { %v6291_v23 = vpop.f32.mrb[80].mxu1 }
0x1a46   : > { %v4735_v31 = vpop.f32.mrb[81].mxu1 }
0x1a47   : > { %v6292_v55 = vpop.f32.mrb[82].mxu1 }
0x1a48   : > { %v4753_v7 = vpack.c.bf16 %v6292_v55, %v6291_v23  ;;  %v4738_v41 = vpop.f32.mrb[83].mxu1 }
0x1a49   : > { %v4752_v6 = vpack.c.bf16 %v4738_v41, %v4735_v31 }
0x1a4b   : > { %6299 = vmatprep.mubr.msk.bf16.mxu1 %vm921_vm1, %v4752_v6 }
0x1a4c   : > { %6300 = vmatmul.mubr.msk.bf16.gmra.mrb[72].mxu1 %vm921_vm1, %v4753_v7 }
0x1b17   : > { %v6297_v40 = vpop.f32.mrb[68].mxu1 }
0x1b18   : > { %v4803_v36 = vpop.f32.mrb[69].mxu1  ;;  %v4850_v62 = vadd.f32 %v6297_v40, %v5687_v63 }
0x1b19   : > { %v4848_v34 = vadd.f32 %v5687_v63, %v4803_v36  ;;  %v6298_v47 = vpop.f32.mrb[70].mxu1 }
0x1b1a   : > { %v4806_v21 = vpop.f32.mrb[71].mxu1  ;;  %v8191_v50 = vadd.f32 %v4850_v62, %v7726_v54  ;;  %v4851_v56 = vadd.f32 %v6298_v47, %v5687_v63 }
0x1b1b   : > { %v8183_v59 = vadd.f32 %v4848_v34, %v7723_v46  ;;  %v4849_v15 = vadd.f32 %v5687_v63, %v4806_v21 }
0x1b1c   : > { %v8201_v35 = vadd.f32 %v4851_v56, %v7736_v5  ;;  %v4872_v54 = vsel %vm825_vm2, %v8191_v50, 0.0  ;;  %v6480_v56 = vld [vmem:[%s8504_s20] ss:$8 sps:$4 sm:$0xff]  }
0x1b1d   : > { %v8186_v37 = vadd.f32 %v4849_v15, %v7729_v49  ;;  %v4866_v38 = vsel %vm825_vm2, %v8183_v59, 0.0 }
0x1b1e   : > { %4867 = vadd.xlane.f32.xlu1 %v4866_v38 }
0x1b1f   : > { %v6301_v16 = vpop.f32.mrb[72].mxu1  ;;  %v4869_v46 = vsel %vm825_vm2, %v8186_v37, 0.0 }
0x1b20   : > { %v4854_v2 = vadd.f32 %v6301_v16, %v5687_v63  ;;  %v4819_v51 = vpop.f32.mrb[73].mxu1 }
0x1b21   : > { %v6302_v44 = vpop.f32.mrb[74].mxu1  ;;  %v4852_v11 = vadd.f32 %v5687_v63, %v4819_v51  ;;  %v6482_v51 = vld [vmem:[%s8504_s20 + $0x4] ss:$8 sps:$4 sm:$0xff]  }
0x1b22   : > { %v8196_v12 = vadd.f32 %v4854_v2, %v7754_v3  ;;  %4870 = vadd.xlane.f32.xlu1 %v4869_v46  ;;  %v4822_v49 = vpop.f32.mrb[75].mxu1  ;;  %v4875_v3 = vsel %vm825_vm2, %v8201_v35, 0.0  ;;  %v4855_v17 = vadd.f32 %v6302_v44, %v5687_v63  ;;  %5050 = vmatprep.subr.bf16.mxu0 %v6482_v51  ;;  %v6485_v44 = vld [vmem:[%s8504_s20 + $0x14] ss:$8 sps:$4 sm:$0xff]   ;;  %v6483_v46 = vld [vmem:[%s8504_s20 + $0x10] ss:$8 sps:$4 sm:$0xff]  }
0x1b23   : > { %v8206_v25 = vadd.f32 %v4852_v11, %v7741_v4  ;;  %v4853_v0 = vadd.f32 %v5687_v63, %v4822_v49  ;;  %5051 = vmatpush1.bf16.msra.mxu0 %v6480_v56  ;;  %v6848_v49 = vmov 0  }
0x1b24   : > { %v4884_v30 = vsel %vm825_vm2, %v8196_v12, 0.0  ;;  %v8216_v14 = vadd.f32 %v4855_v17, %v7749_v53  ;;  %5052 = vmatprep.subr.bf16.mxu0 %v6485_v44  ;;  %5082 = vmatprep.mubr.bf16.mxu0 %v6848_v49 }
0x1b25   : > { %4885 = vadd.xlane.f32.xlu0 %v4884_v30  ;;  %v8211_v24 = vadd.f32 %v4853_v0, %v7744_v45  ;;  %v4878_v5 = vsel %vm825_vm2, %v8206_v25, 0.0 }
0x1b26   : > { %4873 = vadd.xlane.f32.xlu1 %v4872_v54  ;;  %v4887_v61 = vsel %vm825_vm2, %v8216_v14, 0.0 }
0x1b27   : > { %v4881_v4 = vsel %vm825_vm2, %v8211_v24, 0.0  ;;  %5053 = vmatpush1.bf16.msra.mxu0 %v6483_v46 }
0x1b2a   : > { %4876 = vadd.xlane.f32.xlu1 %v4875_v3 }
0x1b2e   : > { %4879 = vadd.xlane.f32.xlu1 %v4878_v5 }
0x1b32   : > { %4882 = vadd.xlane.f32.xlu1 %v4881_v4 }
0x1b36   : > { %4888 = vadd.xlane.f32.xlu1 %v4887_v61 }
0x1bab   : > { %v4868_v39 = vpop.xlane.xlu1 %4867 }
0x1bac   : > { %v4890_v26 = vmul.f32 0.03125, %v4868_v39 }
0x1bae   : > { %v8223_v45 = vsub.f32 %v8183_v59, %v4890_v26 }
0x1baf   : > { %v4871_v20 = vpop.xlane.xlu1 %4870 }
0x1bb0   : > { %v4891_v58 = vmul.f32 0.03125, %v4871_v20  ;;  %v4906_v18 = vmul.f32 %v8223_v45, %v8223_v45 }
0x1bb2   : > { %v8228_v53 = vsub.f32 %v8186_v37, %v4891_v58  ;;  %v4914_v57 = vsel %vm825_vm2, %v4906_v18, 0.0  ;;  %v4886_v19 = vpop.xlane.xlu0 %4885 }
0x1bb3   : > { %v4874_v9 = vpop.xlane.xlu1 %4873  ;;  %4915 = vadd.xlane.f32.xlu1 %v4914_v57  ;;  %v4896_v27 = vmul.f32 0.03125, %v4886_v19 }
0x1bb4   : > { %v4892_v60 = vmul.f32 0.03125, %v4874_v9  ;;  %v4907_v1 = vmul.f32 %v8228_v53, %v8228_v53  ;;  %v5688_v9 = vld [vmem:[%s8502_s18] ss:$0 sm:$0xff] }
0x1bb5   : > { %v8252_v6 = vsub.f32 %v8196_v12, %v4896_v27 }
0x1bb6   : > { %v8234_v33 = vsub.f32 %v8191_v50, %v4892_v60  ;;  %v4917_v52 = vsel %vm825_vm2, %v4907_v1, 0.0 }
0x1bb7   : > { %v4877_v22 = vpop.xlane.xlu1 %4876  ;;  %4918 = vadd.xlane.f32.xlu1 %v4917_v52  ;;  %v4912_v62 = vmul.f32 %v8252_v6, %v8252_v6 }
0x1bb8   : > { %v4893_v29 = vmul.f32 0.03125, %v4877_v22  ;;  %v4908_v13 = vmul.f32 %v8234_v33, %v8234_v33 }
0x1bb9   : > { %v4932_v16 = vsel %vm825_vm2, %v4912_v62, 0.0 }
0x1bba   : > { %v8240_v48 = vsub.f32 %v8201_v35, %v4893_v29  ;;  %v4920_v10 = vsel %vm825_vm2, %v4908_v13, 0.0 }
0x1bbb   : > { %v4880_v32 = vpop.xlane.xlu1 %4879  ;;  %4921 = vadd.xlane.f32.xlu1 %v4920_v10  ;;  %v5689_v10 = vld [vmem:[%s8503_s19] ss:$0 sm:$0xff] }
0x1bbc   : > { %v4894_v8 = vmul.f32 0.03125, %v4880_v32  ;;  %v4909_v28 = vmul.f32 %v8240_v48, %v8240_v48 }
0x1bbe   : > { %v8246_v23 = vsub.f32 %v8206_v25, %v4894_v8  ;;  %v4923_v31 = vsel %vm825_vm2, %v4909_v28, 0.0 }
0x1bbf   : > { %4924 = vadd.xlane.f32.xlu1 %v4923_v31  ;;  %v4883_v55 = vpop.xlane.xlu1 %4882 }
0x1bc0   : > { %v4895_v7 = vmul.f32 0.03125, %v4883_v55  ;;  %v4910_v41 = vmul.f32 %v8246_v23, %v8246_v23 }
0x1bc2   : > { %v8255_v63 = vsub.f32 %v8211_v24, %v4895_v7  ;;  %v4926_v40 = vsel %vm825_vm2, %v4910_v41, 0.0 }
0x1bc3   : > { %4927 = vadd.xlane.f32.xlu1 %v4926_v40  ;;  %v4889_v36 = vpop.xlane.xlu1 %4888 }
0x1bc4   : > { %v4897_v34 = vmul.f32 0.03125, %v4889_v36  ;;  %v4911_v47 = vmul.f32 %v8255_v63, %v8255_v63 }
0x1bc6   : > { %v8261_v21 = vsub.f32 %v8216_v14, %v4897_v34  ;;  %v4929_v15 = vsel %vm825_vm2, %v4911_v47, 0.0 }
0x1bc7   : > { %4930 = vadd.xlane.f32.xlu1 %v4929_v15 }
0x1bc8   : > { %v4913_v38 = vmul.f32 %v8261_v21, %v8261_v21 }
0x1bca   : > { %v4935_v2 = vsel %vm825_vm2, %v4913_v38, 0.0 }
0x1bcb   : > { %4933 = vadd.xlane.f32.xlu1 %v4932_v16  ;;  %4936 = vadd.xlane.f32.xlu0 %v4935_v2 }
0x1c40   : > { %v4916_v30 = vpop.xlane.xlu1 %4915 }
0x1c41   : > { %v4938_v11 = vmul.f32 0.03125, %v4916_v30 }
0x1c43   : > { %v4946_v54 = vadd.f32 1e-05, %v4938_v11 }
0x1c44   : > { %v4919_v0 = vpop.xlane.xlu1 %4918 }
0x1c45   : > { %6786 = vrsqrt.f32 %v4946_v54  ;;  %v4939_v3 = vmul.f32 0.03125, %v4919_v0 }
0x1c47   : > { %v4947_v17 = vadd.f32 1e-05, %v4939_v3 }
0x1c48   : > { %v4922_v5 = vpop.xlane.xlu1 %4921 }
0x1c49   : > { %6788 = vrsqrt.f32 %v4947_v17  ;;  %v4940_v4 = vmul.f32 0.03125, %v4922_v5 }
0x1c4b   : > { %v4948_v61 = vadd.f32 1e-05, %v4940_v4 }
0x1c4c   : > { %v4925_v39 = vpop.xlane.xlu1 %4924 }
0x1c4d   : > { %6790 = vrsqrt.f32 %v4948_v61  ;;  %v4941_v26 = vmul.f32 0.03125, %v4925_v39 }
0x1c4f   : > { %v6787_v20 = vpop.eup %6786  ;;  %v4949_v58 = vadd.f32 1e-05, %v4941_v26 }
0x1c50   : > { %v4962_v18 = vmul.f32 %v6787_v20, %v8223_v45  ;;  %v4928_v57 = vpop.xlane.xlu1 %4927  ;;  %v6489_v20 = vld [vmem:[%s8506_s22 + $0x18] sm:$0xff]  }
0x1c51   : > { %6792 = vrsqrt.f32 %v4949_v58  ;;  %v4942_v60 = vmul.f32 0.03125, %v4928_v57  ;;  %v6490_v58 = vld [vmem:[%s8506_s22 + $0x20] sm:$0xff]   ;;  %v6492_v57 = vld [vmem:[%s8506_s22 + $0x30] sm:$0xff]  }
0x1c52   : > { %v4976_v22 = vmul.f32 %v5688_v9, %v4962_v18  ;;  %v6491_v18 = vld [vmem:[%s8506_s22 + $0x28] sm:$0xff]  }
0x1c53   : > { %v6789_v1 = vpop.eup %6788  ;;  %v4950_v52 = vadd.f32 1e-05, %v4942_v60  ;;  %v5014_v60 = vsub.s32 1, %v7065_v42 }
0x1c54   : > { %v4963_v29 = vmul.f32 %v6789_v1, %v8228_v53  ;;  %v4931_v13 = vpop.xlane.xlu1 %4930  ;;  %v4990_v28 = vadd.f32 %v5689_v10, %v4976_v22  ;;  %v5006_v1 = vld [vmem:[%s8505_s21] sm:$0x3] }
0x1c55   : > { %6794 = vrsqrt.f32 %v4950_v52  ;;  %v4943_v19 = vmul.f32 0.03125, %v4931_v13  ;;  %v8332_v52 = vrot.slane %v5006_v1, %v5014_v60 }
0x1c56   : > { %v4977_v45 = vmul.f32 %v5688_v9, %v4963_v29 }
0x1c57   : > { %v6791_v32 = vpop.eup %6790  ;;  %v4951_v8 = vadd.f32 1e-05, %v4943_v19 }
0x1c58   : > { %v4991_v27 = vadd.f32 %v5689_v10, %v4977_v45  ;;  %v4964_v31 = vmul.f32 %v6791_v32, %v8234_v33  ;;  %v4937_v55 = vpop.xlane.xlu0 %4936  ;;  %v4934_v7 = vpop.xlane.xlu1 %4933 }
0x1c59   : > { %6796 = vrsqrt.f32 %v4951_v8  ;;  %v4945_v41 = vmul.f32 0.03125, %v4937_v55  ;;  %v4944_v40 = vmul.f32 0.03125, %v4934_v7 }
0x1c5a   : > { %v5002_v53 = vpack.c.bf16 %v4991_v27, %v4990_v28  ;;  %v4978_v62 = vmul.f32 %v5688_v9, %v4964_v31 }
0x1c5b   : > { %v6793_v36 = vpop.eup %6792  ;;  %v4953_v34 = vadd.f32 1e-05, %v4945_v41  ;;  %v4952_v47 = vadd.f32 1e-05, %v4944_v40 }
0x1c5c   : > { %v4965_v15 = vmul.f32 %v6793_v36, %v8240_v48  ;;  %5694 = vmatmul.mubr.msk.bf16.vlgmr.msra.gmra.mrb[100].mxu0 %vm825_vm2, %v5002_v53  ;;  %v4992_v2 = vadd.f32 %v5689_v10, %v4978_v62 }
0x1c5d   : > { %6798 = vrsqrt.f32 %v4953_v34  ;;  %5092 = vmatprep.mubr.bf16.mxu0 %v6848_v49 }
0x1c5e   : > { %6800 = vrsqrt.f32 %v4952_v47  ;;  %v4979_v38 = vmul.f32 %v5688_v9, %v4965_v15 }
0x1c5f   : > { %v6795_v33 = vpop.eup %6794 }
0x1c60   : > { %v4966_v16 = vmul.f32 %v6795_v33, %v8246_v23  ;;  %v4993_v51 = vadd.f32 %v5689_v10, %v4979_v38 }
0x1c62   : > { %v5003_v56 = vpack.c.bf16 %v4993_v51, %v4992_v2  ;;  %v4980_v48 = vmul.f32 %v5688_v9, %v4966_v16 }
0x1c63   : > { %v6797_v44 = vpop.eup %6796 }
0x1c64   : > { %v4967_v46 = vmul.f32 %v6797_v44, %v8255_v63  ;;  %5695 = vmatmul.mubr.msk.bf16.gmra.mrb[104].mxu0 %vm825_vm2, %v5003_v56  ;;  %v4994_v3 = vadd.f32 %v5689_v10, %v4980_v48 }
0x1c65   : > { %5102 = vmatprep.mubr.bf16.mxu0 %v6848_v49 }
0x1c66   : > { %v4981_v30 = vmul.f32 %v5688_v9, %v4967_v46 }
0x1c67   : > { %v6799_v11 = vpop.eup %6798 }
0x1c68   : > { %v6801_v54 = vpop.eup %6800  ;;  %v4969_v0 = vmul.f32 %v6799_v11, %v8261_v21  ;;  %v4995_v17 = vadd.f32 %v5689_v10, %v4981_v30  ;;  %v6486_v21 = vld [vmem:[%s8506_s22] sm:$0xff]  }
0x1c69   : > { %v4968_v23 = vmul.f32 %v6801_v54, %v8252_v6  ;;  %6303 = vmatprep.subr.bf16.mxu0 %v6486_v21  ;;  %v6487_v6 = vld [vmem:[%s8506_s22 + $0x8] sm:$0xff]  }
0x1c6a   : > { %v5004_v5 = vpack.c.bf16 %v4995_v17, %v4994_v3  ;;  %v4983_v4 = vmul.f32 %v5688_v9, %v4969_v0  ;;  %6304 = vmatpush3.bf16.msra.mxu0 %v6486_v21 }
0x1c6b   : > { %v4982_v61 = vmul.f32 %v5688_v9, %v4968_v23  ;;  %6305 = vmatprep.subr.bf16.mxu0 %v6487_v6  ;;  %v6493_v9 = vld [vmem:[%s8506_s22 + $0x38] sm:$0xff]  }
0x1c6c   : > { %5696 = vmatmul.mubr.msk.bf16.gmra.mrb[108].mxu0 %vm825_vm2, %v5004_v5  ;;  %v4997_v39 = vadd.f32 %v5689_v10, %v4983_v4 }
0x1c6d   : > { %5112 = vmatprep.mubr.bf16.mxu0 %v6848_v49  ;;  %v4996_v63 = vadd.f32 %v5689_v10, %v4982_v61  ;;  %v6488_v49 = vld [vmem:[%s8506_s22 + $0x10] sm:$0xff]  }
0x1c6e   : > { %6306 = vmatpush3.bf16.msra.mxu0 %v6487_v6  ;;  %v8389_v6 = vrot.slane %v5006_v1, %v7068_v43 }
0x1c6f   : > { %v5005_v26 = vpack.c.bf16 %v4997_v39, %v4996_v63  ;;  %6307 = vmatprep.subr.bf16.mxu0 %v6488_v49 }
0x1c72   : > { %6308 = vmatpush3.bf16.msra.mxu0 %v6488_v49 }
0x1c73   : > { %6309 = vmatprep.subr.bf16.mxu0 %v6489_v20 }
0x1c74   : > { %5697 = vmatmul.mubr.msk.bf16.gmra.mrb[112].mxu0 %vm825_vm2, %v5005_v26 }
0x1c76   : > { %6310 = vmatpush3.bf16.msra.mxu0 %v6489_v20 }
0x1c77   : > { %6311 = vmatprep.subr.bf16.mxu0 %v6490_v58 }
0x1c7a   : > { %6312 = vmatpush3.bf16.msra.mxu0 %v6490_v58 }
0x1c7b   : > { %6313 = vmatprep.subr.bf16.mxu0 %v6491_v18 }
0x1c7e   : > { %6314 = vmatpush3.bf16.msra.mxu0 %v6491_v18 }
0x1c7f   : > { %6315 = vmatprep.subr.bf16.mxu0 %v6492_v57 }
0x1c82   : > { %6316 = vmatpush3.bf16.msra.mxu0 %v6492_v57 }
0x1c83   : > { %6317 = vmatprep.subr.bf16.mxu0 %v6493_v9 }
0x1c86   : > { %6318 = vmatpush3.bf16.msra.mxu0 %v6493_v9 }
0x1d2f   : > { %v8334_v22 = vpop.f32.mrb[100].mxu0 }
0x1d30   : > { %v5086_v29 = vpop.f32.mrb[101].mxu0 }
0x1d31   : > { %v8337_v13 = vadd.f32 %v5086_v29, %v8332_v52  ;;  %v8339_v10 = vpop.f32.mrb[102].mxu0 }
0x1d32   : > { %v5090_v19 = vpop.f32.mrb[103].mxu0 }
0x1d33   : > { %v5123_v45 = vmul.f32 %v8337_v13, %v8337_v13  ;;  %v8344_v42 = vadd.f32 %v5090_v19, %v8332_v52 }
0x1d35   : > { %v5131_v32 = vmul.f32 %v5123_v45, %v8337_v13  ;;  %v5124_v8 = vmul.f32 %v8344_v42, %v8344_v42 }
0x1d37   : > { %v5139_v28 = vmul.f32 0.044715, %v5131_v32  ;;  %v5132_v27 = vmul.f32 %v5124_v8, %v8344_v42  ;;  %v8350_v31 = vpop.f32.mrb[104].mxu0 }
0x1d38   : > { %v5096_v55 = vpop.f32.mrb[105].mxu0 }
0x1d39   : > { %v5147_v7 = vadd.f32 %v5139_v28, %v8337_v13  ;;  %v5140_v41 = vmul.f32 0.044715, %v5132_v27  ;;  %v8354_v40 = vadd.f32 %v5096_v55, %v8332_v52  ;;  %v8356_v53 = vpop.f32.mrb[106].mxu0  ;;  %v5085_v28 = vadd.f32 %v8334_v22, %v8389_v6 }
0x1d3a   : > { %v5100_v36 = vpop.f32.mrb[107].mxu0 }
0x1d3b   : > { %v5155_v34 = vmul.f32 0.7978846, %v5147_v7  ;;  %v5148_v47 = vadd.f32 %v5140_v41, %v8344_v42  ;;  %v5125_v15 = vmul.f32 %v8354_v40, %v8354_v40  ;;  %v8362_v62 = vadd.f32 %v5100_v36, %v8332_v52 }
0x1d3d   : > { %6802 = vtanh.f32 %v5155_v34  ;;  %v5156_v38 = vmul.f32 0.7978846, %v5148_v47  ;;  %v5133_v33 = vmul.f32 %v5125_v15, %v8354_v40  ;;  %v5126_v16 = vmul.f32 %v8362_v62, %v8362_v62 }
0x1d3e   : > { %v5089_v34 = vadd.f32 %v8339_v10, %v8389_v6  ;;  %v5095_v10 = vadd.f32 %v8350_v31, %v8389_v6 }
0x1d3f   : > { %6804 = vtanh.f32 %v5156_v38  ;;  %v5141_v2 = vmul.f32 0.044715, %v5133_v33  ;;  %v5134_v51 = vmul.f32 %v5126_v16, %v8362_v62  ;;  %v8368_v56 = vpop.f32.mrb[108].mxu0 }
0x1d40   : > { %v5106_v44 = vpop.f32.mrb[109].mxu0 }
0x1d41   : > { %v5149_v46 = vadd.f32 %v5141_v2, %v8354_v40  ;;  %v5142_v48 = vmul.f32 0.044715, %v5134_v51  ;;  %v8372_v30 = vadd.f32 %v5106_v44, %v8332_v52  ;;  %v8374_v11 = vpop.f32.mrb[110].mxu0 }
0x1d42   : > { %v5110_v54 = vpop.f32.mrb[111].mxu0 }
0x1d43   : > { %v5157_v0 = vmul.f32 0.7978846, %v5149_v46  ;;  %v5150_v3 = vadd.f32 %v5142_v48, %v8362_v62  ;;  %v5127_v17 = vmul.f32 %v8372_v30, %v8372_v30  ;;  %v8380_v23 = vadd.f32 %v5110_v54, %v8332_v52 }
0x1d45   : > { %6806 = vtanh.f32 %v5157_v0  ;;  %v5158_v5 = vmul.f32 0.7978846, %v5150_v3  ;;  %v5135_v4 = vmul.f32 %v5127_v17, %v8372_v30  ;;  %v5128_v61 = vmul.f32 %v8380_v23, %v8380_v23 }
0x1d47   : > { %v6803_v63 = vpop.eup %6802  ;;  %6808 = vtanh.f32 %v5158_v5  ;;  %v5143_v39 = vmul.f32 0.044715, %v5135_v4  ;;  %v5136_v26 = vmul.f32 %v5128_v61, %v8380_v23  ;;  %v8386_v21 = vpop.f32.mrb[112].mxu0  ;;  %v5099_v4 = vadd.f32 %v8356_v53, %v8389_v6 }
0x1d48   : > { %v5116_v49 = vpop.f32.mrb[113].mxu0  ;;  %v5171_v20 = vadd.f32 1.0, %v6803_v63  ;;  %v5109_v53 = vadd.f32 %v8374_v11, %v8389_v6 }
0x1d49   : > { %v6805_v58 = vpop.eup %6804  ;;  %v5151_v18 = vadd.f32 %v5143_v39, %v8372_v30  ;;  %v5144_v57 = vmul.f32 0.044715, %v5136_v26  ;;  %v8393_v9 = vadd.f32 %v5116_v49, %v8332_v52  ;;  %v8395_v60 = vpop.f32.mrb[114].mxu0 }
0x1d4a   : > { %v5120_v29 = vpop.f32.mrb[115].mxu0  ;;  %v5172_v19 = vadd.f32 1.0, %v6805_v58  ;;  %v5179_v45 = vmul.f32 0.5, %v5171_v20  ;;  %v5119_v11 = vadd.f32 %v8395_v60, %v8389_v6 }
0x1d4b   : > { %v5159_v32 = vmul.f32 0.7978846, %v5151_v18  ;;  %v5152_v8 = vadd.f32 %v5144_v57, %v8380_v23  ;;  %v5129_v43 = vmul.f32 %v8393_v9, %v8393_v9  ;;  %v5121_v1 = vadd.f32 %v5120_v29, %v8332_v52 }
0x1d4c   : > { %v5180_v27 = vmul.f32 0.5, %v5172_v19  ;;  %v5187_v55 = vmul.f32 %v5179_v45, %v8337_v13 }
0x1d4d   : > { %6810 = vtanh.f32 %v5159_v32  ;;  %v5160_v7 = vmul.f32 0.7978846, %v5152_v8  ;;  %v5137_v41 = vmul.f32 %v5129_v43, %v8393_v9  ;;  %v5130_v36 = vmul.f32 %v5121_v1, %v5121_v1 }
0x1d4e   : > { %v5188_v47 = vmul.f32 %v5180_v27, %v8344_v42  ;;  %v5195_v15 = vmul.f32 %v5187_v55, %v5085_v28 }
0x1d4f   : > { %v6807_v38 = vpop.eup %6806  ;;  %6812 = vtanh.f32 %v5160_v7  ;;  %v5145_v52 = vmul.f32 0.044715, %v5137_v41  ;;  %v5138_v33 = vmul.f32 %v5130_v36, %v5121_v1 }
0x1d50   : > { %v5173_v16 = vadd.f32 1.0, %v6807_v38  ;;  %v5196_v22 = vmul.f32 %v5188_v47, %v5089_v34  ;;  %v6494_v34 = vld [vmem:[%s8508_s24] sm:$0xff]  }
0x1d51   : > { %v6809_v2 = vpop.eup %6808  ;;  %v5153_v13 = vadd.f32 %v5145_v52, %v8393_v9  ;;  %v5146_v51 = vmul.f32 0.044715, %v5138_v33  ;;  %6327 = vmatprep.subr.bf16.mxu1 %v6494_v34 }
0x1d52   : > { %v5181_v44 = vmul.f32 0.5, %v5173_v16  ;;  %v5174_v46 = vadd.f32 1.0, %v6809_v2  ;;  %v5219_v48 = vpack.c.bf16 %v5196_v22, %v5195_v15  ;;  %6328 = vmatpush3.bf16.msra.mxu1 %v6494_v34 }
0x1d53   : > { %v5161_v54 = vmul.f32 0.7978846, %v5153_v13  ;;  %v5154_v0 = vadd.f32 %v5146_v51, %v5121_v1 }
0x1d54   : > { %v5189_v42 = vmul.f32 %v5181_v44, %v8354_v40  ;;  %v5182_v3 = vmul.f32 0.5, %v5174_v46  ;;  %6319 = vmatprep.mubr.bf16.mxu0 %v5219_v48  ;;  %v5105_v40 = vadd.f32 %v8368_v56, %v8389_v6  ;;  %v5115_v56 = vadd.f32 %v8386_v21, %v8389_v6  ;;  %v6495_v21 = vld [vmem:[%s8508_s24 + $0x8] sm:$0xff]   ;;  %v5698_v6 = vld [vmem:[%s8507_s23] ss:$0 sm:$0xff] }
0x1d55   : > { %6814 = vtanh.f32 %v5161_v54  ;;  %v5162_v17 = vmul.f32 0.7978846, %v5154_v0  ;;  %6329 = vmatprep.subr.bf16.mxu1 %v6495_v21 }
0x1d56   : > { %v5197_v5 = vmul.f32 %v5189_v42, %v5095_v10  ;;  %v5190_v61 = vmul.f32 %v5182_v3, %v8362_v62  ;;  %6330 = vmatpush3.bf16.msra.mxu1 %v6495_v21 }
0x1d57   : > { %v6811_v63 = vpop.eup %6810  ;;  %6816 = vtanh.f32 %v5162_v17 }
0x1d58   : > { %v5198_v39 = vmul.f32 %v5190_v61, %v5099_v4  ;;  %v5175_v26 = vadd.f32 1.0, %v6811_v63  ;;  %v5707_v61 = vld [vmem:[%s8509_s25] ss:$0 sm:$0xff] }
0x1d59   : > { %v6813_v49 = vpop.eup %6812 }
0x1d5a   : > { %v5220_v20 = vpack.c.bf16 %v5198_v39, %v5197_v5  ;;  %v5176_v58 = vadd.f32 1.0, %v6813_v49  ;;  %v5183_v31 = vmul.f32 0.5, %v5175_v26  ;;  %v6818_v39 = vld [vmem:[%s7034_s7 + $0x10] sm:$0xff] }
0x1d5c   : > { %6320 = vmatmul.mubr.bf16.vlgmr.msra.gmra.mrb[116].mxu0 %v5220_v20  ;;  %v5184_v18 = vmul.f32 0.5, %v5176_v58  ;;  %v5191_v57 = vmul.f32 %v5183_v31, %v8372_v30  ;;  %v6819_v58 = vld [vmem:[%s7034_s7] sm:$0xff] }
0x1d5e   : > { %v5192_v62 = vmul.f32 %v5184_v18, %v8380_v23  ;;  %v5199_v29 = vmul.f32 %v5191_v57, %v5105_v40  ;;  %v6820_v18 = vld [vmem:[%s7034_s7 + $0x18] sm:$0xff] }
0x1d5f   : > { %v6815_v19 = vpop.eup %6814 }
0x1d60   : > { %v5200_v45 = vmul.f32 %v5192_v62, %v5109_v53  ;;  %v5177_v32 = vadd.f32 1.0, %v6815_v19  ;;  %v6821_v53 = vld [vmem:[%s7034_s7 + $0x8] sm:$0xff] }
0x1d61   : > { %v6817_v8 = vpop.eup %6816 }
0x1d62   : > { %v5221_v43 = vpack.c.bf16 %v5200_v45, %v5199_v29  ;;  %v5178_v28 = vadd.f32 1.0, %v6817_v8  ;;  %v5185_v27 = vmul.f32 0.5, %v5177_v32 }
0x1d64   : > { %6323 = vmatprep.mubr.bf16.mxu0 %v5221_v43  ;;  %v5186_v55 = vmul.f32 0.5, %v5178_v28  ;;  %v5193_v30 = vmul.f32 %v5185_v27, %v8393_v9  ;;  %v6822_v43 = vld [vmem:[%s7034_s7 + $0x30] sm:$0xff] }
0x1d66   : > { %v5194_v7 = vmul.f32 %v5186_v55, %v5121_v1  ;;  %v5201_v23 = vmul.f32 %v5193_v30, %v5115_v56  ;;  %v6823_v55 = vld [vmem:[%s7034_s7 + $0x20] sm:$0xff] }
0x1d68   : > { %v5202_v41 = vmul.f32 %v5194_v7, %v5119_v11  ;;  %v6824_v7 = vld [vmem:[%s7034_s7 + $0x38] sm:$0xff] }
0x1d6a   : > { %v5222_v36 = vpack.c.bf16 %v5202_v41, %v5201_v23  ;;  %v6825_v41 = vld [vmem:[%s7034_s7 + $0x28] sm:$0xff] }
0x1d6c   : > { %6324 = vmatmul.mubr.bf16.gmra.mrb[120].mxu0 %v5222_v36 }
0x1e2f   : > { %v6321_v9 = vpop.f32.mrb[116].mxu0 }
0x1e30   : > { %v5321_v60 = vadd.f32 %v6321_v9, %v5698_v6  ;;  %v5312_v1 = vpop.f32.mrb[117].mxu0 }
0x1e31   : > { %v5313_v47 = vadd.f32 %v5698_v6, %v5312_v1  ;;  %v6322_v15 = vpop.f32.mrb[118].mxu0 }
0x1e32   : > { %v5324_v38 = vadd.f32 %v6322_v15, %v5698_v6  ;;  %v5315_v52 = vpop.f32.mrb[119].mxu0  ;;  %v5345_v16 = vadd.f32 %v5321_v60, %v8191_v50 }
0x1e33   : > { %v5316_v33 = vadd.f32 %v5698_v6, %v5315_v52  ;;  %v5343_v2 = vadd.f32 %v5313_v47, %v8183_v59 }
0x1e34   : > { %v5346_v22 = vadd.f32 %v5324_v38, %v8201_v35 }
0x1e35   : > { %v5344_v13 = vadd.f32 %v5316_v33, %v8186_v37 }
0x1e36   : > { %v5356_v51 = vpack.c.bf16 %v5346_v22, %v5345_v16 }
0x1e37   : > { %v5355_v44 = vpack.c.bf16 %v5344_v13, %v5343_v2 }
0x1e39   : > { %6331 = vmatprep.mubr.msk.bf16.mxu1 %vm825_vm2, %v5355_v44 }
0x1e3a   : > { %6332 = vmatmul.mubr.msk.bf16.vlgmr.msra.gmra.mrb[84].mxu1 %vm825_vm2, %v5356_v51 }
0x1e3f   : > { %v6325_v46 = vpop.f32.mrb[120].mxu0 }
0x1e40   : > { %v5337_v48 = vadd.f32 %v6325_v46, %v5698_v6  ;;  %v5328_v54 = vpop.f32.mrb[121].mxu0 }
0x1e41   : > { %v5329_v0 = vadd.f32 %v5698_v6, %v5328_v54  ;;  %v6326_v10 = vpop.f32.mrb[122].mxu0 }
0x1e42   : > { %v5340_v42 = vadd.f32 %v6326_v10, %v5698_v6  ;;  %v5331_v50 = vpop.f32.mrb[123].mxu0  ;;  %v5349_v59 = vadd.f32 %v5337_v48, %v8196_v12 }
0x1e43   : > { %v5332_v3 = vadd.f32 %v5698_v6, %v5331_v50  ;;  %v5347_v35 = vadd.f32 %v5329_v0, %v8206_v25 }
0x1e44   : > { %v5350_v37 = vadd.f32 %v5340_v42, %v8216_v14 }
0x1e45   : > { %v5348_v17 = vadd.f32 %v5332_v3, %v8211_v24 }
0x1e46   : > { %v5358_v5 = vpack.c.bf16 %v5350_v37, %v5349_v59 }
0x1e47   : > { %v5357_v4 = vpack.c.bf16 %v5348_v17, %v5347_v35 }
0x1e49   : > { %6335 = vmatprep.mubr.msk.bf16.mxu1 %vm825_vm2, %v5357_v4 }
0x1e4a   : > { %6336 = vmatmul.mubr.msk.bf16.gmra.mrb[88].mxu1 %vm825_vm2, %v5358_v5 }
0x1f0d   : > { %v6333_v63 = vpop.f32.mrb[84].mxu1 }
0x1f0e   : > { %v5433_v12 = vadd.f32 %v6333_v63, %v5707_v61  ;;  %v5424_v14 = vpop.f32.mrb[85].mxu1 }
0x1f0f   : > { %v5425_v25 = vadd.f32 %v5707_v61, %v5424_v14  ;;  %v6334_v24 = vpop.f32.mrb[86].mxu1 }
0x1f10   : > { %v5457_v26 = vadd.f32 %v6818_v39, %v5433_v12  ;;  %v5436_v49 = vadd.f32 %v6334_v24, %v5707_v61  ;;  %v5427_v20 = vpop.f32.mrb[87].mxu1 }
0x1f11   : > { %v5455_v31 = vadd.f32 %v6819_v58, %v5425_v25  ;;  %v5428_v40 = vadd.f32 %v5707_v61, %v5427_v20 }
0x1f12   : > { %5465 = vst.msk [vmem:[%s8455_s30 + $0x10] sm:$0xff] %vm825_vm2, %v5457_v26  ;;  %v5458_v57 = vadd.f32 %v6820_v18, %v5436_v49 }
0x1f13   : > { %5463 = vst.msk [vmem:[%s8455_s30] sm:$0xff] %vm825_vm2, %v5455_v31  ;;  %v5456_v62 = vadd.f32 %v6821_v53, %v5428_v40 }
0x1f14   : > { %5466 = vst.msk [vmem:[%s8455_s30 + $0x18] sm:$0xff] %vm825_vm2, %v5458_v57 }
0x1f15   : > { %5464 = vst.msk [vmem:[%s8455_s30 + $0x8] sm:$0xff] %vm825_vm2, %v5456_v62 }
0x1f1d   : > { %v6337_v29 = vpop.f32.mrb[88].mxu1 }
0x1f1e   : > { %v5449_v19 = vadd.f32 %v6337_v29, %v5707_v61  ;;  %v5440_v45 = vpop.f32.mrb[89].mxu1 }
0x1f1f   : > { %v5441_v32 = vadd.f32 %v5707_v61, %v5440_v45  ;;  %v6338_v8 = vpop.f32.mrb[90].mxu1 }
0x1f20   : > { %v5461_v28 = vadd.f32 %v6822_v43, %v5449_v19  ;;  %v5452_v27 = vadd.f32 %v6338_v8, %v5707_v61  ;;  %v5443_v56 = vpop.f32.mrb[91].mxu1 }
0x1f21   : > { %v5459_v30 = vadd.f32 %v6823_v55, %v5441_v32  ;;  %v5444_v11 = vadd.f32 %v5707_v61, %v5443_v56 }
0x1f22   : > { %5469 = vst.msk [vmem:[%s8455_s30 + $0x30] sm:$0xff] %vm825_vm2, %v5461_v28  ;;  %v5462_v23 = vadd.f32 %v6824_v7, %v5452_v27 }
0x1f23   : > { %5467 = vst.msk [vmem:[%s8455_s30 + $0x20] sm:$0xff] %vm825_vm2, %v5459_v30  ;;  %v5460_v36 = vadd.f32 %v6825_v41, %v5444_v11 }
0x1f24   : > { %5470 = vst.msk [vmem:[%s8455_s30 + $0x38] sm:$0xff] %vm825_vm2, %v5462_v23 }
0x1f25   : > { %5468 = vst.msk [vmem:[%s8455_s30 + $0x28] sm:$0xff] %vm825_vm2, %v5460_v36 }
0x1f26 PF: > { %s36_s27 = sadd.s32 1, %s6832_s27  }
0x1f27   : > { %p33_p4 = scmp.ge.s32.totalorder %s36_s27, 4  }
0x1f29   :  { %35 = sbr.rel (!%p33_p4) target bundleno = 12 (0xc), region = 157 }

// kernel: cross_attn_up_block_2d.3
= control target key start
LH: loop header
LB: loop body
LE: loop exit
PB: predicated region body
PF: predicated region fallthrough
CT: control target
= control target key end

     0   :  { %s7328_s24 = smov 0   ;;  %s8288_s0 = inlined_call_operand.vmem [shape: f32[2,64,48], index: 0, kind: input, shape index: {}]   ;;  %s8289_s1 = inlined_call_operand.vmem [shape: f32[2,1,64], index: 1, kind: input, shape index: {}]   ;;  %s8290_s2 = inlined_call_operand.vmem [shape: bf16[9,64,64], index: 2, kind: input, shape index: {}]   ;;  %s8291_s3 = inlined_call_operand.vmem [shape: f32[48,8], index: 3, kind: input, shape index: {}]   ;;  %s8292_s4 = inlined_call_operand.vmem [shape: f32[1,48], index: 4, kind: input, shape index: {}]   ;;  %s8293_s5 = inlined_call_operand.vmem [shape: f32[1,48], index: 5, kind: input, shape index: {}]   ;;  %s8294_s6 = inlined_call_operand.vmem [shape: bf16[9,48,32], index: 6, kind: input, shape index: {}]   ;;  %s8295_s7 = inlined_call_operand.vmem [shape: f32[1,32], index: 7, kind: input, shape index: {}]   ;;  %s8296_s8 = inlined_call_operand.vmem [shape: bf16[64,32], index: 8, kind: input, shape index: {}]   ;;  %s8297_s9 = inlined_call_operand.vmem [shape: f32[1,32], index: 9, kind: input, shape index: {}]   ;;  %s8298_s10 = inlined_call_operand.vmem [shape: f32[32,8], index: 10, kind: input, shape index: {}]   ;;  %s8299_s11 = inlined_call_operand.vmem [shape: f32[1,32], index: 11, kind: input, shape index: {}]   ;;  %s8300_s12 = inlined_call_operand.vmem [shape: f32[1,32], index: 12, kind: input, shape index: {}]   ;;  %s8301_s13 = inlined_call_operand.vmem [shape: bf16[9,32,32], index: 13, kind: input, shape index: {}]   ;;  %s8302_s14 = inlined_call_operand.vmem [shape: f32[1,32], index: 14, kind: input, shape index: {}]   ;;  %s8303_s15 = inlined_call_operand.vmem [shape: bf16[48,32], index: 15, kind: input, shape index: {}]   ;;  %s8304_s16 = inlined_call_operand.vmem [shape: f32[1,32], index: 16, kind: input, shape index: {}]   ;;  %s8305_s17 = inlined_call_operand.vmem [shape: f32[2,64,32], index: 17, kind: output, shape index: {}]  }
   0x1   :  { %8306 = sst [smem:[#allocation2_spill]] %s8288_s0 }
   0x2   :  { %8307 = sst [smem:[#allocation3_spill]] %s8289_s1 }
   0x3 LB: > { %s5357_s25 = sadd.s32 4294967295, %s7233_s24   ;;  %p5361_p0 = scmp.ge.s32.totalorder %s7233_s24, 1  ;;  %s7233_s24 = sphi %s7328_s24, %s27_s24  }
   0x4   : > { %p495_p1 = scmp.lt.s32.totalorder %s7233_s24, 3 }
   0x6   : > { %p496_p2 = pnand %p5361_p0, %p495_p1 }
   0x7   : > { %v574_v0 = vld [vmem:[%s8291_s3] sm:$0xff] (!%p496_p2)  ;;  %v575_v1 = vld [vmem:[%s8291_s3 + $0x8] sm:$0xff] (!%p496_p2)  ;;  %v576_v2 = vld [vmem:[%s8291_s3 + $0x10] sm:$0xff] (!%p496_p2)  ;;  %v7235_v3 = vmov (!%p496_p2), 0.0|0.0   ;;  %vm7236_vm0 = vmmov (!%p496_p2), 0   ;;  %v7237_v6 = vmov (!%p496_p2), 0.0   ;;  %v768_v44 = vlaneseq (!%p496_p2) }
   0x8   : > { %499 = sbr.rel (%p496_p2) target bundleno = 3128 (0xc38), region = 88  ;;  %6776 = vmatprep.subr.bf16.mxu0 (!%p496_p2), %v7235_v3  ;;  %v7346_v4 = vpack.c.bf16 (!%p496_p2), %v575_v1, %v574_v0  ;;  %v577_v5 = vld [vmem:[%s8291_s3 + $0x18] sm:$0xff] (!%p496_p2)  ;;  %6136 = vmatprep.mubr.msk.f32.mxu0 (!%p496_p2), %vm7236_vm0, %v7237_v6  ;;  %p550_p3 = scmp.lt.s32.totalorder (!%p496_p2), %s5357_s25, 1  ;;  %vm676_vm1 = vcmask (!%p496_p2), 64512   ;;  %v578_v7 = vld [vmem:[%s8291_s3 + $0x20] sm:$0xff] (!%p496_p2)  ;;  %v579_v10 = vld [vmem:[%s8291_s3 + $0x28] sm:$0xff] (!%p496_p2) }
   0x9   : > { %6785 = vmatprep.subr.bf16.mxu1 (!%p496_p2), %v7235_v3  ;;  %vm7359_vm2 = vmpackc.low (!%p496_p2), %vm676_vm1, %vm676_vm1  ;;  %6151 = vmatprep.mubr.msk.f32.mxu1 (!%p496_p2), %vm7236_vm0, %v7237_v6  ;;  %v7366_v9 = vpack.c.bf16 (!%p496_p2), %v577_v5, %v576_v2  ;;  %vm580_vm3 = vcmask (!%p496_p2), 392192   ;;  %s8310_s28 = sld [smem:[#allocation2_spill]] (!%p496_p2)  ;;  %v7387_v11 = vpack.c.bf16 (!%p496_p2), %v579_v10, %v578_v7  ;;  %v769_v45 = vshrl.u32 (!%p496_p2), %v768_v44, 7  ;;  %s8311_s27 = sld [smem:[#allocation3_spill]] (!%p496_p2) }
   0xa   : > { %6778 = vmatpush3.bf16.msra.mxu0 (!%p496_p2), %v7346_v4  ;;  %6788 = vmatpush3.bf16.xpose.msk.msra.mxu1 (!%p496_p2), %vm7359_vm2, %v7346_v4  ;;  %vm1094_vm4 = vcmask (!%p496_p2), 523264   ;;  %vm3148_vm5 = vcmask (!%p496_p2), 261120  }
   0xb   : > { %6779 = vmatprep.subr.bf16.mxu0 (!%p496_p2), %v7235_v3  ;;  %6789 = vmatprep.subr.bf16.mxu1 (!%p496_p2), %v7235_v3  ;;  %v7425_v46 = vsub.s32 (!%p496_p2), 0, %v769_v45 }
   0xe   : > { %6781 = vmatpush3.bf16.msra.mxu0 (!%p496_p2), %v7366_v9 }
   0xf   : > { %s8313_s25 = smov (!%p550_p3, %s5357_s25), 1  ;;  %6782 = vmatprep.subr.bf16.mxu0 %v7235_v3 }
  0x10   : > { %s5801_s23 = sshll.u32 %s8313_s25, 6 }
  0x11   : > { %s7384_s29 = scalar_lea.vmem %s8310_s28, %s5801_s23  ;;  %s557_s28 = scalar_lea.vmem %s8311_s27, %s8313_s25 }
  0x12   : > { %v564_v12 = vld [vmem:[%s7384_s29] sm:$0xff]  ;;  %v565_v13 = vld [vmem:[%s7384_s29 + $0x8] sm:$0xff]  ;;  %v566_v14 = vld [vmem:[%s7384_s29 + $0x10] sm:$0xff]  ;;  %6784 = vmatpush3.bf16.msra.mxu0 %v7387_v11  ;;  %6792 = vmatpush3.bf16.xpose.msk.msra.mxu1 %vm7359_vm2, %v7366_v9  ;;  %s562_s18 = scalar_lea.vmem %s8305_s17, %s5801_s23 }
  0x13   : > { %v567_v15 = vld [vmem:[%s7384_s29 + $0x18] sm:$0xff]  ;;  %v568_v16 = vld [vmem:[%s7384_s29 + $0x20] sm:$0xff]  ;;  %v569_v17 = vld [vmem:[%s7384_s29 + $0x28] sm:$0xff]  ;;  %v581_v18 = vsel %vm580_vm3, %v564_v12, 0.0  ;;  %v582_v19 = vsel %vm580_vm3, %v565_v13, 0.0  ;;  %v584_v20 = vsel %vm580_vm3, %v566_v14, 0.0  ;;  %6793 = vmatprep.subr.bf16.mxu1 %v7235_v3  ;;  %6797 = vmatprep.subr.bf16.mxu0 %v7235_v3 }
  0x14   : > { %v570_v21 = vld [vmem:[%s7384_s29 + $0x30] sm:$0xff]  ;;  %v571_v22 = vld [vmem:[%s7384_s29 + $0x38] sm:$0xff]  ;;  %v583_v23 = vadd.f32 %v582_v19, %v581_v18  ;;  %v586_v24 = vsel %vm580_vm3, %v567_v15, 0.0  ;;  %v588_v25 = vsel %vm580_vm3, %v568_v16, 0.0  ;;  %v590_v26 = vsel %vm580_vm3, %v569_v17, 0.0 }
  0x15   : > { %v592_v27 = vsel %vm580_vm3, %v570_v21, 0.0  ;;  %v594_v28 = vsel %vm580_vm3, %v571_v22, 0.0 }
  0x16   : > { %v585_v29 = vadd.f32 %v584_v20, %v583_v23 }
  0x18   : > { %v587_v30 = vadd.f32 %v586_v24, %v585_v29 }
  0x1a   : > { %v589_v31 = vadd.f32 %v588_v25, %v587_v30  ;;  %6796 = vmatpush3.bf16.xpose.msk.msra.mxu1 %vm7359_vm2, %v7387_v11 }
  0x1c   : > { %v591_v32 = vadd.f32 %v590_v26, %v589_v31 }
  0x1e   : > { %v593_v33 = vadd.f32 %v592_v27, %v591_v32 }
  0x20   : > { %v595_v34 = vadd.f32 %v594_v28, %v593_v33  ;;  %v7023_v33 = vld [vmem:[%s8290_s2] sm:$0xff]  }
  0x22   : > { %v596_v35 = vrot.slane %v595_v34, 4 }
  0x24   : > { %v597_v36 = vadd.f32 %v596_v35, %v595_v34 }
  0x26   : > { %v598_v37 = vrot.slane %v597_v36, 2 }
  0x28   : > { %v599_v38 = vadd.f32 %v598_v37, %v597_v36  ;;  %v5382_v36 = vld [vmem:[%s8292_s4] ss:$0 sm:$0xff] }
  0x2a   : > { %v600_v39 = vrot.slane %v599_v38, 1 }
  0x2c   : > { %v601_v40 = vadd.f32 %v600_v39, %v599_v38 }
  0x2e   : > { %6137 = vmatmul.mubr.msk.f32.vlgmr.msra.gmra.mrb[0].mxu0 %vm580_vm3, %v601_v40 }
  0x2f   : > { %6799 = vmatpush3.bf16.msra.mxu0 %v7346_v4  ;;  %6166 = vmatprep.mubr.msk.f32.mxu0 %vm7236_vm0, %v7237_v6 }
  0x30   : > { %6800 = vmatprep.subr.bf16.mxu0 %v7235_v3 }
  0x33   : > { %6802 = vmatpush3.bf16.msra.mxu0 %v7366_v9 }
  0x34   : > { %6803 = vmatprep.subr.bf16.mxu0 %v7235_v3 }
  0x37   : > { %6805 = vmatpush3.bf16.msra.mxu0 %v7387_v11 }
  0x38   : > { %6806 = vmatprep.subr.bf16.mxu0 %v7235_v3 }
 0x101   : > { %v671_v41 = vpop.f32.mrb[0].mxu0 }
 0x102   : > { %v675_v42 = vmul.f32 0.0026041667, %v671_v41  ;;  %v6138_v43 = vpop.f32.mrb[1].mxu0  ;;  %v5383_v41 = vld [vmem:[%s8293_s5] ss:$0 sm:$0xff] }
 0x104   : > { %6152 = vmatmul.mubr.msk.f32.vlgmr.msra.gmra.mrb[0].mxu1 %vm676_vm1, %v675_v42 }
 0x105   : > { %6192 = vmatprep.mubr.msk.bf16.mxu1 %vm1094_vm4, %v7023_v33 }
 0x1d7   : > { %v764_v47 = vpop.f32.mrb[0].mxu1 }
 0x1d8   : > { %v771_v48 = vrot.slane %v764_v47, %v7425_v46  ;;  %v6153_v49 = vpop.f32.mrb[1].mxu1 }
 0x1da   : > { %v772_v50 = vsub.f32 %v564_v12, %v771_v48  ;;  %v773_v51 = vsub.f32 %v565_v13, %v771_v48  ;;  %v774_v52 = vsub.f32 %v566_v14, %v771_v48  ;;  %v775_v53 = vsub.f32 %v567_v15, %v771_v48 }
 0x1db   : > { %v776_v54 = vsub.f32 %v568_v16, %v771_v48  ;;  %v777_v58 = vsub.f32 %v569_v17, %v771_v48  ;;  %v778_v63 = vsub.f32 %v570_v21, %v771_v48  ;;  %v779_v5 = vsub.f32 %v571_v22, %v771_v48 }
 0x1dc   : > { %v780_v55 = vmul.f32 %v772_v50, %v772_v50  ;;  %v781_v56 = vmul.f32 %v773_v51, %v773_v51  ;;  %v782_v57 = vmul.f32 %v774_v52, %v774_v52  ;;  %v783_v59 = vmul.f32 %v775_v53, %v775_v53 }
 0x1dd   : > { %v784_v0 = vmul.f32 %v776_v54, %v776_v54  ;;  %v785_v7 = vmul.f32 %v777_v58, %v777_v58  ;;  %v786_v13 = vmul.f32 %v778_v63, %v778_v63  ;;  %v787_v16 = vmul.f32 %v779_v5, %v779_v5 }
 0x1de   : > { %v788_v60 = vsel %vm580_vm3, %v780_v55, 0.0  ;;  %v789_v61 = vsel %vm580_vm3, %v781_v56, 0.0  ;;  %v791_v1 = vsel %vm580_vm3, %v782_v57, 0.0  ;;  %v793_v10 = vsel %vm580_vm3, %v783_v59, 0.0 }
 0x1df   : > { %v790_v62 = vadd.f32 %v789_v61, %v788_v60  ;;  %v795_v14 = vsel %vm580_vm3, %v784_v0, 0.0  ;;  %v797_v17 = vsel %vm580_vm3, %v785_v7, 0.0  ;;  %v799_v19 = vsel %vm580_vm3, %v786_v13, 0.0 }
 0x1e0   : > { %v801_v21 = vsel %vm580_vm3, %v787_v16, 0.0 }
 0x1e1   : > { %v792_v2 = vadd.f32 %v791_v1, %v790_v62 }
 0x1e3   : > { %v794_v12 = vadd.f32 %v793_v10, %v792_v2 }
 0x1e5   : > { %v796_v15 = vadd.f32 %v795_v14, %v794_v12 }
 0x1e7   : > { %v798_v18 = vadd.f32 %v797_v17, %v796_v15 }
 0x1e9   : > { %v800_v20 = vadd.f32 %v799_v19, %v798_v18 }
 0x1eb   : > { %v802_v23 = vadd.f32 %v801_v21, %v800_v20 }
 0x1ed   : > { %v803_v24 = vrot.slane %v802_v23, 4 }
 0x1ef   : > { %v804_v22 = vadd.f32 %v803_v24, %v802_v23 }
 0x1f1   : > { %v805_v25 = vrot.slane %v804_v22, 2 }
 0x1f3   : > { %v806_v26 = vadd.f32 %v805_v25, %v804_v22 }
 0x1f5   : > { %v807_v27 = vrot.slane %v806_v26, 1 }
 0x1f7   : > { %v808_v28 = vadd.f32 %v807_v27, %v806_v26 }
 0x1f9   : > { %6167 = vmatmul.mubr.msk.f32.vlgmr.msra.gmra.mrb[2].mxu0 %vm580_vm3, %v808_v28 }
 0x1fa   : > { %6809 = vmatpush3.bf16.xpose.msk.msra.mxu0 %vm7359_vm2, %v7346_v4  ;;  %6181 = vmatprep.mubr.msk.f32.mxu0 %vm7236_vm0, %v7237_v6 }
 0x1fb   : > { %6810 = vmatprep.subr.bf16.mxu0 %v7235_v3 }
 0x202   : > { %6813 = vmatpush3.bf16.xpose.msk.msra.mxu0 %vm7359_vm2, %v7366_v9  ;;  %v7025_v9 = vld [vmem:[%s8290_s2 + $0x20] sm:$0xff]  }
 0x203   : > { %6814 = vmatprep.subr.bf16.mxu0 %v7235_v3 }
 0x20a   : > { %6817 = vmatpush3.bf16.xpose.msk.msra.mxu0 %vm7359_vm2, %v7387_v11 }
 0x2cc   : > { %v878_v29 = vpop.f32.mrb[2].mxu0 }
 0x2cd   : > { %v882_v30 = vmul.f32 0.0026041667, %v878_v29  ;;  %v6168_v31 = vpop.f32.mrb[3].mxu0 }
 0x2cf   : > { %v883_v32 = vadd.f32 1e-06, %v882_v30 }
 0x2d1   : > { %7111 = vrsqrt.f32 %v883_v32 }
 0x2db   : > { %v7112_v4 = vpop.eup %7111 }
 0x2dc   : > { %6182 = vmatmul.mubr.msk.f32.vlgmr.msra.gmra.mrb[4].mxu0 %vm676_vm1, %v7112_v4 }
 0x2dd   : > { %6222 = vmatprep.mubr.msk.bf16.mxu0 %vm1094_vm4, %v7025_v9 }
 0x3af   : > { %v954_v11 = vpop.f32.mrb[4].mxu0 }
 0x3b0   : > { %v961_v34 = vrot.slane %v954_v11, %v7425_v46  ;;  %v6183_v35 = vpop.f32.mrb[5].mxu0 }
 0x3b2   : > { %v962_v37 = vmul.f32 %v961_v34, %v772_v50  ;;  %v963_v38 = vmul.f32 %v961_v34, %v773_v51  ;;  %v964_v39 = vmul.f32 %v961_v34, %v774_v52  ;;  %v965_v40 = vmul.f32 %v961_v34, %v775_v53 }
 0x3b3   : > { %v966_v42 = vmul.f32 %v961_v34, %v776_v54  ;;  %v967_v43 = vmul.f32 %v961_v34, %v777_v58  ;;  %v968_v44 = vmul.f32 %v961_v34, %v778_v63  ;;  %v969_v45 = vmul.f32 %v961_v34, %v779_v5 }
 0x3b4   : > { %v976_v47 = vmul.f32 %v5382_v36, %v962_v37  ;;  %v977_v48 = vmul.f32 %v5382_v36, %v963_v38  ;;  %v978_v49 = vmul.f32 %v5382_v36, %v964_v39  ;;  %v979_v55 = vmul.f32 %v5382_v36, %v965_v40 }
 0x3b5   : > { %v980_v56 = vmul.f32 %v5382_v36, %v966_v42  ;;  %v981_v57 = vmul.f32 %v5382_v36, %v967_v43  ;;  %v982_v59 = vmul.f32 %v5382_v36, %v968_v44  ;;  %v983_v60 = vmul.f32 %v5382_v36, %v969_v45 }
 0x3b6   : > { %v990_v50 = vadd.f32 %v5383_v41, %v976_v47  ;;  %v991_v51 = vadd.f32 %v5383_v41, %v977_v48  ;;  %v992_v52 = vadd.f32 %v5383_v41, %v978_v49  ;;  %v993_v53 = vadd.f32 %v5383_v41, %v979_v55  ;;  %v7059_v47 = vld [vmem:[%s8294_s6] sm:$0xff]   ;;  %v7024_v48 = vld [vmem:[%s8290_s2 + $0x8] sm:$0xff]   ;;  %v7027_v55 = vld [vmem:[%s8290_s2 + $0x10] sm:$0xff]  }
 0x3b7   : > { %v994_v61 = vadd.f32 %v5383_v41, %v980_v56  ;;  %v995_v62 = vadd.f32 %v5383_v41, %v981_v57  ;;  %v7466_v0 = vadd.f32 %v5383_v41, %v982_v59  ;;  %v997_v1 = vadd.f32 %v5383_v41, %v983_v60  ;;  %v7026_v49 = vld [vmem:[%s8290_s2 + $0x28] sm:$0xff]   ;;  %v7029_v56 = vld [vmem:[%s8290_s2 + $0x30] sm:$0xff]   ;;  %v7028_v59 = vld [vmem:[%s8290_s2 + $0x18] sm:$0xff]  }
 0x3b8   : > { %v5384_v54 = vmul.f32 -1.442695, %v990_v50  ;;  %v5385_v58 = vmul.f32 -1.442695, %v991_v51  ;;  %v5386_v63 = vmul.f32 -1.442695, %v992_v52 }
 0x3b9   : > { %v5387_v2 = vmul.f32 -1.442695, %v993_v53  ;;  %v5388_v5 = vmul.f32 -1.442695, %v994_v61  ;;  %v5389_v7 = vmul.f32 -1.442695, %v995_v62 }
 0x3ba   : > { %7113 = vpow2.f32 %v5384_v54  ;;  %v5390_v10 = vmul.f32 -1.442695, %v7466_v0  ;;  %v5391_v12 = vmul.f32 -1.442695, %v997_v1  ;;  %v7060_v57 = vld [vmem:[%s8294_s6 + $0x8] sm:$0xff]   ;;  %v7030_v60 = vld [vmem:[%s8290_s2 + $0x38] sm:$0xff]  }
 0x3bb   : > { %7115 = vpow2.f32 %v5385_v58  ;;  %v7038_v54 = vld [vmem:[%s8290_s2 + $0x78] sm:$0xff]   ;;  %v7039_v58 = vld [vmem:[%s8290_s2 + $0x80] sm:$0xff]  }
 0x3bc   : > { %7117 = vpow2.f32 %v5386_v63  ;;  %v7040_v63 = vld [vmem:[%s8290_s2 + $0x88] sm:$0xff]  }
 0x3bd   : > { %7119 = vpow2.f32 %v5387_v2  ;;  %v7042_v2 = vld [vmem:[%s8290_s2 + $0x98] sm:$0xff]  }
 0x3be   : > { %7121 = vpow2.f32 %v5388_v5  ;;  %v7043_v5 = vld [vmem:[%s8290_s2 + $0xa0] sm:$0xff]  }
 0x3bf   : > { %7123 = vpow2.f32 %v5389_v7  ;;  %v7044_v7 = vld [vmem:[%s8290_s2 + $0xa8] sm:$0xff]  }
 0x3c0   : > { %7125 = vpow2.f32 %v5390_v10  ;;  %v7045_v10 = vld [vmem:[%s8290_s2 + $0xb0] sm:$0xff]  }
 0x3c1   : > { %7127 = vpow2.f32 %v5391_v12  ;;  %v7046_v12 = vld [vmem:[%s8290_s2 + $0xb8] sm:$0xff]  }
 0x3c4   : > { %v7114_v13 = vpop.eup %7113 }
 0x3c5   : > { %v7116_v14 = vpop.eup %7115  ;;  %v1022_v15 = vadd.f32 1.0, %v7114_v13  ;;  %v7047_v13 = vld [vmem:[%s8290_s2 + $0xc0] sm:$0xff]  }
 0x3c6   : > { %v7118_v16 = vpop.eup %7117  ;;  %v1023_v17 = vadd.f32 1.0, %v7116_v14  ;;  %v7048_v14 = vld [vmem:[%s8290_s2 + $0xc8] sm:$0xff]  }
 0x3c7   : > { %v7120_v18 = vpop.eup %7119  ;;  %v1024_v19 = vadd.f32 1.0, %v7118_v16  ;;  %7129 = vrcp.f32 %v1022_v15  ;;  %v7049_v15 = vld [vmem:[%s8290_s2 + $0xd0] sm:$0xff]   ;;  %v7050_v16 = vld [vmem:[%s8290_s2 + $0xd8] sm:$0xff]  }
 0x3c8   : > { %v7122_v20 = vpop.eup %7121  ;;  %v1025_v21 = vadd.f32 1.0, %v7120_v18  ;;  %7131 = vrcp.f32 %v1023_v17  ;;  %v7051_v17 = vld [vmem:[%s8290_s2 + $0xe0] sm:$0xff]   ;;  %v7061_v18 = vld [vmem:[%s8294_s6 + $0x10] sm:$0xff]  }
 0x3c9   : > { %v7124_v23 = vpop.eup %7123  ;;  %v1026_v24 = vadd.f32 1.0, %v7122_v20  ;;  %7133 = vrcp.f32 %v1024_v19  ;;  %v7661_v19 = vld [vmem:[%s8294_s6 + $0x18] sm:$0xff]   ;;  %v7052_v20 = vld [vmem:[%s8290_s2 + $0xe8] sm:$0xff]  }
 0x3ca   : > { %v7126_v22 = vpop.eup %7125  ;;  %v1027_v25 = vadd.f32 1.0, %v7124_v23  ;;  %7135 = vrcp.f32 %v1025_v21  ;;  %v7053_v21 = vld [vmem:[%s8290_s2 + $0xf0] sm:$0xff]   ;;  %v7054_v23 = vld [vmem:[%s8290_s2 + $0xf8] sm:$0xff]  }
 0x3cb   : > { %v7128_v26 = vpop.eup %7127  ;;  %v1028_v27 = vadd.f32 1.0, %v7126_v22  ;;  %7137 = vrcp.f32 %v1026_v24  ;;  %v7055_v24 = vld [vmem:[%s8290_s2 + $0x100] sm:$0xff]   ;;  %v7056_v22 = vld [vmem:[%s8290_s2 + $0x108] sm:$0xff]  }
 0x3cc   : > { %v1029_v28 = vadd.f32 1.0, %v7128_v26  ;;  %7139 = vrcp.f32 %v1027_v25  ;;  %v7057_v25 = vld [vmem:[%s8290_s2 + $0x110] sm:$0xff]   ;;  %v7058_v26 = vld [vmem:[%s8290_s2 + $0x118] sm:$0xff]  }
 0x3cd   : > { %7141 = vrcp.f32 %v1028_v27  ;;  %v3045_v27 = vld [vmem:[%s557_s28] sm:$0x1] }
 0x3ce   : > { %7143 = vrcp.f32 %v1029_v28  ;;  %v5640_v28 = vmul.f32 -1.442695, %v3045_v27 }
 0x3d0   : > { %7145 = vpow2.f32 %v5640_v28  ;;  %v7070_v28 = vld [vmem:[%s8294_s6 + $0x58] sm:$0xff]  }
 0x3d1   : > { %v7130_v29 = vpop.eup %7129 }
 0x3d2   : > { %v7132_v30 = vpop.eup %7131  ;;  %v1046_v31 = vmul.f32 %v7130_v29, %v990_v50  ;;  %v7031_v50 = vld [vmem:[%s8290_s2 + $0x40] sm:$0xff]  }
 0x3d3   : > { %v7134_v32 = vpop.eup %7133  ;;  %v1047_v4 = vmul.f32 %v7132_v30, %v991_v51  ;;  %v7032_v51 = vld [vmem:[%s8290_s2 + $0x48] sm:$0xff]   ;;  %v7083_v29 = vld [vmem:[%s8296_s8] sm:$0xff]  }
 0x3d4   : > { %v7136_v33 = vpop.eup %7135  ;;  %v1048_v9 = vmul.f32 %v7134_v32, %v992_v52  ;;  %v7033_v52 = vld [vmem:[%s8290_s2 + $0x50] sm:$0xff]   ;;  %v7085_v30 = vld [vmem:[%s8296_s8 + $0x8] sm:$0xff]  }
 0x3d5   : > { %v7138_v11 = vpop.eup %7137  ;;  %v1049_v34 = vmul.f32 %v7136_v33, %v993_v53  ;;  %v7469_v35 = vpack.c.bf16 %v1047_v4, %v1046_v31  ;;  %v7034_v53 = vld [vmem:[%s8290_s2 + $0x58] sm:$0xff]   ;;  %v7087_v4 = vld [vmem:[%s8296_s8 + $0x10] sm:$0xff]  }
 0x3d6   : > { %v7140_v36 = vpop.eup %7139  ;;  %v1050_v38 = vmul.f32 %v7138_v11, %v994_v61  ;;  %v7035_v61 = vld [vmem:[%s8290_s2 + $0x60] sm:$0xff]   ;;  %v7089_v33 = vld [vmem:[%s8296_s8 + $0x18] sm:$0xff]  }
 0x3d7   : > { %v7142_v37 = vpop.eup %7141  ;;  %v1051_v39 = vmul.f32 %v7140_v36, %v995_v62  ;;  %v7471_v40 = vpack.c.bf16 %v1049_v34, %v1048_v9  ;;  %6184 = vmatprep.subr.bf16.mxu1 %v7469_v35  ;;  %6214 = vmatprep.subr.bf16.mxu0 %v7469_v35  ;;  %v7036_v62 = vld [vmem:[%s8290_s2 + $0x68] sm:$0xff]  }
 0x3d8   : > { %v7144_v41 = vpop.eup %7143  ;;  %6185 = vmatpush3.bf16.msra.mxu1 %v7469_v35  ;;  %6215 = vmatpush3.bf16.msra.mxu0 %v7469_v35  ;;  %v1052_v42 = vmul.f32 %v7142_v37, %v7466_v0  ;;  %v7037_v0 = vld [vmem:[%s8290_s2 + $0x70] sm:$0xff]  }
 0x3d9   : > { %6186 = vmatprep.subr.bf16.mxu1 %v7471_v40  ;;  %6216 = vmatprep.subr.bf16.mxu0 %v7471_v40  ;;  %v1053_v43 = vmul.f32 %v7144_v41, %v997_v1  ;;  %v7480_v44 = vpack.c.bf16 %v1051_v39, %v1050_v38  ;;  %v7041_v1 = vld [vmem:[%s8290_s2 + $0x90] sm:$0xff]  }
 0x3da   : > { %v7146_v31 = vpop.eup %7145 }
 0x3db   : > { %v7486_v45 = vpack.c.bf16 %v1053_v43, %v1052_v42  ;;  %v3049_v32 = vadd.f32 1.0, %v7146_v31 }
 0x3dc   : > { %6187 = vmatpush3.bf16.msra.mxu1 %v7471_v40  ;;  %6217 = vmatpush3.bf16.msra.mxu0 %v7471_v40 }
 0x3dd   : > { %6188 = vmatprep.subr.bf16.mxu1 %v7480_v44  ;;  %6218 = vmatprep.subr.bf16.mxu0 %v7480_v44  ;;  %7147 = vrcp.f32 %v3049_v32 }
 0x3e0   : > { %6189 = vmatpush3.bf16.msra.mxu1 %v7480_v44  ;;  %6219 = vmatpush3.bf16.msra.mxu0 %v7480_v44 }
 0x3e1   : > { %6190 = vmatprep.subr.bf16.mxu1 %v7486_v45  ;;  %6220 = vmatprep.subr.bf16.mxu0 %v7486_v45 }
 0x3e4   : > { %6191 = vmatpush3.bf16.msra.mxu1 %v7486_v45  ;;  %6221 = vmatpush3.bf16.msra.mxu0 %v7486_v45 }
 0x3e5   : > { %6244 = vmatprep.subr.bf16.mxu0 %v7469_v35  ;;  %6200 = vmatprep.subr.bf16.mxu1 %v7059_v47 }
 0x3e7   : > { %6193 = vmatmul.mubr.msk.bf16.vlgmr.msra.gmra.mrb[4].mxu1 %vm1094_vm4, %v7024_v48  ;;  %6223 = vmatmul.mubr.msk.bf16.vlgmr.msra.gmra.mrb[8].mxu0 %vm1094_vm4, %v7026_v49 }
 0x3e8   : > { %6245 = vmatpush3.bf16.msra.mxu0 %v7469_v35  ;;  %6196 = vmatprep.mubr.msk.bf16.mxu1 %vm1094_vm4, %v7027_v55 }
 0x3e9   : > { %6246 = vmatprep.subr.bf16.mxu0 %v7471_v40  ;;  %6226 = vmatprep.mubr.msk.bf16.mxu0 %vm1094_vm4, %v7029_v56  ;;  %v7064_v56 = vld [vmem:[%s8294_s6 + $0x28] sm:$0xff]  }
 0x3ea   : > { %6201 = vmatpush3.bf16.msra.mxu1 %v7059_v47 }
 0x3eb   : > { %6202 = vmatprep.subr.bf16.mxu1 %v7060_v57 }
 0x3ec   : > { %6247 = vmatpush3.bf16.msra.mxu0 %v7471_v40 }
 0x3ed   : > { %6248 = vmatprep.subr.bf16.mxu0 %v7480_v44 }
 0x3ee   : > { %6203 = vmatpush3.bf16.msra.mxu1 %v7060_v57 }
 0x3ef   : > { %6197 = vmatmul.mubr.msk.bf16.gmra.mrb[8].mxu1 %vm1094_vm4, %v7028_v59  ;;  %6227 = vmatmul.mubr.msk.bf16.gmra.mrb[12].mxu0 %vm1094_vm4, %v7030_v60 }
 0x3f0   : > { %6249 = vmatpush3.bf16.msra.mxu0 %v7480_v44  ;;  %6252 = vmatprep.mubr.msk.bf16.mxu0 %vm1094_vm4, %v7031_v50 }
 0x3f1   : > { %6250 = vmatprep.subr.bf16.mxu0 %v7486_v45  ;;  %6204 = vmatprep.subr.bf16.mxu1 %v7061_v18 }
 0x3f2   : > { %6205 = vmatpush3.bf16.msra.mxu1 %v7061_v18 }
 0x3f3   : > { %6230 = vmatprep.subr.bf16.mxu1 %v7661_v19 }
 0x3f4   : > { %6251 = vmatpush3.bf16.msra.mxu0 %v7486_v45 }
 0x3f5   : > { %6274 = vmatprep.subr.bf16.mxu0 %v7469_v35 }
 0x3f7   : > { %6253 = vmatmul.mubr.msk.bf16.vlgmr.msra.gmra.mrb[16].mxu0 %vm1094_vm4, %v7032_v51 }
 0x3f8   : > { %6275 = vmatpush3.bf16.msra.mxu0 %v7469_v35  ;;  %6256 = vmatprep.mubr.msk.bf16.mxu0 %vm1094_vm4, %v7033_v52 }
 0x3f9   : > { %6276 = vmatprep.subr.bf16.mxu0 %v7471_v40 }
 0x3fc   : > { %6277 = vmatpush3.bf16.msra.mxu0 %v7471_v40 }
 0x3fd   : > { %6278 = vmatprep.subr.bf16.mxu0 %v7480_v44 }
 0x3ff   : > { %6257 = vmatmul.mubr.msk.bf16.gmra.mrb[20].mxu0 %vm1094_vm4, %v7034_v53 }
 0x400   : > { %6279 = vmatpush3.bf16.msra.mxu0 %v7480_v44  ;;  %6282 = vmatprep.mubr.msk.bf16.mxu0 %vm1094_vm4, %v7035_v61 }
 0x401   : > { %6280 = vmatprep.subr.bf16.mxu0 %v7486_v45 }
 0x404   : > { %6281 = vmatpush3.bf16.msra.mxu0 %v7486_v45 }
 0x405   : > { %6304 = vmatprep.subr.bf16.mxu0 %v7469_v35 }
 0x407   : > { %6283 = vmatmul.mubr.msk.bf16.vlgmr.msra.gmra.mrb[24].mxu0 %vm1094_vm4, %v7036_v62 }
 0x408   : > { %6305 = vmatpush3.bf16.msra.mxu0 %v7469_v35  ;;  %6286 = vmatprep.mubr.msk.bf16.mxu0 %vm1094_vm4, %v7037_v0 }
 0x409   : > { %6306 = vmatprep.subr.bf16.mxu0 %v7471_v40 }
 0x40c   : > { %6307 = vmatpush3.bf16.msra.mxu0 %v7471_v40 }
 0x40d   : > { %6308 = vmatprep.subr.bf16.mxu0 %v7480_v44 }
 0x40f   : > { %6287 = vmatmul.mubr.msk.bf16.gmra.mrb[28].mxu0 %vm1094_vm4, %v7038_v54  ;;  %v7065_v54 = vld [vmem:[%s8294_s6 + $0x30] sm:$0xff]  }
 0x410   : > { %6309 = vmatpush3.bf16.msra.mxu0 %v7480_v44  ;;  %6312 = vmatprep.mubr.msk.bf16.mxu0 %vm1094_vm4, %v7039_v58 }
 0x411   : > { %6310 = vmatprep.subr.bf16.mxu0 %v7486_v45 }
 0x414   : > { %6311 = vmatpush3.bf16.msra.mxu0 %v7486_v45 }
 0x415   : > { %6334 = vmatprep.subr.bf16.mxu0 %v7469_v35 }
 0x417   : > { %6313 = vmatmul.mubr.msk.bf16.vlgmr.msra.gmra.mrb[32].mxu0 %vm1094_vm4, %v7040_v63 }
 0x418   : > { %6335 = vmatpush3.bf16.msra.mxu0 %v7469_v35  ;;  %6316 = vmatprep.mubr.msk.bf16.mxu0 %vm1094_vm4, %v7041_v1 }
 0x419   : > { %6336 = vmatprep.subr.bf16.mxu0 %v7471_v40 }
 0x41c   : > { %6337 = vmatpush3.bf16.msra.mxu0 %v7471_v40 }
 0x41d   : > { %6338 = vmatprep.subr.bf16.mxu0 %v7480_v44 }
 0x41f   : > { %6317 = vmatmul.mubr.msk.bf16.gmra.mrb[36].mxu0 %vm1094_vm4, %v7042_v2 }
 0x420   : > { %6339 = vmatpush3.bf16.msra.mxu0 %v7480_v44  ;;  %6342 = vmatprep.mubr.msk.bf16.mxu0 %vm1094_vm4, %v7043_v5 }
 0x421   : > { %6340 = vmatprep.subr.bf16.mxu0 %v7486_v45 }
 0x424   : > { %6341 = vmatpush3.bf16.msra.mxu0 %v7486_v45 }
 0x425   : > { %6364 = vmatprep.subr.bf16.mxu0 %v7469_v35 }
 0x427   : > { %6343 = vmatmul.mubr.msk.bf16.vlgmr.msra.gmra.mrb[40].mxu0 %vm1094_vm4, %v7044_v7 }
 0x428   : > { %6365 = vmatpush3.bf16.msra.mxu0 %v7469_v35  ;;  %6346 = vmatprep.mubr.msk.bf16.mxu0 %vm1094_vm4, %v7045_v10  ;;  %v7066_v10 = vld [vmem:[%s8294_s6 + $0x38] sm:$0xff]  }
 0x429   : > { %6366 = vmatprep.subr.bf16.mxu0 %v7471_v40 }
 0x42c   : > { %6367 = vmatpush3.bf16.msra.mxu0 %v7471_v40 }
 0x42d   : > { %6368 = vmatprep.subr.bf16.mxu0 %v7480_v44 }
 0x42f   : > { %6347 = vmatmul.mubr.msk.bf16.gmra.mrb[44].mxu0 %vm1094_vm4, %v7046_v12 }
 0x430   : > { %6369 = vmatpush3.bf16.msra.mxu0 %v7480_v44  ;;  %6372 = vmatprep.mubr.msk.bf16.mxu0 %vm1094_vm4, %v7047_v13  ;;  %v7067_v13 = vld [vmem:[%s8294_s6 + $0x40] sm:$0xff]  }
 0x431   : > { %6370 = vmatprep.subr.bf16.mxu0 %v7486_v45 }
 0x434   : > { %6371 = vmatpush3.bf16.msra.mxu0 %v7486_v45 }
 0x435   : > { %6394 = vmatprep.subr.bf16.mxu0 %v7469_v35 }
 0x437   : > { %6373 = vmatmul.mubr.msk.bf16.vlgmr.msra.gmra.mrb[48].mxu0 %vm1094_vm4, %v7048_v14 }
 0x438   : > { %6395 = vmatpush3.bf16.msra.mxu0 %v7469_v35  ;;  %6376 = vmatprep.mubr.msk.bf16.mxu0 %vm1094_vm4, %v7049_v15 }
 0x439   : > { %6396 = vmatprep.subr.bf16.mxu0 %v7471_v40 }
 0x43c   : > { %6397 = vmatpush3.bf16.msra.mxu0 %v7471_v40 }
 0x43d   : > { %6398 = vmatprep.subr.bf16.mxu0 %v7480_v44 }
 0x43f   : > { %6377 = vmatmul.mubr.msk.bf16.gmra.mrb[52].mxu0 %vm1094_vm4, %v7050_v16 }
 0x440   : > { %6399 = vmatpush3.bf16.msra.mxu0 %v7480_v44  ;;  %6402 = vmatprep.mubr.msk.bf16.mxu0 %vm1094_vm4, %v7051_v17 }
 0x441   : > { %6400 = vmatprep.subr.bf16.mxu0 %v7486_v45 }
 0x444   : > { %6401 = vmatpush3.bf16.msra.mxu0 %v7486_v45 }
 0x445   : > { %6424 = vmatprep.subr.bf16.mxu0 %v7469_v35 }
 0x447   : > { %6403 = vmatmul.mubr.msk.bf16.vlgmr.msra.gmra.mrb[56].mxu0 %vm1094_vm4, %v7052_v20 }
 0x448   : > { %6425 = vmatpush3.bf16.msra.mxu0 %v7469_v35  ;;  %6406 = vmatprep.mubr.msk.bf16.mxu0 %vm1094_vm4, %v7053_v21 }
 0x449   : > { %6426 = vmatprep.subr.bf16.mxu0 %v7471_v40 }
 0x44c   : > { %6427 = vmatpush3.bf16.msra.mxu0 %v7471_v40 }
 0x44d   : > { %6428 = vmatprep.subr.bf16.mxu0 %v7480_v44 }
 0x44f   : > { %6407 = vmatmul.mubr.msk.bf16.gmra.mrb[60].mxu0 %vm1094_vm4, %v7054_v23 }
 0x450   : > { %6429 = vmatpush3.bf16.msra.mxu0 %v7480_v44  ;;  %6432 = vmatprep.mubr.msk.bf16.mxu0 %vm1094_vm4, %v7055_v24  ;;  %v7063_v44 = vld [vmem:[%s8294_s6 + $0x20] sm:$0xff]  }
 0x451   : > { %6430 = vmatprep.subr.bf16.mxu0 %v7486_v45 }
 0x454   : > { %6431 = vmatpush3.bf16.msra.mxu0 %v7486_v45  ;;  %v7148_v45 = vpop.eup %7147 }
 0x455   : > { %6454 = vmatprep.subr.bf16.mxu0 %v7237_v6  ;;  %v3052_v47 = vmul.f32 %v7148_v45, %v3045_v27 }
 0x457   : > { %6433 = vmatmul.mubr.msk.bf16.vlgmr.msra.gmra.mrb[64].mxu0 %vm1094_vm4, %v7056_v22  ;;  %v3061_v59 = vpack.c.bf16 %v3052_v47, %v3052_v47  ;;  %v7074_v47 = vld [vmem:[%s8294_s6 + $0x78] sm:$0xff]  }
 0x458   : > { %6436 = vmatprep.mubr.msk.bf16.mxu0 %vm1094_vm4, %v7057_v25  ;;  %6455 = vmatpush3.bf16.msra.mxu0 %v7083_v29 }
 0x459   : > { %6456 = vmatprep.subr.bf16.mxu0 %v7237_v6 }
 0x45c   : > { %6457 = vmatpush3.bf16.msra.mxu0 %v7085_v30 }
 0x45d   : > { %6458 = vmatprep.subr.bf16.mxu0 %v7237_v6 }
 0x45f   : > { %6437 = vmatmul.mubr.msk.bf16.gmra.mrb[68].mxu0 %vm1094_vm4, %v7058_v26  ;;  %v7069_v26 = vld [vmem:[%s8294_s6 + $0x50] sm:$0xff]  }
 0x460   : > { %6462 = vmatprep.mubr.msk.bf16.mxu0 %vm7236_vm0, %v7237_v6  ;;  %6459 = vmatpush3.bf16.msra.mxu0 %v7087_v4 }
 0x461   : > { %6460 = vmatprep.subr.bf16.mxu0 %v7237_v6 }
 0x464   : > { %6461 = vmatpush3.bf16.msra.mxu0 %v7089_v33  ;;  %v7071_v33 = vld [vmem:[%s8294_s6 + $0x60] sm:$0xff]  }
 0x465   : > { %6818 = vmatprep.subr.bf16.mxu0 %v7235_v3 }
 0x467   : > { %6463 = vmatmul.mubr.msk.bf16.vlgmr.msra.gmra.mrb[72].mxu0 %vm1094_vm4, %v3061_v59 }
 0x468   : > { %6474 = vmatprep.mubr.msk.f32.mxu0 %vm7236_vm0, %v7237_v6 }
 0x4ba   : > { %v6194_v9 = vpop.f32.mrb[4].mxu1  ;;  %v6224_v11 = vpop.f32.mrb[8].mxu0 }
 0x4bb   : > { %v1141_v34 = vpop.f32.mrb[5].mxu1  ;;  %v1360_v35 = vpop.f32.mrb[9].mxu0 }
 0x4bc   : > { %v6195_v36 = vpop.f32.mrb[6].mxu1  ;;  %v6225_v37 = vpop.f32.mrb[10].mxu0 }
 0x4bd   : > { %v1173_v38 = vpack.c.bf16 %v6195_v36, %v6194_v9  ;;  %v1144_v39 = vpop.f32.mrb[7].mxu1  ;;  %v1392_v40 = vpack.c.bf16 %v6225_v37, %v6224_v11  ;;  %v1363_v41 = vpop.f32.mrb[11].mxu0 }
 0x4be   : > { %v1172_v42 = vpack.c.bf16 %v1144_v39, %v1141_v34  ;;  %v1391_v43 = vpack.c.bf16 %v1363_v41, %v1360_v35 }
 0x4c0   : > { %6206 = vmatprep.mubr.msk.bf16.mxu1 %vm580_vm3, %v1172_v42 }
 0x4c1   : > { %6207 = vmatmul.mubr.msk.bf16.vlgmr.msra.gmra.mrb[12].mxu1 %vm580_vm3, %v1173_v38  ;;  %v7072_v38 = vld [vmem:[%s8294_s6 + $0x68] sm:$0xff]  }
 0x4c2   : > { %v6198_v48 = vpop.f32.mrb[8].mxu1  ;;  %6231 = vmatpush3.bf16.msra.mxu1 %v7661_v19  ;;  %v6228_v49 = vpop.f32.mrb[12].mxu0  ;;  %v7068_v19 = vld [vmem:[%s8294_s6 + $0x48] sm:$0xff]  }
 0x4c3   : > { %v1157_v55 = vpop.f32.mrb[9].mxu1  ;;  %6232 = vmatprep.subr.bf16.mxu1 %v7063_v44  ;;  %v1376_v57 = vpop.f32.mrb[13].mxu0 }
 0x4c4   : > { %v6199_v60 = vpop.f32.mrb[10].mxu1  ;;  %v6229_v50 = vpop.f32.mrb[14].mxu0 }
 0x4c5   : > { %v1175_v51 = vpack.c.bf16 %v6199_v60, %v6198_v48  ;;  %v1160_v52 = vpop.f32.mrb[11].mxu1  ;;  %v1394_v53 = vpack.c.bf16 %v6229_v50, %v6228_v49  ;;  %v1379_v61 = vpop.f32.mrb[15].mxu0  ;;  %v7075_v60 = vld [vmem:[%s8294_s6 + $0x80] sm:$0xff]  }
 0x4c6   : > { %v1174_v62 = vpack.c.bf16 %v1160_v52, %v1157_v55  ;;  %6233 = vmatpush3.bf16.msra.mxu1 %v7063_v44  ;;  %v1393_v0 = vpack.c.bf16 %v1379_v61, %v1376_v57 }
 0x4c7   : > { %6234 = vmatprep.subr.bf16.mxu1 %v7064_v56 }
 0x4c8   : > { %6210 = vmatprep.mubr.msk.bf16.mxu1 %vm580_vm3, %v1174_v62 }
 0x4c9   : > { %6211 = vmatmul.mubr.msk.bf16.gmra.mrb[16].mxu1 %vm580_vm3, %v1175_v51  ;;  %v7076_v51 = vld [vmem:[%s8294_s6 + $0x88] sm:$0xff]  }
 0x4ca   : > { %6235 = vmatpush3.bf16.msra.mxu1 %v7064_v56  ;;  %6236 = vmatprep.mubr.msk.bf16.mxu1 %vm580_vm3, %v1391_v43  ;;  %v6254_v58 = vpop.f32.mrb[16].mxu0 }
 0x4cb   : > { %6260 = vmatprep.subr.bf16.mxu1 %v7065_v54  ;;  %v1580_v63 = vpop.f32.mrb[17].mxu0 }
 0x4cc   : > { %v6255_v1 = vpop.f32.mrb[18].mxu0 }
 0x4cd   : > { %v1612_v2 = vpack.c.bf16 %v6255_v1, %v6254_v58  ;;  %v1583_v5 = vpop.f32.mrb[19].mxu0 }
 0x4ce   : > { %v1611_v7 = vpack.c.bf16 %v1583_v5, %v1580_v63 }
 0x4d1   : > { %6237 = vmatmul.mubr.msk.bf16.vlgmr.msra.gmra.mrb[12].mxu1 %vm580_vm3, %v1392_v40  ;;  %v7073_v40 = vld [vmem:[%s8294_s6 + $0x70] sm:$0xff]  }
 0x4d2   : > { %6261 = vmatpush3.bf16.msra.mxu1 %v7065_v54  ;;  %6240 = vmatprep.mubr.msk.bf16.mxu1 %vm580_vm3, %v1393_v0  ;;  %v6258_v12 = vpop.f32.mrb[20].mxu0  ;;  %v7077_v54 = vld [vmem:[%s8294_s6 + $0x90] sm:$0xff]  }
 0x4d3   : > { %6262 = vmatprep.subr.bf16.mxu1 %v7066_v10  ;;  %v1596_v14 = vpop.f32.mrb[21].mxu0 }
 0x4d4   : > { %v6259_v15 = vpop.f32.mrb[22].mxu0 }
 0x4d5   : > { %v1614_v16 = vpack.c.bf16 %v6259_v15, %v6258_v12  ;;  %v1599_v17 = vpop.f32.mrb[23].mxu0 }
 0x4d6   : > { %6263 = vmatpush3.bf16.msra.mxu1 %v7066_v10  ;;  %v1613_v18 = vpack.c.bf16 %v1599_v17, %v1596_v14  ;;  %v7078_v10 = vld [vmem:[%s8294_s6 + $0x98] sm:$0xff]  }
 0x4d7   : > { %6264 = vmatprep.subr.bf16.mxu1 %v7067_v13 }
 0x4d9   : > { %6241 = vmatmul.mubr.msk.bf16.gmra.mrb[16].mxu1 %vm580_vm3, %v1394_v53 }
 0x4da   : > { %6265 = vmatpush3.bf16.msra.mxu1 %v7067_v13  ;;  %6266 = vmatprep.mubr.msk.bf16.mxu1 %vm580_vm3, %v1611_v7  ;;  %v6284_v20 = vpop.f32.mrb[24].mxu0  ;;  %v7079_v13 = vld [vmem:[%s8294_s6 + $0xa0] sm:$0xff]  }
 0x4db   : > { %6290 = vmatprep.subr.bf16.mxu1 %v7068_v19  ;;  %v1800_v21 = vpop.f32.mrb[25].mxu0 }
 0x4dc   : > { %v6285_v23 = vpop.f32.mrb[26].mxu0 }
 0x4dd   : > { %v1832_v24 = vpack.c.bf16 %v6285_v23, %v6284_v20  ;;  %v1803_v22 = vpop.f32.mrb[27].mxu0 }
 0x4de   : > { %v1831_v25 = vpack.c.bf16 %v1803_v22, %v1800_v21 }
 0x4e1   : > { %6267 = vmatmul.mubr.msk.bf16.vlgmr.msra.gmra.mrb[12].mxu1 %vm580_vm3, %v1612_v2 }
 0x4e2   : > { %6291 = vmatpush3.bf16.msra.mxu1 %v7068_v19  ;;  %6270 = vmatprep.mubr.msk.bf16.mxu1 %vm580_vm3, %v1613_v18  ;;  %v6288_v27 = vpop.f32.mrb[28].mxu0  ;;  %v7080_v19 = vld [vmem:[%s8294_s6 + $0xa8] sm:$0xff]  }
 0x4e3   : > { %6292 = vmatprep.subr.bf16.mxu1 %v7069_v26  ;;  %v1816_v29 = vpop.f32.mrb[29].mxu0 }
 0x4e4   : > { %v6289_v30 = vpop.f32.mrb[30].mxu0 }
 0x4e5   : > { %v1834_v31 = vpack.c.bf16 %v6289_v30, %v6288_v27  ;;  %v1819_v32 = vpop.f32.mrb[31].mxu0 }
 0x4e6   : > { %6293 = vmatpush3.bf16.msra.mxu1 %v7069_v26  ;;  %v1833_v4 = vpack.c.bf16 %v1819_v32, %v1816_v29  ;;  %v7081_v26 = vld [vmem:[%s8294_s6 + $0xb0] sm:$0xff]  }
 0x4e7   : > { %6294 = vmatprep.subr.bf16.mxu1 %v7070_v28 }
 0x4e9   : > { %6271 = vmatmul.mubr.msk.bf16.gmra.mrb[16].mxu1 %vm580_vm3, %v1614_v16 }
 0x4ea   : > { %6295 = vmatpush3.bf16.msra.mxu1 %v7070_v28  ;;  %6296 = vmatprep.mubr.msk.bf16.mxu1 %vm580_vm3, %v1831_v25  ;;  %v6314_v9 = vpop.f32.mrb[32].mxu0  ;;  %v7082_v28 = vld [vmem:[%s8294_s6 + $0xb8] sm:$0xff]  }
 0x4eb   : > { %6320 = vmatprep.subr.bf16.mxu1 %v7071_v33  ;;  %v2020_v11 = vpop.f32.mrb[33].mxu0 }
 0x4ec   : > { %v6315_v34 = vpop.f32.mrb[34].mxu0 }
 0x4ed   : > { %v2052_v35 = vpack.c.bf16 %v6315_v34, %v6314_v9  ;;  %v2023_v36 = vpop.f32.mrb[35].mxu0 }
 0x4ee   : > { %v2051_v37 = vpack.c.bf16 %v2023_v36, %v2020_v11 }
 0x4f1   : > { %6297 = vmatmul.mubr.msk.bf16.vlgmr.msra.gmra.mrb[12].mxu1 %vm580_vm3, %v1832_v24 }
 0x4f2   : > { %6321 = vmatpush3.bf16.msra.mxu1 %v7071_v33  ;;  %6300 = vmatprep.mubr.msk.bf16.mxu1 %vm580_vm3, %v1833_v4  ;;  %v6318_v39 = vpop.f32.mrb[36].mxu0  ;;  %v7084_v33 = vld [vmem:[%s8294_s6 + $0xc0] sm:$0xff]  }
 0x4f3   : > { %6322 = vmatprep.subr.bf16.mxu1 %v7072_v38  ;;  %v2036_v41 = vpop.f32.mrb[37].mxu0 }
 0x4f4   : > { %v6319_v42 = vpop.f32.mrb[38].mxu0 }
 0x4f5   : > { %v2054_v43 = vpack.c.bf16 %v6319_v42, %v6318_v39  ;;  %v2039_v44 = vpop.f32.mrb[39].mxu0 }
 0x4f6   : > { %6323 = vmatpush3.bf16.msra.mxu1 %v7072_v38  ;;  %v2053_v45 = vpack.c.bf16 %v2039_v44, %v2036_v41  ;;  %v7086_v38 = vld [vmem:[%s8294_s6 + $0xc8] sm:$0xff]  }
 0x4f7   : > { %6324 = vmatprep.subr.bf16.mxu1 %v7073_v40 }
 0x4f9   : > { %6301 = vmatmul.mubr.msk.bf16.gmra.mrb[16].mxu1 %vm580_vm3, %v1834_v31 }
 0x4fa   : > { %6325 = vmatpush3.bf16.msra.mxu1 %v7073_v40  ;;  %6326 = vmatprep.mubr.msk.bf16.mxu1 %vm580_vm3, %v2051_v37  ;;  %v6344_v48 = vpop.f32.mrb[40].mxu0  ;;  %v7088_v40 = vld [vmem:[%s8294_s6 + $0xd0] sm:$0xff]  }
 0x4fb   : > { %6350 = vmatprep.subr.bf16.mxu1 %v7074_v47  ;;  %v2240_v49 = vpop.f32.mrb[41].mxu0 }
 0x4fc   : > { %v6345_v55 = vpop.f32.mrb[42].mxu0 }
 0x4fd   : > { %v2272_v56 = vpack.c.bf16 %v6345_v55, %v6344_v48  ;;  %v2243_v57 = vpop.f32.mrb[43].mxu0 }
 0x4fe   : > { %v2271_v59 = vpack.c.bf16 %v2243_v57, %v2240_v49  ;;  %v3145_v57 = vld [vmem:[%s8298_s10 + $0x8] sm:$0xff] }
 0x501   : > { %6327 = vmatmul.mubr.msk.bf16.vlgmr.msra.gmra.mrb[12].mxu1 %vm580_vm3, %v2052_v35 }
 0x502   : > { %6351 = vmatpush3.bf16.msra.mxu1 %v7074_v47  ;;  %6330 = vmatprep.mubr.msk.bf16.mxu1 %vm580_vm3, %v2053_v45  ;;  %v6348_v50 = vpop.f32.mrb[44].mxu0 }
 0x503   : > { %6352 = vmatprep.subr.bf16.mxu1 %v7075_v60  ;;  %v2256_v52 = vpop.f32.mrb[45].mxu0 }
 0x504   : > { %v6349_v53 = vpop.f32.mrb[46].mxu0 }
 0x505   : > { %v2274_v61 = vpack.c.bf16 %v6349_v53, %v6348_v50  ;;  %v2259_v62 = vpop.f32.mrb[47].mxu0  ;;  %v3147_v50 = vld [vmem:[%s8298_s10 + $0x18] sm:$0xff] }
 0x506   : > { %6353 = vmatpush3.bf16.msra.mxu1 %v7075_v60  ;;  %v2273_v0 = vpack.c.bf16 %v2259_v62, %v2256_v52  ;;  %v3062_v52 = vld [vmem:[%s8297_s9] sm:$0x1] }
 0x507   : > { %6354 = vmatprep.subr.bf16.mxu1 %v7076_v51 }
 0x509   : > { %6331 = vmatmul.mubr.msk.bf16.gmra.mrb[16].mxu1 %vm580_vm3, %v2054_v43 }
 0x50a   : > { %6355 = vmatpush3.bf16.msra.mxu1 %v7076_v51  ;;  %6356 = vmatprep.mubr.msk.bf16.mxu1 %vm580_vm3, %v2271_v59  ;;  %v6374_v58 = vpop.f32.mrb[48].mxu0  ;;  %v3146_v59 = vld [vmem:[%s8298_s10 + $0x10] sm:$0xff] }
 0x50b   : > { %6380 = vmatprep.subr.bf16.mxu1 %v7077_v54  ;;  %v2460_v63 = vpop.f32.mrb[49].mxu0  ;;  %v7851_v51 = vpack.c.bf16 %v3147_v50, %v3146_v59 }
 0x50c   : > { %v6375_v1 = vpop.f32.mrb[50].mxu0 }
 0x50d   : > { %v2492_v2 = vpack.c.bf16 %v6375_v1, %v6374_v58  ;;  %v2463_v5 = vpop.f32.mrb[51].mxu0 }
 0x50e   : > { %v2491_v7 = vpack.c.bf16 %v2463_v5, %v2460_v63 }
 0x511   : > { %6357 = vmatmul.mubr.msk.bf16.vlgmr.msra.gmra.mrb[12].mxu1 %vm580_vm3, %v2272_v56  ;;  %v3144_v56 = vld [vmem:[%s8298_s10] sm:$0xff] }
 0x512   : > { %6381 = vmatpush3.bf16.msra.mxu1 %v7077_v54  ;;  %6360 = vmatprep.mubr.msk.bf16.mxu1 %vm580_vm3, %v2273_v0  ;;  %v6378_v12 = vpop.f32.mrb[52].mxu0  ;;  %v7845_v60 = vpack.c.bf16 %v3145_v57, %v3144_v56 }
 0x513   : > { %6382 = vmatprep.subr.bf16.mxu1 %v7078_v10  ;;  %v2476_v14 = vpop.f32.mrb[53].mxu0 }
 0x514   : > { %v6379_v15 = vpop.f32.mrb[54].mxu0  ;;  %6820 = vmatpush3.bf16.msra.mxu0 %v7845_v60 }
 0x515   : > { %v2494_v16 = vpack.c.bf16 %v6379_v15, %v6378_v12  ;;  %v2479_v17 = vpop.f32.mrb[55].mxu0  ;;  %6821 = vmatprep.subr.bf16.mxu0 %v7235_v3 }
 0x516   : > { %6383 = vmatpush3.bf16.msra.mxu1 %v7078_v10  ;;  %v2493_v18 = vpack.c.bf16 %v2479_v17, %v2476_v14 }
 0x517   : > { %6384 = vmatprep.subr.bf16.mxu1 %v7079_v13 }
 0x518   : > { %6823 = vmatpush3.bf16.msra.mxu0 %v7851_v51 }
 0x519   : > { %6361 = vmatmul.mubr.msk.bf16.gmra.mrb[16].mxu1 %vm580_vm3, %v2274_v61  ;;  %6832 = vmatprep.subr.bf16.mxu0 %v7235_v3  ;;  %v5392_v61 = vld [vmem:[%s8295_s7] ss:$0 sm:$0xff] }
 0x51a   : > { %6385 = vmatpush3.bf16.msra.mxu1 %v7079_v13  ;;  %6386 = vmatprep.mubr.msk.bf16.mxu1 %vm580_vm3, %v2491_v7  ;;  %v6404_v20 = vpop.f32.mrb[56].mxu0 }
 0x51b   : > { %6410 = vmatprep.subr.bf16.mxu1 %v7080_v19  ;;  %v2680_v21 = vpop.f32.mrb[57].mxu0 }
 0x51c   : > { %v6405_v23 = vpop.f32.mrb[58].mxu0 }
 0x51d   : > { %v2712_v24 = vpack.c.bf16 %v6405_v23, %v6404_v20  ;;  %v2683_v22 = vpop.f32.mrb[59].mxu0 }
 0x51e   : > { %v2711_v25 = vpack.c.bf16 %v2683_v22, %v2680_v21 }
 0x521   : > { %6387 = vmatmul.mubr.msk.bf16.vlgmr.msra.gmra.mrb[12].mxu1 %vm580_vm3, %v2492_v2 }
 0x522   : > { %6411 = vmatpush3.bf16.msra.mxu1 %v7080_v19  ;;  %6390 = vmatprep.mubr.msk.bf16.mxu1 %vm580_vm3, %v2493_v18  ;;  %v6408_v27 = vpop.f32.mrb[60].mxu0 }
 0x523   : > { %6412 = vmatprep.subr.bf16.mxu1 %v7081_v26  ;;  %v2696_v29 = vpop.f32.mrb[61].mxu0 }
 0x524   : > { %v6409_v30 = vpop.f32.mrb[62].mxu0 }
 0x525   : > { %v2714_v31 = vpack.c.bf16 %v6409_v30, %v6408_v27  ;;  %v2699_v32 = vpop.f32.mrb[63].mxu0 }
 0x526   : > { %6413 = vmatpush3.bf16.msra.mxu1 %v7081_v26  ;;  %v2713_v4 = vpack.c.bf16 %v2699_v32, %v2696_v29 }
 0x527   : > { %6414 = vmatprep.subr.bf16.mxu1 %v7082_v28 }
 0x529   : > { %6391 = vmatmul.mubr.msk.bf16.gmra.mrb[16].mxu1 %vm580_vm3, %v2494_v16 }
 0x52a   : > { %6415 = vmatpush3.bf16.msra.mxu1 %v7082_v28  ;;  %6416 = vmatprep.mubr.msk.bf16.mxu1 %vm580_vm3, %v2711_v25  ;;  %v6434_v9 = vpop.f32.mrb[64].mxu0 }
 0x52b   : > { %6440 = vmatprep.subr.bf16.mxu1 %v7084_v33  ;;  %v2900_v11 = vpop.f32.mrb[65].mxu0 }
 0x52c   : > { %v6435_v34 = vpop.f32.mrb[66].mxu0 }
 0x52d   : > { %v2932_v35 = vpack.c.bf16 %v6435_v34, %v6434_v9  ;;  %v2903_v36 = vpop.f32.mrb[67].mxu0 }
 0x52e   : > { %v2931_v37 = vpack.c.bf16 %v2903_v36, %v2900_v11 }
 0x531   : > { %6417 = vmatmul.mubr.msk.bf16.vlgmr.msra.gmra.mrb[12].mxu1 %vm580_vm3, %v2712_v24 }
 0x532   : > { %6441 = vmatpush3.bf16.msra.mxu1 %v7084_v33  ;;  %6420 = vmatprep.mubr.msk.bf16.mxu1 %vm580_vm3, %v2713_v4  ;;  %v6438_v39 = vpop.f32.mrb[68].mxu0 }
 0x533   : > { %6442 = vmatprep.subr.bf16.mxu1 %v7086_v38  ;;  %v2916_v41 = vpop.f32.mrb[69].mxu0 }
 0x534   : > { %v6439_v42 = vpop.f32.mrb[70].mxu0 }
 0x535   : > { %v2934_v43 = vpack.c.bf16 %v6439_v42, %v6438_v39  ;;  %v2919_v44 = vpop.f32.mrb[71].mxu0 }
 0x536   : > { %6443 = vmatpush3.bf16.msra.mxu1 %v7086_v38  ;;  %v2933_v45 = vpack.c.bf16 %v2919_v44, %v2916_v41 }
 0x537   : > { %6444 = vmatprep.subr.bf16.mxu1 %v7088_v40 }
 0x539   : > { %6421 = vmatmul.mubr.msk.bf16.gmra.mrb[16].mxu1 %vm580_vm3, %v2714_v31 }
 0x53a   : > { %6445 = vmatpush3.bf16.msra.mxu1 %v7088_v40  ;;  %6446 = vmatprep.mubr.msk.bf16.mxu1 %vm580_vm3, %v2931_v37  ;;  %v3124_v47 = vpop.f32.mrb[72].mxu0 }
 0x53b   : > { %6824 = vmatprep.subr.bf16.mxu1 %v7235_v3  ;;  %v6464_v48 = vpop.f32.mrb[73].mxu0  ;;  %v3125_v53 = vadd.f32 %v3124_v47, %v3062_v52 }
 0x53c   : > { %v3127_v49 = vpop.f32.mrb[74].mxu0 }
 0x53d   : > { %v6465_v55 = vpop.f32.mrb[75].mxu0  ;;  %v3133_v62 = vrot.slane %v3125_v53, %v7425_v46 }
 0x541   : > { %6447 = vmatmul.mubr.msk.bf16.vlgmr.msra.gmra.mrb[12].mxu1 %vm580_vm3, %v2932_v35 }
 0x542   : > { %6450 = vmatprep.mubr.msk.bf16.mxu1 %vm580_vm3, %v2933_v45 }
 0x543   : > { %6827 = vmatpush3.bf16.xpose.msk.msra.mxu1 %vm7359_vm2, %v7845_v60 }
 0x544   : > { %6828 = vmatprep.subr.bf16.mxu1 %v7235_v3 }
 0x549   : > { %6451 = vmatmul.mubr.msk.bf16.gmra.mrb[16].mxu1 %vm580_vm3, %v2934_v43 }
 0x54a   : > { %6485 = vmatprep.mubr.msk.f32.mxu1 %vm7236_vm0, %v7237_v6 }
 0x54b   : > { %6831 = vmatpush3.bf16.xpose.msk.msra.mxu1 %vm7359_vm2, %v7851_v51 }
 0x54c   : > { %6838 = vmatprep.subr.bf16.mxu1 %v7235_v3 }
 0x614   : > { %v6448_v0 = vpop.f32.mrb[12].mxu1 }
 0x615   : > { %v6852_v54 = vadd.f32 %v6448_v0, %v5392_v61  ;;  %v3006_v58 = vpop.f32.mrb[13].mxu1 }
 0x616   : > { %v6853_v63 = vadd.f32 %v5392_v61, %v3006_v58  ;;  %v6449_v1 = vpop.f32.mrb[14].mxu1 }
 0x617   : > { %v3136_v2 = vadd.f32 %v6852_v54, %v3133_v62  ;;  %v6854_v5 = vadd.f32 %v6449_v1, %v5392_v61  ;;  %v3009_v7 = vpop.f32.mrb[15].mxu1 }
 0x618   : > { %v3134_v10 = vadd.f32 %v6853_v63, %v3133_v62  ;;  %v6855_v12 = vadd.f32 %v5392_v61, %v3009_v7 }
 0x619   : > { %v3137_v13 = vadd.f32 %v6854_v5, %v3133_v62  ;;  %v3152_v21 = vsel %vm3148_vm5, %v3136_v2, 0.0 }
 0x61a   : > { %v3135_v14 = vadd.f32 %v6855_v12, %v3133_v62  ;;  %v3149_v15 = vsel %vm3148_vm5, %v3134_v10, 0.0 }
 0x61b   : > { %v3154_v28 = vsel %vm3148_vm5, %v3137_v13, 0.0 }
 0x61c   : > { %v3150_v16 = vsel %vm3148_vm5, %v3135_v14, 0.0  ;;  %v6452_v17 = vpop.f32.mrb[16].mxu1 }
 0x61d   : > { %v3151_v18 = vadd.f32 %v3150_v16, %v3149_v15  ;;  %v6856_v19 = vadd.f32 %v6452_v17, %v5392_v61  ;;  %v3022_v20 = vpop.f32.mrb[17].mxu1 }
 0x61e   : > { %v6857_v23 = vadd.f32 %v5392_v61, %v3022_v20  ;;  %v6453_v24 = vpop.f32.mrb[18].mxu1 }
 0x61f   : > { %v3153_v22 = vadd.f32 %v3152_v21, %v3151_v18  ;;  %v3140_v25 = vadd.f32 %v6856_v19, %v3133_v62  ;;  %v6858_v26 = vadd.f32 %v6453_v24, %v5392_v61  ;;  %v3025_v27 = vpop.f32.mrb[19].mxu1 }
 0x620   : > { %v3138_v29 = vadd.f32 %v6857_v23, %v3133_v62  ;;  %v6859_v30 = vadd.f32 %v5392_v61, %v3025_v27 }
 0x621   : > { %v3155_v31 = vadd.f32 %v3154_v28, %v3153_v22  ;;  %v3141_v32 = vadd.f32 %v6858_v26, %v3133_v62  ;;  %v3160_v35 = vsel %vm3148_vm5, %v3140_v25, 0.0  ;;  %v7183_v28 = vld [vmem:[%s8290_s2] sm:$0xff]  }
 0x622   : > { %v3156_v4 = vsel %vm3148_vm5, %v3138_v29, 0.0  ;;  %v3139_v33 = vadd.f32 %v6859_v30, %v3133_v62 }
 0x623   : > { %v3157_v9 = vadd.f32 %v3156_v4, %v3155_v31  ;;  %v3162_v37 = vsel %vm3148_vm5, %v3141_v32, 0.0 }
 0x624   : > { %v3158_v11 = vsel %vm3148_vm5, %v3139_v33, 0.0 }
 0x625   : > { %v3159_v34 = vadd.f32 %v3158_v11, %v3157_v9 }
 0x627   : > { %v3161_v36 = vadd.f32 %v3160_v35, %v3159_v34  ;;  %v5658_v34 = vld [vmem:[%s8299_s11] ss:$0 sm:$0xff] }
 0x629   : > { %v3163_v38 = vadd.f32 %v3162_v37, %v3161_v36 }
 0x62b   : > { %v3164_v39 = vrot.slane %v3163_v38, 4 }
 0x62d   : > { %v3165_v40 = vadd.f32 %v3164_v39, %v3163_v38  ;;  %v5659_v39 = vld [vmem:[%s8300_s12] ss:$0 sm:$0xff] }
 0x62f   : > { %v3166_v41 = vrot.slane %v3165_v40, 2 }
 0x631   : > { %v3167_v42 = vadd.f32 %v3166_v41, %v3165_v40 }
 0x633   : > { %v3168_v43 = vrot.slane %v3167_v42, 1 }
 0x635   : > { %v3169_v44 = vadd.f32 %v3168_v43, %v3167_v42 }
 0x637   : > { %6475 = vmatmul.mubr.msk.f32.vlgmr.msra.gmra.mrb[6].mxu0 %vm3148_vm5, %v3169_v44 }
 0x638   : > { %6834 = vmatpush3.bf16.msra.mxu0 %v7845_v60  ;;  %6496 = vmatprep.mubr.msk.f32.mxu0 %vm7236_vm0, %v7237_v6 }
 0x639   : > { %6835 = vmatprep.subr.bf16.mxu0 %v7235_v3 }
 0x63c   : > { %6837 = vmatpush3.bf16.msra.mxu0 %v7851_v51 }
 0x70a   : > { %v3239_v45 = vpop.f32.mrb[6].mxu0 }
 0x70b   : > { %v3243_v47 = vmul.f32 0.00390625, %v3239_v45  ;;  %v6476_v48 = vpop.f32.mrb[7].mxu0 }
 0x70d   : > { %6486 = vmatmul.mubr.msk.f32.vlgmr.msra.gmra.mrb[2].mxu1 %vm676_vm1, %v3243_v47 }
 0x70e   : > { %6841 = vmatpush3.bf16.xpose.msk.msra.mxu1 %vm7359_vm2, %v7845_v60  ;;  %6507 = vmatprep.mubr.msk.f32.mxu1 %vm7236_vm0, %v7237_v6 }
 0x70f   : > { %6842 = vmatprep.subr.bf16.mxu1 %v7235_v3 }
 0x716   : > { %6845 = vmatpush3.bf16.xpose.msk.msra.mxu1 %vm7359_vm2, %v7851_v51 }
 0x7e0   : > { %v3325_v49 = vpop.f32.mrb[2].mxu1 }
 0x7e1   : > { %v3332_v55 = vrot.slane %v3325_v49, %v7425_v46  ;;  %v6487_v56 = vpop.f32.mrb[3].mxu1 }
 0x7e3   : > { %v3333_v57 = vsub.f32 %v3134_v10, %v3332_v55  ;;  %v3334_v59 = vsub.f32 %v3135_v14, %v3332_v55  ;;  %v3335_v50 = vsub.f32 %v3136_v2, %v3332_v55  ;;  %v3336_v52 = vsub.f32 %v3137_v13, %v3332_v55 }
 0x7e4   : > { %v3337_v53 = vsub.f32 %v3138_v29, %v3332_v55  ;;  %v3338_v0 = vsub.f32 %v3139_v33, %v3332_v55  ;;  %v3339_v51 = vsub.f32 %v3140_v25, %v3332_v55  ;;  %v3340_v5 = vsub.f32 %v3141_v32, %v3332_v55 }
 0x7e5   : > { %v3341_v61 = vmul.f32 %v3333_v57, %v3333_v57  ;;  %v3342_v60 = vmul.f32 %v3334_v59, %v3334_v59  ;;  %v3343_v62 = vmul.f32 %v3335_v50, %v3335_v50  ;;  %v3344_v6 = vmul.f32 %v3336_v52, %v3336_v52 }
 0x7e6   : > { %v3345_v58 = vmul.f32 %v3337_v53, %v3337_v53  ;;  %v3346_v7 = vmul.f32 %v3338_v0, %v3338_v0  ;;  %v3347_v12 = vmul.f32 %v3339_v51, %v3339_v51  ;;  %v3348_v15 = vmul.f32 %v3340_v5, %v3340_v5 }
 0x7e7   : > { %v3349_v3 = vsel %vm3148_vm5, %v3341_v61, 0.0  ;;  %v3350_v54 = vsel %vm3148_vm5, %v3342_v60, 0.0  ;;  %v3352_v63 = vsel %vm3148_vm5, %v3343_v62, 0.0  ;;  %v3354_v2 = vsel %vm3148_vm5, %v3344_v6, 0.0 }
 0x7e8   : > { %v3351_v8 = vadd.f32 %v3350_v54, %v3349_v3  ;;  %v3356_v13 = vsel %vm3148_vm5, %v3345_v58, 0.0  ;;  %v3358_v16 = vsel %vm3148_vm5, %v3346_v7, 0.0  ;;  %v3360_v18 = vsel %vm3148_vm5, %v3347_v12, 0.0 }
 0x7e9   : > { %v3362_v20 = vsel %vm3148_vm5, %v3348_v15, 0.0 }
 0x7ea   : > { %v3353_v1 = vadd.f32 %v3352_v63, %v3351_v8 }
 0x7ec   : > { %v3355_v10 = vadd.f32 %v3354_v2, %v3353_v1 }
 0x7ee   : > { %v3357_v14 = vadd.f32 %v3356_v13, %v3355_v10 }
 0x7f0   : > { %v3359_v17 = vadd.f32 %v3358_v16, %v3357_v14 }
 0x7f2   : > { %v3361_v19 = vadd.f32 %v3360_v18, %v3359_v17 }
 0x7f4   : > { %v3363_v21 = vadd.f32 %v3362_v20, %v3361_v19 }
 0x7f6   : > { %v3364_v23 = vrot.slane %v3363_v21, 4 }
 0x7f8   : > { %v3365_v24 = vadd.f32 %v3364_v23, %v3363_v21 }
 0x7fa   : > { %v3366_v22 = vrot.slane %v3365_v24, 2 }
 0x7fc   : > { %v3367_v25 = vadd.f32 %v3366_v22, %v3365_v24 }
 0x7fe   : > { %v3368_v26 = vrot.slane %v3367_v25, 1 }
 0x800   : > { %v3369_v27 = vadd.f32 %v3368_v26, %v3367_v25 }
 0x802   : > { %6497 = vmatmul.mubr.msk.f32.vlgmr.msra.gmra.mrb[76].mxu0 %vm3148_vm5, %v3369_v27 }
 0x803   : > { %6518 = vmatprep.mubr.msk.bf16.mxu0 %vm1094_vm4, %v7183_v28 }
 0x8d5   : > { %v3439_v29 = vpop.f32.mrb[76].mxu0 }
 0x8d6   : > { %v3443_v30 = vmul.f32 0.00390625, %v3439_v29  ;;  %v6498_v31 = vpop.f32.mrb[77].mxu0 }
 0x8d8   : > { %v3444_v32 = vadd.f32 1e-06, %v3443_v30 }
 0x8da   : > { %7149 = vrsqrt.f32 %v3444_v32 }
 0x8e4   : > { %v7150_v4 = vpop.eup %7149 }
 0x8e5   : > { %6508 = vmatmul.mubr.msk.f32.vlgmr.msra.gmra.mrb[20].mxu1 %vm676_vm1, %v7150_v4 }
 0x9b8   : > { %v3515_v33 = vpop.f32.mrb[20].mxu1 }
 0x9b9   : > { %v3522_v9 = vrot.slane %v3515_v33, %v7425_v46  ;;  %v6509_v11 = vpop.f32.mrb[21].mxu1 }
 0x9bb   : > { %v3523_v35 = vmul.f32 %v3522_v9, %v3333_v57  ;;  %v3524_v36 = vmul.f32 %v3522_v9, %v3334_v59  ;;  %v3525_v37 = vmul.f32 %v3522_v9, %v3335_v50  ;;  %v3526_v38 = vmul.f32 %v3522_v9, %v3336_v52 }
 0x9bc   : > { %v3527_v40 = vmul.f32 %v3522_v9, %v3337_v53  ;;  %v3528_v41 = vmul.f32 %v3522_v9, %v3338_v0  ;;  %v3529_v42 = vmul.f32 %v3522_v9, %v3339_v51  ;;  %v3530_v43 = vmul.f32 %v3522_v9, %v3340_v5 }
 0x9bd   : > { %v3537_v44 = vmul.f32 %v5658_v34, %v3523_v35  ;;  %v3538_v45 = vmul.f32 %v5658_v34, %v3524_v36  ;;  %v3539_v46 = vmul.f32 %v5658_v34, %v3525_v37  ;;  %v3540_v47 = vmul.f32 %v5658_v34, %v3526_v38 }
 0x9be   : > { %v3541_v48 = vmul.f32 %v5658_v34, %v3527_v40  ;;  %v3542_v49 = vmul.f32 %v5658_v34, %v3528_v41  ;;  %v3543_v55 = vmul.f32 %v5658_v34, %v3529_v42  ;;  %v3544_v56 = vmul.f32 %v5658_v34, %v3530_v43  ;;  %v7184_v40 = vld [vmem:[%s8290_s2 + $0x8] sm:$0xff]   ;;  %v7185_v41 = vld [vmem:[%s8290_s2 + $0x10] sm:$0xff]   ;;  %v7186_v42 = vld [vmem:[%s8290_s2 + $0x18] sm:$0xff]  }
 0x9bf   : > { %v3551_v57 = vadd.f32 %v5659_v39, %v3537_v44  ;;  %v3552_v59 = vadd.f32 %v5659_v39, %v3538_v45  ;;  %v3553_v50 = vadd.f32 %v5659_v39, %v3539_v46  ;;  %v3554_v52 = vadd.f32 %v5659_v39, %v3540_v47  ;;  %v7090_v43 = vld [vmem:[%s8301_s13] sm:$0xff]   ;;  %v7188_v45 = vld [vmem:[%s8290_s2 + $0x28] sm:$0xff]   ;;  %v7189_v46 = vld [vmem:[%s8290_s2 + $0x30] sm:$0xff]  }
 0x9c0   : > { %v3555_v61 = vadd.f32 %v5659_v39, %v3541_v48  ;;  %v3556_v60 = vadd.f32 %v5659_v39, %v3542_v49  ;;  %v3557_v62 = vadd.f32 %v5659_v39, %v3543_v55  ;;  %v3558_v3 = vadd.f32 %v5659_v39, %v3544_v56  ;;  %v7187_v44 = vld [vmem:[%s8290_s2 + $0x20] sm:$0xff]   ;;  %6526 = vmatprep.subr.bf16.mxu1 %v7090_v43  ;;  %v7190_v47 = vld [vmem:[%s8290_s2 + $0x38] sm:$0xff]   ;;  %v7192_v49 = vld [vmem:[%s8290_s2 + $0x48] sm:$0xff]  }
 0x9c1   : > { %v5660_v6 = vmul.f32 -1.442695, %v3551_v57  ;;  %v5661_v53 = vmul.f32 -1.442695, %v3552_v59  ;;  %v5662_v0 = vmul.f32 -1.442695, %v3553_v50  ;;  %6527 = vmatpush3.bf16.msra.mxu1 %v7090_v43 }
 0x9c2   : > { %v5663_v54 = vmul.f32 -1.442695, %v3554_v52  ;;  %v5664_v8 = vmul.f32 -1.442695, %v3555_v61  ;;  %v5665_v51 = vmul.f32 -1.442695, %v3556_v60 }
 0x9c3   : > { %7151 = vpow2.f32 %v5660_v6  ;;  %v5666_v58 = vmul.f32 -1.442695, %v3557_v62  ;;  %v5667_v63 = vmul.f32 -1.442695, %v3558_v3  ;;  %v7191_v48 = vld [vmem:[%s8290_s2 + $0x40] sm:$0xff]   ;;  %v7193_v55 = vld [vmem:[%s8290_s2 + $0x50] sm:$0xff]  }
 0x9c4   : > { %7153 = vpow2.f32 %v5661_v53  ;;  %v7194_v56 = vld [vmem:[%s8290_s2 + $0x58] sm:$0xff]   ;;  %v7203_v53 = vld [vmem:[%s8290_s2 + $0xa0] sm:$0xff]   ;;  %v7095_v43 = vld [vmem:[%s8301_s13 + $0x28] sm:$0xff]  }
 0x9c5   : > { %7155 = vpow2.f32 %v5662_v0  ;;  %v7202_v6 = vld [vmem:[%s8290_s2 + $0x98] sm:$0xff]   ;;  %v7204_v0 = vld [vmem:[%s8290_s2 + $0xa8] sm:$0xff]  }
 0x9c6   : > { %7157 = vpow2.f32 %v5663_v54  ;;  %v7091_v54 = vld [vmem:[%s8301_s13 + $0x8] sm:$0xff]  }
 0x9c7   : > { %7159 = vpow2.f32 %v5664_v8  ;;  %v7206_v8 = vld [vmem:[%s8290_s2 + $0xb8] sm:$0xff]   ;;  %6528 = vmatprep.subr.bf16.mxu1 %v7091_v54 }
 0x9c8   : > { %7161 = vpow2.f32 %v5665_v51  ;;  %v7207_v51 = vld [vmem:[%s8290_s2 + $0xc0] sm:$0xff]   ;;  %6529 = vmatpush3.bf16.msra.mxu1 %v7091_v54 }
 0x9c9   : > { %7163 = vpow2.f32 %v5666_v58  ;;  %v7092_v58 = vld [vmem:[%s8301_s13 + $0x10] sm:$0xff]  }
 0x9ca   : > { %7165 = vpow2.f32 %v5667_v63  ;;  %6554 = vmatprep.subr.bf16.mxu1 %v7092_v58  ;;  %v7208_v63 = vld [vmem:[%s8290_s2 + $0xc8] sm:$0xff]  }
 0x9cd   : > { %v7152_v1 = vpop.eup %7151 }
 0x9ce   : > { %v7154_v5 = vpop.eup %7153  ;;  %v3583_v7 = vadd.f32 1.0, %v7152_v1  ;;  %v7209_v1 = vld [vmem:[%s8290_s2 + $0xd0] sm:$0xff]  }
 0x9cf   : > { %v7156_v2 = vpop.eup %7155  ;;  %v3584_v10 = vadd.f32 1.0, %v7154_v5  ;;  %v7210_v5 = vld [vmem:[%s8290_s2 + $0xd8] sm:$0xff]  }
 0x9d0   : > { %v7158_v12 = vpop.eup %7157  ;;  %v3585_v13 = vadd.f32 1.0, %v7156_v2  ;;  %7167 = vrcp.f32 %v3583_v7  ;;  %v7211_v7 = vld [vmem:[%s8290_s2 + $0xe0] sm:$0xff]   ;;  %v7212_v2 = vld [vmem:[%s8290_s2 + $0xe8] sm:$0xff]  }
 0x9d1   : > { %v7160_v14 = vpop.eup %7159  ;;  %v3586_v15 = vadd.f32 1.0, %v7158_v12  ;;  %7169 = vrcp.f32 %v3584_v10  ;;  %v7213_v10 = vld [vmem:[%s8290_s2 + $0xf0] sm:$0xff]   ;;  %v7214_v12 = vld [vmem:[%s8290_s2 + $0xf8] sm:$0xff]  }
 0x9d2   : > { %v7162_v16 = vpop.eup %7161  ;;  %v3587_v17 = vadd.f32 1.0, %v7160_v14  ;;  %7171 = vrcp.f32 %v3585_v13  ;;  %v7215_v13 = vld [vmem:[%s8290_s2 + $0x100] sm:$0xff]   ;;  %v7216_v14 = vld [vmem:[%s8290_s2 + $0x108] sm:$0xff]  }
 0x9d3   : > { %v7164_v18 = vpop.eup %7163  ;;  %v3588_v19 = vadd.f32 1.0, %v7162_v16  ;;  %7173 = vrcp.f32 %v3586_v15  ;;  %v7217_v15 = vld [vmem:[%s8290_s2 + $0x110] sm:$0xff]   ;;  %v7218_v16 = vld [vmem:[%s8290_s2 + $0x118] sm:$0xff]  }
 0x9d4   : > { %v7166_v20 = vpop.eup %7165  ;;  %v3589_v21 = vadd.f32 1.0, %v7164_v18  ;;  %7175 = vrcp.f32 %v3587_v17  ;;  %v8149_v17 = vld [vmem:[%s8303_s15] sm:$0xff]  }
 0x9d5   : > { %v3590_v23 = vadd.f32 1.0, %v7166_v20  ;;  %7177 = vrcp.f32 %v3588_v19  ;;  %v8156_v20 = vld [vmem:[%s8303_s15 + $0x8] sm:$0xff]  }
 0x9d6   : > { %7179 = vrcp.f32 %v3589_v21 }
 0x9d7   : > { %7181 = vrcp.f32 %v3590_v23 }
 0x9da   : > { %v7168_v24 = vpop.eup %7167 }
 0x9db   : > { %v7170_v22 = vpop.eup %7169  ;;  %v3607_v25 = vmul.f32 %v7168_v24, %v3551_v57  ;;  %v7195_v57 = vld [vmem:[%s8290_s2 + $0x60] sm:$0xff]  }
 0x9dc   : > { %v7172_v26 = vpop.eup %7171  ;;  %v3608_v27 = vmul.f32 %v7170_v22, %v3552_v59  ;;  %v7196_v59 = vld [vmem:[%s8290_s2 + $0x68] sm:$0xff]  }
 0x9dd   : > { %v7174_v28 = vpop.eup %7173  ;;  %v3609_v29 = vmul.f32 %v7172_v26, %v3553_v50  ;;  %v7197_v50 = vld [vmem:[%s8290_s2 + $0x70] sm:$0xff]   ;;  %v7093_v26 = vld [vmem:[%s8301_s13 + $0x18] sm:$0xff]  }
 0x9de   : > { %v7176_v30 = vpop.eup %7175  ;;  %v3610_v31 = vmul.f32 %v7174_v28, %v3554_v52  ;;  %v7917_v32 = vpack.c.bf16 %v3608_v27, %v3607_v25  ;;  %v7198_v52 = vld [vmem:[%s8290_s2 + $0x78] sm:$0xff]   ;;  %v8163_v25 = vld [vmem:[%s8303_s15 + $0x10] sm:$0xff]   ;;  %v7219_v28 = vld [vmem:[%s7384_s29] sm:$0xff] }
 0x9df   : > { %v7178_v4 = vpop.eup %7177  ;;  %v3611_v9 = vmul.f32 %v7176_v30, %v3555_v61  ;;  %v7199_v61 = vld [vmem:[%s8290_s2 + $0x80] sm:$0xff]  }
 0x9e0   : > { %v7180_v33 = vpop.eup %7179  ;;  %v3612_v11 = vmul.f32 %v7178_v4, %v3556_v60  ;;  %v7919_v34 = vpack.c.bf16 %v3610_v31, %v3609_v29  ;;  %6510 = vmatprep.subr.bf16.mxu0 %v7917_v32  ;;  %v7200_v60 = vld [vmem:[%s8290_s2 + $0x88] sm:$0xff]   ;;  %v7221_v4 = vld [vmem:[%s7384_s29 + $0x10] sm:$0xff] }
 0x9e1   : > { %v7182_v35 = vpop.eup %7181  ;;  %6511 = vmatpush3.bf16.msra.mxu0 %v7917_v32  ;;  %v3613_v36 = vmul.f32 %v7180_v33, %v3557_v62  ;;  %v7201_v62 = vld [vmem:[%s8290_s2 + $0x90] sm:$0xff]   ;;  %v7220_v29 = vld [vmem:[%s7384_s29 + $0x8] sm:$0xff]  ;;  %v7222_v33 = vld [vmem:[%s7384_s29 + $0x18] sm:$0xff] }
 0x9e2   : > { %6512 = vmatprep.subr.bf16.mxu0 %v7919_v34  ;;  %v3614_v37 = vmul.f32 %v7182_v35, %v3558_v3  ;;  %v7924_v38 = vpack.c.bf16 %v3612_v11, %v3611_v9  ;;  %v7205_v3 = vld [vmem:[%s8290_s2 + $0xb0] sm:$0xff]   ;;  %v5171_v30 = vpack.c.bf16 %v7220_v29, %v7219_v28  ;;  %v5172_v9 = vpack.c.bf16 %v7222_v33, %v7221_v4 }
 0x9e4   : > { %v7928_v39 = vpack.c.bf16 %v3614_v37, %v3613_v36 }
 0x9e5   : > { %6513 = vmatpush3.bf16.msra.mxu0 %v7919_v34 }
 0x9e6   : > { %6514 = vmatprep.subr.bf16.mxu0 %v7924_v38 }
 0x9e9   : > { %6515 = vmatpush3.bf16.msra.mxu0 %v7924_v38 }
 0x9ea   : > { %6516 = vmatprep.subr.bf16.mxu0 %v7928_v39 }
 0x9ed   : > { %6517 = vmatpush3.bf16.msra.mxu0 %v7928_v39 }
 0x9ee   : > { %6538 = vmatprep.subr.bf16.mxu0 %v7917_v32 }
 0x9f0   : > { %6519 = vmatmul.mubr.msk.bf16.vlgmr.msra.gmra.mrb[80].mxu0 %vm1094_vm4, %v7184_v40 }
 0x9f1   : > { %6539 = vmatpush3.bf16.msra.mxu0 %v7917_v32  ;;  %6522 = vmatprep.mubr.msk.bf16.mxu0 %vm1094_vm4, %v7185_v41 }
 0x9f2   : > { %6540 = vmatprep.subr.bf16.mxu0 %v7919_v34 }
 0x9f5   : > { %6541 = vmatpush3.bf16.msra.mxu0 %v7919_v34 }
 0x9f6   : > { %6542 = vmatprep.subr.bf16.mxu0 %v7924_v38 }
 0x9f8   : > { %6523 = vmatmul.mubr.msk.bf16.gmra.mrb[84].mxu0 %vm1094_vm4, %v7186_v42 }
 0x9f9   : > { %6543 = vmatpush3.bf16.msra.mxu0 %v7924_v38  ;;  %6546 = vmatprep.mubr.msk.bf16.mxu0 %vm1094_vm4, %v7187_v44 }
 0x9fa   : > { %6544 = vmatprep.subr.bf16.mxu0 %v7928_v39 }
 0x9fd   : > { %6545 = vmatpush3.bf16.msra.mxu0 %v7928_v39 }
 0x9fe   : > { %6566 = vmatprep.subr.bf16.mxu0 %v7917_v32 }
 0xa00   : > { %6547 = vmatmul.mubr.msk.bf16.vlgmr.msra.gmra.mrb[88].mxu0 %vm1094_vm4, %v7188_v45 }
 0xa01   : > { %6567 = vmatpush3.bf16.msra.mxu0 %v7917_v32  ;;  %6550 = vmatprep.mubr.msk.bf16.mxu0 %vm1094_vm4, %v7189_v46  ;;  %v7096_v46 = vld [vmem:[%s8301_s13 + $0x30] sm:$0xff]  }
 0xa02   : > { %6568 = vmatprep.subr.bf16.mxu0 %v7919_v34 }
 0xa05   : > { %6569 = vmatpush3.bf16.msra.mxu0 %v7919_v34 }
 0xa06   : > { %6570 = vmatprep.subr.bf16.mxu0 %v7924_v38 }
 0xa08   : > { %6551 = vmatmul.mubr.msk.bf16.gmra.mrb[92].mxu0 %vm1094_vm4, %v7190_v47 }
 0xa09   : > { %6571 = vmatpush3.bf16.msra.mxu0 %v7924_v38  ;;  %6574 = vmatprep.mubr.msk.bf16.mxu0 %vm1094_vm4, %v7191_v48 }
 0xa0a   : > { %6572 = vmatprep.subr.bf16.mxu0 %v7928_v39 }
 0xa0d   : > { %6573 = vmatpush3.bf16.msra.mxu0 %v7928_v39 }
 0xa0e   : > { %6594 = vmatprep.subr.bf16.mxu0 %v7917_v32 }
 0xa10   : > { %6575 = vmatmul.mubr.msk.bf16.vlgmr.msra.gmra.mrb[96].mxu0 %vm1094_vm4, %v7192_v49 }
 0xa11   : > { %6595 = vmatpush3.bf16.msra.mxu0 %v7917_v32  ;;  %6578 = vmatprep.mubr.msk.bf16.mxu0 %vm1094_vm4, %v7193_v55 }
 0xa12   : > { %6596 = vmatprep.subr.bf16.mxu0 %v7919_v34 }
 0xa15   : > { %6597 = vmatpush3.bf16.msra.mxu0 %v7919_v34 }
 0xa16   : > { %6598 = vmatprep.subr.bf16.mxu0 %v7924_v38 }
 0xa18   : > { %6579 = vmatmul.mubr.msk.bf16.gmra.mrb[100].mxu0 %vm1094_vm4, %v7194_v56 }
 0xa19   : > { %6599 = vmatpush3.bf16.msra.mxu0 %v7924_v38  ;;  %6602 = vmatprep.mubr.msk.bf16.mxu0 %vm1094_vm4, %v7195_v57 }
 0xa1a   : > { %6600 = vmatprep.subr.bf16.mxu0 %v7928_v39 }
 0xa1d   : > { %6601 = vmatpush3.bf16.msra.mxu0 %v7928_v39 }
 0xa1e   : > { %6622 = vmatprep.subr.bf16.mxu0 %v7917_v32 }
 0xa20   : > { %6603 = vmatmul.mubr.msk.bf16.vlgmr.msra.gmra.mrb[104].mxu0 %vm1094_vm4, %v7196_v59 }
 0xa21   : > { %6623 = vmatpush3.bf16.msra.mxu0 %v7917_v32  ;;  %6606 = vmatprep.mubr.msk.bf16.mxu0 %vm1094_vm4, %v7197_v50 }
 0xa22   : > { %6624 = vmatprep.subr.bf16.mxu0 %v7919_v34 }
 0xa25   : > { %6625 = vmatpush3.bf16.msra.mxu0 %v7919_v34 }
 0xa26   : > { %6626 = vmatprep.subr.bf16.mxu0 %v7924_v38 }
 0xa28   : > { %6607 = vmatmul.mubr.msk.bf16.gmra.mrb[108].mxu0 %vm1094_vm4, %v7198_v52 }
 0xa29   : > { %6627 = vmatpush3.bf16.msra.mxu0 %v7924_v38  ;;  %6630 = vmatprep.mubr.msk.bf16.mxu0 %vm1094_vm4, %v7199_v61 }
 0xa2a   : > { %6628 = vmatprep.subr.bf16.mxu0 %v7928_v39 }
 0xa2d   : > { %6629 = vmatpush3.bf16.msra.mxu0 %v7928_v39 }
 0xa2e   : > { %6650 = vmatprep.subr.bf16.mxu0 %v7917_v32 }
 0xa30   : > { %6631 = vmatmul.mubr.msk.bf16.vlgmr.msra.gmra.mrb[112].mxu0 %vm1094_vm4, %v7200_v60  ;;  %v7097_v60 = vld [vmem:[%s8301_s13 + $0x38] sm:$0xff]  }
 0xa31   : > { %6651 = vmatpush3.bf16.msra.mxu0 %v7917_v32  ;;  %6634 = vmatprep.mubr.msk.bf16.mxu0 %vm1094_vm4, %v7201_v62 }
 0xa32   : > { %6652 = vmatprep.subr.bf16.mxu0 %v7919_v34 }
 0xa35   : > { %6653 = vmatpush3.bf16.msra.mxu0 %v7919_v34 }
 0xa36   : > { %6654 = vmatprep.subr.bf16.mxu0 %v7924_v38 }
 0xa38   : > { %6635 = vmatmul.mubr.msk.bf16.gmra.mrb[116].mxu0 %vm1094_vm4, %v7202_v6 }
 0xa39   : > { %6655 = vmatpush3.bf16.msra.mxu0 %v7924_v38  ;;  %6658 = vmatprep.mubr.msk.bf16.mxu0 %vm1094_vm4, %v7203_v53  ;;  %v7098_v53 = vld [vmem:[%s8301_s13 + $0x40] sm:$0xff]  }
 0xa3a   : > { %6656 = vmatprep.subr.bf16.mxu0 %v7928_v39 }
 0xa3d   : > { %6657 = vmatpush3.bf16.msra.mxu0 %v7928_v39 }
 0xa3e   : > { %6678 = vmatprep.subr.bf16.mxu0 %v7917_v32 }
 0xa40   : > { %6659 = vmatmul.mubr.msk.bf16.vlgmr.msra.gmra.mrb[120].mxu0 %vm1094_vm4, %v7204_v0 }
 0xa41   : > { %6679 = vmatpush3.bf16.msra.mxu0 %v7917_v32  ;;  %6662 = vmatprep.mubr.msk.bf16.mxu0 %vm1094_vm4, %v7205_v3 }
 0xa42   : > { %6680 = vmatprep.subr.bf16.mxu0 %v7919_v34 }
 0xa45   : > { %6681 = vmatpush3.bf16.msra.mxu0 %v7919_v34 }
 0xa46   : > { %6682 = vmatprep.subr.bf16.mxu0 %v7924_v38 }
 0xa48   : > { %6663 = vmatmul.mubr.msk.bf16.gmra.mrb[124].mxu0 %vm1094_vm4, %v7206_v8 }
 0xa49   : > { %6683 = vmatpush3.bf16.msra.mxu0 %v7924_v38  ;;  %6686 = vmatprep.mubr.msk.bf16.mxu0 %vm1094_vm4, %v7207_v51 }
 0xa4a   : > { %6684 = vmatprep.subr.bf16.mxu0 %v7928_v39 }
 0xa4d   : > { %6685 = vmatpush3.bf16.msra.mxu0 %v7928_v39 }
 0xa4e   : > { %6706 = vmatprep.subr.bf16.mxu0 %v7917_v32 }
 0xa50   : > { %6687 = vmatmul.mubr.msk.bf16.vlgmr.msra.gmra.mrb[128].mxu0 %vm1094_vm4, %v7208_v63 }
 0xa51   : > { %6707 = vmatpush3.bf16.msra.mxu0 %v7917_v32  ;;  %6690 = vmatprep.mubr.msk.bf16.mxu0 %vm1094_vm4, %v7209_v1 }
 0xa52   : > { %6708 = vmatprep.subr.bf16.mxu0 %v7919_v34 }
 0xa55   : > { %6709 = vmatpush3.bf16.msra.mxu0 %v7919_v34 }
 0xa56   : > { %6710 = vmatprep.subr.bf16.mxu0 %v7924_v38 }
 0xa58   : > { %6691 = vmatmul.mubr.msk.bf16.gmra.mrb[132].mxu0 %vm1094_vm4, %v7210_v5 }
 0xa59   : > { %6711 = vmatpush3.bf16.msra.mxu0 %v7924_v38  ;;  %6714 = vmatprep.mubr.msk.bf16.mxu0 %vm1094_vm4, %v7211_v7 }
 0xa5a   : > { %6712 = vmatprep.subr.bf16.mxu0 %v7928_v39 }
 0xa5d   : > { %6713 = vmatpush3.bf16.msra.mxu0 %v7928_v39 }
 0xa5e   : > { %6734 = vmatprep.subr.bf16.mxu0 %v7917_v32 }
 0xa60   : > { %6715 = vmatmul.mubr.msk.bf16.vlgmr.msra.gmra.mrb[136].mxu0 %vm1094_vm4, %v7212_v2  ;;  %v7099_v2 = vld [vmem:[%s8301_s13 + $0x48] sm:$0xff]  }
 0xa61   : > { %6735 = vmatpush3.bf16.msra.mxu0 %v7917_v32  ;;  %6718 = vmatprep.mubr.msk.bf16.mxu0 %vm1094_vm4, %v7213_v10  ;;  %v7094_v32 = vld [vmem:[%s8301_s13 + $0x20] sm:$0xff]  }
 0xa62   : > { %6736 = vmatprep.subr.bf16.mxu0 %v7919_v34 }
 0xa65   : > { %6737 = vmatpush3.bf16.msra.mxu0 %v7919_v34 }
 0xa66   : > { %6738 = vmatprep.subr.bf16.mxu0 %v7924_v38 }
 0xa68   : > { %6719 = vmatmul.mubr.msk.bf16.gmra.mrb[140].mxu0 %vm1094_vm4, %v7214_v12 }
 0xa69   : > { %6739 = vmatpush3.bf16.msra.mxu0 %v7924_v38  ;;  %6742 = vmatprep.mubr.msk.bf16.mxu0 %vm1094_vm4, %v7215_v13  ;;  %v7100_v13 = vld [vmem:[%s8301_s13 + $0x50] sm:$0xff]  }
 0xa6a   : > { %6740 = vmatprep.subr.bf16.mxu0 %v7928_v39 }
 0xa6d   : > { %6741 = vmatpush3.bf16.msra.mxu0 %v7928_v39 }
 0xa6e   : > { %6762 = vmatprep.subr.bf16.mxu0 %v8149_v17 }
 0xa70   : > { %6743 = vmatmul.mubr.msk.bf16.vlgmr.msra.gmra.mrb[144].mxu0 %vm1094_vm4, %v7216_v14 }
 0xa71   : > { %6746 = vmatprep.mubr.msk.bf16.mxu0 %vm1094_vm4, %v7217_v15  ;;  %6763 = vmatpush3.bf16.msra.mxu0 %v8149_v17 }
 0xa72   : > { %6764 = vmatprep.subr.bf16.mxu0 %v8156_v20 }
 0xa75   : > { %6765 = vmatpush3.bf16.msra.mxu0 %v8156_v20 }
 0xa76   : > { %6766 = vmatprep.subr.bf16.mxu0 %v8163_v25 }
 0xa78   : > { %6747 = vmatmul.mubr.msk.bf16.gmra.mrb[148].mxu0 %vm1094_vm4, %v7218_v16 }
 0xa79   : > { %6767 = vmatpush3.bf16.msra.mxu0 %v8163_v25  ;;  %6768 = vmatprep.mubr.msk.bf16.mxu0 %vm580_vm3, %v5171_v30  ;;  %v7102_v30 = vld [vmem:[%s8301_s13 + $0x60] sm:$0xff]  }
 0xa80   : > { %6769 = vmatmul.mubr.msk.bf16.vlgmr.msra.gmra.mrb[152].mxu0 %vm580_vm3, %v5172_v9 }
 0xac3   : > { %v6520_v18 = vpop.f32.mrb[80].mxu0 }
 0xac4   : > { %v3661_v19 = vpop.f32.mrb[81].mxu0 }
 0xac5   : > { %v6521_v21 = vpop.f32.mrb[82].mxu0 }
 0xac6   : > { %v3693_v23 = vpack.c.bf16 %v6521_v21, %v6520_v18  ;;  %v3664_v24 = vpop.f32.mrb[83].mxu0 }
 0xac7   : > { %v3692_v22 = vpack.c.bf16 %v3664_v24, %v3661_v19 }
 0xac9   : > { %6530 = vmatprep.mubr.msk.bf16.mxu1 %vm3148_vm5, %v3692_v22 }
 0xaca   : > { %6531 = vmatmul.mubr.msk.bf16.vlgmr.msra.gmra.mrb[24].mxu1 %vm3148_vm5, %v3693_v23 }
 0xacb   : > { %v6524_v27 = vpop.f32.mrb[84].mxu0  ;;  %6555 = vmatpush3.bf16.msra.mxu1 %v7092_v58 }
 0xacc   : > { %v3677_v31 = vpop.f32.mrb[85].mxu0  ;;  %6556 = vmatprep.subr.bf16.mxu1 %v7093_v26 }
 0xacd   : > { %v6525_v11 = vpop.f32.mrb[86].mxu0 }
 0xace   : > { %v3695_v34 = vpack.c.bf16 %v6525_v11, %v6524_v27  ;;  %v3680_v35 = vpop.f32.mrb[87].mxu0  ;;  %v7101_v27 = vld [vmem:[%s8301_s13 + $0x58] sm:$0xff]  }
 0xacf   : > { %v3694_v36 = vpack.c.bf16 %v3680_v35, %v3677_v31  ;;  %6557 = vmatpush3.bf16.msra.mxu1 %v7093_v26 }
 0xad0   : > { %6582 = vmatprep.subr.bf16.mxu1 %v7094_v32 }
 0xad1   : > { %6534 = vmatprep.mubr.msk.bf16.mxu1 %vm3148_vm5, %v3694_v36 }
 0xad2   : > { %6535 = vmatmul.mubr.msk.bf16.gmra.mrb[28].mxu1 %vm3148_vm5, %v3695_v34 }
 0xad3   : > { %v6548_v37 = vpop.f32.mrb[88].mxu0 }
 0xad4   : > { %v3831_v38 = vpop.f32.mrb[89].mxu0 }
 0xad5   : > { %v6549_v39 = vpop.f32.mrb[90].mxu0 }
 0xad6   : > { %v3863_v40 = vpack.c.bf16 %v6549_v39, %v6548_v37  ;;  %v3834_v41 = vpop.f32.mrb[91].mxu0 }
 0xad7   : > { %v3862_v42 = vpack.c.bf16 %v3834_v41, %v3831_v38  ;;  %v7103_v38 = vld [vmem:[%s8301_s13 + $0x68] sm:$0xff]   ;;  %v7104_v41 = vld [vmem:[%s8301_s13 + $0x70] sm:$0xff]  }
 0xad9   : > { %6558 = vmatprep.mubr.msk.bf16.mxu1 %vm3148_vm5, %v3862_v42 }
 0xada   : > { %6559 = vmatmul.mubr.msk.bf16.vlgmr.msra.gmra.mrb[24].mxu1 %vm3148_vm5, %v3863_v40 }
 0xadb   : > { %v6552_v44 = vpop.f32.mrb[92].mxu0  ;;  %6583 = vmatpush3.bf16.msra.mxu1 %v7094_v32 }
 0xadc   : > { %v3847_v45 = vpop.f32.mrb[93].mxu0  ;;  %6584 = vmatprep.subr.bf16.mxu1 %v7095_v43 }
 0xadd   : > { %v6553_v47 = vpop.f32.mrb[94].mxu0 }
 0xade   : > { %v3865_v48 = vpack.c.bf16 %v6553_v47, %v6552_v44  ;;  %v3850_v49 = vpop.f32.mrb[95].mxu0 }
 0xadf   : > { %v3864_v55 = vpack.c.bf16 %v3850_v49, %v3847_v45  ;;  %6585 = vmatpush3.bf16.msra.mxu1 %v7095_v43 }
 0xae0   : > { %6610 = vmatprep.subr.bf16.mxu1 %v7096_v46 }
 0xae1   : > { %6562 = vmatprep.mubr.msk.bf16.mxu1 %vm3148_vm5, %v3864_v55 }
 0xae2   : > { %6563 = vmatmul.mubr.msk.bf16.gmra.mrb[28].mxu1 %vm3148_vm5, %v3865_v48 }
 0xae3   : > { %v6576_v56 = vpop.f32.mrb[96].mxu0 }
 0xae4   : > { %v4002_v57 = vpop.f32.mrb[97].mxu0 }
 0xae5   : > { %v6577_v59 = vpop.f32.mrb[98].mxu0 }
 0xae6   : > { %v4034_v50 = vpack.c.bf16 %v6577_v59, %v6576_v56  ;;  %v4005_v52 = vpop.f32.mrb[99].mxu0 }
 0xae7   : > { %v4033_v61 = vpack.c.bf16 %v4005_v52, %v4002_v57  ;;  %v7105_v57 = vld [vmem:[%s8301_s13 + $0x78] sm:$0xff]   ;;  %v7106_v52 = vld [vmem:[%s8301_s13 + $0x80] sm:$0xff]  }
 0xae9   : > { %6586 = vmatprep.mubr.msk.bf16.mxu1 %vm3148_vm5, %v4033_v61 }
 0xaea   : > { %6587 = vmatmul.mubr.msk.bf16.vlgmr.msra.gmra.mrb[24].mxu1 %vm3148_vm5, %v4034_v50 }
 0xaeb   : > { %v6580_v62 = vpop.f32.mrb[100].mxu0  ;;  %6611 = vmatpush3.bf16.msra.mxu1 %v7096_v46 }
 0xaec   : > { %v4018_v6 = vpop.f32.mrb[101].mxu0  ;;  %6612 = vmatprep.subr.bf16.mxu1 %v7097_v60 }
 0xaed   : > { %v6581_v0 = vpop.f32.mrb[102].mxu0 }
 0xaee   : > { %v4036_v3 = vpack.c.bf16 %v6581_v0, %v6580_v62  ;;  %v4021_v54 = vpop.f32.mrb[103].mxu0 }
 0xaef   : > { %v4035_v8 = vpack.c.bf16 %v4021_v54, %v4018_v6  ;;  %6613 = vmatpush3.bf16.msra.mxu1 %v7097_v60 }
 0xaf0   : > { %6638 = vmatprep.subr.bf16.mxu1 %v7098_v53 }
 0xaf1   : > { %6590 = vmatprep.mubr.msk.bf16.mxu1 %vm3148_vm5, %v4035_v8 }
 0xaf2   : > { %6591 = vmatmul.mubr.msk.bf16.gmra.mrb[28].mxu1 %vm3148_vm5, %v4036_v3 }
 0xaf3   : > { %v6604_v51 = vpop.f32.mrb[104].mxu0 }
 0xaf4   : > { %v4173_v58 = vpop.f32.mrb[105].mxu0 }
 0xaf5   : > { %v6605_v63 = vpop.f32.mrb[106].mxu0 }
 0xaf6   : > { %v4205_v1 = vpack.c.bf16 %v6605_v63, %v6604_v51  ;;  %v4176_v5 = vpop.f32.mrb[107].mxu0 }
 0xaf7   : > { %v4204_v7 = vpack.c.bf16 %v4176_v5, %v4173_v58  ;;  %v7108_v58 = vld [vmem:[%s8301_s13 + $0x88] sm:$0xff]  }
 0xaf9   : > { %6614 = vmatprep.mubr.msk.bf16.mxu1 %vm3148_vm5, %v4204_v7 }
 0xafa   : > { %6615 = vmatmul.mubr.msk.bf16.vlgmr.msra.gmra.mrb[24].mxu1 %vm3148_vm5, %v4205_v1 }
 0xafb   : > { %v6608_v10 = vpop.f32.mrb[108].mxu0  ;;  %6639 = vmatpush3.bf16.msra.mxu1 %v7098_v53 }
 0xafc   : > { %v4189_v12 = vpop.f32.mrb[109].mxu0  ;;  %6640 = vmatprep.subr.bf16.mxu1 %v7099_v2 }
 0xafd   : > { %v6609_v14 = vpop.f32.mrb[110].mxu0 }
 0xafe   : > { %v4207_v15 = vpack.c.bf16 %v6609_v14, %v6608_v10  ;;  %v4192_v16 = vpop.f32.mrb[111].mxu0 }
 0xaff   : > { %v4206_v18 = vpack.c.bf16 %v4192_v16, %v4189_v12  ;;  %6641 = vmatpush3.bf16.msra.mxu1 %v7099_v2 }
 0xb00   : > { %6666 = vmatprep.subr.bf16.mxu1 %v7100_v13 }
 0xb01   : > { %6618 = vmatprep.mubr.msk.bf16.mxu1 %vm3148_vm5, %v4206_v18 }
 0xb02   : > { %6619 = vmatmul.mubr.msk.bf16.gmra.mrb[28].mxu1 %vm3148_vm5, %v4207_v15 }
 0xb03   : > { %v6632_v19 = vpop.f32.mrb[112].mxu0 }
 0xb04   : > { %v4344_v21 = vpop.f32.mrb[113].mxu0 }
 0xb05   : > { %v6633_v23 = vpop.f32.mrb[114].mxu0 }
 0xb06   : > { %v4376_v24 = vpack.c.bf16 %v6633_v23, %v6632_v19  ;;  %v4347_v22 = vpop.f32.mrb[115].mxu0 }
 0xb07   : > { %v4375_v26 = vpack.c.bf16 %v4347_v22, %v4344_v21 }
 0xb09   : > { %6642 = vmatprep.mubr.msk.bf16.mxu1 %vm3148_vm5, %v4375_v26 }
 0xb0a   : > { %6643 = vmatmul.mubr.msk.bf16.vlgmr.msra.gmra.mrb[24].mxu1 %vm3148_vm5, %v4376_v24 }
 0xb0b   : > { %v6636_v28 = vpop.f32.mrb[116].mxu0  ;;  %6667 = vmatpush3.bf16.msra.mxu1 %v7100_v13 }
 0xb0c   : > { %v4360_v29 = vpop.f32.mrb[117].mxu0  ;;  %6668 = vmatprep.subr.bf16.mxu1 %v7101_v27 }
 0xb0d   : > { %v6637_v31 = vpop.f32.mrb[118].mxu0 }
 0xb0e   : > { %v4378_v32 = vpack.c.bf16 %v6637_v31, %v6636_v28  ;;  %v4363_v4 = vpop.f32.mrb[119].mxu0  ;;  %v7224_v28 = vld [vmem:[%s7384_s29 + $0x28] sm:$0xff] }
 0xb0f   : > { %v4377_v33 = vpack.c.bf16 %v4363_v4, %v4360_v29  ;;  %6669 = vmatpush3.bf16.msra.mxu1 %v7101_v27  ;;  %v7223_v27 = vld [vmem:[%s7384_s29 + $0x20] sm:$0xff] }
 0xb10   : > { %6694 = vmatprep.subr.bf16.mxu1 %v7102_v30  ;;  %v5173_v29 = vpack.c.bf16 %v7224_v28, %v7223_v27 }
 0xb11   : > { %6646 = vmatprep.mubr.msk.bf16.mxu1 %vm3148_vm5, %v4377_v33 }
 0xb12   : > { %6647 = vmatmul.mubr.msk.bf16.gmra.mrb[28].mxu1 %vm3148_vm5, %v4378_v32 }
 0xb13   : > { %v6660_v9 = vpop.f32.mrb[120].mxu0 }
 0xb14   : > { %v4515_v11 = vpop.f32.mrb[121].mxu0 }
 0xb15   : > { %v6661_v34 = vpop.f32.mrb[122].mxu0 }
 0xb16   : > { %v4547_v35 = vpack.c.bf16 %v6661_v34, %v6660_v9  ;;  %v4518_v36 = vpop.f32.mrb[123].mxu0  ;;  %v5668_v9 = vld [vmem:[%s8302_s14] ss:$0 sm:$0xff] }
 0xb17   : > { %v4546_v37 = vpack.c.bf16 %v4518_v36, %v4515_v11 }
 0xb19   : > { %6670 = vmatprep.mubr.msk.bf16.mxu1 %vm3148_vm5, %v4546_v37  ;;  %v5791_v37 = vld [vmem:[%s8304_s16] ss:$0 sm:$0xff] }
 0xb1a   : > { %6671 = vmatmul.mubr.msk.bf16.vlgmr.msra.gmra.mrb[24].mxu1 %vm3148_vm5, %v4547_v35 }
 0xb1b   : > { %v6664_v39 = vpop.f32.mrb[124].mxu0  ;;  %6695 = vmatpush3.bf16.msra.mxu1 %v7102_v30  ;;  %v7226_v30 = vld [vmem:[%s7384_s29 + $0x38] sm:$0xff] }
 0xb1c   : > { %v4531_v40 = vpop.f32.mrb[125].mxu0  ;;  %6696 = vmatprep.subr.bf16.mxu1 %v7103_v38 }
 0xb1d   : > { %v6665_v42 = vpop.f32.mrb[126].mxu0 }
 0xb1e   : > { %v4549_v43 = vpack.c.bf16 %v6665_v42, %v6664_v39  ;;  %v4534_v44 = vpop.f32.mrb[127].mxu0 }
 0xb1f   : > { %v4548_v45 = vpack.c.bf16 %v4534_v44, %v4531_v40  ;;  %6697 = vmatpush3.bf16.msra.mxu1 %v7103_v38 }
 0xb20   : > { %6722 = vmatprep.subr.bf16.mxu1 %v7104_v41 }
 0xb21   : > { %6674 = vmatprep.mubr.msk.bf16.mxu1 %vm3148_vm5, %v4548_v45 }
 0xb22   : > { %6675 = vmatmul.mubr.msk.bf16.gmra.mrb[28].mxu1 %vm3148_vm5, %v4549_v43 }
 0xb23   : > { %v6688_v46 = vpop.f32.mrb[128].mxu0 }
 0xb24   : > { %v4686_v47 = vpop.f32.mrb[129].mxu0 }
 0xb25   : > { %v6689_v48 = vpop.f32.mrb[130].mxu0 }
 0xb26   : > { %v4718_v49 = vpack.c.bf16 %v6689_v48, %v6688_v46  ;;  %v4689_v55 = vpop.f32.mrb[131].mxu0 }
 0xb27   : > { %v4717_v56 = vpack.c.bf16 %v4689_v55, %v4686_v47 }
 0xb29   : > { %6698 = vmatprep.mubr.msk.bf16.mxu1 %vm3148_vm5, %v4717_v56 }
 0xb2a   : > { %6699 = vmatmul.mubr.msk.bf16.vlgmr.msra.gmra.mrb[24].mxu1 %vm3148_vm5, %v4718_v49  ;;  %v6874_v49 = vadd.f32 %v5791_v37, %v5668_v9 }
 0xb2b   : > { %v6692_v59 = vpop.f32.mrb[132].mxu0  ;;  %6723 = vmatpush3.bf16.msra.mxu1 %v7104_v41 }
 0xb2c   : > { %v4702_v50 = vpop.f32.mrb[133].mxu0  ;;  %6724 = vmatprep.subr.bf16.mxu1 %v7105_v57 }
 0xb2d   : > { %v6693_v61 = vpop.f32.mrb[134].mxu0 }
 0xb2e   : > { %v4720_v60 = vpack.c.bf16 %v6693_v61, %v6692_v59  ;;  %v4705_v62 = vpop.f32.mrb[135].mxu0 }
 0xb2f   : > { %v4719_v6 = vpack.c.bf16 %v4705_v62, %v4702_v50  ;;  %6725 = vmatpush3.bf16.msra.mxu1 %v7105_v57 }
 0xb30   : > { %6750 = vmatprep.subr.bf16.mxu1 %v7106_v52 }
 0xb31   : > { %6702 = vmatprep.mubr.msk.bf16.mxu1 %vm3148_vm5, %v4719_v6 }
 0xb32   : > { %6703 = vmatmul.mubr.msk.bf16.gmra.mrb[28].mxu1 %vm3148_vm5, %v4720_v60 }
 0xb33   : > { %v6716_v53 = vpop.f32.mrb[136].mxu0 }
 0xb34   : > { %v4857_v0 = vpop.f32.mrb[137].mxu0 }
 0xb35   : > { %v6717_v3 = vpop.f32.mrb[138].mxu0 }
 0xb36   : > { %v4889_v54 = vpack.c.bf16 %v6717_v3, %v6716_v53  ;;  %v4860_v8 = vpop.f32.mrb[139].mxu0 }
 0xb37   : > { %v4888_v51 = vpack.c.bf16 %v4860_v8, %v4857_v0 }
 0xb39   : > { %6726 = vmatprep.mubr.msk.bf16.mxu1 %vm3148_vm5, %v4888_v51 }
 0xb3a   : > { %6727 = vmatmul.mubr.msk.bf16.vlgmr.msra.gmra.mrb[24].mxu1 %vm3148_vm5, %v4889_v54 }
 0xb3b   : > { %v6720_v63 = vpop.f32.mrb[140].mxu0  ;;  %6751 = vmatpush3.bf16.msra.mxu1 %v7106_v52 }
 0xb3c   : > { %v4873_v1 = vpop.f32.mrb[141].mxu0  ;;  %6752 = vmatprep.subr.bf16.mxu1 %v7108_v58 }
 0xb3d   : > { %v6721_v5 = vpop.f32.mrb[142].mxu0 }
 0xb3e   : > { %v4891_v7 = vpack.c.bf16 %v6721_v5, %v6720_v63  ;;  %v4876_v2 = vpop.f32.mrb[143].mxu0 }
 0xb3f   : > { %v4890_v10 = vpack.c.bf16 %v4876_v2, %v4873_v1  ;;  %6753 = vmatpush3.bf16.msra.mxu1 %v7108_v58 }
 0xb40   : > { %6846 = vmatprep.subr.bf16.mxu1 %v8149_v17 }
 0xb41   : > { %6730 = vmatprep.mubr.msk.bf16.mxu1 %vm3148_vm5, %v4890_v10 }
 0xb42   : > { %6731 = vmatmul.mubr.msk.bf16.gmra.mrb[28].mxu1 %vm3148_vm5, %v4891_v7 }
 0xb43   : > { %v6744_v12 = vpop.f32.mrb[144].mxu0 }
 0xb44   : > { %v5028_v13 = vpop.f32.mrb[145].mxu0 }
 0xb45   : > { %v6745_v14 = vpop.f32.mrb[146].mxu0 }
 0xb46   : > { %v5060_v15 = vpack.c.bf16 %v6745_v14, %v6744_v12  ;;  %v5031_v16 = vpop.f32.mrb[147].mxu0 }
 0xb47   : > { %v5059_v18 = vpack.c.bf16 %v5031_v16, %v5028_v13 }
 0xb49   : > { %6754 = vmatprep.mubr.msk.bf16.mxu1 %vm3148_vm5, %v5059_v18 }
 0xb4a   : > { %6755 = vmatmul.mubr.msk.bf16.vlgmr.msra.gmra.mrb[24].mxu1 %vm3148_vm5, %v5060_v15 }
 0xb4b   : > { %v6748_v19 = vpop.f32.mrb[148].mxu0  ;;  %6849 = vmatpush3.bf16.msra.mxu1 %v8149_v17  ;;  %v7225_v17 = vld [vmem:[%s7384_s29 + $0x30] sm:$0xff] }
 0xb4c   : > { %v5044_v21 = vpop.f32.mrb[149].mxu0  ;;  %6847 = vmatprep.subr.bf16.mxu1 %v8156_v20  ;;  %v5174_v31 = vpack.c.bf16 %v7226_v30, %v7225_v17 }
 0xb4d   : > { %v6749_v23 = vpop.f32.mrb[150].mxu0 }
 0xb4e   : > { %v5062_v24 = vpack.c.bf16 %v6749_v23, %v6748_v19  ;;  %v5047_v22 = vpop.f32.mrb[151].mxu0 }
 0xb4f   : > { %v5061_v26 = vpack.c.bf16 %v5047_v22, %v5044_v21  ;;  %6850 = vmatpush3.bf16.msra.mxu1 %v8156_v20 }
 0xb50   : > { %6848 = vmatprep.subr.bf16.mxu1 %v8163_v25 }
 0xb51   : > { %6758 = vmatprep.mubr.msk.bf16.mxu1 %vm3148_vm5, %v5061_v26 }
 0xb52   : > { %6759 = vmatmul.mubr.msk.bf16.gmra.mrb[28].mxu1 %vm3148_vm5, %v5062_v24 }
 0xb53   : > { %6851 = vmatpush3.bf16.msra.mxu1 %v8163_v25  ;;  %6772 = vmatprep.mubr.msk.bf16.mxu1 %vm580_vm3, %v5173_v29  ;;  %v6770_v20 = vpop.f32.mrb[152].mxu0 }
 0xb54   : > { %v5246_v32 = vpop.f32.mrb[153].mxu0 }
 0xb55   : > { %v6771_v4 = vpop.f32.mrb[154].mxu0 }
 0xb56   : > { %v5249_v33 = vpop.f32.mrb[155].mxu0 }
 0xb5e   : > { %6773 = vmatmul.mubr.msk.bf16.vlgmr.msra.gmra.mrb[28].mxu1 %vm580_vm3, %v5174_v31 }
 0xc1d   : > { %v6756_v11 = vpop.f32.mrb[24].mxu1 }
 0xc1e   : > { %v6860_v34 = vadd.f32 %v6756_v11, %v5668_v9  ;;  %v5126_v35 = vpop.f32.mrb[25].mxu1 }
 0xc1f   : > { %v6863_v25 = vadd.f32 %v5668_v9, %v5126_v35  ;;  %v6757_v36 = vpop.f32.mrb[26].mxu1 }
 0xc20   : > { %v6866_v38 = vadd.f32 %v6757_v36, %v5668_v9  ;;  %v6861_v39 = vadd.f32 %v6860_v34, %v6770_v20  ;;  %v5129_v40 = vpop.f32.mrb[27].mxu1 }
 0xc21   : > { %v6869_v41 = vadd.f32 %v5668_v9, %v5129_v40  ;;  %v6864_v42 = vadd.f32 %v6863_v25, %v5246_v32 }
 0xc22   : > { %v6862_v43 = vadd.f32 %v6861_v39, %v5791_v37  ;;  %v6867_v44 = vadd.f32 %v6866_v38, %v5791_v37 }
 0xc23   : > { %v6865_v45 = vadd.f32 %v6864_v42, %v5791_v37  ;;  %v6870_v46 = vadd.f32 %v6869_v41, %v5791_v37 }
 0xc24   : > { %5287 = vst.msk [vmem:[%s562_s18 + $0x10] sm:$0xff] %vm3148_vm5, %v6862_v43  ;;  %v6868_v47 = vadd.f32 %v6867_v44, %v6771_v4 }
 0xc25   : > { %5285 = vst.msk [vmem:[%s562_s18] sm:$0xff] %vm3148_vm5, %v6865_v45  ;;  %v6871_v48 = vadd.f32 %v6870_v46, %v5249_v33 }
 0xc26   : > { %5288 = vst.msk [vmem:[%s562_s18 + $0x18] sm:$0xff] %vm3148_vm5, %v6868_v47 }
 0xc27   : > { %5286 = vst.msk [vmem:[%s562_s18 + $0x8] sm:$0xff] %vm3148_vm5, %v6871_v48 }
 0xc31   : > { %v6774_v55 = vpop.f32.mrb[28].mxu1 }
 0xc32   : > { %v6873_v56 = vadd.f32 %v6874_v49, %v6774_v55  ;;  %v5262_v57 = vpop.f32.mrb[29].mxu1 }
 0xc33   : > { %v6875_v59 = vadd.f32 %v6874_v49, %v5262_v57  ;;  %v6775_v50 = vpop.f32.mrb[30].mxu1 }
 0xc34   : > { %5291 = vst.msk [vmem:[%s562_s18 + $0x30] sm:$0xff] %vm3148_vm5, %v6873_v56  ;;  %v6877_v52 = vadd.f32 %v6874_v49, %v6775_v50  ;;  %v5265_v61 = vpop.f32.mrb[31].mxu1 }
 0xc35   : > { %5289 = vst.msk [vmem:[%s562_s18 + $0x20] sm:$0xff] %vm3148_vm5, %v6875_v59  ;;  %v6879_v60 = vadd.f32 %v6874_v49, %v5265_v61 }
 0xc36   : > { %5292 = vst.msk [vmem:[%s562_s18 + $0x38] sm:$0xff] %vm3148_vm5, %v6877_v52 }
 0xc37   : > { %5290 = vst.msk [vmem:[%s562_s18 + $0x28] sm:$0xff] %vm3148_vm5, %v6879_v60 }
 0xc38 PF: > { %s27_s24 = sadd.s32 1, %s7233_s24  }
 0xc39   : > { %p24_p4 = scmp.ge.s32.totalorder %s27_s24, 4  }
 0xc3b   :  { %26 = sbr.rel (!%p24_p4) target bundleno = 3 (0x3), region = 145 }

// kernel: cross_attn_up_block_2d.5
= control target key start
LH: loop header
LB: loop body
LE: loop exit
PB: predicated region body
PF: predicated region fallthrough
CT: control target
= control target key end

     0   :  { %9 = vsyncpa [#allocation3], 0  ;;  %s9236_s0 = inlined_call_operand.vmem [shape: f32[2,64,32], index: 0, kind: input, shape index: {}]   ;;  %s9237_s1 = inlined_call_operand.vmem [shape: bf16[9,256,64], index: 1, kind: input, shape index: {}]   ;;  %s9238_s2 = inlined_call_operand.vmem [shape: bf16[9,32,32], index: 2, kind: input, shape index: {}]   ;;  %s9239_s3 = inlined_call_operand.vmem [shape: f32[1,32], index: 3, kind: input, shape index: {}]   ;;  %s9240_s4 = inlined_call_operand.hbm [shape: f32[2,256,32], index: 4, kind: output, shape index: {}]  }
   0x1   :  { %11 = vsyncpa [#allocation3 + $0x1], 0  ;;  %s8051_s15 = smov 0   ;;  %s8053_s16 = smov 0  }
   0x2   :  { %s8055_s17 = smov 0   ;;  %s8057_s18 = smov 0  }
   0x3 LB: > { %s8072_s19 = sadd.s32 4294967295, %s8021_s18   ;;  %s5689_s20 = sadd.s32 4294967294, %s8021_s18   ;;  %s8021_s18 = sphi %s8057_s18, %s9246_s18   ;;  %s8017_s17 = sphi %s8055_s17, %s9245_s17   ;;  %s8013_s16 = sphi %s8053_s16, %s9244_s16   ;;  %s8009_s15 = sphi %s8051_s15, %s9243_s15  }
   0x4   : > { %s8076_s21 = sadd.s32 1, %s8021_s18   ;;  %s113_s22 = sadd.s32 1, %s8017_s17 }
   0x5   : > { %s110_s23 = ssub.s32 %s8021_s18, %s8076_s21  ;;  %p123_p0 = scmp.ne.s32.totalorder %s8017_s17, %s8013_s16 }
   0x6   : > { %p111_p1 = scmp.eq.s32.totalorder %s110_s23, 0  ;;  %p124_p2 = scmp.eq.s32.totalorder %s8072_s19, 1 }
   0x7   : > { %p129_p3 = scmp.ne.s32.totalorder %s8013_s16, %s8009_s15  ;;  %p130_p4 = scmp.eq.s32.totalorder %s5689_s20, 1 }
   0x8   : > { %s8087_s24 = scalar_select %p111_p1, %s8017_s17, %s113_s22  }
   0x9   : > { %p8089_p5 = por %p124_p2, %p123_p0  ;;  %p8093_p6 = por %p130_p4, %p129_p3 }
   0xa   : > { %p5692_p7 = scmp.ge.s32.totalorder %s8021_s18, 1  ;;  %p165_p8 = scmp.lt.s32.totalorder %s8021_s18, 3 }
   0xc   : > { %p166_p9 = pnand %p5692_p7, %p165_p8 }
   0xd   : > { %p191_p10 = scmp.lt.s32.totalorder (!%p166_p9), %s8072_s19, 1  ;;  %v7797_v0 = vld [vmem:[%s9237_s1] sm:$0xff] (!%p166_p9)   ;;  %vm329_vm0 = vcmask (!%p166_p9), 523264   ;;  %v7798_v13 = vld [vmem:[%s9237_s1 + $0x8] sm:$0xff] (!%p166_p9)   ;;  %v7799_v15 = vld [vmem:[%s9237_s1 + $0x10] sm:$0xff] (!%p166_p9)   ;;  %vm571_vm1 = vcmask (!%p166_p9), 261120  }
   0xe   : > { %169 = sbr.rel (%p166_p9) target bundleno = 1216 (0x4c0), region = 36  ;;  %6792 = vmatprep.mubr.msk.bf16.mxu0 (!%p166_p9), %vm329_vm0, %v7797_v0  ;;  %v7813_v14 = vld [vmem:[%s9238_s2] sm:$0xff] (!%p166_p9)   ;;  %v7814_v16 = vld [vmem:[%s9238_s2 + $0x8] sm:$0xff] (!%p166_p9)   ;;  %v7800_v17 = vld [vmem:[%s9237_s1 + $0x18] sm:$0xff] (!%p166_p9)   ;;  %s6441_s12 = sshll.u32 (!%p166_p9), %s8072_s19, 12 }
   0xf   : > { %v7801_v18 = vld [vmem:[%s9237_s1 + $0x20] sm:$0xff] (!%p166_p9)   ;;  %v7802_v19 = vld [vmem:[%s9237_s1 + $0x28] sm:$0xff] (!%p166_p9)   ;;  %v7803_v20 = vld [vmem:[%s9237_s1 + $0x30] sm:$0xff] (!%p166_p9)   ;;  %s9183_s20 = scalar_lea.hbm (!%p166_p9), %s9240_s4, %s6441_s12  ;;  %s8023_s27 = smov (!%p166_p9), [#allocation2]  }
  0x10   : > { %v7804_v21 = vld [vmem:[%s9237_s1 + $0x38] sm:$0xff] (!%p166_p9)   ;;  %v7805_v22 = vld [vmem:[%s9237_s1 + $0x40] sm:$0xff] (!%p166_p9)   ;;  %v7806_v23 = vld [vmem:[%s9237_s1 + $0x48] sm:$0xff] (!%p166_p9)   ;;  %s7963_s28 = sshll.u32 (!%p166_p9), %s8023_s27, 4  ;;  %s7964_s28 = int_to_ptr.vmem [resolvable:$false] %s7963_s28 }
  0x11   : > { %v7807_v24 = vld [vmem:[%s9237_s1 + $0x50] sm:$0xff] (!%p166_p9)   ;;  %v7808_v25 = vld [vmem:[%s9237_s1 + $0x58] sm:$0xff] (!%p166_p9)   ;;  %v7809_v26 = vld [vmem:[%s9237_s1 + $0x60] sm:$0xff] (!%p166_p9)  }
  0x12   : > { %v7810_v27 = vld [vmem:[%s9237_s1 + $0x68] sm:$0xff] (!%p166_p9)   ;;  %v7811_v28 = vld [vmem:[%s9237_s1 + $0x70] sm:$0xff] (!%p166_p9)   ;;  %v7812_v29 = vld [vmem:[%s9237_s1 + $0x78] sm:$0xff] (!%p166_p9)  }
  0x13   : > { %v7815_v30 = vld [vmem:[%s9237_s1 + $0x80] sm:$0xff] (!%p166_p9)   ;;  %v7816_v31 = vld [vmem:[%s9237_s1 + $0x88] sm:$0xff] (!%p166_p9)   ;;  %v7817_v32 = vld [vmem:[%s9237_s1 + $0x90] sm:$0xff] (!%p166_p9)  }
  0x14   : > { %6868 = vmatprep.mubr.msk.bf16.mxu1 (!%p166_p9), %vm329_vm0, %v7815_v30  ;;  %v7818_v33 = vld [vmem:[%s9237_s1 + $0x98] sm:$0xff] (!%p166_p9)   ;;  %v7819_v34 = vld [vmem:[%s9237_s1 + $0xa0] sm:$0xff] (!%p166_p9)   ;;  %v7820_v35 = vld [vmem:[%s9237_s1 + $0xa8] sm:$0xff] (!%p166_p9)  }
  0x15   : > { %s192_s29 = scalar_select %p191_p10, %s8072_s19, 1  ;;  %v7821_v36 = vld [vmem:[%s9237_s1 + $0xb0] sm:$0xff]   ;;  %v7822_v37 = vld [vmem:[%s9237_s1 + $0xb8] sm:$0xff]   ;;  %v7823_v38 = vld [vmem:[%s9237_s1 + $0xc0] sm:$0xff]  }
  0x16   : > { %v7824_v39 = vld [vmem:[%s9237_s1 + $0xc8] sm:$0xff]   ;;  %v7825_v40 = vld [vmem:[%s9237_s1 + $0xd0] sm:$0xff]   ;;  %v7826_v41 = vld [vmem:[%s9237_s1 + $0xd8] sm:$0xff]  }
  0x17   : > { %s6440_s30 = sshll.u32 %s192_s29, 6  ;;  %v7827_v42 = vld [vmem:[%s9237_s1 + $0xe0] sm:$0xff]   ;;  %v7828_v43 = vld [vmem:[%s9237_s1 + $0xe8] sm:$0xff]   ;;  %v7829_v44 = vld [vmem:[%s9237_s1 + $0xf0] sm:$0xff]   ;;  %s7965_s29 = scalar_lea.vmem %s7964_s28, 8192 }
  0x18   : > { %s195_s7 = scalar_lea.vmem %s9236_s0, %s6440_s30  ;;  %v7830_v45 = vld [vmem:[%s9237_s1 + $0xf8] sm:$0xff]  }
  0x19   : > { %v197_v1 = vld [vmem:[%s195_s7] sm:$0xff]  ;;  %v198_v2 = vld [vmem:[%s195_s7 + $0x8] sm:$0xff]  ;;  %v199_v3 = vld [vmem:[%s195_s7 + $0x10] sm:$0xff] }
  0x1a   : > { %v8108_v4 = vpack.c.bf16 %v198_v2, %v197_v1  ;;  %v200_v5 = vld [vmem:[%s195_s7 + $0x18] sm:$0xff]  ;;  %v201_v7 = vld [vmem:[%s195_s7 + $0x20] sm:$0xff]  ;;  %v202_v8 = vld [vmem:[%s195_s7 + $0x28] sm:$0xff] }
  0x1b   : > { %v8110_v6 = vpack.c.bf16 %v200_v5, %v199_v3  ;;  %v8117_v9 = vpack.c.bf16 %v202_v8, %v201_v7  ;;  %v203_v10 = vld [vmem:[%s195_s7 + $0x30] sm:$0xff]  ;;  %v204_v11 = vld [vmem:[%s195_s7 + $0x38] sm:$0xff]  ;;  %s188_s7 = sand.u32 1, %s8013_s16  }
  0x1c   : > { %6784 = vmatprep.subr.bf16.mxu0 %v8108_v4  ;;  %6860 = vmatprep.subr.bf16.mxu1 %v8108_v4  ;;  %v8123_v12 = vpack.c.bf16 %v204_v11, %v203_v10  ;;  %v7855_v8 = vld [vmem:[%s9238_s2 + $0x10] sm:$0xff]   ;;  %s5693_s10 = sshll.u32 %s188_s7, 8  ;;  %s9195_s22 = scalar_lea.sflag [#allocation3], %s188_s7 }
  0x1d   : > { %6785 = vmatpush3.bf16.msra.mxu0 %v8108_v4  ;;  %6861 = vmatpush3.bf16.msra.mxu1 %v8108_v4  ;;  %s9062_s11 = scalar_lea.vmem [#allocation2], %s5693_s10 }
  0x1e   : > { %6786 = vmatprep.subr.bf16.mxu0 %v8110_v6  ;;  %6862 = vmatprep.subr.bf16.mxu1 %v8110_v6  ;;  %s5627_s13 = sshll.u32 %s9062_s11, 4  ;;  %s9185_s13 = int_to_ptr.vmem [resolvable:$true] %s5627_s13 }
  0x1f   : > { %s7959_s23 = scalar_lea.vmem %s9185_s13, 4096  ;;  %p7966_p0 = scmp.lt.s32.totalorder %s9185_s13, %s7964_s28 }
  0x20   : > { %p7960_p11 = scmp.ne.s32.totalorder %s9185_s13, %s7959_s23  ;;  %p7967_p1 = scmp.lt.s32.totalorder %s7965_s29, %s7959_s23 }
  0x21   : > { %6787 = vmatpush3.bf16.msra.mxu0 %v8110_v6  ;;  %6863 = vmatpush3.bf16.msra.mxu1 %v8110_v6 }
  0x22   : > { %6788 = vmatprep.subr.bf16.mxu0 %v8117_v9  ;;  %6864 = vmatprep.subr.bf16.mxu1 %v8117_v9  ;;  %p7961_p12 = pnand %p7960_p11, %p8089_p5  ;;  %p7968_p2 = por %p7967_p1, %p7966_p0 }
  0x24   : > { %p7962_p13 = pneg %p7961_p12 }
  0x25   : > { %6789 = vmatpush3.bf16.msra.mxu0 %v8117_v9  ;;  %6865 = vmatpush3.bf16.msra.mxu1 %v8117_v9 }
  0x26   : > { %6790 = vmatprep.subr.bf16.mxu0 %v8123_v12  ;;  %6866 = vmatprep.subr.bf16.mxu1 %v8123_v12  ;;  %p7969_p3 = pnand %p7968_p2, %p7962_p13 }
  0x29   : > { %6791 = vmatpush3.bf16.msra.mxu0 %v8123_v12  ;;  %6867 = vmatpush3.bf16.msra.mxu1 %v8123_v12 }
  0x2a   : > { %6824 = vmatprep.subr.bf16.mxu0 %v7813_v14  ;;  %6900 = vmatprep.subr.bf16.mxu1 %v7855_v8 }
  0x2c   : > { %6793 = vmatmul.mubr.msk.bf16.vlgmr.msra.gmra.mrb[0].mxu0 %vm329_vm0, %v7798_v13  ;;  %6869 = vmatmul.mubr.msk.bf16.vlgmr.msra.gmra.mrb[0].mxu1 %vm329_vm0, %v7816_v31 }
  0x2d   : > { %6796 = vmatprep.mubr.msk.bf16.mxu0 %vm329_vm0, %v7799_v15  ;;  %6825 = vmatpush3.bf16.msra.mxu0 %v7813_v14 }
  0x2e   : > { %6826 = vmatprep.subr.bf16.mxu0 %v7814_v16  ;;  %6872 = vmatprep.mubr.msk.bf16.mxu1 %vm329_vm0, %v7817_v32 }
  0x2f   : > { %6901 = vmatpush3.bf16.msra.mxu1 %v7855_v8 }
  0x31   : > { %6827 = vmatpush3.bf16.msra.mxu0 %v7814_v16 }
  0x32   : > { %6936 = vmatprep.subr.bf16.mxu0 %v8108_v4 }
  0x34   : > { %6797 = vmatmul.mubr.msk.bf16.gmra.mrb[4].mxu0 %vm329_vm0, %v7800_v17  ;;  %6873 = vmatmul.mubr.msk.bf16.gmra.mrb[4].mxu1 %vm329_vm0, %v7818_v33 }
  0x35   : > { %6800 = vmatprep.mubr.msk.bf16.mxu0 %vm329_vm0, %v7801_v18  ;;  %6876 = vmatprep.mubr.msk.bf16.mxu1 %vm329_vm0, %v7819_v34 }
  0x3c   : > { %6801 = vmatmul.mubr.msk.bf16.gmra.mrb[8].mxu0 %vm329_vm0, %v7802_v19  ;;  %6877 = vmatmul.mubr.msk.bf16.gmra.mrb[8].mxu1 %vm329_vm0, %v7820_v35  ;;  %v7831_v35 = vld [vmem:[%s9237_s1 + $0x100] sm:$0xff]  }
  0x3d   : > { %6804 = vmatprep.mubr.msk.bf16.mxu0 %vm329_vm0, %v7803_v20  ;;  %6880 = vmatprep.mubr.msk.bf16.mxu1 %vm329_vm0, %v7821_v36  ;;  %v7864_v36 = vld [vmem:[%s9238_s2 + $0x18] sm:$0xff]  }
  0x3e   : > { %6902 = vmatprep.subr.bf16.mxu1 %v7864_v36 }
  0x3f   : > { %6903 = vmatpush3.bf16.msra.mxu1 %v7864_v36 }
  0x44   : > { %6805 = vmatmul.mubr.msk.bf16.gmra.mrb[12].mxu0 %vm329_vm0, %v7804_v21  ;;  %6881 = vmatmul.mubr.msk.bf16.gmra.mrb[12].mxu1 %vm329_vm0, %v7822_v37  ;;  %v7832_v37 = vld [vmem:[%s9237_s1 + $0x108] sm:$0xff]  }
  0x45   : > { %6808 = vmatprep.mubr.msk.bf16.mxu0 %vm329_vm0, %v7805_v22  ;;  %6884 = vmatprep.mubr.msk.bf16.mxu1 %vm329_vm0, %v7823_v38  ;;  %v7833_v38 = vld [vmem:[%s9237_s1 + $0x110] sm:$0xff]  }
  0x4c   : > { %6809 = vmatmul.mubr.msk.bf16.gmra.mrb[16].mxu0 %vm329_vm0, %v7806_v23  ;;  %6885 = vmatmul.mubr.msk.bf16.gmra.mrb[16].mxu1 %vm329_vm0, %v7824_v39  ;;  %v7834_v39 = vld [vmem:[%s9237_s1 + $0x118] sm:$0xff]  }
  0x4d   : > { %6812 = vmatprep.mubr.msk.bf16.mxu0 %vm329_vm0, %v7807_v24  ;;  %6888 = vmatprep.mubr.msk.bf16.mxu1 %vm329_vm0, %v7825_v40  ;;  %v7835_v40 = vld [vmem:[%s9237_s1 + $0x120] sm:$0xff]  }
  0x54   : > { %6813 = vmatmul.mubr.msk.bf16.gmra.mrb[20].mxu0 %vm329_vm0, %v7808_v25  ;;  %6889 = vmatmul.mubr.msk.bf16.gmra.mrb[20].mxu1 %vm329_vm0, %v7826_v41  ;;  %v7836_v41 = vld [vmem:[%s9237_s1 + $0x128] sm:$0xff]  }
  0x55   : > { %6816 = vmatprep.mubr.msk.bf16.mxu0 %vm329_vm0, %v7809_v26  ;;  %6892 = vmatprep.mubr.msk.bf16.mxu1 %vm329_vm0, %v7827_v42  ;;  %v7837_v42 = vld [vmem:[%s9237_s1 + $0x130] sm:$0xff]  }
  0x5c   : > { %6817 = vmatmul.mubr.msk.bf16.gmra.mrb[24].mxu0 %vm329_vm0, %v7810_v27  ;;  %6893 = vmatmul.mubr.msk.bf16.gmra.mrb[24].mxu1 %vm329_vm0, %v7828_v43 }
  0x5d   : > { %6820 = vmatprep.mubr.msk.bf16.mxu0 %vm329_vm0, %v7811_v28  ;;  %6896 = vmatprep.mubr.msk.bf16.mxu1 %vm329_vm0, %v7829_v44 }
  0x64   : > { %6821 = vmatmul.mubr.msk.bf16.gmra.mrb[28].mxu0 %vm329_vm0, %v7812_v29  ;;  %6897 = vmatmul.mubr.msk.bf16.gmra.mrb[28].mxu1 %vm329_vm0, %v7830_v45 }
  0xff   : > { %v6794_v46 = vpop.f32.mrb[0].mxu0  ;;  %v6870_v43 = vpop.f32.mrb[0].mxu1 }
 0x100   : > { %v412_v47 = vpop.f32.mrb[1].mxu0  ;;  %v1008_v44 = vpop.f32.mrb[1].mxu1 }
 0x101   : > { %v6795_v48 = vpop.f32.mrb[2].mxu0  ;;  %v6871_v45 = vpop.f32.mrb[2].mxu1 }
 0x102   : > { %v540_v49 = vpack.c.bf16 %v6795_v48, %v6794_v46  ;;  %v415_v50 = vpop.f32.mrb[3].mxu0  ;;  %v1136_v46 = vpack.c.bf16 %v6871_v45, %v6870_v43 }
 0x103   : > { %v539_v51 = vpack.c.bf16 %v415_v50, %v412_v47  ;;  %v1011_v47 = vpop.f32.mrb[3].mxu1  ;;  %v7839_v50 = vld [vmem:[%s9237_s1 + $0x140] sm:$0xff]  }
 0x104   : > { %v1135_v48 = vpack.c.bf16 %v1011_v47, %v1008_v44  ;;  %v7852_v47 = vld [vmem:[%s9237_s1 + $0x1a8] sm:$0xff]  }
 0x105   : > { %6828 = vmatprep.mubr.msk.bf16.mxu0 %vm571_vm1, %v539_v51 }
 0x106   : > { %6829 = vmatmul.mubr.msk.bf16.vlgmr.msra.gmra.mrb[32].mxu0 %vm571_vm1, %v540_v49  ;;  %v7838_v49 = vld [vmem:[%s9237_s1 + $0x138] sm:$0xff]   ;;  %6904 = vmatprep.mubr.msk.bf16.mxu1 %vm571_vm1, %v1135_v48  ;;  %v7853_v48 = vld [vmem:[%s9237_s1 + $0x1b0] sm:$0xff]  }
 0x107   : > { %6937 = vmatpush3.bf16.msra.mxu0 %v8108_v4  ;;  %v6798_v52 = vpop.f32.mrb[4].mxu0  ;;  %6905 = vmatmul.mubr.msk.bf16.vlgmr.msra.gmra.mrb[32].mxu1 %vm571_vm1, %v1136_v46  ;;  %v6874_v51 = vpop.f32.mrb[4].mxu1 }
 0x108   : > { %v428_v53 = vpop.f32.mrb[5].mxu0  ;;  %6938 = vmatprep.subr.bf16.mxu0 %v8110_v6 }
 0x109   : > { %v6799_v54 = vpop.f32.mrb[6].mxu0 }
 0x10a   : > { %v542_v55 = vpack.c.bf16 %v6799_v54, %v6798_v52  ;;  %v431_v56 = vpop.f32.mrb[7].mxu0  ;;  %v1024_v52 = vpop.f32.mrb[5].mxu1 }
 0x10b   : > { %v541_v57 = vpack.c.bf16 %v431_v56, %v428_v53  ;;  %6939 = vmatpush3.bf16.msra.mxu0 %v8110_v6  ;;  %v7873_v53 = vld [vmem:[%s9238_s2 + $0x20] sm:$0xff]   ;;  %v6875_v54 = vpop.f32.mrb[6].mxu1 }
 0x10c   : > { %6940 = vmatprep.subr.bf16.mxu0 %v8117_v9  ;;  %6976 = vmatprep.subr.bf16.mxu1 %v7873_v53  ;;  %v1027_v56 = vpop.f32.mrb[7].mxu1 }
 0x10d   : > { %6832 = vmatprep.mubr.msk.bf16.mxu0 %vm571_vm1, %v541_v57  ;;  %v1137_v57 = vpack.c.bf16 %v1027_v56, %v1024_v52  ;;  %6977 = vmatpush3.bf16.msra.mxu1 %v7873_v53  ;;  %v7857_v52 = vld [vmem:[%s9237_s1 + $0x1c8] sm:$0xff]   ;;  %v7858_v53 = vld [vmem:[%s9237_s1 + $0x1d0] sm:$0xff]  }
 0x10e   : > { %6833 = vmatmul.mubr.msk.bf16.gmra.mrb[36].mxu0 %vm571_vm1, %v542_v55  ;;  %v1138_v55 = vpack.c.bf16 %v6875_v54, %v6874_v51  ;;  %v8434_v51 = vld [vmem:[%s9238_s2 + $0x30] sm:$0xff]   ;;  %v7859_v54 = vld [vmem:[%s9237_s1 + $0x1d8] sm:$0xff]   ;;  %v7861_v56 = vld [vmem:[%s9237_s1 + $0x1e8] sm:$0xff]  }
 0x10f   : > { %v6802_v58 = vpop.f32.mrb[8].mxu0  ;;  %6941 = vmatpush3.bf16.msra.mxu0 %v8117_v9  ;;  %6908 = vmatprep.mubr.msk.bf16.mxu1 %vm571_vm1, %v1137_v57  ;;  %v7862_v57 = vld [vmem:[%s9237_s1 + $0x1f0] sm:$0xff]  }
 0x110   : > { %v444_v59 = vpop.f32.mrb[9].mxu0  ;;  %6942 = vmatprep.subr.bf16.mxu0 %v8123_v12  ;;  %6909 = vmatmul.mubr.msk.bf16.gmra.mrb[36].mxu1 %vm571_vm1, %v1138_v55  ;;  %v7860_v55 = vld [vmem:[%s9237_s1 + $0x1e0] sm:$0xff]  }
 0x111   : > { %v6803_v60 = vpop.f32.mrb[10].mxu0 }
 0x112   : > { %v544_v61 = vpack.c.bf16 %v6803_v60, %v6802_v58  ;;  %v447_v62 = vpop.f32.mrb[11].mxu0  ;;  %v7840_v58 = vld [vmem:[%s9237_s1 + $0x148] sm:$0xff]   ;;  %v6878_v60 = vpop.f32.mrb[8].mxu1 }
 0x113   : > { %v543_v63 = vpack.c.bf16 %v447_v62, %v444_v59  ;;  %6943 = vmatpush3.bf16.msra.mxu0 %v8123_v12  ;;  %v7841_v59 = vld [vmem:[%s9237_s1 + $0x150] sm:$0xff]  }
 0x114   : > { %7012 = vmatprep.subr.bf16.mxu0 %v8108_v4 }
 0x115   : > { %6836 = vmatprep.mubr.msk.bf16.mxu0 %vm571_vm1, %v543_v63 }
 0x116   : > { %6837 = vmatmul.mubr.msk.bf16.gmra.mrb[40].mxu0 %vm571_vm1, %v544_v61  ;;  %v1040_v61 = vpop.f32.mrb[9].mxu1 }
 0x117   : > { %v6806_v0 = vpop.f32.mrb[12].mxu0  ;;  %v6879_v62 = vpop.f32.mrb[10].mxu1 }
 0x118   : > { %v460_v1 = vpop.f32.mrb[13].mxu0  ;;  %v1140_v63 = vpack.c.bf16 %v6879_v62, %v6878_v60  ;;  %v7866_v60 = vld [vmem:[%s9237_s1 + $0x208] sm:$0xff]   ;;  %v7868_v62 = vld [vmem:[%s9237_s1 + $0x218] sm:$0xff]  }
 0x119   : > { %v6807_v2 = vpop.f32.mrb[14].mxu0 }
 0x11a   : > { %v546_v3 = vpack.c.bf16 %v6807_v2, %v6806_v0  ;;  %v463_v5 = vpop.f32.mrb[15].mxu0  ;;  %v1043_v0 = vpop.f32.mrb[11].mxu1  ;;  %v7842_v2 = vld [vmem:[%s9237_s1 + $0x158] sm:$0xff]  }
 0x11b   : > { %v545_v7 = vpack.c.bf16 %v463_v5, %v460_v1  ;;  %v1139_v1 = vpack.c.bf16 %v1043_v0, %v1040_v61  ;;  %v6882_v5 = vpop.f32.mrb[12].mxu1  ;;  %v7867_v61 = vld [vmem:[%s9237_s1 + $0x210] sm:$0xff]   ;;  %v7870_v0 = vld [vmem:[%s9237_s1 + $0x228] sm:$0xff]  }
 0x11d   : > { %6840 = vmatprep.mubr.msk.bf16.mxu0 %vm571_vm1, %v545_v7  ;;  %6912 = vmatprep.mubr.msk.bf16.mxu1 %vm571_vm1, %v1139_v1  ;;  %v1056_v7 = vpop.f32.mrb[13].mxu1  ;;  %v7871_v1 = vld [vmem:[%s9237_s1 + $0x230] sm:$0xff]  }
 0x11e   : > { %6841 = vmatmul.mubr.msk.bf16.gmra.mrb[44].mxu0 %vm571_vm1, %v546_v3  ;;  %v7843_v3 = vld [vmem:[%s9237_s1 + $0x160] sm:$0xff]   ;;  %6913 = vmatmul.mubr.msk.bf16.gmra.mrb[40].mxu1 %vm571_vm1, %v1140_v63  ;;  %v6883_v8 = vpop.f32.mrb[14].mxu1 }
 0x11f   : > { %v6810_v10 = vpop.f32.mrb[16].mxu0  ;;  %v7869_v63 = vld [vmem:[%s9237_s1 + $0x220] sm:$0xff]  }
 0x120   : > { %v476_v11 = vpop.f32.mrb[17].mxu0 }
 0x121   : > { %v6811_v13 = vpop.f32.mrb[18].mxu0 }
 0x122   : > { %v548_v14 = vpack.c.bf16 %v6811_v13, %v6810_v10  ;;  %v479_v15 = vpop.f32.mrb[19].mxu0  ;;  %v1142_v10 = vpack.c.bf16 %v6883_v8, %v6882_v5  ;;  %v7872_v5 = vld [vmem:[%s9237_s1 + $0x238] sm:$0xff]   ;;  %v7874_v8 = vld [vmem:[%s9237_s1 + $0x240] sm:$0xff]  }
 0x123   : > { %v547_v16 = vpack.c.bf16 %v479_v15, %v476_v11  ;;  %v1059_v11 = vpop.f32.mrb[15].mxu1  ;;  %v7845_v15 = vld [vmem:[%s9237_s1 + $0x170] sm:$0xff]  }
 0x124   : > { %v1141_v13 = vpack.c.bf16 %v1059_v11, %v1056_v7 }
 0x125   : > { %6844 = vmatprep.mubr.msk.bf16.mxu0 %vm571_vm1, %v547_v16  ;;  %v6886_v16 = vpop.f32.mrb[16].mxu1 }
 0x126   : > { %6845 = vmatmul.mubr.msk.bf16.gmra.mrb[48].mxu0 %vm571_vm1, %v548_v14  ;;  %v7844_v14 = vld [vmem:[%s9237_s1 + $0x168] sm:$0xff]   ;;  %6916 = vmatprep.mubr.msk.bf16.mxu1 %vm571_vm1, %v1141_v13 }
 0x127   : > { %v6814_v17 = vpop.f32.mrb[20].mxu0  ;;  %6917 = vmatmul.mubr.msk.bf16.gmra.mrb[44].mxu1 %vm571_vm1, %v1142_v10 }
 0x128   : > { %v492_v18 = vpop.f32.mrb[21].mxu0 }
 0x129   : > { %v6815_v19 = vpop.f32.mrb[22].mxu0 }
 0x12a   : > { %v550_v20 = vpack.c.bf16 %v6815_v19, %v6814_v17  ;;  %v495_v21 = vpop.f32.mrb[23].mxu0  ;;  %v1072_v17 = vpop.f32.mrb[17].mxu1 }
 0x12b   : > { %v549_v22 = vpack.c.bf16 %v495_v21, %v492_v18  ;;  %v6887_v18 = vpop.f32.mrb[18].mxu1 }
 0x12c   : > { %v1144_v19 = vpack.c.bf16 %v6887_v18, %v6886_v16  ;;  %v7876_v16 = vld [vmem:[%s9237_s1 + $0x250] sm:$0xff]  }
 0x12d   : > { %6848 = vmatprep.mubr.msk.bf16.mxu0 %vm571_vm1, %v549_v22  ;;  %v7846_v22 = vld [vmem:[%s9237_s1 + $0x178] sm:$0xff]  }
 0x12e   : > { %6849 = vmatmul.mubr.msk.bf16.gmra.mrb[52].mxu0 %vm571_vm1, %v550_v20  ;;  %v1075_v20 = vpop.f32.mrb[19].mxu1 }
 0x12f   : > { %v6818_v23 = vpop.f32.mrb[24].mxu0  ;;  %v1143_v21 = vpack.c.bf16 %v1075_v20, %v1072_v17  ;;  %v7877_v20 = vld [vmem:[%s9237_s1 + $0x258] sm:$0xff]  }
 0x130   : > { %v508_v24 = vpop.f32.mrb[25].mxu0 }
 0x131   : > { %v6819_v25 = vpop.f32.mrb[26].mxu0  ;;  %6920 = vmatprep.mubr.msk.bf16.mxu1 %vm571_vm1, %v1143_v21 }
 0x132   : > { %v552_v26 = vpack.c.bf16 %v6819_v25, %v6818_v23  ;;  %v511_v27 = vpop.f32.mrb[27].mxu0  ;;  %v7847_v23 = vld [vmem:[%s9237_s1 + $0x180] sm:$0xff]   ;;  %6921 = vmatmul.mubr.msk.bf16.gmra.mrb[48].mxu1 %vm571_vm1, %v1144_v19 }
 0x133   : > { %v551_v28 = vpack.c.bf16 %v511_v27, %v508_v24  ;;  %v6890_v24 = vpop.f32.mrb[20].mxu1 }
 0x134   : > { %v1088_v25 = vpop.f32.mrb[21].mxu1 }
 0x135   : > { %6852 = vmatprep.mubr.msk.bf16.mxu0 %vm571_vm1, %v551_v28  ;;  %v6891_v27 = vpop.f32.mrb[22].mxu1 }
 0x136   : > { %6853 = vmatmul.mubr.msk.bf16.gmra.mrb[56].mxu0 %vm571_vm1, %v552_v26  ;;  %v7882_v26 = vld [vmem:[%s9238_s2 + $0x28] sm:$0xff]   ;;  %v1146_v28 = vpack.c.bf16 %v6891_v27, %v6890_v24 }
 0x137   : > { %v6822_v29 = vpop.f32.mrb[28].mxu0  ;;  %6978 = vmatprep.subr.bf16.mxu1 %v7882_v26 }
 0x138   : > { %v524_v30 = vpop.f32.mrb[29].mxu0  ;;  %6979 = vmatpush3.bf16.msra.mxu1 %v7882_v26  ;;  %v7879_v26 = vld [vmem:[%s9237_s1 + $0x268] sm:$0xff]  }
 0x139   : > { %v6823_v31 = vpop.f32.mrb[30].mxu0  ;;  %7052 = vmatprep.subr.bf16.mxu1 %v8434_v51 }
 0x13a   : > { %v554_v32 = vpack.c.bf16 %v6823_v31, %v6822_v29  ;;  %v527_v33 = vpop.f32.mrb[31].mxu0  ;;  %v1091_v29 = vpop.f32.mrb[23].mxu1  ;;  %v7848_v31 = vld [vmem:[%s9237_s1 + $0x188] sm:$0xff]  }
 0x13b   : > { %v553_v34 = vpack.c.bf16 %v527_v33, %v524_v30  ;;  %v1145_v30 = vpack.c.bf16 %v1091_v29, %v1088_v25  ;;  %v6894_v33 = vpop.f32.mrb[24].mxu1 }
 0x13d   : > { %6856 = vmatprep.mubr.msk.bf16.mxu0 %vm571_vm1, %v553_v34  ;;  %6924 = vmatprep.mubr.msk.bf16.mxu1 %vm571_vm1, %v1145_v30  ;;  %v1104_v34 = vpop.f32.mrb[25].mxu1 }
 0x13e   : > { %6857 = vmatmul.mubr.msk.bf16.gmra.mrb[60].mxu0 %vm571_vm1, %v554_v32  ;;  %v7849_v32 = vld [vmem:[%s9237_s1 + $0x190] sm:$0xff]   ;;  %6925 = vmatmul.mubr.msk.bf16.gmra.mrb[52].mxu1 %vm571_vm1, %v1146_v28 }
 0x13f   : > { %6944 = vmatprep.mubr.msk.bf16.mxu0 %vm329_vm0, %v7831_v35  ;;  %v6895_v35 = vpop.f32.mrb[26].mxu1  ;;  %v7880_v28 = vld [vmem:[%s9237_s1 + $0x270] sm:$0xff]  }
 0x140   : > { %v1148_v36 = vpack.c.bf16 %v6895_v35, %v6894_v33 }
 0x146   : > { %6945 = vmatmul.mubr.msk.bf16.vlgmr.msra.gmra.mrb[64].mxu0 %vm329_vm0, %v7832_v37  ;;  %v1107_v37 = vpop.f32.mrb[27].mxu1 }
 0x147   : > { %7013 = vmatpush3.bf16.msra.mxu0 %v8108_v4  ;;  %6948 = vmatprep.mubr.msk.bf16.mxu0 %vm329_vm0, %v7833_v38  ;;  %v1147_v38 = vpack.c.bf16 %v1107_v37, %v1104_v34  ;;  %v7883_v34 = vld [vmem:[%s9237_s1 + $0x280] sm:$0xff]  }
 0x148   : > { %7014 = vmatprep.subr.bf16.mxu0 %v8110_v6 }
 0x149   : > { %6928 = vmatprep.mubr.msk.bf16.mxu1 %vm571_vm1, %v1147_v38  ;;  %v7884_v38 = vld [vmem:[%s9237_s1 + $0x288] sm:$0xff]  }
 0x14a   : > { %6929 = vmatmul.mubr.msk.bf16.gmra.mrb[56].mxu1 %vm571_vm1, %v1148_v36 }
 0x14b   : > { %7015 = vmatpush3.bf16.msra.mxu0 %v8110_v6 }
 0x14c   : > { %7016 = vmatprep.subr.bf16.mxu0 %v8117_v9 }
 0x14e   : > { %6949 = vmatmul.mubr.msk.bf16.gmra.mrb[68].mxu0 %vm329_vm0, %v7834_v39  ;;  %v7850_v39 = vld [vmem:[%s9237_s1 + $0x198] sm:$0xff]  }
 0x14f   : > { %6952 = vmatprep.mubr.msk.bf16.mxu0 %vm329_vm0, %v7835_v40  ;;  %7017 = vmatpush3.bf16.msra.mxu0 %v8117_v9  ;;  %v7851_v40 = vld [vmem:[%s9237_s1 + $0x1a0] sm:$0xff]  }
 0x150   : > { %7018 = vmatprep.subr.bf16.mxu0 %v8123_v12 }
 0x153   : > { %7019 = vmatpush3.bf16.msra.mxu0 %v8123_v12 }
 0x154   : > { %7088 = vmatprep.subr.bf16.mxu0 %v8108_v4 }
 0x156   : > { %6953 = vmatmul.mubr.msk.bf16.gmra.mrb[72].mxu0 %vm329_vm0, %v7836_v41  ;;  %v6898_v41 = vpop.f32.mrb[28].mxu1 }
 0x157   : > { %6956 = vmatprep.mubr.msk.bf16.mxu0 %vm329_vm0, %v7837_v42  ;;  %v1120_v42 = vpop.f32.mrb[29].mxu1 }
 0x158   : > { %v6899_v43 = vpop.f32.mrb[30].mxu1 }
 0x159   : > { %v1150_v44 = vpack.c.bf16 %v6899_v43, %v6898_v41  ;;  %v1123_v45 = vpop.f32.mrb[31].mxu1 }
 0x15a   : > { %v1149_v46 = vpack.c.bf16 %v1123_v45, %v1120_v42 }
 0x15c   : > { %6932 = vmatprep.mubr.msk.bf16.mxu1 %vm571_vm1, %v1149_v46  ;;  %v7887_v46 = vld [vmem:[%s9237_s1 + $0x2a0] sm:$0xff]  }
 0x15d   : > { %6933 = vmatmul.mubr.msk.bf16.gmra.mrb[60].mxu1 %vm571_vm1, %v1150_v44  ;;  %v7886_v44 = vld [vmem:[%s9237_s1 + $0x298] sm:$0xff]  }
 0x15e   : > { %6957 = vmatmul.mubr.msk.bf16.gmra.mrb[76].mxu0 %vm329_vm0, %v7838_v49  ;;  %v7854_v49 = vld [vmem:[%s9237_s1 + $0x1b8] sm:$0xff]  }
 0x15f   : > { %6960 = vmatprep.mubr.msk.bf16.mxu0 %vm329_vm0, %v7839_v50  ;;  %v7856_v50 = vld [vmem:[%s9237_s1 + $0x1c0] sm:$0xff]  }
 0x166   : > { %6961 = vmatmul.mubr.msk.bf16.gmra.mrb[80].mxu0 %vm329_vm0, %v7840_v58  ;;  %v7863_v58 = vld [vmem:[%s9237_s1 + $0x1f8] sm:$0xff]  }
 0x167   : > { %6964 = vmatprep.mubr.msk.bf16.mxu0 %vm329_vm0, %v7841_v59  ;;  %v7865_v59 = vld [vmem:[%s9237_s1 + $0x200] sm:$0xff]  }
 0x16e   : > { %6965 = vmatmul.mubr.msk.bf16.gmra.mrb[84].mxu0 %vm329_vm0, %v7842_v2 }
 0x16f   : > { %6968 = vmatprep.mubr.msk.bf16.mxu0 %vm329_vm0, %v7843_v3 }
 0x176   : > { %6969 = vmatmul.mubr.msk.bf16.gmra.mrb[88].mxu0 %vm329_vm0, %v7844_v14  ;;  %v7875_v14 = vld [vmem:[%s9237_s1 + $0x248] sm:$0xff]  }
 0x177   : > { %6972 = vmatprep.mubr.msk.bf16.mxu0 %vm329_vm0, %v7845_v15 }
 0x17e   : > { %6973 = vmatmul.mubr.msk.bf16.gmra.mrb[92].mxu0 %vm329_vm0, %v7846_v22  ;;  %v7878_v22 = vld [vmem:[%s9237_s1 + $0x260] sm:$0xff]  }
 0x17f   : > { %7020 = vmatprep.mubr.msk.bf16.mxu0 %vm329_vm0, %v7847_v23 }
 0x186   : > { %7021 = vmatmul.mubr.msk.bf16.vlgmr.msra.gmra.mrb[96].mxu0 %vm329_vm0, %v7848_v31 }
 0x187   : > { %7089 = vmatpush3.bf16.msra.mxu0 %v8108_v4  ;;  %7024 = vmatprep.mubr.msk.bf16.mxu0 %vm329_vm0, %v7849_v32  ;;  %v7881_v32 = vld [vmem:[%s9237_s1 + $0x278] sm:$0xff]  }
 0x188   : > { %7090 = vmatprep.subr.bf16.mxu0 %v8110_v6 }
 0x18b   : > { %7091 = vmatpush3.bf16.msra.mxu0 %v8110_v6 }
 0x18c   : > { %7092 = vmatprep.subr.bf16.mxu0 %v8117_v9 }
 0x18e   : > { %7025 = vmatmul.mubr.msk.bf16.gmra.mrb[100].mxu0 %vm329_vm0, %v7850_v39 }
 0x18f   : > { %7028 = vmatprep.mubr.msk.bf16.mxu0 %vm329_vm0, %v7851_v40  ;;  %7093 = vmatpush3.bf16.msra.mxu0 %v8117_v9  ;;  %v7885_v40 = vld [vmem:[%s9237_s1 + $0x290] sm:$0xff]  }
 0x190   : > { %7094 = vmatprep.subr.bf16.mxu0 %v8123_v12 }
 0x193   : > { %7095 = vmatpush3.bf16.msra.mxu0 %v8123_v12 }
 0x194   : > { %7164 = vmatprep.subr.bf16.mxu0 %v8108_v4 }
 0x196   : > { %7029 = vmatmul.mubr.msk.bf16.gmra.mrb[104].mxu0 %vm329_vm0, %v7852_v47 }
 0x197   : > { %7032 = vmatprep.mubr.msk.bf16.mxu0 %vm329_vm0, %v7853_v48 }
 0x19e   : > { %7033 = vmatmul.mubr.msk.bf16.gmra.mrb[108].mxu0 %vm329_vm0, %v7854_v49 }
 0x19f   : > { %7036 = vmatprep.mubr.msk.bf16.mxu0 %vm329_vm0, %v7856_v50  ;;  %v7888_v50 = vld [vmem:[%s9237_s1 + $0x2a8] sm:$0xff]  }
 0x1a6   : > { %7037 = vmatmul.mubr.msk.bf16.gmra.mrb[112].mxu0 %vm329_vm0, %v7857_v52 }
 0x1a7   : > { %7040 = vmatprep.mubr.msk.bf16.mxu0 %vm329_vm0, %v7858_v53  ;;  %v7889_v53 = vld [vmem:[%s9237_s1 + $0x2b0] sm:$0xff]  }
 0x1ae   : > { %7041 = vmatmul.mubr.msk.bf16.gmra.mrb[116].mxu0 %vm329_vm0, %v7859_v54 }
 0x1af   : > { %7044 = vmatprep.mubr.msk.bf16.mxu0 %vm329_vm0, %v7860_v55 }
 0x1b6   : > { %7045 = vmatmul.mubr.msk.bf16.gmra.mrb[120].mxu0 %vm329_vm0, %v7861_v56 }
 0x1b7   : > { %7048 = vmatprep.mubr.msk.bf16.mxu0 %vm329_vm0, %v7862_v57  ;;  %v7890_v57 = vld [vmem:[%s9237_s1 + $0x2b8] sm:$0xff]  }
 0x1be   : > { %7049 = vmatmul.mubr.msk.bf16.gmra.mrb[124].mxu0 %vm329_vm0, %v7863_v58 }
 0x1bf   : > { %7096 = vmatprep.mubr.msk.bf16.mxu0 %vm329_vm0, %v7865_v59  ;;  %v7892_v59 = vld [vmem:[%s9237_s1 + $0x2c0] sm:$0xff]  }
 0x1c6   : > { %7097 = vmatmul.mubr.msk.bf16.vlgmr.msra.gmra.mrb[128].mxu0 %vm329_vm0, %v7866_v60 }
 0x1c7   : > { %7165 = vmatpush3.bf16.msra.mxu0 %v8108_v4  ;;  %7100 = vmatprep.mubr.msk.bf16.mxu0 %vm329_vm0, %v7867_v61 }
 0x1c8   : > { %7166 = vmatprep.subr.bf16.mxu0 %v8110_v6 }
 0x1cb   : > { %7167 = vmatpush3.bf16.msra.mxu0 %v8110_v6 }
 0x1cc   : > { %7168 = vmatprep.subr.bf16.mxu0 %v8117_v9 }
 0x1ce   : > { %7101 = vmatmul.mubr.msk.bf16.gmra.mrb[132].mxu0 %vm329_vm0, %v7868_v62 }
 0x1cf   : > { %7104 = vmatprep.mubr.msk.bf16.mxu0 %vm329_vm0, %v7869_v63  ;;  %7169 = vmatpush3.bf16.msra.mxu0 %v8117_v9  ;;  %v7900_v63 = vld [vmem:[%s9238_s2 + $0x38] sm:$0xff]  }
 0x1d0   : > { %7170 = vmatprep.subr.bf16.mxu0 %v8123_v12 }
 0x1d3   : > { %7171 = vmatpush3.bf16.msra.mxu0 %v8123_v12 }
 0x1d4   : > { %7240 = vmatprep.subr.bf16.mxu0 %v8108_v4 }
 0x1d6   : > { %7105 = vmatmul.mubr.msk.bf16.gmra.mrb[136].mxu0 %vm329_vm0, %v7870_v0 }
 0x1d7   : > { %7108 = vmatprep.mubr.msk.bf16.mxu0 %vm329_vm0, %v7871_v1 }
 0x1d9   : > { %v8501_v2 = vpop.f32.mrb[32].mxu0 }
 0x1da   : > { %v8503_v3 = vpop.f32.mrb[33].mxu0 }
 0x1db   : > { %v8508_v7 = vpop.f32.mrb[34].mxu0 }
 0x1dc   : > { %v8513_v10 = vpop.f32.mrb[35].mxu0 }
 0x1de   : > { %7109 = vmatmul.mubr.msk.bf16.gmra.mrb[140].mxu0 %vm329_vm0, %v7872_v5  ;;  %v7893_v5 = vld [vmem:[%s9237_s1 + $0x2c8] sm:$0xff]  }
 0x1df   : > { %7112 = vmatprep.mubr.msk.bf16.mxu0 %vm329_vm0, %v7874_v8  ;;  %v8657_v8 = vld [vmem:[%s9238_s2 + $0x40] sm:$0xff]  }
 0x1e1   : > { %v8517_v11 = vpop.f32.mrb[36].mxu0 }
 0x1e2   : > { %v8519_v13 = vpop.f32.mrb[37].mxu0 }
 0x1e3   : > { %v8524_v15 = vpop.f32.mrb[38].mxu0 }
 0x1e4   : > { %v8529_v17 = vpop.f32.mrb[39].mxu0 }
 0x1e6   : > { %7113 = vmatmul.mubr.msk.bf16.gmra.mrb[144].mxu0 %vm329_vm0, %v7875_v14 }
 0x1e7   : > { %7116 = vmatprep.mubr.msk.bf16.mxu0 %vm329_vm0, %v7876_v16  ;;  %v7894_v16 = vld [vmem:[%s9237_s1 + $0x2d0] sm:$0xff]  }
 0x1e9   : > { %v8533_v18 = vpop.f32.mrb[40].mxu0 }
 0x1ea   : > { %v8535_v19 = vpop.f32.mrb[41].mxu0 }
 0x1eb   : > { %v8540_v21 = vpop.f32.mrb[42].mxu0 }
 0x1ec   : > { %v8545_v23 = vpop.f32.mrb[43].mxu0 }
 0x1ee   : > { %7117 = vmatmul.mubr.msk.bf16.gmra.mrb[148].mxu0 %vm329_vm0, %v7877_v20 }
 0x1ef   : > { %7120 = vmatprep.mubr.msk.bf16.mxu0 %vm329_vm0, %v7878_v22 }
 0x1f1   : > { %v8549_v24 = vpop.f32.mrb[44].mxu0 }
 0x1f2   : > { %v8551_v25 = vpop.f32.mrb[45].mxu0 }
 0x1f3   : > { %v8556_v27 = vpop.f32.mrb[46].mxu0 }
 0x1f4   : > { %v8561_v29 = vpop.f32.mrb[47].mxu0 }
 0x1f6   : > { %7121 = vmatmul.mubr.msk.bf16.gmra.mrb[152].mxu0 %vm329_vm0, %v7879_v26 }
 0x1f7   : > { %7124 = vmatprep.mubr.msk.bf16.mxu0 %vm329_vm0, %v7880_v28 }
 0x1f9   : > { %v8565_v30 = vpop.f32.mrb[48].mxu0 }
 0x1fa   : > { %v8567_v31 = vpop.f32.mrb[49].mxu0 }
 0x1fb   : > { %v8572_v33 = vpop.f32.mrb[50].mxu0 }
 0x1fc   : > { %v8577_v35 = vpop.f32.mrb[51].mxu0 }
 0x1fe   : > { %7125 = vmatmul.mubr.msk.bf16.gmra.mrb[156].mxu0 %vm329_vm0, %v7881_v32  ;;  %v7895_v32 = vld [vmem:[%s9237_s1 + $0x2d8] sm:$0xff]  }
 0x1ff   : > { %7172 = vmatprep.mubr.msk.bf16.mxu0 %vm329_vm0, %v7883_v34 }
 0x201   : > { %v8581_v36 = vpop.f32.mrb[52].mxu0 }
 0x202   : > { %v8583_v37 = vpop.f32.mrb[53].mxu0 }
 0x203   : > { %v8588_v39 = vpop.f32.mrb[54].mxu0 }
 0x204   : > { %v8593_v41 = vpop.f32.mrb[55].mxu0 }
 0x206   : > { %7173 = vmatmul.mubr.msk.bf16.vlgmr.msra.gmra.mrb[160].mxu0 %vm329_vm0, %v7884_v38  ;;  %v7896_v38 = vld [vmem:[%s9237_s1 + $0x2e0] sm:$0xff]  }
 0x207   : > { %7241 = vmatpush3.bf16.msra.mxu0 %v8108_v4  ;;  %7176 = vmatprep.mubr.msk.bf16.mxu0 %vm329_vm0, %v7885_v40 }
 0x208   : > { %7242 = vmatprep.subr.bf16.mxu0 %v8110_v6 }
 0x209   : > { %v8599_v42 = vpop.f32.mrb[56].mxu0 }
 0x20a   : > { %v8601_v43 = vpop.f32.mrb[57].mxu0 }
 0x20b   : > { %v8606_v45 = vpop.f32.mrb[58].mxu0  ;;  %7243 = vmatpush3.bf16.msra.mxu0 %v8110_v6 }
 0x20c   : > { %v8612_v47 = vpop.f32.mrb[59].mxu0  ;;  %7244 = vmatprep.subr.bf16.mxu0 %v8117_v9 }
 0x20e   : > { %7177 = vmatmul.mubr.msk.bf16.gmra.mrb[164].mxu0 %vm329_vm0, %v7886_v44 }
 0x20f   : > { %7180 = vmatprep.mubr.msk.bf16.mxu0 %vm329_vm0, %v7887_v46  ;;  %7245 = vmatpush3.bf16.msra.mxu0 %v8117_v9 }
 0x210   : > { %7246 = vmatprep.subr.bf16.mxu0 %v8123_v12 }
 0x211   : > { %v8619_v48 = vpop.f32.mrb[60].mxu0 }
 0x212   : > { %v8621_v49 = vpop.f32.mrb[61].mxu0 }
 0x213   : > { %v8626_v52 = vpop.f32.mrb[62].mxu0  ;;  %7247 = vmatpush3.bf16.msra.mxu0 %v8123_v12 }
 0x214   : > { %v8632_v54 = vpop.f32.mrb[63].mxu0  ;;  %7316 = vmatprep.subr.bf16.mxu0 %v8108_v4 }
 0x216   : > { %7181 = vmatmul.mubr.msk.bf16.gmra.mrb[168].mxu0 %vm329_vm0, %v7888_v50 }
 0x217   : > { %7184 = vmatprep.mubr.msk.bf16.mxu0 %vm329_vm0, %v7889_v53 }
 0x219   : > { %v6946_v55 = vpop.f32.mrb[64].mxu0 }
 0x21a   : > { %v1604_v56 = vpop.f32.mrb[65].mxu0 }
 0x21b   : > { %v6947_v58 = vpop.f32.mrb[66].mxu0 }
 0x21c   : > { %v1732_v60 = vpack.c.bf16 %v6947_v58, %v6946_v55  ;;  %v1607_v61 = vpop.f32.mrb[67].mxu0  ;;  %v7897_v55 = vld [vmem:[%s9237_s1 + $0x2e8] sm:$0xff]  }
 0x21d   : > { %v1731_v62 = vpack.c.bf16 %v1607_v61, %v1604_v56 }
 0x21e   : > { %7185 = vmatmul.mubr.msk.bf16.gmra.mrb[172].mxu0 %vm329_vm0, %v7890_v57  ;;  %v7898_v57 = vld [vmem:[%s9237_s1 + $0x2f0] sm:$0xff]  }
 0x21f   : > { %6980 = vmatprep.mubr.msk.bf16.mxu1 %vm571_vm1, %v1731_v62  ;;  %7188 = vmatprep.mubr.msk.bf16.mxu0 %vm329_vm0, %v7892_v59 }
 0x220   : > { %6981 = vmatmul.mubr.msk.bf16.vlgmr.msra.gmra.mrb[32].mxu1 %vm571_vm1, %v1732_v60 }
 0x221   : > { %7053 = vmatpush3.bf16.msra.mxu1 %v8434_v51  ;;  %v6950_v0 = vpop.f32.mrb[68].mxu0 }
 0x222   : > { %v1620_v1 = vpop.f32.mrb[69].mxu0  ;;  %7054 = vmatprep.subr.bf16.mxu1 %v7900_v63 }
 0x223   : > { %v6951_v14 = vpop.f32.mrb[70].mxu0 }
 0x224   : > { %v1734_v20 = vpack.c.bf16 %v6951_v14, %v6950_v0  ;;  %v1623_v22 = vpop.f32.mrb[71].mxu0 }
 0x225   : > { %v1733_v51 = vpack.c.bf16 %v1623_v22, %v1620_v1  ;;  %7055 = vmatpush3.bf16.msra.mxu1 %v7900_v63  ;;  %v7899_v63 = vld [vmem:[%s9237_s1 + $0x2f8] sm:$0xff]   ;;  %v7901_v1 = vld [vmem:[%s9237_s1 + $0x300] sm:$0xff]  }
 0x226   : > { %7189 = vmatmul.mubr.msk.bf16.gmra.mrb[176].mxu0 %vm329_vm0, %v7893_v5  ;;  %7128 = vmatprep.subr.bf16.mxu1 %v8657_v8 }
 0x227   : > { %6984 = vmatprep.mubr.msk.bf16.mxu1 %vm571_vm1, %v1733_v51  ;;  %7192 = vmatprep.mubr.msk.bf16.mxu0 %vm329_vm0, %v7894_v16  ;;  %v7902_v51 = vld [vmem:[%s9237_s1 + $0x308] sm:$0xff]  }
 0x228   : > { %6985 = vmatmul.mubr.msk.bf16.gmra.mrb[36].mxu1 %vm571_vm1, %v1734_v20 }
 0x229   : > { %v6954_v26 = vpop.f32.mrb[72].mxu0 }
 0x22a   : > { %v1636_v28 = vpop.f32.mrb[73].mxu0 }
 0x22b   : > { %v6955_v34 = vpop.f32.mrb[74].mxu0 }
 0x22c   : > { %v1736_v40 = vpack.c.bf16 %v6955_v34, %v6954_v26  ;;  %v1639_v44 = vpop.f32.mrb[75].mxu0  ;;  %v7903_v34 = vld [vmem:[%s9237_s1 + $0x310] sm:$0xff]  }
 0x22d   : > { %v1735_v46 = vpack.c.bf16 %v1639_v44, %v1636_v28 }
 0x22e   : > { %7193 = vmatmul.mubr.msk.bf16.gmra.mrb[180].mxu0 %vm329_vm0, %v7895_v32 }
 0x22f   : > { %6988 = vmatprep.mubr.msk.bf16.mxu1 %vm571_vm1, %v1735_v46  ;;  %7196 = vmatprep.mubr.msk.bf16.mxu0 %vm329_vm0, %v7896_v38  ;;  %v7904_v46 = vld [vmem:[%s9237_s1 + $0x318] sm:$0xff]  }
 0x230   : > { %6989 = vmatmul.mubr.msk.bf16.gmra.mrb[40].mxu1 %vm571_vm1, %v1736_v40 }
 0x231   : > { %v6958_v50 = vpop.f32.mrb[76].mxu0 }
 0x232   : > { %v1652_v53 = vpop.f32.mrb[77].mxu0 }
 0x233   : > { %v6959_v56 = vpop.f32.mrb[78].mxu0 }
 0x234   : > { %v1738_v58 = vpack.c.bf16 %v6959_v56, %v6958_v50  ;;  %v1655_v59 = vpop.f32.mrb[79].mxu0 }
 0x235   : > { %v1737_v60 = vpack.c.bf16 %v1655_v59, %v1652_v53  ;;  %v7905_v53 = vld [vmem:[%s9237_s1 + $0x320] sm:$0xff]  }
 0x236   : > { %7197 = vmatmul.mubr.msk.bf16.gmra.mrb[184].mxu0 %vm329_vm0, %v7897_v55 }
 0x237   : > { %6992 = vmatprep.mubr.msk.bf16.mxu1 %vm571_vm1, %v1737_v60  ;;  %7200 = vmatprep.mubr.msk.bf16.mxu0 %vm329_vm0, %v7898_v57  ;;  %v7906_v60 = vld [vmem:[%s9237_s1 + $0x328] sm:$0xff]  }
 0x238   : > { %6993 = vmatmul.mubr.msk.bf16.gmra.mrb[44].mxu1 %vm571_vm1, %v1738_v58 }
 0x239   : > { %v6962_v61 = vpop.f32.mrb[80].mxu0 }
 0x23a   : > { %v1668_v62 = vpop.f32.mrb[81].mxu0 }
 0x23b   : > { %v6963_v0 = vpop.f32.mrb[82].mxu0 }
 0x23c   : > { %v1740_v5 = vpack.c.bf16 %v6963_v0, %v6962_v61  ;;  %v1671_v14 = vpop.f32.mrb[83].mxu0 }
 0x23d   : > { %v1739_v16 = vpack.c.bf16 %v1671_v14, %v1668_v62  ;;  %v7907_v62 = vld [vmem:[%s9237_s1 + $0x330] sm:$0xff]  }
 0x23e   : > { %7201 = vmatmul.mubr.msk.bf16.gmra.mrb[188].mxu0 %vm329_vm0, %v7899_v63 }
 0x23f   : > { %6996 = vmatprep.mubr.msk.bf16.mxu1 %vm571_vm1, %v1739_v16  ;;  %7248 = vmatprep.mubr.msk.bf16.mxu0 %vm329_vm0, %v7901_v1  ;;  %v7908_v16 = vld [vmem:[%s9237_s1 + $0x338] sm:$0xff]  }
 0x240   : > { %6997 = vmatmul.mubr.msk.bf16.gmra.mrb[48].mxu1 %vm571_vm1, %v1740_v5 }
 0x241   : > { %v6966_v20 = vpop.f32.mrb[84].mxu0 }
 0x242   : > { %v1684_v22 = vpop.f32.mrb[85].mxu0 }
 0x243   : > { %v6967_v26 = vpop.f32.mrb[86].mxu0 }
 0x244   : > { %v1742_v28 = vpack.c.bf16 %v6967_v26, %v6966_v20  ;;  %v1687_v32 = vpop.f32.mrb[87].mxu0 }
 0x245   : > { %v1741_v38 = vpack.c.bf16 %v1687_v32, %v1684_v22  ;;  %v7910_v22 = vld [vmem:[%s9237_s1 + $0x340] sm:$0xff]   ;;  %v7918_v32 = vld [vmem:[%s9238_s2 + $0x48] sm:$0xff]  }
 0x246   : > { %7249 = vmatmul.mubr.msk.bf16.vlgmr.msra.gmra.mrb[192].mxu0 %vm329_vm0, %v7902_v51 }
 0x247   : > { %7317 = vmatpush3.bf16.msra.mxu0 %v8108_v4  ;;  %7000 = vmatprep.mubr.msk.bf16.mxu1 %vm571_vm1, %v1741_v38 }
 0x248   : > { %7001 = vmatmul.mubr.msk.bf16.gmra.mrb[52].mxu1 %vm571_vm1, %v1742_v28  ;;  %7252 = vmatprep.mubr.msk.bf16.mxu0 %vm329_vm0, %v7903_v34 }
 0x249   : > { %v6970_v40 = vpop.f32.mrb[88].mxu0  ;;  %7318 = vmatprep.subr.bf16.mxu0 %v8110_v6 }
 0x24a   : > { %v1700_v44 = vpop.f32.mrb[89].mxu0 }
 0x24b   : > { %v6971_v50 = vpop.f32.mrb[90].mxu0  ;;  %7319 = vmatpush3.bf16.msra.mxu0 %v8110_v6 }
 0x24c   : > { %v1744_v55 = vpack.c.bf16 %v6971_v50, %v6970_v40  ;;  %v1703_v56 = vpop.f32.mrb[91].mxu0  ;;  %7320 = vmatprep.subr.bf16.mxu0 %v8117_v9  ;;  %v7911_v40 = vld [vmem:[%s9237_s1 + $0x348] sm:$0xff]   ;;  %v7912_v50 = vld [vmem:[%s9237_s1 + $0x350] sm:$0xff]  }
 0x24d   : > { %v1743_v57 = vpack.c.bf16 %v1703_v56, %v1700_v44  ;;  %v8755_v44 = vld [vmem:[%s9238_s2 + $0x50] sm:$0xff]  }
 0x24e   : > { %7253 = vmatmul.mubr.msk.bf16.gmra.mrb[196].mxu0 %vm329_vm0, %v7904_v46 }
 0x24f   : > { %7004 = vmatprep.mubr.msk.bf16.mxu1 %vm571_vm1, %v1743_v57  ;;  %7256 = vmatprep.mubr.msk.bf16.mxu0 %vm329_vm0, %v7905_v53 }
 0x250   : > { %7005 = vmatmul.mubr.msk.bf16.gmra.mrb[56].mxu1 %vm571_vm1, %v1744_v55  ;;  %7321 = vmatpush3.bf16.msra.mxu0 %v8117_v9 }
 0x251   : > { %v6974_v58 = vpop.f32.mrb[92].mxu0  ;;  %7322 = vmatprep.subr.bf16.mxu0 %v8123_v12 }
 0x252   : > { %v1716_v59 = vpop.f32.mrb[93].mxu0 }
 0x253   : > { %v6975_v61 = vpop.f32.mrb[94].mxu0 }
 0x254   : > { %v1746_v63 = vpack.c.bf16 %v6975_v61, %v6974_v58  ;;  %v1719_v0 = vpop.f32.mrb[95].mxu0  ;;  %7323 = vmatpush3.bf16.msra.mxu0 %v8123_v12  ;;  %v7913_v58 = vld [vmem:[%s9237_s1 + $0x358] sm:$0xff]  }
 0x255   : > { %v1745_v1 = vpack.c.bf16 %v1719_v0, %v1716_v59  ;;  %7392 = vmatprep.subr.bf16.mxu0 %v8108_v4 }
 0x256   : > { %7257 = vmatmul.mubr.msk.bf16.gmra.mrb[200].mxu0 %vm329_vm0, %v7906_v60  ;;  %v7914_v60 = vld [vmem:[%s9237_s1 + $0x360] sm:$0xff]  }
 0x257   : > { %7008 = vmatprep.mubr.msk.bf16.mxu1 %vm571_vm1, %v1745_v1  ;;  %7260 = vmatprep.mubr.msk.bf16.mxu0 %vm329_vm0, %v7907_v62 }
 0x258   : > { %7009 = vmatmul.mubr.msk.bf16.gmra.mrb[60].mxu1 %vm571_vm1, %v1746_v63 }
 0x259   : > { %v7022_v5 = vpop.f32.mrb[96].mxu0 }
 0x25a   : > { %v2200_v14 = vpop.f32.mrb[97].mxu0 }
 0x25b   : > { %v7023_v20 = vpop.f32.mrb[98].mxu0 }
 0x25c   : > { %v2328_v51 = vpack.c.bf16 %v7023_v20, %v7022_v5  ;;  %v2203_v26 = vpop.f32.mrb[99].mxu0  ;;  %v7915_v5 = vld [vmem:[%s9237_s1 + $0x368] sm:$0xff]  }
 0x25d   : > { %v2327_v28 = vpack.c.bf16 %v2203_v26, %v2200_v14 }
 0x25e   : > { %7261 = vmatmul.mubr.msk.bf16.gmra.mrb[204].mxu0 %vm329_vm0, %v7908_v16  ;;  %v7916_v16 = vld [vmem:[%s9237_s1 + $0x370] sm:$0xff]  }
 0x25f   : > { %7056 = vmatprep.mubr.msk.bf16.mxu1 %vm571_vm1, %v2327_v28  ;;  %7264 = vmatprep.mubr.msk.bf16.mxu0 %vm329_vm0, %v7910_v22 }
 0x260   : > { %7057 = vmatmul.mubr.msk.bf16.vlgmr.msra.gmra.mrb[32].mxu1 %vm571_vm1, %v2328_v51 }
 0x261   : > { %7129 = vmatpush3.bf16.msra.mxu1 %v8657_v8  ;;  %v7026_v34 = vpop.f32.mrb[100].mxu0 }
 0x262   : > { %v2216_v38 = vpop.f32.mrb[101].mxu0  ;;  %7130 = vmatprep.subr.bf16.mxu1 %v7918_v32 }
 0x263   : > { %v7027_v46 = vpop.f32.mrb[102].mxu0 }
 0x264   : > { %v2330_v53 = vpack.c.bf16 %v7027_v46, %v7026_v34  ;;  %v2219_v55 = vpop.f32.mrb[103].mxu0 }
 0x265   : > { %v2329_v8 = vpack.c.bf16 %v2219_v55, %v2216_v38  ;;  %7131 = vmatpush3.bf16.msra.mxu1 %v7918_v32  ;;  %v7917_v32 = vld [vmem:[%s9237_s1 + $0x378] sm:$0xff]   ;;  %v7919_v38 = vld [vmem:[%s9237_s1 + $0x380] sm:$0xff]  }
 0x266   : > { %7265 = vmatmul.mubr.msk.bf16.gmra.mrb[208].mxu0 %vm329_vm0, %v7911_v40  ;;  %7204 = vmatprep.subr.bf16.mxu1 %v8755_v44 }
 0x267   : > { %7060 = vmatprep.mubr.msk.bf16.mxu1 %vm571_vm1, %v2329_v8  ;;  %7268 = vmatprep.mubr.msk.bf16.mxu0 %vm329_vm0, %v7912_v50  ;;  %v7920_v8 = vld [vmem:[%s9237_s1 + $0x388] sm:$0xff]  }
 0x268   : > { %7061 = vmatmul.mubr.msk.bf16.gmra.mrb[36].mxu1 %vm571_vm1, %v2330_v53 }
 0x269   : > { %v7030_v56 = vpop.f32.mrb[104].mxu0 }
 0x26a   : > { %v2232_v57 = vpop.f32.mrb[105].mxu0 }
 0x26b   : > { %v7031_v59 = vpop.f32.mrb[106].mxu0 }
 0x26c   : > { %v2332_v61 = vpack.c.bf16 %v7031_v59, %v7030_v56  ;;  %v2235_v62 = vpop.f32.mrb[107].mxu0  ;;  %v7921_v59 = vld [vmem:[%s9237_s1 + $0x390] sm:$0xff]  }
 0x26d   : > { %v2331_v63 = vpack.c.bf16 %v2235_v62, %v2232_v57 }
 0x26e   : > { %7269 = vmatmul.mubr.msk.bf16.gmra.mrb[212].mxu0 %vm329_vm0, %v7913_v58 }
 0x26f   : > { %7064 = vmatprep.mubr.msk.bf16.mxu1 %vm571_vm1, %v2331_v63  ;;  %7272 = vmatprep.mubr.msk.bf16.mxu0 %vm329_vm0, %v7914_v60  ;;  %v7922_v63 = vld [vmem:[%s9237_s1 + $0x398] sm:$0xff]  }
 0x270   : > { %7065 = vmatmul.mubr.msk.bf16.gmra.mrb[40].mxu1 %vm571_vm1, %v2332_v61 }
 0x271   : > { %v7034_v0 = vpop.f32.mrb[108].mxu0 }
 0x272   : > { %v2248_v1 = vpop.f32.mrb[109].mxu0 }
 0x273   : > { %v7035_v14 = vpop.f32.mrb[110].mxu0 }
 0x274   : > { %v2334_v20 = vpack.c.bf16 %v7035_v14, %v7034_v0  ;;  %v2251_v22 = vpop.f32.mrb[111].mxu0 }
 0x275   : > { %v2333_v51 = vpack.c.bf16 %v2251_v22, %v2248_v1  ;;  %v7923_v1 = vld [vmem:[%s9237_s1 + $0x3a0] sm:$0xff]  }
 0x276   : > { %7273 = vmatmul.mubr.msk.bf16.gmra.mrb[216].mxu0 %vm329_vm0, %v7915_v5 }
 0x277   : > { %7068 = vmatprep.mubr.msk.bf16.mxu1 %vm571_vm1, %v2333_v51  ;;  %7276 = vmatprep.mubr.msk.bf16.mxu0 %vm329_vm0, %v7916_v16  ;;  %v7925_v51 = vld [vmem:[%s9237_s1 + $0x3b0] sm:$0xff]  }
 0x278   : > { %7069 = vmatmul.mubr.msk.bf16.gmra.mrb[44].mxu1 %vm571_vm1, %v2334_v20 }
 0x279   : > { %v7038_v26 = vpop.f32.mrb[112].mxu0 }
 0x27a   : > { %v2264_v28 = vpop.f32.mrb[113].mxu0 }
 0x27b   : > { %v7039_v34 = vpop.f32.mrb[114].mxu0 }
 0x27c   : > { %v2336_v40 = vpack.c.bf16 %v7039_v34, %v7038_v26  ;;  %v2267_v46 = vpop.f32.mrb[115].mxu0 }
 0x27d   : > { %v2335_v50 = vpack.c.bf16 %v2267_v46, %v2264_v28 }
 0x27e   : > { %7277 = vmatmul.mubr.msk.bf16.gmra.mrb[220].mxu0 %vm329_vm0, %v7917_v32 }
 0x27f   : > { %7072 = vmatprep.mubr.msk.bf16.mxu1 %vm571_vm1, %v2335_v50  ;;  %7324 = vmatprep.mubr.msk.bf16.mxu0 %vm329_vm0, %v7919_v38  ;;  %v7926_v38 = vld [vmem:[%s9237_s1 + $0x3b8] sm:$0xff]  }
 0x280   : > { %7073 = vmatmul.mubr.msk.bf16.gmra.mrb[48].mxu1 %vm571_vm1, %v2336_v40 }
 0x281   : > { %v7042_v53 = vpop.f32.mrb[116].mxu0 }
 0x282   : > { %v2280_v55 = vpop.f32.mrb[117].mxu0 }
 0x283   : > { %v7043_v56 = vpop.f32.mrb[118].mxu0 }
 0x284   : > { %v2338_v57 = vpack.c.bf16 %v7043_v56, %v7042_v53  ;;  %v2283_v58 = vpop.f32.mrb[119].mxu0 }
 0x285   : > { %v2337_v60 = vpack.c.bf16 %v2283_v58, %v2280_v55  ;;  %v7936_v55 = vld [vmem:[%s9238_s2 + $0x58] sm:$0xff]   ;;  %v8852_v58 = vld [vmem:[%s9238_s2 + $0x60] sm:$0xff]  }
 0x286   : > { %7325 = vmatmul.mubr.msk.bf16.vlgmr.msra.gmra.mrb[224].mxu0 %vm329_vm0, %v7920_v8 }
 0x287   : > { %7393 = vmatpush3.bf16.msra.mxu0 %v8108_v4  ;;  %7076 = vmatprep.mubr.msk.bf16.mxu1 %vm571_vm1, %v2337_v60  ;;  %v7930_v60 = vld [vmem:[%s9237_s1 + $0x3d0] sm:$0xff]  }
 0x288   : > { %7077 = vmatmul.mubr.msk.bf16.gmra.mrb[52].mxu1 %vm571_vm1, %v2338_v57  ;;  %7328 = vmatprep.mubr.msk.bf16.mxu0 %vm329_vm0, %v7921_v59  ;;  %v7929_v57 = vld [vmem:[%s9237_s1 + $0x3c8] sm:$0xff]  }
 0x289   : > { %v7046_v61 = vpop.f32.mrb[120].mxu0  ;;  %7394 = vmatprep.subr.bf16.mxu0 %v8110_v6 }
 0x28a   : > { %v2296_v62 = vpop.f32.mrb[121].mxu0 }
 0x28b   : > { %v7047_v0 = vpop.f32.mrb[122].mxu0  ;;  %7395 = vmatpush3.bf16.msra.mxu0 %v8110_v6  ;;  %v7924_v6 = vld [vmem:[%s9237_s1 + $0x3a8] sm:$0xff]  }
 0x28c   : > { %v2340_v4 = vpack.c.bf16 %v7047_v0, %v7046_v61  ;;  %v2299_v5 = vpop.f32.mrb[123].mxu0  ;;  %7396 = vmatprep.subr.bf16.mxu0 %v8117_v9 }
 0x28d   : > { %v2339_v14 = vpack.c.bf16 %v2299_v5, %v2296_v62  ;;  %v7932_v5 = vld [vmem:[%s9237_s1 + $0x3e0] sm:$0xff]  }
 0x28e   : > { %7329 = vmatmul.mubr.msk.bf16.gmra.mrb[228].mxu0 %vm329_vm0, %v7922_v63 }
 0x28f   : > { %7080 = vmatprep.mubr.msk.bf16.mxu1 %vm571_vm1, %v2339_v14  ;;  %7332 = vmatprep.mubr.msk.bf16.mxu0 %vm329_vm0, %v7923_v1  ;;  %v7931_v1 = vld [vmem:[%s9237_s1 + $0x3d8] sm:$0xff]  }
 0x290   : > { %7081 = vmatmul.mubr.msk.bf16.gmra.mrb[56].mxu1 %vm571_vm1, %v2340_v4  ;;  %7397 = vmatpush3.bf16.msra.mxu0 %v8117_v9 }
 0x291   : > { %v7050_v16 = vpop.f32.mrb[124].mxu0  ;;  %7398 = vmatprep.subr.bf16.mxu0 %v8123_v12 }
 0x292   : > { %v2312_v20 = vpop.f32.mrb[125].mxu0 }
 0x293   : > { %v7051_v22 = vpop.f32.mrb[126].mxu0 }
 0x294   : > { %v2342_v26 = vpack.c.bf16 %v7051_v22, %v7050_v16  ;;  %v2315_v28 = vpop.f32.mrb[127].mxu0  ;;  %7399 = vmatpush3.bf16.msra.mxu0 %v8123_v12  ;;  %v7928_v12 = vld [vmem:[%s9237_s1 + $0x3c0] sm:$0xff]  }
 0x295   : > { %v2341_v32 = vpack.c.bf16 %v2315_v28, %v2312_v20  ;;  %v7934_v28 = vld [vmem:[%s9237_s1 + $0x3f0] sm:$0xff]  }
 0x296   : > { %7333 = vmatmul.mubr.msk.bf16.gmra.mrb[232].mxu0 %vm329_vm0, %v7924_v6 }
 0x297   : > { %7084 = vmatprep.mubr.msk.bf16.mxu1 %vm571_vm1, %v2341_v32  ;;  %7336 = vmatprep.mubr.msk.bf16.mxu0 %vm329_vm0, %v7925_v51  ;;  %v7933_v51 = vld [vmem:[%s9237_s1 + $0x3e8] sm:$0xff]  }
 0x298   : > { %7085 = vmatmul.mubr.msk.bf16.gmra.mrb[60].mxu1 %vm571_vm1, %v2342_v26 }
 0x299   : > { %v7098_v9 = vpop.f32.mrb[128].mxu0 }
 0x29a   : > { %v2796_v34 = vpop.f32.mrb[129].mxu0 }
 0x29b   : > { %v7099_v40 = vpop.f32.mrb[130].mxu0 }
 0x29c   : > { %v2924_v46 = vpack.c.bf16 %v7099_v40, %v7098_v9  ;;  %v2799_v50 = vpop.f32.mrb[131].mxu0 }
 0x29d   : > { %v2923_v53 = vpack.c.bf16 %v2799_v50, %v2796_v34  ;;  %v7937_v50 = vld [vmem:[%s9237_s1 + $0x400] sm:$0xff]  }
 0x29e   : > { %7337 = vmatmul.mubr.msk.bf16.gmra.mrb[236].mxu0 %vm329_vm0, %v7926_v38 }
 0x29f   : > { %7132 = vmatprep.mubr.msk.bf16.mxu1 %vm571_vm1, %v2923_v53  ;;  %7340 = vmatprep.mubr.msk.bf16.mxu0 %vm329_vm0, %v7928_v12  ;;  %v7935_v12 = vld [vmem:[%s9237_s1 + $0x3f8] sm:$0xff]  }
 0x2a0   : > { %7133 = vmatmul.mubr.msk.bf16.vlgmr.msra.gmra.mrb[32].mxu1 %vm571_vm1, %v2924_v46 }
 0x2a1   : > { %7205 = vmatpush3.bf16.msra.mxu1 %v8755_v44  ;;  %v7102_v8 = vpop.f32.mrb[132].mxu0 }
 0x2a2   : > { %v2812_v56 = vpop.f32.mrb[133].mxu0  ;;  %7206 = vmatprep.subr.bf16.mxu1 %v7936_v55 }
 0x2a3   : > { %v7103_v59 = vpop.f32.mrb[134].mxu0 }
 0x2a4   : > { %v2926_v61 = vpack.c.bf16 %v7103_v59, %v7102_v8  ;;  %v2815_v62 = vpop.f32.mrb[135].mxu0  ;;  %v7938_v59 = vld [vmem:[%s9237_s1 + $0x408] sm:$0xff]  }
 0x2a5   : > { %v2925_v44 = vpack.c.bf16 %v2815_v62, %v2812_v56  ;;  %7207 = vmatpush3.bf16.msra.mxu1 %v7936_v55 }
 0x2a6   : > { %7341 = vmatmul.mubr.msk.bf16.gmra.mrb[240].mxu0 %vm329_vm0, %v7929_v57  ;;  %7280 = vmatprep.subr.bf16.mxu1 %v8852_v58 }
 0x2a7   : > { %7136 = vmatprep.mubr.msk.bf16.mxu1 %vm571_vm1, %v2925_v44  ;;  %7344 = vmatprep.mubr.msk.bf16.mxu0 %vm329_vm0, %v7930_v60 }
 0x2a8   : > { %7137 = vmatmul.mubr.msk.bf16.gmra.mrb[36].mxu1 %vm571_vm1, %v2926_v61  ;;  %v7939_v61 = vld [vmem:[%s9237_s1 + $0x410] sm:$0xff]  }
 0x2a9   : > { %v7106_v63 = vpop.f32.mrb[136].mxu0 }
 0x2aa   : > { %v2828_v0 = vpop.f32.mrb[137].mxu0 }
 0x2ab   : > { %v7107_v4 = vpop.f32.mrb[138].mxu0 }
 0x2ac   : > { %v2928_v14 = vpack.c.bf16 %v7107_v4, %v7106_v63  ;;  %v2831_v16 = vpop.f32.mrb[139].mxu0  ;;  %v7940_v4 = vld [vmem:[%s9237_s1 + $0x418] sm:$0xff]  }
 0x2ad   : > { %v2927_v20 = vpack.c.bf16 %v2831_v16, %v2828_v0 }
 0x2ae   : > { %7345 = vmatmul.mubr.msk.bf16.gmra.mrb[244].mxu0 %vm329_vm0, %v7931_v1 }
 0x2af   : > { %7140 = vmatprep.mubr.msk.bf16.mxu1 %vm571_vm1, %v2927_v20  ;;  %7348 = vmatprep.mubr.msk.bf16.mxu0 %vm329_vm0, %v7932_v5 }
 0x2b0   : > { %7141 = vmatmul.mubr.msk.bf16.gmra.mrb[40].mxu1 %vm571_vm1, %v2928_v14  ;;  %v7941_v14 = vld [vmem:[%s9237_s1 + $0x420] sm:$0xff]  }
 0x2b1   : > { %v7110_v6 = vpop.f32.mrb[140].mxu0 }
 0x2b2   : > { %v2844_v22 = vpop.f32.mrb[141].mxu0 }
 0x2b3   : > { %v7111_v26 = vpop.f32.mrb[142].mxu0 }
 0x2b4   : > { %v2930_v32 = vpack.c.bf16 %v7111_v26, %v7110_v6  ;;  %v2847_v9 = vpop.f32.mrb[143].mxu0  ;;  %v7942_v26 = vld [vmem:[%s9237_s1 + $0x428] sm:$0xff]  }
 0x2b5   : > { %v2929_v34 = vpack.c.bf16 %v2847_v9, %v2844_v22 }
 0x2b6   : > { %7349 = vmatmul.mubr.msk.bf16.gmra.mrb[248].mxu0 %vm329_vm0, %v7933_v51 }
 0x2b7   : > { %7144 = vmatprep.mubr.msk.bf16.mxu1 %vm571_vm1, %v2929_v34  ;;  %7352 = vmatprep.mubr.msk.bf16.mxu0 %vm329_vm0, %v7934_v28 }
 0x2b8   : > { %7145 = vmatmul.mubr.msk.bf16.gmra.mrb[44].mxu1 %vm571_vm1, %v2930_v32  ;;  %v7943_v32 = vld [vmem:[%s9237_s1 + $0x430] sm:$0xff]  }
 0x2b9   : > { %v7114_v38 = vpop.f32.mrb[144].mxu0 }
 0x2ba   : > { %v2860_v40 = vpop.f32.mrb[145].mxu0 }
 0x2bb   : > { %v7115_v46 = vpop.f32.mrb[146].mxu0 }
 0x2bc   : > { %v2932_v53 = vpack.c.bf16 %v7115_v46, %v7114_v38  ;;  %v2863_v55 = vpop.f32.mrb[147].mxu0  ;;  %v7944_v46 = vld [vmem:[%s9237_s1 + $0x438] sm:$0xff]  }
 0x2bd   : > { %v2931_v8 = vpack.c.bf16 %v2863_v55, %v2860_v40 }
 0x2be   : > { %7353 = vmatmul.mubr.msk.bf16.gmra.mrb[252].mxu0 %vm329_vm0, %v7935_v12 }
 0x2bf   : > { %7148 = vmatprep.mubr.msk.bf16.mxu1 %vm571_vm1, %v2931_v8  ;;  %7400 = vmatprep.mubr.msk.bf16.mxu0 %vm329_vm0, %v7937_v50 }
 0x2c0   : > { %7149 = vmatmul.mubr.msk.bf16.gmra.mrb[48].mxu1 %vm571_vm1, %v2932_v53  ;;  %v7946_v53 = vld [vmem:[%s9237_s1 + $0x440] sm:$0xff]  }
 0x2c1   : > { %v7118_v56 = vpop.f32.mrb[148].mxu0 }
 0x2c2   : > { %v2876_v57 = vpop.f32.mrb[149].mxu0 }
 0x2c3   : > { %v7119_v60 = vpop.f32.mrb[150].mxu0 }
 0x2c4   : > { %v2934_v62 = vpack.c.bf16 %v7119_v60, %v7118_v56  ;;  %v2879_v44 = vpop.f32.mrb[151].mxu0 }
 0x2c5   : > { %v2933_v63 = vpack.c.bf16 %v2879_v44, %v2876_v57  ;;  %v7954_v57 = vld [vmem:[%s9238_s2 + $0x68] sm:$0xff]  }
 0x2c6   : > { %7401 = vmatmul.mubr.msk.bf16.vlgmr.msra.gmra.mrb[0].mxu0 %vm329_vm0, %v7938_v59 }
 0x2c7   : > { %7152 = vmatprep.mubr.msk.bf16.mxu1 %vm571_vm1, %v2933_v63  ;;  %7404 = vmatprep.mubr.msk.bf16.mxu0 %vm329_vm0, %v7939_v61  ;;  %v7947_v61 = vld [vmem:[%s9237_s1 + $0x448] sm:$0xff]   ;;  %v7948_v63 = vld [vmem:[%s9237_s1 + $0x450] sm:$0xff]  }
 0x2c8   : > { %7153 = vmatmul.mubr.msk.bf16.gmra.mrb[52].mxu1 %vm571_vm1, %v2934_v62  ;;  %v8942_v62 = vld [vmem:[%s9238_s2 + $0x70] sm:$0xff]  }
 0x2c9   : > { %v7122_v0 = vpop.f32.mrb[152].mxu0 }
 0x2ca   : > { %v2892_v1 = vpop.f32.mrb[153].mxu0 }
 0x2cb   : > { %v7123_v5 = vpop.f32.mrb[154].mxu0 }
 0x2cc   : > { %v2936_v16 = vpack.c.bf16 %v7123_v5, %v7122_v0  ;;  %v2895_v20 = vpop.f32.mrb[155].mxu0 }
 0x2cd   : > { %v2935_v6 = vpack.c.bf16 %v2895_v20, %v2892_v1  ;;  %v7950_v20 = vld [vmem:[%s9237_s1 + $0x460] sm:$0xff]  }
 0x2ce   : > { %7405 = vmatmul.mubr.msk.bf16.gmra.mrb[4].mxu0 %vm329_vm0, %v7940_v4 }
 0x2cf   : > { %7156 = vmatprep.mubr.msk.bf16.mxu1 %vm571_vm1, %v2935_v6  ;;  %7408 = vmatprep.mubr.msk.bf16.mxu0 %vm329_vm0, %v7941_v14  ;;  %v7949_v14 = vld [vmem:[%s9237_s1 + $0x458] sm:$0xff]  }
 0x2d0   : > { %7157 = vmatmul.mubr.msk.bf16.gmra.mrb[56].mxu1 %vm571_vm1, %v2936_v16 }
 0x2d1   : > { %v7126_v22 = vpop.f32.mrb[156].mxu0 }
 0x2d2   : > { %v2908_v51 = vpop.f32.mrb[157].mxu0 }
 0x2d3   : > { %v7127_v28 = vpop.f32.mrb[158].mxu0 }
 0x2d4   : > { %v2938_v9 = vpack.c.bf16 %v7127_v28, %v7126_v22  ;;  %v2911_v34 = vpop.f32.mrb[159].mxu0 }
 0x2d5   : > { %v2937_v38 = vpack.c.bf16 %v2911_v34, %v2908_v51  ;;  %v7952_v34 = vld [vmem:[%s9237_s1 + $0x470] sm:$0xff]  }
 0x2d6   : > { %7409 = vmatmul.mubr.msk.bf16.gmra.mrb[8].mxu0 %vm329_vm0, %v7942_v26 }
 0x2d7   : > { %7160 = vmatprep.mubr.msk.bf16.mxu1 %vm571_vm1, %v2937_v38  ;;  %7412 = vmatprep.mubr.msk.bf16.mxu0 %vm329_vm0, %v7943_v32  ;;  %v7951_v32 = vld [vmem:[%s9237_s1 + $0x468] sm:$0xff]  }
 0x2d8   : > { %7161 = vmatmul.mubr.msk.bf16.gmra.mrb[60].mxu1 %vm571_vm1, %v2938_v9 }
 0x2d9   : > { %v7174_v40 = vpop.f32.mrb[160].mxu0 }
 0x2da   : > { %v3392_v12 = vpop.f32.mrb[161].mxu0 }
 0x2db   : > { %v7175_v50 = vpop.f32.mrb[162].mxu0 }
 0x2dc   : > { %v3520_v55 = vpack.c.bf16 %v7175_v50, %v7174_v40  ;;  %v3395_v8 = vpop.f32.mrb[163].mxu0 }
 0x2dd   : > { %v3519_v56 = vpack.c.bf16 %v3395_v8, %v3392_v12 }
 0x2de   : > { %7413 = vmatmul.mubr.msk.bf16.gmra.mrb[12].mxu0 %vm329_vm0, %v7944_v46 }
 0x2df   : > { %7208 = vmatprep.mubr.msk.bf16.mxu1 %vm571_vm1, %v3519_v56  ;;  %7416 = vmatprep.mubr.msk.bf16.mxu0 %vm329_vm0, %v7946_v53  ;;  %v7953_v53 = vld [vmem:[%s9237_s1 + $0x478] sm:$0xff]  }
 0x2e0   : > { %7209 = vmatmul.mubr.msk.bf16.vlgmr.msra.gmra.mrb[32].mxu1 %vm571_vm1, %v3520_v55 }
 0x2e1   : > { %7281 = vmatpush3.bf16.msra.mxu1 %v8852_v58  ;;  %v7178_v59 = vpop.f32.mrb[164].mxu0 }
 0x2e2   : > { %v3408_v60 = vpop.f32.mrb[165].mxu0  ;;  %7282 = vmatprep.subr.bf16.mxu1 %v7954_v57 }
 0x2e3   : > { %v7179_v44 = vpop.f32.mrb[166].mxu0 }
 0x2e4   : > { %v3522_v0 = vpack.c.bf16 %v7179_v44, %v7178_v59  ;;  %v3411_v1 = vpop.f32.mrb[167].mxu0 }
 0x2e5   : > { %v3521_v58 = vpack.c.bf16 %v3411_v1, %v3408_v60  ;;  %7283 = vmatpush3.bf16.msra.mxu1 %v7954_v57 }
 0x2e6   : > { %7417 = vmatmul.mubr.msk.bf16.gmra.mrb[16].mxu0 %vm329_vm0, %v7947_v61  ;;  %7356 = vmatprep.subr.bf16.mxu1 %v8942_v62 }
 0x2e7   : > { %7212 = vmatprep.mubr.msk.bf16.mxu1 %vm571_vm1, %v3521_v58  ;;  %7420 = vmatprep.mubr.msk.bf16.mxu0 %vm329_vm0, %v7948_v63 }
 0x2e8   : > { %7213 = vmatmul.mubr.msk.bf16.gmra.mrb[36].mxu1 %vm571_vm1, %v3522_v0 }
 0x2e9   : > { %v7182_v4 = vpop.f32.mrb[168].mxu0 }
 0x2ea   : > { %v3424_v5 = vpop.f32.mrb[169].mxu0 }
 0x2eb   : > { %v7183_v16 = vpop.f32.mrb[170].mxu0 }
 0x2ec   : > { %v3524_v6 = vpack.c.bf16 %v7183_v16, %v7182_v4  ;;  %v3427_v22 = vpop.f32.mrb[171].mxu0 }
 0x2ed   : > { %v3523_v51 = vpack.c.bf16 %v3427_v22, %v3424_v5 }
 0x2ee   : > { %7421 = vmatmul.mubr.msk.bf16.gmra.mrb[20].mxu0 %vm329_vm0, %v7949_v14 }
 0x2ef   : > { %7216 = vmatprep.mubr.msk.bf16.mxu1 %vm571_vm1, %v3523_v51  ;;  %7424 = vmatprep.mubr.msk.bf16.mxu0 %vm329_vm0, %v7950_v20 }
 0x2f0   : > { %7217 = vmatmul.mubr.msk.bf16.gmra.mrb[40].mxu1 %vm571_vm1, %v3524_v6 }
 0x2f1   : > { %v7186_v26 = vpop.f32.mrb[172].mxu0 }
 0x2f2   : > { %v3440_v28 = vpop.f32.mrb[173].mxu0 }
 0x2f3   : > { %v7187_v9 = vpop.f32.mrb[174].mxu0 }
 0x2f4   : > { %v3526_v38 = vpack.c.bf16 %v7187_v9, %v7186_v26  ;;  %v3443_v40 = vpop.f32.mrb[175].mxu0 }
 0x2f5   : > { %v3525_v12 = vpack.c.bf16 %v3443_v40, %v3440_v28 }
 0x2f6   : > { %7425 = vmatmul.mubr.msk.bf16.gmra.mrb[24].mxu0 %vm329_vm0, %v7951_v32 }
 0x2f7   : > { %7220 = vmatprep.mubr.msk.bf16.mxu1 %vm571_vm1, %v3525_v12  ;;  %7428 = vmatprep.mubr.msk.bf16.mxu0 %vm329_vm0, %v7952_v34 }
 0x2f8   : > { %7221 = vmatmul.mubr.msk.bf16.gmra.mrb[44].mxu1 %vm571_vm1, %v3526_v38 }
 0x2f9   : > { %v7190_v46 = vpop.f32.mrb[176].mxu0 }
 0x2fa   : > { %v3456_v50 = vpop.f32.mrb[177].mxu0 }
 0x2fb   : > { %v7191_v55 = vpop.f32.mrb[178].mxu0 }
 0x2fc   : > { %v3528_v8 = vpack.c.bf16 %v7191_v55, %v7190_v46  ;;  %v3459_v56 = vpop.f32.mrb[179].mxu0  ;;  %v7956_v46 = vld [vmem:[%s9238_s2 + $0x78] sm:$0xff]   ;;  %v8993_v55 = vld [vmem:[%s9238_s2 + $0x80] sm:$0xff]  }
 0x2fd   : > { %v3527_v57 = vpack.c.bf16 %v3459_v56, %v3456_v50 }
 0x2fe   : > { %7429 = vmatmul.mubr.msk.bf16.gmra.mrb[28].mxu0 %vm329_vm0, %v7953_v53 }
 0x2ff   : > { %7224 = vmatprep.mubr.msk.bf16.mxu1 %vm571_vm1, %v3527_v57 }
 0x300   : > { %7225 = vmatmul.mubr.msk.bf16.gmra.mrb[48].mxu1 %vm571_vm1, %v3528_v8 }
 0x301   : > { %v7194_v59 = vpop.f32.mrb[180].mxu0 }
 0x302   : > { %v3472_v60 = vpop.f32.mrb[181].mxu0 }
 0x303   : > { %v7195_v61 = vpop.f32.mrb[182].mxu0 }
 0x304   : > { %v3530_v44 = vpack.c.bf16 %v7195_v61, %v7194_v59  ;;  %v3475_v63 = vpop.f32.mrb[183].mxu0 }
 0x305   : > { %v3529_v0 = vpack.c.bf16 %v3475_v63, %v3472_v60 }
 0x307   : > { %7228 = vmatprep.mubr.msk.bf16.mxu1 %vm571_vm1, %v3529_v0 }
 0x308   : > { %7229 = vmatmul.mubr.msk.bf16.gmra.mrb[52].mxu1 %vm571_vm1, %v3530_v44 }
 0x309   : > { %v7198_v1 = vpop.f32.mrb[184].mxu0 }
 0x30a   : > { %v3488_v58 = vpop.f32.mrb[185].mxu0 }
 0x30b   : > { %v7199_v4 = vpop.f32.mrb[186].mxu0 }
 0x30c   : > { %v3532_v5 = vpack.c.bf16 %v7199_v4, %v7198_v1  ;;  %v3491_v14 = vpop.f32.mrb[187].mxu0 }
 0x30d   : > { %v3531_v16 = vpack.c.bf16 %v3491_v14, %v3488_v58 }
 0x30f   : > { %7232 = vmatprep.mubr.msk.bf16.mxu1 %vm571_vm1, %v3531_v16 }
 0x310   : > { %7233 = vmatmul.mubr.msk.bf16.gmra.mrb[56].mxu1 %vm571_vm1, %v3532_v5 }
 0x311   : > { %v7202_v20 = vpop.f32.mrb[188].mxu0 }
 0x312   : > { %v3504_v6 = vpop.f32.mrb[189].mxu0 }
 0x313   : > { %v7203_v22 = vpop.f32.mrb[190].mxu0 }
 0x314   : > { %v3534_v51 = vpack.c.bf16 %v7203_v22, %v7202_v20  ;;  %v3507_v26 = vpop.f32.mrb[191].mxu0 }
 0x315   : > { %v3533_v28 = vpack.c.bf16 %v3507_v26, %v3504_v6 }
 0x317   : > { %7236 = vmatprep.mubr.msk.bf16.mxu1 %vm571_vm1, %v3533_v28 }
 0x318   : > { %7237 = vmatmul.mubr.msk.bf16.gmra.mrb[60].mxu1 %vm571_vm1, %v3534_v51 }
 0x319   : > { %v7250_v32 = vpop.f32.mrb[192].mxu0 }
 0x31a   : > { %v3988_v9 = vpop.f32.mrb[193].mxu0 }
 0x31b   : > { %v7251_v34 = vpop.f32.mrb[194].mxu0 }
 0x31c   : > { %v4116_v38 = vpack.c.bf16 %v7251_v34, %v7250_v32  ;;  %v3991_v40 = vpop.f32.mrb[195].mxu0 }
 0x31d   : > { %v4115_v12 = vpack.c.bf16 %v3991_v40, %v3988_v9 }
 0x31f   : > { %7284 = vmatprep.mubr.msk.bf16.mxu1 %vm571_vm1, %v4115_v12 }
 0x320   : > { %7285 = vmatmul.mubr.msk.bf16.vlgmr.msra.gmra.mrb[32].mxu1 %vm571_vm1, %v4116_v38 }
 0x321   : > { %7357 = vmatpush3.bf16.msra.mxu1 %v8942_v62  ;;  %v7254_v50 = vpop.f32.mrb[196].mxu0 }
 0x322   : > { %v4004_v53 = vpop.f32.mrb[197].mxu0  ;;  %7358 = vmatprep.subr.bf16.mxu1 %v7956_v46 }
 0x323   : > { %v7255_v8 = vpop.f32.mrb[198].mxu0 }
 0x324   : > { %v4118_v56 = vpack.c.bf16 %v7255_v8, %v7254_v50  ;;  %v4007_v57 = vpop.f32.mrb[199].mxu0 }
 0x325   : > { %v4117_v59 = vpack.c.bf16 %v4007_v57, %v4004_v53  ;;  %7359 = vmatpush3.bf16.msra.mxu1 %v7956_v46 }
 0x326   : > { %7432 = vmatprep.subr.bf16.mxu1 %v8993_v55 }
 0x327   : > { %7288 = vmatprep.mubr.msk.bf16.mxu1 %vm571_vm1, %v4117_v59 }
 0x328   : > { %7289 = vmatmul.mubr.msk.bf16.gmra.mrb[36].mxu1 %vm571_vm1, %v4118_v56 }
 0x329   : > { %v7258_v62 = vpop.f32.mrb[200].mxu0 }
 0x32a   : > { %v4020_v60 = vpop.f32.mrb[201].mxu0 }
 0x32b   : > { %v7259_v61 = vpop.f32.mrb[202].mxu0 }
 0x32c   : > { %v4120_v44 = vpack.c.bf16 %v7259_v61, %v7258_v62  ;;  %v4023_v63 = vpop.f32.mrb[203].mxu0 }
 0x32d   : > { %v4119_v0 = vpack.c.bf16 %v4023_v63, %v4020_v60 }
 0x32f   : > { %7292 = vmatprep.mubr.msk.bf16.mxu1 %vm571_vm1, %v4119_v0 }
 0x330   : > { %7293 = vmatmul.mubr.msk.bf16.gmra.mrb[40].mxu1 %vm571_vm1, %v4120_v44 }
 0x331   : > { %v7262_v1 = vpop.f32.mrb[204].mxu0 }
 0x332   : > { %v4036_v58 = vpop.f32.mrb[205].mxu0 }
 0x333   : > { %v7263_v4 = vpop.f32.mrb[206].mxu0 }
 0x334   : > { %v4122_v5 = vpack.c.bf16 %v7263_v4, %v7262_v1  ;;  %v4039_v14 = vpop.f32.mrb[207].mxu0 }
 0x335   : > { %v4121_v16 = vpack.c.bf16 %v4039_v14, %v4036_v58 }
 0x337   : > { %7296 = vmatprep.mubr.msk.bf16.mxu1 %vm571_vm1, %v4121_v16  ;;  %v7958_v16 = vld [vmem:[%s9238_s2 + $0x88] sm:$0xff]  }
 0x338   : > { %7297 = vmatmul.mubr.msk.bf16.gmra.mrb[44].mxu1 %vm571_vm1, %v4122_v5 }
 0x339   : > { %v7266_v20 = vpop.f32.mrb[208].mxu0 }
 0x33a   : > { %v4052_v6 = vpop.f32.mrb[209].mxu0 }
 0x33b   : > { %v7267_v22 = vpop.f32.mrb[210].mxu0 }
 0x33c   : > { %v4124_v51 = vpack.c.bf16 %v7267_v22, %v7266_v20  ;;  %v4055_v26 = vpop.f32.mrb[211].mxu0 }
 0x33d   : > { %v4123_v28 = vpack.c.bf16 %v4055_v26, %v4052_v6 }
 0x33f   : > { %7300 = vmatprep.mubr.msk.bf16.mxu1 %vm571_vm1, %v4123_v28 }
 0x340   : > { %7301 = vmatmul.mubr.msk.bf16.gmra.mrb[48].mxu1 %vm571_vm1, %v4124_v51 }
 0x341   : > { %v7270_v32 = vpop.f32.mrb[212].mxu0 }
 0x342   : > { %v4068_v9 = vpop.f32.mrb[213].mxu0 }
 0x343   : > { %v7271_v34 = vpop.f32.mrb[214].mxu0 }
 0x344   : > { %v4126_v38 = vpack.c.bf16 %v7271_v34, %v7270_v32  ;;  %v4071_v40 = vpop.f32.mrb[215].mxu0 }
 0x345   : > { %v4125_v12 = vpack.c.bf16 %v4071_v40, %v4068_v9 }
 0x347   : > { %7304 = vmatprep.mubr.msk.bf16.mxu1 %vm571_vm1, %v4125_v12 }
 0x348   : > { %7305 = vmatmul.mubr.msk.bf16.gmra.mrb[52].mxu1 %vm571_vm1, %v4126_v38 }
 0x349   : > { %v7274_v46 = vpop.f32.mrb[216].mxu0 }
 0x34a   : > { %v4084_v50 = vpop.f32.mrb[217].mxu0 }
 0x34b   : > { %v7275_v53 = vpop.f32.mrb[218].mxu0 }
 0x34c   : > { %v4128_v8 = vpack.c.bf16 %v7275_v53, %v7274_v46  ;;  %v4087_v56 = vpop.f32.mrb[219].mxu0 }
 0x34d   : > { %v4127_v57 = vpack.c.bf16 %v4087_v56, %v4084_v50 }
 0x34f   : > { %7308 = vmatprep.mubr.msk.bf16.mxu1 %vm571_vm1, %v4127_v57 }
 0x350   : > { %7309 = vmatmul.mubr.msk.bf16.gmra.mrb[56].mxu1 %vm571_vm1, %v4128_v8 }
 0x351   : > { %v7278_v59 = vpop.f32.mrb[220].mxu0 }
 0x352   : > { %v4100_v62 = vpop.f32.mrb[221].mxu0 }
 0x353   : > { %v7279_v60 = vpop.f32.mrb[222].mxu0 }
 0x354   : > { %v4130_v61 = vpack.c.bf16 %v7279_v60, %v7278_v59  ;;  %v4103_v44 = vpop.f32.mrb[223].mxu0 }
 0x355   : > { %v4129_v63 = vpack.c.bf16 %v4103_v44, %v4100_v62 }
 0x357   : > { %7312 = vmatprep.mubr.msk.bf16.mxu1 %vm571_vm1, %v4129_v63 }
 0x358   : > { %7313 = vmatmul.mubr.msk.bf16.gmra.mrb[60].mxu1 %vm571_vm1, %v4130_v61 }
 0x359   : > { %v7326_v0 = vpop.f32.mrb[224].mxu0 }
 0x35a   : > { %v4584_v1 = vpop.f32.mrb[225].mxu0 }
 0x35b   : > { %v7327_v58 = vpop.f32.mrb[226].mxu0 }
 0x35c   : > { %v4712_v4 = vpack.c.bf16 %v7327_v58, %v7326_v0  ;;  %v4587_v5 = vpop.f32.mrb[227].mxu0 }
 0x35d   : > { %v4711_v14 = vpack.c.bf16 %v4587_v5, %v4584_v1 }
 0x35f   : > { %7360 = vmatprep.mubr.msk.bf16.mxu1 %vm571_vm1, %v4711_v14 }
 0x360   : > { %7361 = vmatmul.mubr.msk.bf16.vlgmr.msra.gmra.mrb[32].mxu1 %vm571_vm1, %v4712_v4 }
 0x361   : > { %7433 = vmatpush3.bf16.msra.mxu1 %v8993_v55  ;;  %v7330_v20 = vpop.f32.mrb[228].mxu0 }
 0x362   : > { %v4600_v6 = vpop.f32.mrb[229].mxu0  ;;  %7434 = vmatprep.subr.bf16.mxu1 %v7958_v16 }
 0x363   : > { %v7331_v22 = vpop.f32.mrb[230].mxu0 }
 0x364   : > { %v4714_v51 = vpack.c.bf16 %v7331_v22, %v7330_v20  ;;  %v4603_v26 = vpop.f32.mrb[231].mxu0 }
 0x365   : > { %v4713_v28 = vpack.c.bf16 %v4603_v26, %v4600_v6  ;;  %7435 = vmatpush3.bf16.msra.mxu1 %v7958_v16 }
 0x367   : > { %7364 = vmatprep.mubr.msk.bf16.mxu1 %vm571_vm1, %v4713_v28 }
 0x368   : > { %7365 = vmatmul.mubr.msk.bf16.gmra.mrb[36].mxu1 %vm571_vm1, %v4714_v51 }
 0x369   : > { %v7334_v32 = vpop.f32.mrb[232].mxu0 }
 0x36a   : > { %v4616_v9 = vpop.f32.mrb[233].mxu0 }
 0x36b   : > { %v7335_v34 = vpop.f32.mrb[234].mxu0 }
 0x36c   : > { %v4716_v38 = vpack.c.bf16 %v7335_v34, %v7334_v32  ;;  %v4619_v40 = vpop.f32.mrb[235].mxu0 }
 0x36d   : > { %v4715_v12 = vpack.c.bf16 %v4619_v40, %v4616_v9 }
 0x36f   : > { %7368 = vmatprep.mubr.msk.bf16.mxu1 %vm571_vm1, %v4715_v12 }
 0x370   : > { %7369 = vmatmul.mubr.msk.bf16.gmra.mrb[40].mxu1 %vm571_vm1, %v4716_v38 }
 0x371   : > { %v7338_v55 = vpop.f32.mrb[236].mxu0 }
 0x372   : > { %v4632_v46 = vpop.f32.mrb[237].mxu0 }
 0x373   : > { %v7339_v50 = vpop.f32.mrb[238].mxu0 }
 0x374   : > { %v4718_v53 = vpack.c.bf16 %v7339_v50, %v7338_v55  ;;  %v4635_v8 = vpop.f32.mrb[239].mxu0 }
 0x375   : > { %v4717_v56 = vpack.c.bf16 %v4635_v8, %v4632_v46 }
 0x377   : > { %7372 = vmatprep.mubr.msk.bf16.mxu1 %vm571_vm1, %v4717_v56 }
 0x378   : > { %7373 = vmatmul.mubr.msk.bf16.gmra.mrb[44].mxu1 %vm571_vm1, %v4718_v53 }
 0x379   : > { %v7342_v57 = vpop.f32.mrb[240].mxu0 }
 0x37a   : > { %v4648_v59 = vpop.f32.mrb[241].mxu0 }
 0x37b   : > { %v7343_v62 = vpop.f32.mrb[242].mxu0 }
 0x37c   : > { %v4720_v60 = vpack.c.bf16 %v7343_v62, %v7342_v57  ;;  %v4651_v61 = vpop.f32.mrb[243].mxu0 }
 0x37d   : > { %v4719_v44 = vpack.c.bf16 %v4651_v61, %v4648_v59 }
 0x37f   : > { %7376 = vmatprep.mubr.msk.bf16.mxu1 %vm571_vm1, %v4719_v44 }
 0x380   : > { %7377 = vmatmul.mubr.msk.bf16.gmra.mrb[48].mxu1 %vm571_vm1, %v4720_v60 }
 0x381   : > { %v7346_v63 = vpop.f32.mrb[244].mxu0 }
 0x382   : > { %v4664_v0 = vpop.f32.mrb[245].mxu0 }
 0x383   : > { %v7347_v1 = vpop.f32.mrb[246].mxu0 }
 0x384   : > { %v4722_v58 = vpack.c.bf16 %v7347_v1, %v7346_v63  ;;  %v4667_v4 = vpop.f32.mrb[247].mxu0 }
 0x385   : > { %v4721_v5 = vpack.c.bf16 %v4667_v4, %v4664_v0 }
 0x387   : > { %7380 = vmatprep.mubr.msk.bf16.mxu1 %vm571_vm1, %v4721_v5 }
 0x388   : > { %7381 = vmatmul.mubr.msk.bf16.gmra.mrb[52].mxu1 %vm571_vm1, %v4722_v58 }
 0x389   : > { %v7350_v14 = vpop.f32.mrb[248].mxu0 }
 0x38a   : > { %v4680_v16 = vpop.f32.mrb[249].mxu0 }
 0x38b   : > { %v7351_v20 = vpop.f32.mrb[250].mxu0 }
 0x38c   : > { %v4724_v6 = vpack.c.bf16 %v7351_v20, %v7350_v14  ;;  %v4683_v22 = vpop.f32.mrb[251].mxu0 }
 0x38d   : > { %v4723_v51 = vpack.c.bf16 %v4683_v22, %v4680_v16 }
 0x38f   : > { %7384 = vmatprep.mubr.msk.bf16.mxu1 %vm571_vm1, %v4723_v51 }
 0x390   : > { %7385 = vmatmul.mubr.msk.bf16.gmra.mrb[56].mxu1 %vm571_vm1, %v4724_v6 }
 0x391   : > { %v7354_v26 = vpop.f32.mrb[252].mxu0 }
 0x392   : > { %v4696_v28 = vpop.f32.mrb[253].mxu0 }
 0x393   : > { %v7355_v32 = vpop.f32.mrb[254].mxu0 }
 0x394   : > { %v4726_v9 = vpack.c.bf16 %v7355_v32, %v7354_v26  ;;  %v4699_v34 = vpop.f32.mrb[255].mxu0 }
 0x395   : > { %v4725_v38 = vpack.c.bf16 %v4699_v34, %v4696_v28 }
 0x397   : > { %7388 = vmatprep.mubr.msk.bf16.mxu1 %vm571_vm1, %v4725_v38 }
 0x398   : > { %7389 = vmatmul.mubr.msk.bf16.gmra.mrb[60].mxu1 %vm571_vm1, %v4726_v9 }
 0x399   : > { %v7402_v40 = vpop.f32.mrb[0].mxu0 }
 0x39a   : > { %v5180_v12 = vpop.f32.mrb[1].mxu0 }
 0x39b   : > { %v7403_v55 = vpop.f32.mrb[2].mxu0 }
 0x39c   : > { %v5308_v46 = vpack.c.bf16 %v7403_v55, %v7402_v40  ;;  %v5183_v50 = vpop.f32.mrb[3].mxu0 }
 0x39d   : > { %v5307_v53 = vpack.c.bf16 %v5183_v50, %v5180_v12 }
 0x39f   : > { %7436 = vmatprep.mubr.msk.bf16.mxu1 %vm571_vm1, %v5307_v53 }
 0x3a0   : > { %7437 = vmatmul.mubr.msk.bf16.vlgmr.msra.gmra.mrb[32].mxu1 %vm571_vm1, %v5308_v46 }
 0x3a1   : > { %v7406_v8 = vpop.f32.mrb[4].mxu0 }
 0x3a2   : > { %v5196_v56 = vpop.f32.mrb[5].mxu0 }
 0x3a3   : > { %v7407_v57 = vpop.f32.mrb[6].mxu0 }
 0x3a4   : > { %v5310_v59 = vpack.c.bf16 %v7407_v57, %v7406_v8  ;;  %v5199_v62 = vpop.f32.mrb[7].mxu0 }
 0x3a5   : > { %v5309_v60 = vpack.c.bf16 %v5199_v62, %v5196_v56 }
 0x3a7   : > { %7440 = vmatprep.mubr.msk.bf16.mxu1 %vm571_vm1, %v5309_v60 }
 0x3a8   : > { %7441 = vmatmul.mubr.msk.bf16.gmra.mrb[36].mxu1 %vm571_vm1, %v5310_v59 }
 0x3a9   : > { %v7410_v61 = vpop.f32.mrb[8].mxu0 }
 0x3aa   : > { %v5212_v44 = vpop.f32.mrb[9].mxu0 }
 0x3ab   : > { %v7411_v63 = vpop.f32.mrb[10].mxu0 }
 0x3ac   : > { %v5312_v0 = vpack.c.bf16 %v7411_v63, %v7410_v61  ;;  %v5215_v1 = vpop.f32.mrb[11].mxu0 }
 0x3ad   : > { %v5311_v58 = vpack.c.bf16 %v5215_v1, %v5212_v44  ;;  %v9050_v1 = vld [vmem:[%s9239_s3] ss:$0 sm:$0xff] }
 0x3af   : > { %7444 = vmatprep.mubr.msk.bf16.mxu1 %vm571_vm1, %v5311_v58  ;;  %v783_v58 = vadd.f32 %v8501_v2, %v9050_v1 }
 0x3b0   : > { %7445 = vmatmul.mubr.msk.bf16.gmra.mrb[40].mxu1 %vm571_vm1, %v5312_v0 }
 0x3b1   : > { %v7414_v4 = vpop.f32.mrb[12].mxu0 }
 0x3b2   : > { %v5228_v5 = vpop.f32.mrb[13].mxu0 }
 0x3b3   : > { %v7415_v14 = vpop.f32.mrb[14].mxu0 }
 0x3b4   : > { %v5314_v16 = vpack.c.bf16 %v7415_v14, %v7414_v4  ;;  %v5231_v20 = vpop.f32.mrb[15].mxu0  ;;  %v781_v4 = vadd.f32 %v9050_v1, %v8503_v3  ;;  %v784_v14 = vadd.f32 %v8508_v7, %v9050_v1 }
 0x3b5   : > { %v5313_v6 = vpack.c.bf16 %v5231_v20, %v5228_v5 }
 0x3b7   : > { %7448 = vmatprep.mubr.msk.bf16.mxu1 %vm571_vm1, %v5313_v6  ;;  %v782_v6 = vadd.f32 %v9050_v1, %v8513_v10  ;;  %v787_v10 = vadd.f32 %v8517_v11, %v9050_v1 }
 0x3b8   : > { %7449 = vmatmul.mubr.msk.bf16.gmra.mrb[44].mxu1 %vm571_vm1, %v5314_v16 }
 0x3b9   : > { %v7418_v22 = vpop.f32.mrb[16].mxu0 }
 0x3ba   : > { %v5244_v51 = vpop.f32.mrb[17].mxu0 }
 0x3bb   : > { %v7419_v26 = vpop.f32.mrb[18].mxu0 }
 0x3bc   : > { %v5316_v28 = vpack.c.bf16 %v7419_v26, %v7418_v22  ;;  %v5247_v32 = vpop.f32.mrb[19].mxu0  ;;  %v785_v26 = vadd.f32 %v9050_v1, %v8519_v13  ;;  %v791_v13 = vadd.f32 %v8533_v18, %v9050_v1 }
 0x3bd   : > { %v5315_v9 = vpack.c.bf16 %v5247_v32, %v5244_v51  ;;  %v788_v32 = vadd.f32 %v8524_v15, %v9050_v1  ;;  %v789_v15 = vadd.f32 %v9050_v1, %v8535_v19  ;;  %v795_v19 = vadd.f32 %v8549_v24, %v9050_v1 }
 0x3bf   : > { %7452 = vmatprep.mubr.msk.bf16.mxu1 %vm571_vm1, %v5315_v9 }
 0x3c0   : > { %7453 = vmatmul.mubr.msk.bf16.gmra.mrb[48].mxu1 %vm571_vm1, %v5316_v28 }
 0x3c1   : > { %v7422_v34 = vpop.f32.mrb[20].mxu0 }
 0x3c2   : > { %v5260_v38 = vpop.f32.mrb[21].mxu0 }
 0x3c3   : > { %v7423_v40 = vpop.f32.mrb[22].mxu0 }
 0x3c4   : > { %v5318_v12 = vpack.c.bf16 %v7423_v40, %v7422_v34  ;;  %v5263_v55 = vpop.f32.mrb[23].mxu0 }
 0x3c5   : > { %v5317_v46 = vpack.c.bf16 %v5263_v55, %v5260_v38  ;;  %v786_v38 = vadd.f32 %v9050_v1, %v8529_v17 }
 0x3c7   : > { %7456 = vmatprep.mubr.msk.bf16.mxu1 %vm571_vm1, %v5317_v46 }
 0x3c8   : > { %7457 = vmatmul.mubr.msk.bf16.gmra.mrb[52].mxu1 %vm571_vm1, %v5318_v12 }
 0x3c9   : > { %v7426_v50 = vpop.f32.mrb[24].mxu0 }
 0x3ca   : > { %v5276_v53 = vpop.f32.mrb[25].mxu0 }
 0x3cb   : > { %v7427_v8 = vpop.f32.mrb[26].mxu0 }
 0x3cc   : > { %v5320_v56 = vpack.c.bf16 %v7427_v8, %v7426_v50  ;;  %v5279_v57 = vpop.f32.mrb[27].mxu0  ;;  %v792_v50 = vadd.f32 %v8540_v21, %v9050_v1  ;;  %v793_v21 = vadd.f32 %v9050_v1, %v8551_v25  ;;  %v799_v25 = vadd.f32 %v8565_v30, %v9050_v1 }
 0x3cd   : > { %v5319_v59 = vpack.c.bf16 %v5279_v57, %v5276_v53 }
 0x3cf   : > { %7460 = vmatprep.mubr.msk.bf16.mxu1 %vm571_vm1, %v5319_v59 }
 0x3d0   : > { %7461 = vmatmul.mubr.msk.bf16.gmra.mrb[56].mxu1 %vm571_vm1, %v5320_v56  ;;  %v790_v56 = vadd.f32 %v9050_v1, %v8545_v23 }
 0x3d1   : > { %v7430_v62 = vpop.f32.mrb[28].mxu0 }
 0x3d2   : > { %v5292_v60 = vpop.f32.mrb[29].mxu0 }
 0x3d3   : > { %v7431_v61 = vpop.f32.mrb[30].mxu0 }
 0x3d4   : > { %v5322_v44 = vpack.c.bf16 %v7431_v61, %v7430_v62  ;;  %v5295_v63 = vpop.f32.mrb[31].mxu0  ;;  %v796_v61 = vadd.f32 %v8556_v27, %v9050_v1  ;;  %v797_v27 = vadd.f32 %v9050_v1, %v8567_v31  ;;  %v803_v31 = vadd.f32 %v8581_v36, %v9050_v1 }
 0x3d5   : > { %v5321_v0 = vpack.c.bf16 %v5295_v63, %v5292_v60 }
 0x3d7   : > { %7464 = vmatprep.mubr.msk.bf16.mxu1 %vm571_vm1, %v5321_v0  ;;  %v794_v0 = vadd.f32 %v9050_v1, %v8561_v29 }
 0x3d8   : > { %7465 = vmatmul.mubr.msk.bf16.gmra.mrb[60].mxu1 %vm571_vm1, %v5322_v44 }
 0x473   : > { %v7438_v5 = vpop.f32.mrb[32].mxu1 }
 0x474   : > { %v7469_v16 = vadd.f32 %v7438_v5, %v783_v58  ;;  %v5422_v20 = vpop.f32.mrb[33].mxu1 }
 0x475   : > { %v7471_v22 = vadd.f32 %v5422_v20, %v781_v4  ;;  %v7439_v51 = vpop.f32.mrb[34].mxu1 }
 0x476   : > { %5583 = vst.msk [vmem:[%s9062_s11 + $0x10] sm:$0xff] %vm571_vm1, %v7469_v16  ;;  %v7473_v2 = vadd.f32 %v7439_v51, %v784_v14  ;;  %v5425_v3 = vpop.f32.mrb[35].mxu1  ;;  %v800_v16 = vadd.f32 %v8572_v33, %v9050_v1  ;;  %v801_v33 = vadd.f32 %v9050_v1, %v8583_v37  ;;  %v807_v37 = vadd.f32 %v8599_v42, %v9050_v1 }
 0x477   : > { %5581 = vst.msk [vmem:[%s9062_s11] sm:$0xff] %vm571_vm1, %v7471_v22  ;;  %v7475_v7 = vadd.f32 %v5425_v3, %v782_v6  ;;  %v798_v22 = vadd.f32 %v9050_v1, %v8577_v35 }
 0x478   : > { %5584 = vst.msk [vmem:[%s9062_s11 + $0x18] sm:$0xff] %vm571_vm1, %v7473_v2 }
 0x479   : > { %5582 = vst.msk [vmem:[%s9062_s11 + $0x8] sm:$0xff] %vm571_vm1, %v7475_v7 }
 0x47b   : > { %v7442_v28 = vpop.f32.mrb[36].mxu1 }
 0x47c   : > { %v7477_v9 = vadd.f32 %v7442_v28, %v787_v10  ;;  %v5438_v34 = vpop.f32.mrb[37].mxu1  ;;  %v804_v10 = vadd.f32 %v8588_v39, %v9050_v1  ;;  %v805_v39 = vadd.f32 %v9050_v1, %v8601_v43 }
 0x47d   : > { %v7479_v40 = vadd.f32 %v5438_v34, %v785_v26  ;;  %v7443_v12 = vpop.f32.mrb[38].mxu1 }
 0x47e   : > { %5587 = vst.msk [vmem:[%s9062_s11 + $0x30] sm:$0xff] %vm571_vm1, %v7477_v9  ;;  %v7481_v55 = vadd.f32 %v7443_v12, %v788_v32  ;;  %v5441_v46 = vpop.f32.mrb[39].mxu1  ;;  %v802_v32 = vadd.f32 %v9050_v1, %v8593_v41  ;;  %v808_v12 = vadd.f32 %v8606_v45, %v9050_v1  ;;  %v811_v45 = vadd.f32 %v8619_v48, %v9050_v1 }
 0x47f   : > { %5585 = vst.msk [vmem:[%s9062_s11 + $0x20] sm:$0xff] %vm571_vm1, %v7479_v40  ;;  %v7483_v11 = vadd.f32 %v5441_v46, %v786_v38 }
 0x480   : > { %5588 = vst.msk [vmem:[%s9062_s11 + $0x38] sm:$0xff] %vm571_vm1, %v7481_v55 }
 0x481   : > { %5586 = vst.msk [vmem:[%s9062_s11 + $0x28] sm:$0xff] %vm571_vm1, %v7483_v11  ;;  %v806_v11 = vadd.f32 %v9050_v1, %v8612_v47  ;;  %v809_v47 = vadd.f32 %v9050_v1, %v8621_v49 }
 0x483   : > { %v7446_v17 = vpop.f32.mrb[40].mxu1 }
 0x484   : > { %v7485_v53 = vadd.f32 %v7446_v17, %v791_v13  ;;  %v5454_v8 = vpop.f32.mrb[41].mxu1 }
 0x485   : > { %v7487_v57 = vadd.f32 %v5454_v8, %v789_v15  ;;  %v7447_v59 = vpop.f32.mrb[42].mxu1 }
 0x486   : > { %5591 = vst.msk [vmem:[%s9062_s11 + $0x50] sm:$0xff] %vm571_vm1, %v7485_v53  ;;  %v7489_v62 = vadd.f32 %v7447_v59, %v792_v50  ;;  %v5457_v60 = vpop.f32.mrb[43].mxu1  ;;  %v812_v53 = vadd.f32 %v8626_v52, %v9050_v1 }
 0x487   : > { %5589 = vst.msk [vmem:[%s9062_s11 + $0x40] sm:$0xff] %vm571_vm1, %v7487_v57  ;;  %v7491_v18 = vadd.f32 %v5457_v60, %v790_v56  ;;  %v810_v57 = vadd.f32 %v9050_v1, %v8632_v54 }
 0x488   : > { %5592 = vst.msk [vmem:[%s9062_s11 + $0x58] sm:$0xff] %vm571_vm1, %v7489_v62 }
 0x489   : > { %5590 = vst.msk [vmem:[%s9062_s11 + $0x48] sm:$0xff] %vm571_vm1, %v7491_v18 }
 0x48b   : > { %v7450_v23 = vpop.f32.mrb[44].mxu1 }
 0x48c   : > { %v7493_v44 = vadd.f32 %v7450_v23, %v795_v19  ;;  %v5470_v63 = vpop.f32.mrb[45].mxu1 }
 0x48d   : > { %v7495_v58 = vadd.f32 %v5470_v63, %v793_v21  ;;  %v7451_v4 = vpop.f32.mrb[46].mxu1 }
 0x48e   : > { %5595 = vst.msk [vmem:[%s9062_s11 + $0x70] sm:$0xff] %vm571_vm1, %v7493_v44  ;;  %v7497_v5 = vadd.f32 %v7451_v4, %v796_v61  ;;  %v5473_v14 = vpop.f32.mrb[47].mxu1 }
 0x48f   : > { %5593 = vst.msk [vmem:[%s9062_s11 + $0x60] sm:$0xff] %vm571_vm1, %v7495_v58  ;;  %v7499_v24 = vadd.f32 %v5473_v14, %v794_v0 }
 0x490   : > { %5596 = vst.msk [vmem:[%s9062_s11 + $0x78] sm:$0xff] %vm571_vm1, %v7497_v5 }
 0x491   : > { %5594 = vst.msk [vmem:[%s9062_s11 + $0x68] sm:$0xff] %vm571_vm1, %v7499_v24 }
 0x493   : > { %v7454_v29 = vpop.f32.mrb[48].mxu1 }
 0x494   : > { %v7501_v20 = vadd.f32 %v7454_v29, %v799_v25  ;;  %v5486_v6 = vpop.f32.mrb[49].mxu1 }
 0x495   : > { %v7503_v51 = vadd.f32 %v5486_v6, %v797_v27  ;;  %v7455_v2 = vpop.f32.mrb[50].mxu1 }
 0x496   : > { %5599 = vst.msk [vmem:[%s9062_s11 + $0x90] sm:$0xff] %vm571_vm1, %v7501_v20  ;;  %v7505_v3 = vadd.f32 %v7455_v2, %v800_v16  ;;  %v5489_v7 = vpop.f32.mrb[51].mxu1 }
 0x497   : > { %5597 = vst.msk [vmem:[%s9062_s11 + $0x80] sm:$0xff] %vm571_vm1, %v7503_v51  ;;  %v7507_v30 = vadd.f32 %v5489_v7, %v798_v22 }
 0x498   : > { %5600 = vst.msk [vmem:[%s9062_s11 + $0x98] sm:$0xff] %vm571_vm1, %v7505_v3 }
 0x499   : > { %5598 = vst.msk [vmem:[%s9062_s11 + $0x88] sm:$0xff] %vm571_vm1, %v7507_v30 }
 0x49b   : > { %v7458_v35 = vpop.f32.mrb[52].mxu1 }
 0x49c   : > { %v7509_v26 = vadd.f32 %v7458_v35, %v803_v31  ;;  %v5502_v28 = vpop.f32.mrb[53].mxu1 }
 0x49d   : > { %v7511_v9 = vadd.f32 %v5502_v28, %v801_v33  ;;  %v7459_v34 = vpop.f32.mrb[54].mxu1 }
 0x49e   : > { %5603 = vst.msk [vmem:[%s9062_s11 + $0xb0] sm:$0xff] %vm571_vm1, %v7509_v26  ;;  %v7513_v38 = vadd.f32 %v7459_v34, %v804_v10  ;;  %v5505_v40 = vpop.f32.mrb[55].mxu1 }
 0x49f   : > { %5601 = vst.msk [vmem:[%s9062_s11 + $0xa0] sm:$0xff] %vm571_vm1, %v7511_v9  ;;  %v7515_v36 = vadd.f32 %v5505_v40, %v802_v32 }
 0x4a0   : > { %5604 = vst.msk [vmem:[%s9062_s11 + $0xb8] sm:$0xff] %vm571_vm1, %v7513_v38 }
 0x4a1   : > { %5602 = vst.msk [vmem:[%s9062_s11 + $0xa8] sm:$0xff] %vm571_vm1, %v7515_v36 }
 0x4a3   : > { %v7462_v41 = vpop.f32.mrb[56].mxu1 }
 0x4a4   : > { %v7517_v55 = vadd.f32 %v7462_v41, %v807_v37  ;;  %v5518_v46 = vpop.f32.mrb[57].mxu1 }
 0x4a5   : > { %v7519_v13 = vadd.f32 %v5518_v46, %v805_v39  ;;  %v7463_v15 = vpop.f32.mrb[58].mxu1 }
 0x4a6   : > { %5607 = vst.msk [vmem:[%s9062_s11 + $0xd0] sm:$0xff] %vm571_vm1, %v7517_v55  ;;  %v7521_v17 = vadd.f32 %v7463_v15, %v808_v12  ;;  %v5521_v42 = vpop.f32.mrb[59].mxu1 }
 0x4a7   : > { %5605 = vst.msk [vmem:[%s9062_s11 + $0xc0] sm:$0xff] %vm571_vm1, %v7519_v13  ;;  %v7523_v43 = vadd.f32 %v5521_v42, %v806_v11 }
 0x4a8   : > { %5608 = vst.msk [vmem:[%s9062_s11 + $0xd8] sm:$0xff] %vm571_vm1, %v7521_v17 }
 0x4a9   : > { %5606 = vst.msk [vmem:[%s9062_s11 + $0xc8] sm:$0xff] %vm571_vm1, %v7523_v43 }
 0x4ab   : > { %v7466_v50 = vpop.f32.mrb[60].mxu1 }
 0x4ac   : > { %v7525_v8 = vadd.f32 %v7466_v50, %v811_v45  ;;  %v5534_v56 = vpop.f32.mrb[61].mxu1 }
 0x4ad   : > { %v7527_v48 = vadd.f32 %v5534_v56, %v809_v47  ;;  %v7467_v59 = vpop.f32.mrb[62].mxu1 }
 0x4ae   : > { %5611 = vst.msk [vmem:[%s9062_s11 + $0xf0] sm:$0xff] %vm571_vm1, %v7525_v8  ;;  %v7529_v49 = vadd.f32 %v7467_v59, %v812_v53  ;;  %v5537_v62 = vpop.f32.mrb[63].mxu1 }
 0x4af   : > { %5609 = vst.msk [vmem:[%s9062_s11 + $0xe0] sm:$0xff] %vm571_vm1, %v7527_v48  ;;  %v7531_v52 = vadd.f32 %v5537_v62, %v810_v57 }
 0x4b0   : > { %5612 = vst.msk [vmem:[%s9062_s11 + $0xf8] sm:$0xff] %vm571_vm1, %v7529_v49 }
 0x4b1   : > { %5610 = vst.msk [vmem:[%s9062_s11 + $0xe8] sm:$0xff] %vm571_vm1, %v7531_v52 }
 0x4b2   : > { %7972 = shalt.err (!%p7969_p3)
}
 0x4b3   : > { %s7973_s30 = scalar_lea.hbm %s9183_s20, 4096  ;;  %s7977_s7 = scalar_lea.hbm %s9240_s4, 8192 }
 0x4b4   : > { %p7974_p4 = scmp.ne.s32.totalorder %s9183_s20, %s7973_s30  ;;  %p7978_p9 = scmp.lt.u32.totalorder %s9183_s20, %s9240_s4 }
 0x4b5   : > { %p7979_p10 = scmp.lt.u32.totalorder %s7977_s7, %s7973_s30  ;;  %p7981_p12 = scmp.lt.u32.totalorder %s7973_s30, %s9183_s20 }
 0x4b6   : > { %p7975_p7 = pnand %p7974_p4, %p8089_p5 }
 0x4b7   : > { %p7980_p11 = por %p7979_p10, %p7978_p9 }
 0x4b8   : > { %p7976_p8 = pneg %p7975_p7 }
 0x4b9   : > { %p7982_p13 = por %p7981_p12, %p7980_p11 }
 0x4bb   : > { %p7983_p0 = pnand %p7982_p13, %p7976_p8 }
 0x4bd   : > { %7986 = shalt.err (!%p7983_p0)
}
 0x4be   : > { %s8024_s10 = smov 128   ;;  %s8025_s11 = smov 8  }
 0x4bf   : > { %7756 = dma.vmem_to_hbm [thread:$0]  (%p8089_p5), %s9185_s13, 4096, %s9183_s20, %s9195_s22, %s8024_s10, %s8024_s10, %s8025_s11  }
 0x4c0 PF: > { %p7762_p1 = scmp.ge.s32.totalorder %s8021_s18, 2  ;;  %s5642_s12 = sand.u32 1, %s8009_s15  }
 0x4c1   : > { %s5643_s14 = scalar_lea.sflag [#allocation3], %s5642_s12 }
 0x4c2   : > { %p7759_p2 = pnand %p7762_p1, %p8093_p6 }
 0x4c4   : > { %8004 = dma.done.wait (!%p7759_p2), %s5643_s14, 4096  }
 0x4c5   : > { %8006 = vsyncadd (!%p7759_p2), %s5643_s14, 4294963200  ;;  %p14_p3 = scmp.ge.s32.totalorder %s8076_s21, 4   ;;  %s9243_s15 = smov %s8013_s16 }
 0x4c6   : > { %s9244_s16 = smov %s8017_s17  ;;  %s9245_s17 = smov %s8087_s24 }
 0x4c7   : > { %s9246_s18 = smov %s8076_s21  ;;  %16 = sbr.rel (!%p14_p3) target bundleno = 3 (0x3), region = 87 }
 0x4ce   :  { %5648 = vsyncpa [#allocation3], 1 }
 0x4cf   :  { %5650 = vsyncpa [#allocation3 + $0x1], 1 }

</bundles_post_ra>
